<compile_context>
chip_gen: v7x
topology: tpu7x:2x2x1
jax: 0.10.0
libtpu: 0.0.40
codegen_flags: <defaults>
</compile_context>

<pallas_src>
import math
import numpy as np
import jax
import jax.numpy as jnp
from jax import lax
from jax.experimental import pallas as pl
from jax.experimental.pallas import tpu as pltpu

ARCH = [(3, 8, 1), (3, 16, 1)]   # (kernel_size, out_channels, padding) per conv block
NUM_VIEWS = 4
DROPOUT = 0.1  # TODO(synk): module stores `dropout` but never uses it in forward()


# ----------------------------- Pallas kernel -----------------------------------------

def _fused_head_kernel(xpad_ref, w1_ref, b1_ref, w2_ref, b2_ref, out_ref, p1pad_ref):
    """One view (all batch images) through both conv->ReLU->maxpool blocks, fully VMEM-resident.

      xpad_ref  : (B, H+2, W+2, 1)  padded single-channel input (channels-last)
      w1_ref    : (9, C1)           block-1 weights, row = kh*3 + kw
      b1_ref    : (1, C1)
      w2_ref    : (9*C1, C2)        block-2 weights, row = (kh*3+kw)*C1 + cin
      b2_ref    : (1, C2)
      out_ref   : (B, H//4, W//4, C2)
      p1pad_ref : (B, H//2+2, W//2+2, C1)  VMEM scratch: zero-padded pool-1 output
    """
    B, Hp, Wp, _ = xpad_ref.shape
    H1, W1 = Hp - 2, Wp - 2
    C1 = w1_ref.shape[1]
    C2 = w2_ref.shape[1]
    H2, W2 = H1 // 2, W1 // 2
    H3, W3 = H2 // 2, W2 // 2

    w1 = w1_ref[...]                                   # (9, C1)
    b1 = b1_ref[...]                                   # (1, C1)

    # Scratch persists across grid steps -> re-zero (only the 1-px border actually needs it).
    p1pad_ref[...] = jnp.zeros(p1pad_ref.shape, p1pad_ref.dtype)

    # -------- block 1: 3x3 conv (Cin=1) + bias + ReLU on the VPU, fused with 2x2 max-pool #1 ----
    # 9 shifted broadcast-FMAs in exact f32, processed ROWS output rows at a time to keep the
    # channels-last accumulator's live footprint small.
    ROWS = 4                                           # H is asserted %4 == 0 in the wrapper
    for h0 in range(0, H1, ROWS):
        acc = jnp.zeros((B, ROWS, W1, C1), jnp.float32) + b1
        for k in range(9):
            kh, kw = divmod(k, 3)
            xs = xpad_ref[:, h0 + kh:h0 + kh + ROWS, kw:kw + W1, :]   # (B,ROWS,W1,1)
            acc = acc + xs * w1[k:k + 1, :]                            # lane-broadcast FMA
        y = jnp.maximum(acc, 0.0)

        # row-direction pool: split the (leading) row dim only -> free reshape, then max
        t = y.reshape(B, ROWS // 2, 2, W1, C1)
        hmax = jnp.maximum(t[:, :, 0], t[:, :, 1])                     # (B, ROWS//2, W1, C1)

        # column-direction pool: static unit-stride size-1 slices (no strided / gather indexing),
        # written straight into the zero-padded block-2 input.
        r0 = 1 + h0 // 2
        for w in range(W2):
            pm = jnp.maximum(hmax[:, :, 2 * w:2 * w + 1, :],
                             hmax[:, :, 2 * w + 1:2 * w + 2, :])       # (B, ROWS//2, 1, C1)
            p1pad_ref[:, r0:r0 + ROWS // 2, 1 + w:2 + w, :] = pm

    # -------- block 2: 3x3 conv (C1->C2) as in-kernel im2col + ONE MXU GEMM --------
    cols = []
    for k in range(9):
        kh, kw = divmod(k, 3)
        cols.append(p1pad_ref[:, kh:kh + H2, kw:kw + W2, :])           # (B,H2,W2,C1)
    patch = jnp.concatenate(cols, axis=-1).reshape(B * H2 * W2, 9 * C1)
    y2 = jnp.dot(patch.astype(jnp.bfloat16),                           # (B*H2*W2, 9*C1)
                 w2_ref[...].astype(jnp.bfloat16),                     # (9*C1, C2)
                 preferred_element_type=jnp.float32)
    y2 = jnp.maximum(y2 + b2_ref[...], 0.0)                            # (B*H2*W2, C2)

    # -------- 2x2 / stride-2 max-pool #2 + output --------
    t2 = y2.reshape(B, H3, 2, W2, C2)
    h2 = jnp.maximum(t2[:, :, 0], t2[:, :, 1])                         # (B,H3,W2,C2)
    for w in range(W3):
        out_ref[:, :, w:w + 1, :] = jnp.maximum(h2[:, :, 2 * w:2 * w + 1, :],
                                                h2[:, :, 2 * w + 1:2 * w + 2, :])
    # TODO(synk): output last dim is C2=16 (<128 lanes); at these toy sizes the masked stores are
    # negligible. For production shapes, flatten spatial into the lane dim for a lane-dense output.


def _multiviews_pallas(xpad, w1r, b1r, w2r, b2r):
    V, B, Hp, Wp, _ = xpad.shape
    H, W = Hp - 2, Wp - 2
    C1 = w1r.shape[-1]
    C2 = w2r.shape[-1]
    H3, W3 = H // 4, W // 4
    return pl.pallas_call(
        _fused_head_kernel,
        out_shape=jax.ShapeDtypeStruct((V, B, H3, W3, C2), jnp.float32),
        grid_spec=pltpu.PrefetchScalarGridSpec(
            num_scalar_prefetch=0,
            grid=(V,),                                  # one step per view; batch folded in
            in_specs=[
                pl.BlockSpec((None, B, Hp, Wp, 1), lambda v: (v, 0, 0, 0, 0)),
                pl.BlockSpec((None, 9, C1),        lambda v: (v, 0, 0)),
                pl.BlockSpec((None, 1, C1),        lambda v: (v, 0, 0)),
                pl.BlockSpec((None, 9 * C1, C2),   lambda v: (v, 0, 0)),
                pl.BlockSpec((None, 1, C2),        lambda v: (v, 0, 0)),
            ],
            out_specs=pl.BlockSpec((None, B, H3, W3, C2), lambda v: (v, 0, 0, 0, 0)),
            scratch_shapes=[
                pltpu.VMEM((B, H // 2 + 2, W // 2 + 2, C1), jnp.float32),  # zero-padded pool-1 out
            ],
        ),
        compiler_params=pltpu.CompilerParams(
            dimension_semantics=("parallel",)),         # views independent -> megacore / dual TC
    )(xpad, w1r, b1r, w2r, b2r)


# ----------------------------- plain-JAX glue (jit-ed) ---------------------------------

@jax.jit
def multiviews_forward(x_nchw, params):
    """x_nchw: (B, 4, H, W) -> (B, 4*C2, H//4, W//4), same semantics as the torch module."""
    B, V, H, W = x_nchw.shape
    assert V == NUM_VIEWS
    (k1, c1, pad1), (k2, c2, pad2) = ARCH
    assert (k1, pad1) == (3, 1) and (k2, pad2) == (3, 1) and H % 4 == 0 and W % 4 == 0
    # TODO(synk): kernel is specialised to the two 3x3/pad-1 conv blocks of this ARCH.

    (w1, b1), (w2, b2) = params
    # pure layout glue around the fused kernel (constant-folded / fused by XLA under jit)
    xpad = jnp.transpose(x_nchw.astype(jnp.float32), (1, 0, 2, 3))
    xpad = jnp.pad(xpad, ((0, 0), (0, 0), (pad1, pad1), (pad1, pad1)))[..., None]  # (V,B,H+2,W+2,1)
    w1r = w1.astype(jnp.float32).reshape(V, k1 * k1 * 1, c1)                       # (V, 9, C1)
    b1r = b1.astype(jnp.float32).reshape(V, 1, c1)
    w2r = w2.astype(jnp.float32).reshape(V, k2 * k2 * c1, c2)                      # (V, 72, C2)
    b2r = b2.astype(jnp.float32).reshape(V, 1, c2)

    out = _multiviews_pallas(xpad, w1r, b1r, w2r, b2r)       # (V, B, H//4, W//4, C2)
    out = jnp.transpose(out, (1, 0, 4, 2, 3))                # (B, V, C2, Hf, Wf)
    return out.reshape(B, V * c2, H // 4, W // 4)


# ----------------------------- pure-JAX reference -------------------------------------

def multiviews_reference(x_nchw, params):
    outs = []
    for v in range(NUM_VIEWS):
        h = x_nchw[:, v:v + 1].astype(jnp.float32)             # (B, 1, H, W)
        for (k, cout, pad), (w, b) in zip(ARCH, params):
            h = lax.conv_general_dilated(
                h, w[v], window_strides=(1, 1),
                padding=[(pad, pad), (pad, pad)],
                dimension_numbers=("NCHW", "HWIO", "NCHW"),
                precision=lax.Precision.HIGHEST)
            h = h + b[v].reshape(1, -1, 1, 1)
            h = jnp.maximum(h, 0.0)
            h = lax.reduce_window(h, -jnp.inf, lax.max,
                                  (1, 1, 2, 2), (1, 1, 2, 2), "VALID")
        outs.append(h)
    return jnp.concatenate(outs, axis=1)


# ----------------------------- main ----------------------------------------------------

if __name__ == "__main__":
    B, H, W = 2, 16, 16
    key = jax.random.PRNGKey(0)
    key, kx = jax.random.split(key)
    x = jax.random.normal(kx, (B, NUM_VIEWS, H, W), jnp.float32)

    # Deterministic per-head parameters (each of the 4 heads has its own conv weights).
    params = []
    cin = 1
    for (k, cout, pad) in ARCH:
        key, kw_, kb_ = jax.random.split(key, 3)
        scale = 1.0 / math.sqrt(cin * k * k)
        w = jax.random.normal(kw_, (NUM_VIEWS, k, k, cin, cout), jnp.float32) * scale
        b = jax.random.normal(kb_, (NUM_VIEWS, cout), jnp.float32) * scale
        params.append((w, b))
        cin = cout

    out = jax.block_until_ready(multiviews_forward(x, params))
    ref = jax.block_until_ready(multiviews_reference(x, params))

    assert out.shape == (B, NUM_VIEWS * ARCH[-1][1], 4, 4), out.shape
    # Block-2 GEMM uses bf16 MXU operands (f32 accumulation); the reference is exact f32
    # (HIGHEST), so compare at 2e-2 (typical max abs error observed is ~1e-3).
    np.testing.assert_allclose(np.asarray(out), np.asarray(ref), rtol=2e-2, atol=2e-2)
    print("KERNEL_OK")
</pallas_src>

<mosaic_0001>
module attributes {stable_mosaic.version = 11 : i64} {
  func.func @_fused_head_kernel(%arg0: i32, %arg1: memref<1x2x18x18x1xf32, #tpu.memory_space<vmem>>, %arg2: memref<1x9x8xf32, #tpu.memory_space<vmem>>, %arg3: memref<1x1x8xf32, #tpu.memory_space<vmem>>, %arg4: memref<1x72x16xf32, #tpu.memory_space<vmem>>, %arg5: memref<1x1x16xf32, #tpu.memory_space<vmem>>, %arg6: memref<1x2x4x4x16xf32, #tpu.memory_space<vmem>>, %arg7: memref<2x10x10x8xf32, #tpu.memory_space<vmem>>) attributes {dimension_semantics = [#tpu.dimension_semantics<parallel>], iteration_bounds = array<i64: 4>, scalar_prefetch = 0 : i64, scratch_operands = 1 : i64, tpu.core_type = #tpu.core_type<tc>, window_params = [{transform_indices = @transform_0, window_bounds = array<i64: 1, 2, 18, 18, 1>}, {transform_indices = @transform_1, window_bounds = array<i64: 1, 9, 8>}, {transform_indices = @transform_2, window_bounds = array<i64: 1, 1, 8>}, {transform_indices = @transform_3, window_bounds = array<i64: 1, 72, 16>}, {transform_indices = @transform_4, window_bounds = array<i64: 1, 1, 16>}, {transform_indices = @transform_5, window_bounds = array<i64: 1, 2, 4, 4, 16>}]} {
    %c0 = arith.constant 0 : index
    %c0_0 = arith.constant 0 : index
    %c0_1 = arith.constant 0 : index
    %0 = vector.load %arg2[%c0, %c0_0, %c0_1] : memref<1x9x8xf32, #tpu.memory_space<vmem>>, vector<1x9x8xf32>
    %1 = vector.shape_cast %0 : vector<1x9x8xf32> to vector<9x8xf32>
    %c0_2 = arith.constant 0 : index
    %c0_3 = arith.constant 0 : index
    %c0_4 = arith.constant 0 : index
    %2 = vector.load %arg3[%c0_2, %c0_3, %c0_4] : memref<1x1x8xf32, #tpu.memory_space<vmem>>, vector<1x1x8xf32>
    %3 = vector.shape_cast %2 : vector<1x1x8xf32> to vector<1x8xf32>
    %cst = arith.constant 0.000000e+00 : f32
    %4 = vector.broadcast %cst : f32 to vector<2x10x10x8xf32>
    %c0_5 = arith.constant 0 : index
    %c0_6 = arith.constant 0 : index
    %c0_7 = arith.constant 0 : index
    %c0_8 = arith.constant 0 : index
    %5 = vector.load %arg7[%c0_5, %c0_6, %c0_7, %c0_8] : memref<2x10x10x8xf32, #tpu.memory_space<vmem>>, vector<2x10x10x8xf32>
    tpu.vector_store %arg7[%c0_5, %c0_6, %c0_7, %c0_8], %4 {strides = array<i32>} : memref<2x10x10x8xf32, #tpu.memory_space<vmem>>, vector<2x10x10x8xf32>,
    %cst_9 = arith.constant 0.000000e+00 : f32
    %6 = vector.broadcast %cst_9 : f32 to vector<2x4x16x8xf32>
    %7 = vector.shape_cast %3 : vector<1x8xf32> to vector<1x1x1x8xf32>
    %8 = vector.broadcast %7 : vector<1x1x1x8xf32> to vector<2x4x16x8xf32>
    %9 = arith.addf %6, %8 : vector<2x4x16x8xf32>
    %c0_10 = arith.constant 0 : index
    %c0_11 = arith.constant 0 : index
    %c0_12 = arith.constant 0 : index
    %c0_13 = arith.constant 0 : index
    %c0_14 = arith.constant 0 : index
    %10 = vector.load %arg1[%c0_10, %c0_11, %c0_12, %c0_13, %c0_14] : memref<1x2x18x18x1xf32, #tpu.memory_space<vmem>>, vector<1x2x4x16x1xf32>
    %11 = vector.shape_cast %10 : vector<1x2x4x16x1xf32> to vector<2x4x16x1xf32>
    %12 = vector.extract_strided_slice %1 {offsets = [0, 0], sizes = [1, 8], strides = [1, 1]} : vector<9x8xf32> to vector<1x8xf32>
    %13 = vector.shape_cast %12 : vector<1x8xf32> to vector<1x1x1x8xf32>
    %14 = vector.broadcast %11 : vector<2x4x16x1xf32> to vector<2x4x16x8xf32>
    %15 = vector.broadcast %13 : vector<1x1x1x8xf32> to vector<2x4x16x8xf32>
    %16 = arith.mulf %14, %15 : vector<2x4x16x8xf32>
    %17 = arith.addf %9, %16 : vector<2x4x16x8xf32>
    %c0_15 = arith.constant 0 : index
    %c0_16 = arith.constant 0 : index
    %c0_17 = arith.constant 0 : index
    %c1 = arith.constant 1 : index
    %c0_18 = arith.constant 0 : index
    %18 = vector.load %arg1[%c0_15, %c0_16, %c0_17, %c1, %c0_18] : memref<1x2x18x18x1xf32, #tpu.memory_space<vmem>>, vector<1x2x4x16x1xf32>
    %19 = vector.shape_cast %18 : vector<1x2x4x16x1xf32> to vector<2x4x16x1xf32>
    %20 = vector.extract_strided_slice %1 {offsets = [1, 0], sizes = [1, 8], strides = [1, 1]} : vector<9x8xf32> to vector<1x8xf32>
    %21 = vector.shape_cast %20 : vector<1x8xf32> to vector<1x1x1x8xf32>
    %22 = vector.broadcast %19 : vector<2x4x16x1xf32> to vector<2x4x16x8xf32>
    %23 = vector.broadcast %21 : vector<1x1x1x8xf32> to vector<2x4x16x8xf32>
    %24 = arith.mulf %22, %23 : vector<2x4x16x8xf32>
    %25 = arith.addf %17, %24 : vector<2x4x16x8xf32>
    %c0_19 = arith.constant 0 : index
    %c0_20 = arith.constant 0 : index
    %c0_21 = arith.constant 0 : index
    %c2 = arith.constant 2 : index
    %c0_22 = arith.constant 0 : index
    %26 = vector.load %arg1[%c0_19, %c0_20, %c0_21, %c2, %c0_22] : memref<1x2x18x18x1xf32, #tpu.memory_space<vmem>>, vector<1x2x4x16x1xf32>
    %27 = vector.shape_cast %26 : vector<1x2x4x16x1xf32> to vector<2x4x16x1xf32>
    %28 = vector.extract_strided_slice %1 {offsets = [2, 0], sizes = [1, 8], strides = [1, 1]} : vector<9x8xf32> to vector<1x8xf32>
    %29 = vector.shape_cast %28 : vector<1x8xf32> to vector<1x1x1x8xf32>
    %30 = vector.broadcast %27 : vector<2x4x16x1xf32> to vector<2x4x16x8xf32>
    %31 = vector.broadcast %29 : vector<1x1x1x8xf32> to vector<2x4x16x8xf32>
    %32 = arith.mulf %30, %31 : vector<2x4x16x8xf32>
    %33 = arith.addf %25, %32 : vector<2x4x16x8xf32>
    %c0_23 = arith.constant 0 : index
    %c0_24 = arith.constant 0 : index
    %c1_25 = arith.constant 1 : index
    %c0_26 = arith.constant 0 : index
    %c0_27 = arith.constant 0 : index
    %34 = vector.load %arg1[%c0_23, %c0_24, %c1_25, %c0_26, %c0_27] : memref<1x2x18x18x1xf32, #tpu.memory_space<vmem>>, vector<1x2x4x16x1xf32>
    %35 = vector.shape_cast %34 : vector<1x2x4x16x1xf32> to vector<2x4x16x1xf32>
    %36 = vector.extract_strided_slice %1 {offsets = [3, 0], sizes = [1, 8], strides = [1, 1]} : vector<9x8xf32> to vector<1x8xf32>
    %37 = vector.shape_cast %36 : vector<1x8xf32> to vector<1x1x1x8xf32>
    %38 = vector.broadcast %35 : vector<2x4x16x1xf32> to vector<2x4x16x8xf32>
    %39 = vector.broadcast %37 : vector<1x1x1x8xf32> to vector<2x4x16x8xf32>
    %40 = arith.mulf %38, %39 : vector<2x4x16x8xf32>
    %41 = arith.addf %33, %40 : vector<2x4x16x8xf32>
    %c0_28 = arith.constant 0 : index
    %c0_29 = arith.constant 0 : index
    %c1_30 = arith.constant 1 : index
    %c1_31 = arith.constant 1 : index
    %c0_32 = arith.constant 0 : index
    %42 = vector.load %arg1[%c0_28, %c0_29, %c1_30, %c1_31, %c0_32] : memref<1x2x18x18x1xf32, #tpu.memory_space<vmem>>, vector<1x2x4x16x1xf32>
    %43 = vector.shape_cast %42 : vector<1x2x4x16x1xf32> to vector<2x4x16x1xf32>
    %44 = vector.extract_strided_slice %1 {offsets = [4, 0], sizes = [1, 8], strides = [1, 1]} : vector<9x8xf32> to vector<1x8xf32>
    %45 = vector.shape_cast %44 : vector<1x8xf32> to vector<1x1x1x8xf32>
    %46 = vector.broadcast %43 : vector<2x4x16x1xf32> to vector<2x4x16x8xf32>
    %47 = vector.broadcast %45 : vector<1x1x1x8xf32> to vector<2x4x16x8xf32>
    %48 = arith.mulf %46, %47 : vector<2x4x16x8xf32>
    %49 = arith.addf %41, %48 : vector<2x4x16x8xf32>
    %c0_33 = arith.constant 0 : index
    %c0_34 = arith.constant 0 : index
    %c1_35 = arith.constant 1 : index
    %c2_36 = arith.constant 2 : index
    %c0_37 = arith.constant 0 : index
    %50 = vector.load %arg1[%c0_33, %c0_34, %c1_35, %c2_36, %c0_37] : memref<1x2x18x18x1xf32, #tpu.memory_space<vmem>>, vector<1x2x4x16x1xf32>
    %51 = vector.shape_cast %50 : vector<1x2x4x16x1xf32> to vector<2x4x16x1xf32>
    %52 = vector.extract_strided_slice %1 {offsets = [5, 0], sizes = [1, 8], strides = [1, 1]} : vector<9x8xf32> to vector<1x8xf32>
    %53 = vector.shape_cast %52 : vector<1x8xf32> to vector<1x1x1x8xf32>
    %54 = vector.broadcast %51 : vector<2x4x16x1xf32> to vector<2x4x16x8xf32>
    %55 = vector.broadcast %53 : vector<1x1x1x8xf32> to vector<2x4x16x8xf32>
    %56 = arith.mulf %54, %55 : vector<2x4x16x8xf32>
    %57 = arith.addf %49, %56 : vector<2x4x16x8xf32>
    %c0_38 = arith.constant 0 : index
    %c0_39 = arith.constant 0 : index
    %c2_40 = arith.constant 2 : index
    %c0_41 = arith.constant 0 : index
    %c0_42 = arith.constant 0 : index
    %58 = vector.load %arg1[%c0_38, %c0_39, %c2_40, %c0_41, %c0_42] : memref<1x2x18x18x1xf32, #tpu.memory_space<vmem>>, vector<1x2x4x16x1xf32>
    %59 = vector.shape_cast %58 : vector<1x2x4x16x1xf32> to vector<2x4x16x1xf32>
    %60 = vector.extract_strided_slice %1 {offsets = [6, 0], sizes = [1, 8], strides = [1, 1]} : vector<9x8xf32> to vector<1x8xf32>
    %61 = vector.shape_cast %60 : vector<1x8xf32> to vector<1x1x1x8xf32>
    %62 = vector.broadcast %59 : vector<2x4x16x1xf32> to vector<2x4x16x8xf32>
    %63 = vector.broadcast %61 : vector<1x1x1x8xf32> to vector<2x4x16x8xf32>
    %64 = arith.mulf %62, %63 : vector<2x4x16x8xf32>
    %65 = arith.addf %57, %64 : vector<2x4x16x8xf32>
    %c0_43 = arith.constant 0 : index
    %c0_44 = arith.constant 0 : index
    %c2_45 = arith.constant 2 : index
    %c1_46 = arith.constant 1 : index
    %c0_47 = arith.constant 0 : index
    %66 = vector.load %arg1[%c0_43, %c0_44, %c2_45, %c1_46, %c0_47] : memref<1x2x18x18x1xf32, #tpu.memory_space<vmem>>, vector<1x2x4x16x1xf32>
    %67 = vector.shape_cast %66 : vector<1x2x4x16x1xf32> to vector<2x4x16x1xf32>
    %68 = vector.extract_strided_slice %1 {offsets = [7, 0], sizes = [1, 8], strides = [1, 1]} : vector<9x8xf32> to vector<1x8xf32>
    %69 = vector.shape_cast %68 : vector<1x8xf32> to vector<1x1x1x8xf32>
    %70 = vector.broadcast %67 : vector<2x4x16x1xf32> to vector<2x4x16x8xf32>
    %71 = vector.broadcast %69 : vector<1x1x1x8xf32> to vector<2x4x16x8xf32>
    %72 = arith.mulf %70, %71 : vector<2x4x16x8xf32>
    %73 = arith.addf %65, %72 : vector<2x4x16x8xf32>
    %c0_48 = arith.constant 0 : index
    %c0_49 = arith.constant 0 : index
    %c2_50 = arith.constant 2 : index
    %c2_51 = arith.constant 2 : index
    %c0_52 = arith.constant 0 : index
    %74 = vector.load %arg1[%c0_48, %c0_49, %c2_50, %c2_51, %c0_52] : memref<1x2x18x18x1xf32, #tpu.memory_space<vmem>>, vector<1x2x4x16x1xf32>
    %75 = vector.shape_cast %74 : vector<1x2x4x16x1xf32> to vector<2x4x16x1xf32>
    %76 = vector.extract_strided_slice %1 {offsets = [8, 0], sizes = [1, 8], strides = [1, 1]} : vector<9x8xf32> to vector<1x8xf32>
    %77 = vector.shape_cast %76 : vector<1x8xf32> to vector<1x1x1x8xf32>
    %78 = vector.broadcast %75 : vector<2x4x16x1xf32> to vector<2x4x16x8xf32>
    %79 = vector.broadcast %77 : vector<1x1x1x8xf32> to vector<2x4x16x8xf32>
    %80 = arith.mulf %78, %79 : vector<2x4x16x8xf32>
    %81 = arith.addf %73, %80 : vector<2x4x16x8xf32>
    %cst_53 = arith.constant 0.000000e+00 : f32
    %82 = vector.broadcast %cst_53 : f32 to vector<2x4x16x8xf32>
    %83 = arith.maximumf %81, %82 : vector<2x4x16x8xf32>
    %84 = vector.shape_cast %83 : vector<2x4x16x8xf32> to vector<2x2x2x16x8xf32>
    %85 = vector.extract_strided_slice %84 {offsets = [0, 0, 0, 0, 0], sizes = [2, 2, 1, 16, 8], strides = [1, 1, 1, 1, 1]} : vector<2x2x2x16x8xf32> to vector<2x2x1x16x8xf32>
    %86 = vector.shape_cast %85 : vector<2x2x1x16x8xf32> to vector<2x2x16x8xf32>
    %87 = vector.extract_strided_slice %84 {offsets = [0, 0, 1, 0, 0], sizes = [2, 2, 1, 16, 8], strides = [1, 1, 1, 1, 1]} : vector<2x2x2x16x8xf32> to vector<2x2x1x16x8xf32>
    %88 = vector.shape_cast %87 : vector<2x2x1x16x8xf32> to vector<2x2x16x8xf32>
    %89 = arith.maximumf %86, %88 : vector<2x2x16x8xf32>
    %90 = vector.extract_strided_slice %89 {offsets = [0, 0, 0, 0], sizes = [2, 2, 1, 8], strides = [1, 1, 1, 1]} : vector<2x2x16x8xf32> to vector<2x2x1x8xf32>
    %91 = vector.extract_strided_slice %89 {offsets = [0, 0, 1, 0], sizes = [2, 2, 1, 8], strides = [1, 1, 1, 1]} : vector<2x2x16x8xf32> to vector<2x2x1x8xf32>
    %92 = arith.maximumf %90, %91 : vector<2x2x1x8xf32>
    %c0_54 = arith.constant 0 : index
    %c1_55 = arith.constant 1 : index
    %c1_56 = arith.constant 1 : index
    %c0_57 = arith.constant 0 : index
    %93 = vector.load %arg7[%c0_54, %c1_55, %c1_56, %c0_57] : memref<2x10x10x8xf32, #tpu.memory_space<vmem>>, vector<2x2x1x8xf32>
    tpu.vector_store %arg7[%c0_54, %c1_55, %c1_56, %c0_57], %92 {strides = array<i32>} : memref<2x10x10x8xf32, #tpu.memory_space<vmem>>, vector<2x2x1x8xf32>,
    %94 = vector.extract_strided_slice %89 {offsets = [0, 0, 2, 0], sizes = [2, 2, 1, 8], strides = [1, 1, 1, 1]} : vector<2x2x16x8xf32> to vector<2x2x1x8xf32>
    %95 = vector.extract_strided_slice %89 {offsets = [0, 0, 3, 0], sizes = [2, 2, 1, 8], strides = [1, 1, 1, 1]} : vector<2x2x16x8xf32> to vector<2x2x1x8xf32>
    %96 = arith.maximumf %94, %95 : vector<2x2x1x8xf32>
    %c0_58 = arith.constant 0 : index
    %c1_59 = arith.constant 1 : index
    %c2_60 = arith.constant 2 : index
    %c0_61 = arith.constant 0 : index
    %97 = vector.load %arg7[%c0_58, %c1_59, %c2_60, %c0_61] : memref<2x10x10x8xf32, #tpu.memory_space<vmem>>, vector<2x2x1x8xf32>
    tpu.vector_store %arg7[%c0_58, %c1_59, %c2_60, %c0_61], %96 {strides = array<i32>} : memref<2x10x10x8xf32, #tpu.memory_space<vmem>>, vector<2x2x1x8xf32>,
    %98 = vector.extract_strided_slice %89 {offsets = [0, 0, 4, 0], sizes = [2, 2, 1, 8], strides = [1, 1, 1, 1]} : vector<2x2x16x8xf32> to vector<2x2x1x8xf32>
    %99 = vector.extract_strided_slice %89 {offsets = [0, 0, 5, 0], sizes = [2, 2, 1, 8], strides = [1, 1, 1, 1]} : vector<2x2x16x8xf32> to vector<2x2x1x8xf32>
    %100 = arith.maximumf %98, %99 : vector<2x2x1x8xf32>
    %c0_62 = arith.constant 0 : index
    %c1_63 = arith.constant 1 : index
    %c3 = arith.constant 3 : index
    %c0_64 = arith.constant 0 : index
    %101 = vector.load %arg7[%c0_62, %c1_63, %c3, %c0_64] : memref<2x10x10x8xf32, #tpu.memory_space<vmem>>, vector<2x2x1x8xf32>
    tpu.vector_store %arg7[%c0_62, %c1_63, %c3, %c0_64], %100 {strides = array<i32>} : memref<2x10x10x8xf32, #tpu.memory_space<vmem>>, vector<2x2x1x8xf32>,
    %102 = vector.extract_strided_slice %89 {offsets = [0, 0, 6, 0], sizes = [2, 2, 1, 8], strides = [1, 1, 1, 1]} : vector<2x2x16x8xf32> to vector<2x2x1x8xf32>
    %103 = vector.extract_strided_slice %89 {offsets = [0, 0, 7, 0], sizes = [2, 2, 1, 8], strides = [1, 1, 1, 1]} : vector<2x2x16x8xf32> to vector<2x2x1x8xf32>
    %104 = arith.maximumf %102, %103 : vector<2x2x1x8xf32>
    %c0_65 = arith.constant 0 : index
    %c1_66 = arith.constant 1 : index
    %c4 = arith.constant 4 : index
    %c0_67 = arith.constant 0 : index
    %105 = vector.load %arg7[%c0_65, %c1_66, %c4, %c0_67] : memref<2x10x10x8xf32, #tpu.memory_space<vmem>>, vector<2x2x1x8xf32>
    tpu.vector_store %arg7[%c0_65, %c1_66, %c4, %c0_67], %104 {strides = array<i32>} : memref<2x10x10x8xf32, #tpu.memory_space<vmem>>, vector<2x2x1x8xf32>,
    %106 = vector.extract_strided_slice %89 {offsets = [0, 0, 8, 0], sizes = [2, 2, 1, 8], strides = [1, 1, 1, 1]} : vector<2x2x16x8xf32> to vector<2x2x1x8xf32>
    %107 = vector.extract_strided_slice %89 {offsets = [0, 0, 9, 0], sizes = [2, 2, 1, 8], strides = [1, 1, 1, 1]} : vector<2x2x16x8xf32> to vector<2x2x1x8xf32>
    %108 = arith.maximumf %106, %107 : vector<2x2x1x8xf32>
    %c0_68 = arith.constant 0 : index
    %c1_69 = arith.constant 1 : index
    %c5 = arith.constant 5 : index
    %c0_70 = arith.constant 0 : index
    %109 = vector.load %arg7[%c0_68, %c1_69, %c5, %c0_70] : memref<2x10x10x8xf32, #tpu.memory_space<vmem>>, vector<2x2x1x8xf32>
    tpu.vector_store %arg7[%c0_68, %c1_69, %c5, %c0_70], %108 {strides = array<i32>} : memref<2x10x10x8xf32, #tpu.memory_space<vmem>>, vector<2x2x1x8xf32>,
    %110 = vector.extract_strided_slice %89 {offsets = [0, 0, 10, 0], sizes = [2, 2, 1, 8], strides = [1, 1, 1, 1]} : vector<2x2x16x8xf32> to vector<2x2x1x8xf32>
    %111 = vector.extract_strided_slice %89 {offsets = [0, 0, 11, 0], sizes = [2, 2, 1, 8], strides = [1, 1, 1, 1]} : vector<2x2x16x8xf32> to vector<2x2x1x8xf32>
    %112 = arith.maximumf %110, %111 : vector<2x2x1x8xf32>
    %c0_71 = arith.constant 0 : index
    %c1_72 = arith.constant 1 : index
    %c6 = arith.constant 6 : index
    %c0_73 = arith.constant 0 : index
    %113 = vector.load %arg7[%c0_71, %c1_72, %c6, %c0_73] : memref<2x10x10x8xf32, #tpu.memory_space<vmem>>, vector<2x2x1x8xf32>
    tpu.vector_store %arg7[%c0_71, %c1_72, %c6, %c0_73], %112 {strides = array<i32>} : memref<2x10x10x8xf32, #tpu.memory_space<vmem>>, vector<2x2x1x8xf32>,
    %114 = vector.extract_strided_slice %89 {offsets = [0, 0, 12, 0], sizes = [2, 2, 1, 8], strides = [1, 1, 1, 1]} : vector<2x2x16x8xf32> to vector<2x2x1x8xf32>
    %115 = vector.extract_strided_slice %89 {offsets = [0, 0, 13, 0], sizes = [2, 2, 1, 8], strides = [1, 1, 1, 1]} : vector<2x2x16x8xf32> to vector<2x2x1x8xf32>
    %116 = arith.maximumf %114, %115 : vector<2x2x1x8xf32>
    %c0_74 = arith.constant 0 : index
    %c1_75 = arith.constant 1 : index
    %c7 = arith.constant 7 : index
    %c0_76 = arith.constant 0 : index
    %117 = vector.load %arg7[%c0_74, %c1_75, %c7, %c0_76] : memref<2x10x10x8xf32, #tpu.memory_space<vmem>>, vector<2x2x1x8xf32>
    tpu.vector_store %arg7[%c0_74, %c1_75, %c7, %c0_76], %116 {strides = array<i32>} : memref<2x10x10x8xf32, #tpu.memory_space<vmem>>, vector<2x2x1x8xf32>,
    %118 = vector.extract_strided_slice %89 {offsets = [0, 0, 14, 0], sizes = [2, 2, 1, 8], strides = [1, 1, 1, 1]} : vector<2x2x16x8xf32> to vector<2x2x1x8xf32>
    %119 = vector.extract_strided_slice %89 {offsets = [0, 0, 15, 0], sizes = [2, 2, 1, 8], strides = [1, 1, 1, 1]} : vector<2x2x16x8xf32> to vector<2x2x1x8xf32>
    %120 = arith.maximumf %118, %119 : vector<2x2x1x8xf32>
    %c0_77 = arith.constant 0 : index
    %c1_78 = arith.constant 1 : index
    %c8 = arith.constant 8 : index
    %c0_79 = arith.constant 0 : index
    %121 = vector.load %arg7[%c0_77, %c1_78, %c8, %c0_79] : memref<2x10x10x8xf32, #tpu.memory_space<vmem>>, vector<2x2x1x8xf32>
    tpu.vector_store %arg7[%c0_77, %c1_78, %c8, %c0_79], %120 {strides = array<i32>} : memref<2x10x10x8xf32, #tpu.memory_space<vmem>>, vector<2x2x1x8xf32>,
    %cst_80 = arith.constant 0.000000e+00 : f32
    %122 = vector.broadcast %cst_80 : f32 to vector<2x4x16x8xf32>
    %123 = vector.shape_cast %3 : vector<1x8xf32> to vector<1x1x1x8xf32>
    %124 = vector.broadcast %123 : vector<1x1x1x8xf32> to vector<2x4x16x8xf32>
    %125 = arith.addf %122, %124 : vector<2x4x16x8xf32>
    %c0_81 = arith.constant 0 : index
    %c0_82 = arith.constant 0 : index
    %c4_83 = arith.constant 4 : index
    %c0_84 = arith.constant 0 : index
    %c0_85 = arith.constant 0 : index
    %126 = vector.load %arg1[%c0_81, %c0_82, %c4_83, %c0_84, %c0_85] : memref<1x2x18x18x1xf32, #tpu.memory_space<vmem>>, vector<1x2x4x16x1xf32>
    %127 = vector.shape_cast %126 : vector<1x2x4x16x1xf32> to vector<2x4x16x1xf32>
    %128 = vector.extract_strided_slice %1 {offsets = [0, 0], sizes = [1, 8], strides = [1, 1]} : vector<9x8xf32> to vector<1x8xf32>
    %129 = vector.shape_cast %128 : vector<1x8xf32> to vector<1x1x1x8xf32>
    %130 = vector.broadcast %127 : vector<2x4x16x1xf32> to vector<2x4x16x8xf32>
    %131 = vector.broadcast %129 : vector<1x1x1x8xf32> to vector<2x4x16x8xf32>
    %132 = arith.mulf %130, %131 : vector<2x4x16x8xf32>
    %133 = arith.addf %125, %132 : vector<2x4x16x8xf32>
    %c0_86 = arith.constant 0 : index
    %c0_87 = arith.constant 0 : index
    %c4_88 = arith.constant 4 : index
    %c1_89 = arith.constant 1 : index
    %c0_90 = arith.constant 0 : index
    %134 = vector.load %arg1[%c0_86, %c0_87, %c4_88, %c1_89, %c0_90] : memref<1x2x18x18x1xf32, #tpu.memory_space<vmem>>, vector<1x2x4x16x1xf32>
    %135 = vector.shape_cast %134 : vector<1x2x4x16x1xf32> to vector<2x4x16x1xf32>
    %136 = vector.extract_strided_slice %1 {offsets = [1, 0], sizes = [1, 8], strides = [1, 1]} : vector<9x8xf32> to vector<1x8xf32>
    %137 = vector.shape_cast %136 : vector<1x8xf32> to vector<1x1x1x8xf32>
    %138 = vector.broadcast %135 : vector<2x4x16x1xf32> to vector<2x4x16x8xf32>
    %139 = vector.broadcast %137 : vector<1x1x1x8xf32> to vector<2x4x16x8xf32>
    %140 = arith.mulf %138, %139 : vector<2x4x16x8xf32>
    %141 = arith.addf %133, %140 : vector<2x4x16x8xf32>
    %c0_91 = arith.constant 0 : index
    %c0_92 = arith.constant 0 : index
    %c4_93 = arith.constant 4 : index
    %c2_94 = arith.constant 2 : index
    %c0_95 = arith.constant 0 : index
    %142 = vector.load %arg1[%c0_91, %c0_92, %c4_93, %c2_94, %c0_95] : memref<1x2x18x18x1xf32, #tpu.memory_space<vmem>>, vector<1x2x4x16x1xf32>
    %143 = vector.shape_cast %142 : vector<1x2x4x16x1xf32> to vector<2x4x16x1xf32>
    %144 = vector.extract_strided_slice %1 {offsets = [2, 0], sizes = [1, 8], strides = [1, 1]} : vector<9x8xf32> to vector<1x8xf32>
    %145 = vector.shape_cast %144 : vector<1x8xf32> to vector<1x1x1x8xf32>
    %146 = vector.broadcast %143 : vector<2x4x16x1xf32> to vector<2x4x16x8xf32>
    %147 = vector.broadcast %145 : vector<1x1x1x8xf32> to vector<2x4x16x8xf32>
    %148 = arith.mulf %146, %147 : vector<2x4x16x8xf32>
    %149 = arith.addf %141, %148 : vector<2x4x16x8xf32>
    %c0_96 = arith.constant 0 : index
    %c0_97 = arith.constant 0 : index
    %c5_98 = arith.constant 5 : index
    %c0_99 = arith.constant 0 : index
    %c0_100 = arith.constant 0 : index
    %150 = vector.load %arg1[%c0_96, %c0_97, %c5_98, %c0_99, %c0_100] : memref<1x2x18x18x1xf32, #tpu.memory_space<vmem>>, vector<1x2x4x16x1xf32>
    %151 = vector.shape_cast %150 : vector<1x2x4x16x1xf32> to vector<2x4x16x1xf32>
    %152 = vector.extract_strided_slice %1 {offsets = [3, 0], sizes = [1, 8], strides = [1, 1]} : vector<9x8xf32> to vector<1x8xf32>
    %153 = vector.shape_cast %152 : vector<1x8xf32> to vector<1x1x1x8xf32>
    %154 = vector.broadcast %151 : vector<2x4x16x1xf32> to vector<2x4x16x8xf32>
    %155 = vector.broadcast %153 : vector<1x1x1x8xf32> to vector<2x4x16x8xf32>
    %156 = arith.mulf %154, %155 : vector<2x4x16x8xf32>
    %157 = arith.addf %149, %156 : vector<2x4x16x8xf32>
    %c0_101 = arith.constant 0 : index
    %c0_102 = arith.constant 0 : index
    %c5_103 = arith.constant 5 : index
    %c1_104 = arith.constant 1 : index
    %c0_105 = arith.constant 0 : index
    %158 = vector.load %arg1[%c0_101, %c0_102, %c5_103, %c1_104, %c0_105] : memref<1x2x18x18x1xf32, #tpu.memory_space<vmem>>, vector<1x2x4x16x1xf32>
    %159 = vector.shape_cast %158 : vector<1x2x4x16x1xf32> to vector<2x4x16x1xf32>
    %160 = vector.extract_strided_slice %1 {offsets = [4, 0], sizes = [1, 8], strides = [1, 1]} : vector<9x8xf32> to vector<1x8xf32>
    %161 = vector.shape_cast %160 : vector<1x8xf32> to vector<1x1x1x8xf32>
    %162 = vector.broadcast %159 : vector<2x4x16x1xf32> to vector<2x4x16x8xf32>
    %163 = vector.broadcast %161 : vector<1x1x1x8xf32> to vector<2x4x16x8xf32>
    %164 = arith.mulf %162, %163 : vector<2x4x16x8xf32>
    %165 = arith.addf %157, %164 : vector<2x4x16x8xf32>
    %c0_106 = arith.constant 0 : index
    %c0_107 = arith.constant 0 : index
    %c5_108 = arith.constant 5 : index
    %c2_109 = arith.constant 2 : index
    %c0_110 = arith.constant 0 : index
    %166 = vector.load %arg1[%c0_106, %c0_107, %c5_108, %c2_109, %c0_110] : memref<1x2x18x18x1xf32, #tpu.memory_space<vmem>>, vector<1x2x4x16x1xf32>
    %167 = vector.shape_cast %166 : vector<1x2x4x16x1xf32> to vector<2x4x16x1xf32>
    %168 = vector.extract_strided_slice %1 {offsets = [5, 0], sizes = [1, 8], strides = [1, 1]} : vector<9x8xf32> to vector<1x8xf32>
    %169 = vector.shape_cast %168 : vector<1x8xf32> to vector<1x1x1x8xf32>
    %170 = vector.broadcast %167 : vector<2x4x16x1xf32> to vector<2x4x16x8xf32>
    %171 = vector.broadcast %169 : vector<1x1x1x8xf32> to vector<2x4x16x8xf32>
    %172 = arith.mulf %170, %171 : vector<2x4x16x8xf32>
    %173 = arith.addf %165, %172 : vector<2x4x16x8xf32>
    %c0_111 = arith.constant 0 : index
    %c0_112 = arith.constant 0 : index
    %c6_113 = arith.constant 6 : index
    %c0_114 = arith.constant 0 : index
    %c0_115 = arith.constant 0 : index
    %174 = vector.load %arg1[%c0_111, %c0_112, %c6_113, %c0_114, %c0_115] : memref<1x2x18x18x1xf32, #tpu.memory_space<vmem>>, vector<1x2x4x16x1xf32>
    %175 = vector.shape_cast %174 : vector<1x2x4x16x1xf32> to vector<2x4x16x1xf32>
    %176 = vector.extract_strided_slice %1 {offsets = [6, 0], sizes = [1, 8], strides = [1, 1]} : vector<9x8xf32> to vector<1x8xf32>
    %177 = vector.shape_cast %176 : vector<1x8xf32> to vector<1x1x1x8xf32>
    %178 = vector.broadcast %175 : vector<2x4x16x1xf32> to vector<2x4x16x8xf32>
    %179 = vector.broadcast %177 : vector<1x1x1x8xf32> to vector<2x4x16x8xf32>
    %180 = arith.mulf %178, %179 : vector<2x4x16x8xf32>
    %181 = arith.addf %173, %180 : vector<2x4x16x8xf32>
    %c0_116 = arith.constant 0 : index
    %c0_117 = arith.constant 0 : index
    %c6_118 = arith.constant 6 : index
    %c1_119 = arith.constant 1 : index
    %c0_120 = arith.constant 0 : index
    %182 = vector.load %arg1[%c0_116, %c0_117, %c6_118, %c1_119, %c0_120] : memref<1x2x18x18x1xf32, #tpu.memory_space<vmem>>, vector<1x2x4x16x1xf32>
    %183 = vector.shape_cast %182 : vector<1x2x4x16x1xf32> to vector<2x4x16x1xf32>
    %184 = vector.extract_strided_slice %1 {offsets = [7, 0], sizes = [1, 8], strides = [1, 1]} : vector<9x8xf32> to vector<1x8xf32>
    %185 = vector.shape_cast %184 : vector<1x8xf32> to vector<1x1x1x8xf32>
    %186 = vector.broadcast %183 : vector<2x4x16x1xf32> to vector<2x4x16x8xf32>
    %187 = vector.broadcast %185 : vector<1x1x1x8xf32> to vector<2x4x16x8xf32>
    %188 = arith.mulf %186, %187 : vector<2x4x16x8xf32>
    %189 = arith.addf %181, %188 : vector<2x4x16x8xf32>
    %c0_121 = arith.constant 0 : index
    %c0_122 = arith.constant 0 : index
    %c6_123 = arith.constant 6 : index
    %c2_124 = arith.constant 2 : index
    %c0_125 = arith.constant 0 : index
    %190 = vector.load %arg1[%c0_121, %c0_122, %c6_123, %c2_124, %c0_125] : memref<1x2x18x18x1xf32, #tpu.memory_space<vmem>>, vector<1x2x4x16x1xf32>
    %191 = vector.shape_cast %190 : vector<1x2x4x16x1xf32> to vector<2x4x16x1xf32>
    %192 = vector.extract_strided_slice %1 {offsets = [8, 0], sizes = [1, 8], strides = [1, 1]} : vector<9x8xf32> to vector<1x8xf32>
    %193 = vector.shape_cast %192 : vector<1x8xf32> to vector<1x1x1x8xf32>
    %194 = vector.broadcast %191 : vector<2x4x16x1xf32> to vector<2x4x16x8xf32>
    %195 = vector.broadcast %193 : vector<1x1x1x8xf32> to vector<2x4x16x8xf32>
    %196 = arith.mulf %194, %195 : vector<2x4x16x8xf32>
    %197 = arith.addf %189, %196 : vector<2x4x16x8xf32>
    %cst_126 = arith.constant 0.000000e+00 : f32
    %198 = vector.broadcast %cst_126 : f32 to vector<2x4x16x8xf32>
    %199 = arith.maximumf %197, %198 : vector<2x4x16x8xf32>
    %200 = vector.shape_cast %199 : vector<2x4x16x8xf32> to vector<2x2x2x16x8xf32>
    %201 = vector.extract_strided_slice %200 {offsets = [0, 0, 0, 0, 0], sizes = [2, 2, 1, 16, 8], strides = [1, 1, 1, 1, 1]} : vector<2x2x2x16x8xf32> to vector<2x2x1x16x8xf32>
    %202 = vector.shape_cast %201 : vector<2x2x1x16x8xf32> to vector<2x2x16x8xf32>
    %203 = vector.extract_strided_slice %200 {offsets = [0, 0, 1, 0, 0], sizes = [2, 2, 1, 16, 8], strides = [1, 1, 1, 1, 1]} : vector<2x2x2x16x8xf32> to vector<2x2x1x16x8xf32>
    %204 = vector.shape_cast %203 : vector<2x2x1x16x8xf32> to vector<2x2x16x8xf32>
    %205 = arith.maximumf %202, %204 : vector<2x2x16x8xf32>
    %206 = vector.extract_strided_slice %205 {offsets = [0, 0, 0, 0], sizes = [2, 2, 1, 8], strides = [1, 1, 1, 1]} : vector<2x2x16x8xf32> to vector<2x2x1x8xf32>
    %207 = vector.extract_strided_slice %205 {offsets = [0, 0, 1, 0], sizes = [2, 2, 1, 8], strides = [1, 1, 1, 1]} : vector<2x2x16x8xf32> to vector<2x2x1x8xf32>
    %208 = arith.maximumf %206, %207 : vector<2x2x1x8xf32>
    %c0_127 = arith.constant 0 : index
    %c3_128 = arith.constant 3 : index
    %c1_129 = arith.constant 1 : index
    %c0_130 = arith.constant 0 : index
    %209 = vector.load %arg7[%c0_127, %c3_128, %c1_129, %c0_130] : memref<2x10x10x8xf32, #tpu.memory_space<vmem>>, vector<2x2x1x8xf32>
    tpu.vector_store %arg7[%c0_127, %c3_128, %c1_129, %c0_130], %208 {strides = array<i32>} : memref<2x10x10x8xf32, #tpu.memory_space<vmem>>, vector<2x2x1x8xf32>,
    %210 = vector.extract_strided_slice %205 {offsets = [0, 0, 2, 0], sizes = [2, 2, 1, 8], strides = [1, 1, 1, 1]} : vector<2x2x16x8xf32> to vector<2x2x1x8xf32>
    %211 = vector.extract_strided_slice %205 {offsets = [0, 0, 3, 0], sizes = [2, 2, 1, 8], strides = [1, 1, 1, 1]} : vector<2x2x16x8xf32> to vector<2x2x1x8xf32>
    %212 = arith.maximumf %210, %211 : vector<2x2x1x8xf32>
    %c0_131 = arith.constant 0 : index
    %c3_132 = arith.constant 3 : index
    %c2_133 = arith.constant 2 : index
    %c0_134 = arith.constant 0 : index
    %213 = vector.load %arg7[%c0_131, %c3_132, %c2_133, %c0_134] : memref<2x10x10x8xf32, #tpu.memory_space<vmem>>, vector<2x2x1x8xf32>
    tpu.vector_store %arg7[%c0_131, %c3_132, %c2_133, %c0_134], %212 {strides = array<i32>} : memref<2x10x10x8xf32, #tpu.memory_space<vmem>>, vector<2x2x1x8xf32>,
    %214 = vector.extract_strided_slice %205 {offsets = [0, 0, 4, 0], sizes = [2, 2, 1, 8], strides = [1, 1, 1, 1]} : vector<2x2x16x8xf32> to vector<2x2x1x8xf32>
    %215 = vector.extract_strided_slice %205 {offsets = [0, 0, 5, 0], sizes = [2, 2, 1, 8], strides = [1, 1, 1, 1]} : vector<2x2x16x8xf32> to vector<2x2x1x8xf32>
    %216 = arith.maximumf %214, %215 : vector<2x2x1x8xf32>
    %c0_135 = arith.constant 0 : index
    %c3_136 = arith.constant 3 : index
    %c3_137 = arith.constant 3 : index
    %c0_138 = arith.constant 0 : index
    %217 = vector.load %arg7[%c0_135, %c3_136, %c3_137, %c0_138] : memref<2x10x10x8xf32, #tpu.memory_space<vmem>>, vector<2x2x1x8xf32>
    tpu.vector_store %arg7[%c0_135, %c3_136, %c3_137, %c0_138], %216 {strides = array<i32>} : memref<2x10x10x8xf32, #tpu.memory_space<vmem>>, vector<2x2x1x8xf32>,
    %218 = vector.extract_strided_slice %205 {offsets = [0, 0, 6, 0], sizes = [2, 2, 1, 8], strides = [1, 1, 1, 1]} : vector<2x2x16x8xf32> to vector<2x2x1x8xf32>
    %219 = vector.extract_strided_slice %205 {offsets = [0, 0, 7, 0], sizes = [2, 2, 1, 8], strides = [1, 1, 1, 1]} : vector<2x2x16x8xf32> to vector<2x2x1x8xf32>
    %220 = arith.maximumf %218, %219 : vector<2x2x1x8xf32>
    %c0_139 = arith.constant 0 : index
    %c3_140 = arith.constant 3 : index
    %c4_141 = arith.constant 4 : index
    %c0_142 = arith.constant 0 : index
    %221 = vector.load %arg7[%c0_139, %c3_140, %c4_141, %c0_142] : memref<2x10x10x8xf32, #tpu.memory_space<vmem>>, vector<2x2x1x8xf32>
    tpu.vector_store %arg7[%c0_139, %c3_140, %c4_141, %c0_142], %220 {strides = array<i32>} : memref<2x10x10x8xf32, #tpu.memory_space<vmem>>, vector<2x2x1x8xf32>,
    %222 = vector.extract_strided_slice %205 {offsets = [0, 0, 8, 0], sizes = [2, 2, 1, 8], strides = [1, 1, 1, 1]} : vector<2x2x16x8xf32> to vector<2x2x1x8xf32>
    %223 = vector.extract_strided_slice %205 {offsets = [0, 0, 9, 0], sizes = [2, 2, 1, 8], strides = [1, 1, 1, 1]} : vector<2x2x16x8xf32> to vector<2x2x1x8xf32>
    %224 = arith.maximumf %222, %223 : vector<2x2x1x8xf32>
    %c0_143 = arith.constant 0 : index
    %c3_144 = arith.constant 3 : index
    %c5_145 = arith.constant 5 : index
    %c0_146 = arith.constant 0 : index
    %225 = vector.load %arg7[%c0_143, %c3_144, %c5_145, %c0_146] : memref<2x10x10x8xf32, #tpu.memory_space<vmem>>, vector<2x2x1x8xf32>
    tpu.vector_store %arg7[%c0_143, %c3_144, %c5_145, %c0_146], %224 {strides = array<i32>} : memref<2x10x10x8xf32, #tpu.memory_space<vmem>>, vector<2x2x1x8xf32>,
    %226 = vector.extract_strided_slice %205 {offsets = [0, 0, 10, 0], sizes = [2, 2, 1, 8], strides = [1, 1, 1, 1]} : vector<2x2x16x8xf32> to vector<2x2x1x8xf32>
    %227 = vector.extract_strided_slice %205 {offsets = [0, 0, 11, 0], sizes = [2, 2, 1, 8], strides = [1, 1, 1, 1]} : vector<2x2x16x8xf32> to vector<2x2x1x8xf32>
    %228 = arith.maximumf %226, %227 : vector<2x2x1x8xf32>
    %c0_147 = arith.constant 0 : index
    %c3_148 = arith.constant 3 : index
    %c6_149 = arith.constant 6 : index
    %c0_150 = arith.constant 0 : index
    %229 = vector.load %arg7[%c0_147, %c3_148, %c6_149, %c0_150] : memref<2x10x10x8xf32, #tpu.memory_space<vmem>>, vector<2x2x1x8xf32>
    tpu.vector_store %arg7[%c0_147, %c3_148, %c6_149, %c0_150], %228 {strides = array<i32>} : memref<2x10x10x8xf32, #tpu.memory_space<vmem>>, vector<2x2x1x8xf32>,
    %230 = vector.extract_strided_slice %205 {offsets = [0, 0, 12, 0], sizes = [2, 2, 1, 8], strides = [1, 1, 1, 1]} : vector<2x2x16x8xf32> to vector<2x2x1x8xf32>
    %231 = vector.extract_strided_slice %205 {offsets = [0, 0, 13, 0], sizes = [2, 2, 1, 8], strides = [1, 1, 1, 1]} : vector<2x2x16x8xf32> to vector<2x2x1x8xf32>
    %232 = arith.maximumf %230, %231 : vector<2x2x1x8xf32>
    %c0_151 = arith.constant 0 : index
    %c3_152 = arith.constant 3 : index
    %c7_153 = arith.constant 7 : index
    %c0_154 = arith.constant 0 : index
    %233 = vector.load %arg7[%c0_151, %c3_152, %c7_153, %c0_154] : memref<2x10x10x8xf32, #tpu.memory_space<vmem>>, vector<2x2x1x8xf32>
    tpu.vector_store %arg7[%c0_151, %c3_152, %c7_153, %c0_154], %232 {strides = array<i32>} : memref<2x10x10x8xf32, #tpu.memory_space<vmem>>, vector<2x2x1x8xf32>,
    %234 = vector.extract_strided_slice %205 {offsets = [0, 0, 14, 0], sizes = [2, 2, 1, 8], strides = [1, 1, 1, 1]} : vector<2x2x16x8xf32> to vector<2x2x1x8xf32>
    %235 = vector.extract_strided_slice %205 {offsets = [0, 0, 15, 0], sizes = [2, 2, 1, 8], strides = [1, 1, 1, 1]} : vector<2x2x16x8xf32> to vector<2x2x1x8xf32>
    %236 = arith.maximumf %234, %235 : vector<2x2x1x8xf32>
    %c0_155 = arith.constant 0 : index
    %c3_156 = arith.constant 3 : index
    %c8_157 = arith.constant 8 : index
    %c0_158 = arith.constant 0 : index
    %237 = vector.load %arg7[%c0_155, %c3_156, %c8_157, %c0_158] : memref<2x10x10x8xf32, #tpu.memory_space<vmem>>, vector<2x2x1x8xf32>
    tpu.vector_store %arg7[%c0_155, %c3_156, %c8_157, %c0_158], %236 {strides = array<i32>} : memref<2x10x10x8xf32, #tpu.memory_space<vmem>>, vector<2x2x1x8xf32>,
    %cst_159 = arith.constant 0.000000e+00 : f32
    %238 = vector.broadcast %cst_159 : f32 to vector<2x4x16x8xf32>
    %239 = vector.shape_cast %3 : vector<1x8xf32> to vector<1x1x1x8xf32>
    %240 = vector.broadcast %239 : vector<1x1x1x8xf32> to vector<2x4x16x8xf32>
    %241 = arith.addf %238, %240 : vector<2x4x16x8xf32>
    %c0_160 = arith.constant 0 : index
    %c0_161 = arith.constant 0 : index
    %c8_162 = arith.constant 8 : index
    %c0_163 = arith.constant 0 : index
    %c0_164 = arith.constant 0 : index
    %242 = vector.load %arg1[%c0_160, %c0_161, %c8_162, %c0_163, %c0_164] : memref<1x2x18x18x1xf32, #tpu.memory_space<vmem>>, vector<1x2x4x16x1xf32>
    %243 = vector.shape_cast %242 : vector<1x2x4x16x1xf32> to vector<2x4x16x1xf32>
    %244 = vector.extract_strided_slice %1 {offsets = [0, 0], sizes = [1, 8], strides = [1, 1]} : vector<9x8xf32> to vector<1x8xf32>
    %245 = vector.shape_cast %244 : vector<1x8xf32> to vector<1x1x1x8xf32>
    %246 = vector.broadcast %243 : vector<2x4x16x1xf32> to vector<2x4x16x8xf32>
    %247 = vector.broadcast %245 : vector<1x1x1x8xf32> to vector<2x4x16x8xf32>
    %248 = arith.mulf %246, %247 : vector<2x4x16x8xf32>
    %249 = arith.addf %241, %248 : vector<2x4x16x8xf32>
    %c0_165 = arith.constant 0 : index
    %c0_166 = arith.constant 0 : index
    %c8_167 = arith.constant 8 : index
    %c1_168 = arith.constant 1 : index
    %c0_169 = arith.constant 0 : index
    %250 = vector.load %arg1[%c0_165, %c0_166, %c8_167, %c1_168, %c0_169] : memref<1x2x18x18x1xf32, #tpu.memory_space<vmem>>, vector<1x2x4x16x1xf32>
    %251 = vector.shape_cast %250 : vector<1x2x4x16x1xf32> to vector<2x4x16x1xf32>
    %252 = vector.extract_strided_slice %1 {offsets = [1, 0], sizes = [1, 8], strides = [1, 1]} : vector<9x8xf32> to vector<1x8xf32>
    %253 = vector.shape_cast %252 : vector<1x8xf32> to vector<1x1x1x8xf32>
    %254 = vector.broadcast %251 : vector<2x4x16x1xf32> to vector<2x4x16x8xf32>
    %255 = vector.broadcast %253 : vector<1x1x1x8xf32> to vector<2x4x16x8xf32>
    %256 = arith.mulf %254, %255 : vector<2x4x16x8xf32>
    %257 = arith.addf %249, %256 : vector<2x4x16x8xf32>
    %c0_170 = arith.constant 0 : index
    %c0_171 = arith.constant 0 : index
    %c8_172 = arith.constant 8 : index
    %c2_173 = arith.constant 2 : index
    %c0_174 = arith.constant 0 : index
    %258 = vector.load %arg1[%c0_170, %c0_171, %c8_172, %c2_173, %c0_174] : memref<1x2x18x18x1xf32, #tpu.memory_space<vmem>>, vector<1x2x4x16x1xf32>
    %259 = vector.shape_cast %258 : vector<1x2x4x16x1xf32> to vector<2x4x16x1xf32>
    %260 = vector.extract_strided_slice %1 {offsets = [2, 0], sizes = [1, 8], strides = [1, 1]} : vector<9x8xf32> to vector<1x8xf32>
    %261 = vector.shape_cast %260 : vector<1x8xf32> to vector<1x1x1x8xf32>
    %262 = vector.broadcast %259 : vector<2x4x16x1xf32> to vector<2x4x16x8xf32>
    %263 = vector.broadcast %261 : vector<1x1x1x8xf32> to vector<2x4x16x8xf32>
    %264 = arith.mulf %262, %263 : vector<2x4x16x8xf32>
    %265 = arith.addf %257, %264 : vector<2x4x16x8xf32>
    %c0_175 = arith.constant 0 : index
    %c0_176 = arith.constant 0 : index
    %c9 = arith.constant 9 : index
    %c0_177 = arith.constant 0 : index
    %c0_178 = arith.constant 0 : index
    %266 = vector.load %arg1[%c0_175, %c0_176, %c9, %c0_177, %c0_178] : memref<1x2x18x18x1xf32, #tpu.memory_space<vmem>>, vector<1x2x4x16x1xf32>
    %267 = vector.shape_cast %266 : vector<1x2x4x16x1xf32> to vector<2x4x16x1xf32>
    %268 = vector.extract_strided_slice %1 {offsets = [3, 0], sizes = [1, 8], strides = [1, 1]} : vector<9x8xf32> to vector<1x8xf32>
    %269 = vector.shape_cast %268 : vector<1x8xf32> to vector<1x1x1x8xf32>
    %270 = vector.broadcast %267 : vector<2x4x16x1xf32> to vector<2x4x16x8xf32>
    %271 = vector.broadcast %269 : vector<1x1x1x8xf32> to vector<2x4x16x8xf32>
    %272 = arith.mulf %270, %271 : vector<2x4x16x8xf32>
    %273 = arith.addf %265, %272 : vector<2x4x16x8xf32>
    %c0_179 = arith.constant 0 : index
    %c0_180 = arith.constant 0 : index
    %c9_181 = arith.constant 9 : index
    %c1_182 = arith.constant 1 : index
    %c0_183 = arith.constant 0 : index
    %274 = vector.load %arg1[%c0_179, %c0_180, %c9_181, %c1_182, %c0_183] : memref<1x2x18x18x1xf32, #tpu.memory_space<vmem>>, vector<1x2x4x16x1xf32>
    %275 = vector.shape_cast %274 : vector<1x2x4x16x1xf32> to vector<2x4x16x1xf32>
    %276 = vector.extract_strided_slice %1 {offsets = [4, 0], sizes = [1, 8], strides = [1, 1]} : vector<9x8xf32> to vector<1x8xf32>
    %277 = vector.shape_cast %276 : vector<1x8xf32> to vector<1x1x1x8xf32>
    %278 = vector.broadcast %275 : vector<2x4x16x1xf32> to vector<2x4x16x8xf32>
    %279 = vector.broadcast %277 : vector<1x1x1x8xf32> to vector<2x4x16x8xf32>
    %280 = arith.mulf %278, %279 : vector<2x4x16x8xf32>
    %281 = arith.addf %273, %280 : vector<2x4x16x8xf32>
    %c0_184 = arith.constant 0 : index
    %c0_185 = arith.constant 0 : index
    %c9_186 = arith.constant 9 : index
    %c2_187 = arith.constant 2 : index
    %c0_188 = arith.constant 0 : index
    %282 = vector.load %arg1[%c0_184, %c0_185, %c9_186, %c2_187, %c0_188] : memref<1x2x18x18x1xf32, #tpu.memory_space<vmem>>, vector<1x2x4x16x1xf32>
    %283 = vector.shape_cast %282 : vector<1x2x4x16x1xf32> to vector<2x4x16x1xf32>
    %284 = vector.extract_strided_slice %1 {offsets = [5, 0], sizes = [1, 8], strides = [1, 1]} : vector<9x8xf32> to vector<1x8xf32>
    %285 = vector.shape_cast %284 : vector<1x8xf32> to vector<1x1x1x8xf32>
    %286 = vector.broadcast %283 : vector<2x4x16x1xf32> to vector<2x4x16x8xf32>
    %287 = vector.broadcast %285 : vector<1x1x1x8xf32> to vector<2x4x16x8xf32>
    %288 = arith.mulf %286, %287 : vector<2x4x16x8xf32>
    %289 = arith.addf %281, %288 : vector<2x4x16x8xf32>
    %c0_189 = arith.constant 0 : index
    %c0_190 = arith.constant 0 : index
    %c10 = arith.constant 10 : index
    %c0_191 = arith.constant 0 : index
    %c0_192 = arith.constant 0 : index
    %290 = vector.load %arg1[%c0_189, %c0_190, %c10, %c0_191, %c0_192] : memref<1x2x18x18x1xf32, #tpu.memory_space<vmem>>, vector<1x2x4x16x1xf32>
    %291 = vector.shape_cast %290 : vector<1x2x4x16x1xf32> to vector<2x4x16x1xf32>
    %292 = vector.extract_strided_slice %1 {offsets = [6, 0], sizes = [1, 8], strides = [1, 1]} : vector<9x8xf32> to vector<1x8xf32>
    %293 = vector.shape_cast %292 : vector<1x8xf32> to vector<1x1x1x8xf32>
    %294 = vector.broadcast %291 : vector<2x4x16x1xf32> to vector<2x4x16x8xf32>
    %295 = vector.broadcast %293 : vector<1x1x1x8xf32> to vector<2x4x16x8xf32>
    %296 = arith.mulf %294, %295 : vector<2x4x16x8xf32>
    %297 = arith.addf %289, %296 : vector<2x4x16x8xf32>
    %c0_193 = arith.constant 0 : index
    %c0_194 = arith.constant 0 : index
    %c10_195 = arith.constant 10 : index
    %c1_196 = arith.constant 1 : index
    %c0_197 = arith.constant 0 : index
    %298 = vector.load %arg1[%c0_193, %c0_194, %c10_195, %c1_196, %c0_197] : memref<1x2x18x18x1xf32, #tpu.memory_space<vmem>>, vector<1x2x4x16x1xf32>
    %299 = vector.shape_cast %298 : vector<1x2x4x16x1xf32> to vector<2x4x16x1xf32>
    %300 = vector.extract_strided_slice %1 {offsets = [7, 0], sizes = [1, 8], strides = [1, 1]} : vector<9x8xf32> to vector<1x8xf32>
    %301 = vector.shape_cast %300 : vector<1x8xf32> to vector<1x1x1x8xf32>
    %302 = vector.broadcast %299 : vector<2x4x16x1xf32> to vector<2x4x16x8xf32>
    %303 = vector.broadcast %301 : vector<1x1x1x8xf32> to vector<2x4x16x8xf32>
    %304 = arith.mulf %302, %303 : vector<2x4x16x8xf32>
    %305 = arith.addf %297, %304 : vector<2x4x16x8xf32>
    %c0_198 = arith.constant 0 : index
    %c0_199 = arith.constant 0 : index
    %c10_200 = arith.constant 10 : index
    %c2_201 = arith.constant 2 : index
    %c0_202 = arith.constant 0 : index
    %306 = vector.load %arg1[%c0_198, %c0_199, %c10_200, %c2_201, %c0_202] : memref<1x2x18x18x1xf32, #tpu.memory_space<vmem>>, vector<1x2x4x16x1xf32>
    %307 = vector.shape_cast %306 : vector<1x2x4x16x1xf32> to vector<2x4x16x1xf32>
    %308 = vector.extract_strided_slice %1 {offsets = [8, 0], sizes = [1, 8], strides = [1, 1]} : vector<9x8xf32> to vector<1x8xf32>
    %309 = vector.shape_cast %308 : vector<1x8xf32> to vector<1x1x1x8xf32>
    %310 = vector.broadcast %307 : vector<2x4x16x1xf32> to vector<2x4x16x8xf32>
    %311 = vector.broadcast %309 : vector<1x1x1x8xf32> to vector<2x4x16x8xf32>
    %312 = arith.mulf %310, %311 : vector<2x4x16x8xf32>
    %313 = arith.addf %305, %312 : vector<2x4x16x8xf32>
    %cst_203 = arith.constant 0.000000e+00 : f32
    %314 = vector.broadcast %cst_203 : f32 to vector<2x4x16x8xf32>
    %315 = arith.maximumf %313, %314 : vector<2x4x16x8xf32>
    %316 = vector.shape_cast %315 : vector<2x4x16x8xf32> to vector<2x2x2x16x8xf32>
    %317 = vector.extract_strided_slice %316 {offsets = [0, 0, 0, 0, 0], sizes = [2, 2, 1, 16, 8], strides = [1, 1, 1, 1, 1]} : vector<2x2x2x16x8xf32> to vector<2x2x1x16x8xf32>
    %318 = vector.shape_cast %317 : vector<2x2x1x16x8xf32> to vector<2x2x16x8xf32>
    %319 = vector.extract_strided_slice %316 {offsets = [0, 0, 1, 0, 0], sizes = [2, 2, 1, 16, 8], strides = [1, 1, 1, 1, 1]} : vector<2x2x2x16x8xf32> to vector<2x2x1x16x8xf32>
    %320 = vector.shape_cast %319 : vector<2x2x1x16x8xf32> to vector<2x2x16x8xf32>
    %321 = arith.maximumf %318, %320 : vector<2x2x16x8xf32>
    %322 = vector.extract_strided_slice %321 {offsets = [0, 0, 0, 0], sizes = [2, 2, 1, 8], strides = [1, 1, 1, 1]} : vector<2x2x16x8xf32> to vector<2x2x1x8xf32>
    %323 = vector.extract_strided_slice %321 {offsets = [0, 0, 1, 0], sizes = [2, 2, 1, 8], strides = [1, 1, 1, 1]} : vector<2x2x16x8xf32> to vector<2x2x1x8xf32>
    %324 = arith.maximumf %322, %323 : vector<2x2x1x8xf32>
    %c0_204 = arith.constant 0 : index
    %c5_205 = arith.constant 5 : index
    %c1_206 = arith.constant 1 : index
    %c0_207 = arith.constant 0 : index
    %325 = vector.load %arg7[%c0_204, %c5_205, %c1_206, %c0_207] : memref<2x10x10x8xf32, #tpu.memory_space<vmem>>, vector<2x2x1x8xf32>
    tpu.vector_store %arg7[%c0_204, %c5_205, %c1_206, %c0_207], %324 {strides = array<i32>} : memref<2x10x10x8xf32, #tpu.memory_space<vmem>>, vector<2x2x1x8xf32>,
    %326 = vector.extract_strided_slice %321 {offsets = [0, 0, 2, 0], sizes = [2, 2, 1, 8], strides = [1, 1, 1, 1]} : vector<2x2x16x8xf32> to vector<2x2x1x8xf32>
    %327 = vector.extract_strided_slice %321 {offsets = [0, 0, 3, 0], sizes = [2, 2, 1, 8], strides = [1, 1, 1, 1]} : vector<2x2x16x8xf32> to vector<2x2x1x8xf32>
    %328 = arith.maximumf %326, %327 : vector<2x2x1x8xf32>
    %c0_208 = arith.constant 0 : index
    %c5_209 = arith.constant 5 : index
    %c2_210 = arith.constant 2 : index
    %c0_211 = arith.constant 0 : index
    %329 = vector.load %arg7[%c0_208, %c5_209, %c2_210, %c0_211] : memref<2x10x10x8xf32, #tpu.memory_space<vmem>>, vector<2x2x1x8xf32>
    tpu.vector_store %arg7[%c0_208, %c5_209, %c2_210, %c0_211], %328 {strides = array<i32>} : memref<2x10x10x8xf32, #tpu.memory_space<vmem>>, vector<2x2x1x8xf32>,
    %330 = vector.extract_strided_slice %321 {offsets = [0, 0, 4, 0], sizes = [2, 2, 1, 8], strides = [1, 1, 1, 1]} : vector<2x2x16x8xf32> to vector<2x2x1x8xf32>
    %331 = vector.extract_strided_slice %321 {offsets = [0, 0, 5, 0], sizes = [2, 2, 1, 8], strides = [1, 1, 1, 1]} : vector<2x2x16x8xf32> to vector<2x2x1x8xf32>
    %332 = arith.maximumf %330, %331 : vector<2x2x1x8xf32>
    %c0_212 = arith.constant 0 : index
    %c5_213 = arith.constant 5 : index
    %c3_214 = arith.constant 3 : index
    %c0_215 = arith.constant 0 : index
    %333 = vector.load %arg7[%c0_212, %c5_213, %c3_214, %c0_215] : memref<2x10x10x8xf32, #tpu.memory_space<vmem>>, vector<2x2x1x8xf32>
    tpu.vector_store %arg7[%c0_212, %c5_213, %c3_214, %c0_215], %332 {strides = array<i32>} : memref<2x10x10x8xf32, #tpu.memory_space<vmem>>, vector<2x2x1x8xf32>,
    %334 = vector.extract_strided_slice %321 {offsets = [0, 0, 6, 0], sizes = [2, 2, 1, 8], strides = [1, 1, 1, 1]} : vector<2x2x16x8xf32> to vector<2x2x1x8xf32>
    %335 = vector.extract_strided_slice %321 {offsets = [0, 0, 7, 0], sizes = [2, 2, 1, 8], strides = [1, 1, 1, 1]} : vector<2x2x16x8xf32> to vector<2x2x1x8xf32>
    %336 = arith.maximumf %334, %335 : vector<2x2x1x8xf32>
    %c0_216 = arith.constant 0 : index
    %c5_217 = arith.constant 5 : index
    %c4_218 = arith.constant 4 : index
    %c0_219 = arith.constant 0 : index
    %337 = vector.load %arg7[%c0_216, %c5_217, %c4_218, %c0_219] : memref<2x10x10x8xf32, #tpu.memory_space<vmem>>, vector<2x2x1x8xf32>
    tpu.vector_store %arg7[%c0_216, %c5_217, %c4_218, %c0_219], %336 {strides = array<i32>} : memref<2x10x10x8xf32, #tpu.memory_space<vmem>>, vector<2x2x1x8xf32>,
    %338 = vector.extract_strided_slice %321 {offsets = [0, 0, 8, 0], sizes = [2, 2, 1, 8], strides = [1, 1, 1, 1]} : vector<2x2x16x8xf32> to vector<2x2x1x8xf32>
    %339 = vector.extract_strided_slice %321 {offsets = [0, 0, 9, 0], sizes = [2, 2, 1, 8], strides = [1, 1, 1, 1]} : vector<2x2x16x8xf32> to vector<2x2x1x8xf32>
    %340 = arith.maximumf %338, %339 : vector<2x2x1x8xf32>
    %c0_220 = arith.constant 0 : index
    %c5_221 = arith.constant 5 : index
    %c5_222 = arith.constant 5 : index
    %c0_223 = arith.constant 0 : index
    %341 = vector.load %arg7[%c0_220, %c5_221, %c5_222, %c0_223] : memref<2x10x10x8xf32, #tpu.memory_space<vmem>>, vector<2x2x1x8xf32>
    tpu.vector_store %arg7[%c0_220, %c5_221, %c5_222, %c0_223], %340 {strides = array<i32>} : memref<2x10x10x8xf32, #tpu.memory_space<vmem>>, vector<2x2x1x8xf32>,
    %342 = vector.extract_strided_slice %321 {offsets = [0, 0, 10, 0], sizes = [2, 2, 1, 8], strides = [1, 1, 1, 1]} : vector<2x2x16x8xf32> to vector<2x2x1x8xf32>
    %343 = vector.extract_strided_slice %321 {offsets = [0, 0, 11, 0], sizes = [2, 2, 1, 8], strides = [1, 1, 1, 1]} : vector<2x2x16x8xf32> to vector<2x2x1x8xf32>
    %344 = arith.maximumf %342, %343 : vector<2x2x1x8xf32>
    %c0_224 = arith.constant 0 : index
    %c5_225 = arith.constant 5 : index
    %c6_226 = arith.constant 6 : index
    %c0_227 = arith.constant 0 : index
    %345 = vector.load %arg7[%c0_224, %c5_225, %c6_226, %c0_227] : memref<2x10x10x8xf32, #tpu.memory_space<vmem>>, vector<2x2x1x8xf32>
    tpu.vector_store %arg7[%c0_224, %c5_225, %c6_226, %c0_227], %344 {strides = array<i32>} : memref<2x10x10x8xf32, #tpu.memory_space<vmem>>, vector<2x2x1x8xf32>,
    %346 = vector.extract_strided_slice %321 {offsets = [0, 0, 12, 0], sizes = [2, 2, 1, 8], strides = [1, 1, 1, 1]} : vector<2x2x16x8xf32> to vector<2x2x1x8xf32>
    %347 = vector.extract_strided_slice %321 {offsets = [0, 0, 13, 0], sizes = [2, 2, 1, 8], strides = [1, 1, 1, 1]} : vector<2x2x16x8xf32> to vector<2x2x1x8xf32>
    %348 = arith.maximumf %346, %347 : vector<2x2x1x8xf32>
    %c0_228 = arith.constant 0 : index
    %c5_229 = arith.constant 5 : index
    %c7_230 = arith.constant 7 : index
    %c0_231 = arith.constant 0 : index
    %349 = vector.load %arg7[%c0_228, %c5_229, %c7_230, %c0_231] : memref<2x10x10x8xf32, #tpu.memory_space<vmem>>, vector<2x2x1x8xf32>
    tpu.vector_store %arg7[%c0_228, %c5_229, %c7_230, %c0_231], %348 {strides = array<i32>} : memref<2x10x10x8xf32, #tpu.memory_space<vmem>>, vector<2x2x1x8xf32>,
    %350 = vector.extract_strided_slice %321 {offsets = [0, 0, 14, 0], sizes = [2, 2, 1, 8], strides = [1, 1, 1, 1]} : vector<2x2x16x8xf32> to vector<2x2x1x8xf32>
    %351 = vector.extract_strided_slice %321 {offsets = [0, 0, 15, 0], sizes = [2, 2, 1, 8], strides = [1, 1, 1, 1]} : vector<2x2x16x8xf32> to vector<2x2x1x8xf32>
    %352 = arith.maximumf %350, %351 : vector<2x2x1x8xf32>
    %c0_232 = arith.constant 0 : index
    %c5_233 = arith.constant 5 : index
    %c8_234 = arith.constant 8 : index
    %c0_235 = arith.constant 0 : index
    %353 = vector.load %arg7[%c0_232, %c5_233, %c8_234, %c0_235] : memref<2x10x10x8xf32, #tpu.memory_space<vmem>>, vector<2x2x1x8xf32>
    tpu.vector_store %arg7[%c0_232, %c5_233, %c8_234, %c0_235], %352 {strides = array<i32>} : memref<2x10x10x8xf32, #tpu.memory_space<vmem>>, vector<2x2x1x8xf32>,
    %cst_236 = arith.constant 0.000000e+00 : f32
    %354 = vector.broadcast %cst_236 : f32 to vector<2x4x16x8xf32>
    %355 = vector.shape_cast %3 : vector<1x8xf32> to vector<1x1x1x8xf32>
    %356 = vector.broadcast %355 : vector<1x1x1x8xf32> to vector<2x4x16x8xf32>
    %357 = arith.addf %354, %356 : vector<2x4x16x8xf32>
    %c0_237 = arith.constant 0 : index
    %c0_238 = arith.constant 0 : index
    %c12 = arith.constant 12 : index
    %c0_239 = arith.constant 0 : index
    %c0_240 = arith.constant 0 : index
    %358 = vector.load %arg1[%c0_237, %c0_238, %c12, %c0_239, %c0_240] : memref<1x2x18x18x1xf32, #tpu.memory_space<vmem>>, vector<1x2x4x16x1xf32>
    %359 = vector.shape_cast %358 : vector<1x2x4x16x1xf32> to vector<2x4x16x1xf32>
    %360 = vector.extract_strided_slice %1 {offsets = [0, 0], sizes = [1, 8], strides = [1, 1]} : vector<9x8xf32> to vector<1x8xf32>
    %361 = vector.shape_cast %360 : vector<1x8xf32> to vector<1x1x1x8xf32>
    %362 = vector.broadcast %359 : vector<2x4x16x1xf32> to vector<2x4x16x8xf32>
    %363 = vector.broadcast %361 : vector<1x1x1x8xf32> to vector<2x4x16x8xf32>
    %364 = arith.mulf %362, %363 : vector<2x4x16x8xf32>
    %365 = arith.addf %357, %364 : vector<2x4x16x8xf32>
    %c0_241 = arith.constant 0 : index
    %c0_242 = arith.constant 0 : index
    %c12_243 = arith.constant 12 : index
    %c1_244 = arith.constant 1 : index
    %c0_245 = arith.constant 0 : index
    %366 = vector.load %arg1[%c0_241, %c0_242, %c12_243, %c1_244, %c0_245] : memref<1x2x18x18x1xf32, #tpu.memory_space<vmem>>, vector<1x2x4x16x1xf32>
    %367 = vector.shape_cast %366 : vector<1x2x4x16x1xf32> to vector<2x4x16x1xf32>
    %368 = vector.extract_strided_slice %1 {offsets = [1, 0], sizes = [1, 8], strides = [1, 1]} : vector<9x8xf32> to vector<1x8xf32>
    %369 = vector.shape_cast %368 : vector<1x8xf32> to vector<1x1x1x8xf32>
    %370 = vector.broadcast %367 : vector<2x4x16x1xf32> to vector<2x4x16x8xf32>
    %371 = vector.broadcast %369 : vector<1x1x1x8xf32> to vector<2x4x16x8xf32>
    %372 = arith.mulf %370, %371 : vector<2x4x16x8xf32>
    %373 = arith.addf %365, %372 : vector<2x4x16x8xf32>
    %c0_246 = arith.constant 0 : index
    %c0_247 = arith.constant 0 : index
    %c12_248 = arith.constant 12 : index
    %c2_249 = arith.constant 2 : index
    %c0_250 = arith.constant 0 : index
    %374 = vector.load %arg1[%c0_246, %c0_247, %c12_248, %c2_249, %c0_250] : memref<1x2x18x18x1xf32, #tpu.memory_space<vmem>>, vector<1x2x4x16x1xf32>
    %375 = vector.shape_cast %374 : vector<1x2x4x16x1xf32> to vector<2x4x16x1xf32>
    %376 = vector.extract_strided_slice %1 {offsets = [2, 0], sizes = [1, 8], strides = [1, 1]} : vector<9x8xf32> to vector<1x8xf32>
    %377 = vector.shape_cast %376 : vector<1x8xf32> to vector<1x1x1x8xf32>
    %378 = vector.broadcast %375 : vector<2x4x16x1xf32> to vector<2x4x16x8xf32>
    %379 = vector.broadcast %377 : vector<1x1x1x8xf32> to vector<2x4x16x8xf32>
    %380 = arith.mulf %378, %379 : vector<2x4x16x8xf32>
    %381 = arith.addf %373, %380 : vector<2x4x16x8xf32>
    %c0_251 = arith.constant 0 : index
    %c0_252 = arith.constant 0 : index
    %c13 = arith.constant 13 : index
    %c0_253 = arith.constant 0 : index
    %c0_254 = arith.constant 0 : index
    %382 = vector.load %arg1[%c0_251, %c0_252, %c13, %c0_253, %c0_254] : memref<1x2x18x18x1xf32, #tpu.memory_space<vmem>>, vector<1x2x4x16x1xf32>
    %383 = vector.shape_cast %382 : vector<1x2x4x16x1xf32> to vector<2x4x16x1xf32>
    %384 = vector.extract_strided_slice %1 {offsets = [3, 0], sizes = [1, 8], strides = [1, 1]} : vector<9x8xf32> to vector<1x8xf32>
    %385 = vector.shape_cast %384 : vector<1x8xf32> to vector<1x1x1x8xf32>
    %386 = vector.broadcast %383 : vector<2x4x16x1xf32> to vector<2x4x16x8xf32>
    %387 = vector.broadcast %385 : vector<1x1x1x8xf32> to vector<2x4x16x8xf32>
    %388 = arith.mulf %386, %387 : vector<2x4x16x8xf32>
    %389 = arith.addf %381, %388 : vector<2x4x16x8xf32>
    %c0_255 = arith.constant 0 : index
    %c0_256 = arith.constant 0 : index
    %c13_257 = arith.constant 13 : index
    %c1_258 = arith.constant 1 : index
    %c0_259 = arith.constant 0 : index
    %390 = vector.load %arg1[%c0_255, %c0_256, %c13_257, %c1_258, %c0_259] : memref<1x2x18x18x1xf32, #tpu.memory_space<vmem>>, vector<1x2x4x16x1xf32>
    %391 = vector.shape_cast %390 : vector<1x2x4x16x1xf32> to vector<2x4x16x1xf32>
    %392 = vector.extract_strided_slice %1 {offsets = [4, 0], sizes = [1, 8], strides = [1, 1]} : vector<9x8xf32> to vector<1x8xf32>
    %393 = vector.shape_cast %392 : vector<1x8xf32> to vector<1x1x1x8xf32>
    %394 = vector.broadcast %391 : vector<2x4x16x1xf32> to vector<2x4x16x8xf32>
    %395 = vector.broadcast %393 : vector<1x1x1x8xf32> to vector<2x4x16x8xf32>
    %396 = arith.mulf %394, %395 : vector<2x4x16x8xf32>
    %397 = arith.addf %389, %396 : vector<2x4x16x8xf32>
    %c0_260 = arith.constant 0 : index
    %c0_261 = arith.constant 0 : index
    %c13_262 = arith.constant 13 : index
    %c2_263 = arith.constant 2 : index
    %c0_264 = arith.constant 0 : index
    %398 = vector.load %arg1[%c0_260, %c0_261, %c13_262, %c2_263, %c0_264] : memref<1x2x18x18x1xf32, #tpu.memory_space<vmem>>, vector<1x2x4x16x1xf32>
    %399 = vector.shape_cast %398 : vector<1x2x4x16x1xf32> to vector<2x4x16x1xf32>
    %400 = vector.extract_strided_slice %1 {offsets = [5, 0], sizes = [1, 8], strides = [1, 1]} : vector<9x8xf32> to vector<1x8xf32>
    %401 = vector.shape_cast %400 : vector<1x8xf32> to vector<1x1x1x8xf32>
    %402 = vector.broadcast %399 : vector<2x4x16x1xf32> to vector<2x4x16x8xf32>
    %403 = vector.broadcast %401 : vector<1x1x1x8xf32> to vector<2x4x16x8xf32>
    %404 = arith.mulf %402, %403 : vector<2x4x16x8xf32>
    %405 = arith.addf %397, %404 : vector<2x4x16x8xf32>
    %c0_265 = arith.constant 0 : index
    %c0_266 = arith.constant 0 : index
    %c14 = arith.constant 14 : index
    %c0_267 = arith.constant 0 : index
    %c0_268 = arith.constant 0 : index
    %406 = vector.load %arg1[%c0_265, %c0_266, %c14, %c0_267, %c0_268] : memref<1x2x18x18x1xf32, #tpu.memory_space<vmem>>, vector<1x2x4x16x1xf32>
    %407 = vector.shape_cast %406 : vector<1x2x4x16x1xf32> to vector<2x4x16x1xf32>
    %408 = vector.extract_strided_slice %1 {offsets = [6, 0], sizes = [1, 8], strides = [1, 1]} : vector<9x8xf32> to vector<1x8xf32>
    %409 = vector.shape_cast %408 : vector<1x8xf32> to vector<1x1x1x8xf32>
    %410 = vector.broadcast %407 : vector<2x4x16x1xf32> to vector<2x4x16x8xf32>
    %411 = vector.broadcast %409 : vector<1x1x1x8xf32> to vector<2x4x16x8xf32>
    %412 = arith.mulf %410, %411 : vector<2x4x16x8xf32>
    %413 = arith.addf %405, %412 : vector<2x4x16x8xf32>
    %c0_269 = arith.constant 0 : index
    %c0_270 = arith.constant 0 : index
    %c14_271 = arith.constant 14 : index
    %c1_272 = arith.constant 1 : index
    %c0_273 = arith.constant 0 : index
    %414 = vector.load %arg1[%c0_269, %c0_270, %c14_271, %c1_272, %c0_273] : memref<1x2x18x18x1xf32, #tpu.memory_space<vmem>>, vector<1x2x4x16x1xf32>
    %415 = vector.shape_cast %414 : vector<1x2x4x16x1xf32> to vector<2x4x16x1xf32>
    %416 = vector.extract_strided_slice %1 {offsets = [7, 0], sizes = [1, 8], strides = [1, 1]} : vector<9x8xf32> to vector<1x8xf32>
    %417 = vector.shape_cast %416 : vector<1x8xf32> to vector<1x1x1x8xf32>
    %418 = vector.broadcast %415 : vector<2x4x16x1xf32> to vector<2x4x16x8xf32>
    %419 = vector.broadcast %417 : vector<1x1x1x8xf32> to vector<2x4x16x8xf32>
    %420 = arith.mulf %418, %419 : vector<2x4x16x8xf32>
    %421 = arith.addf %413, %420 : vector<2x4x16x8xf32>
    %c0_274 = arith.constant 0 : index
    %c0_275 = arith.constant 0 : index
    %c14_276 = arith.constant 14 : index
    %c2_277 = arith.constant 2 : index
    %c0_278 = arith.constant 0 : index
    %422 = vector.load %arg1[%c0_274, %c0_275, %c14_276, %c2_277, %c0_278] : memref<1x2x18x18x1xf32, #tpu.memory_space<vmem>>, vector<1x2x4x16x1xf32>
    %423 = vector.shape_cast %422 : vector<1x2x4x16x1xf32> to vector<2x4x16x1xf32>
    %424 = vector.extract_strided_slice %1 {offsets = [8, 0], sizes = [1, 8], strides = [1, 1]} : vector<9x8xf32> to vector<1x8xf32>
    %425 = vector.shape_cast %424 : vector<1x8xf32> to vector<1x1x1x8xf32>
    %426 = vector.broadcast %423 : vector<2x4x16x1xf32> to vector<2x4x16x8xf32>
    %427 = vector.broadcast %425 : vector<1x1x1x8xf32> to vector<2x4x16x8xf32>
    %428 = arith.mulf %426, %427 : vector<2x4x16x8xf32>
    %429 = arith.addf %421, %428 : vector<2x4x16x8xf32>
    %cst_279 = arith.constant 0.000000e+00 : f32
    %430 = vector.broadcast %cst_279 : f32 to vector<2x4x16x8xf32>
    %431 = arith.maximumf %429, %430 : vector<2x4x16x8xf32>
    %432 = vector.shape_cast %431 : vector<2x4x16x8xf32> to vector<2x2x2x16x8xf32>
    %433 = vector.extract_strided_slice %432 {offsets = [0, 0, 0, 0, 0], sizes = [2, 2, 1, 16, 8], strides = [1, 1, 1, 1, 1]} : vector<2x2x2x16x8xf32> to vector<2x2x1x16x8xf32>
    %434 = vector.shape_cast %433 : vector<2x2x1x16x8xf32> to vector<2x2x16x8xf32>
    %435 = vector.extract_strided_slice %432 {offsets = [0, 0, 1, 0, 0], sizes = [2, 2, 1, 16, 8], strides = [1, 1, 1, 1, 1]} : vector<2x2x2x16x8xf32> to vector<2x2x1x16x8xf32>
    %436 = vector.shape_cast %435 : vector<2x2x1x16x8xf32> to vector<2x2x16x8xf32>
    %437 = arith.maximumf %434, %436 : vector<2x2x16x8xf32>
    %438 = vector.extract_strided_slice %437 {offsets = [0, 0, 0, 0], sizes = [2, 2, 1, 8], strides = [1, 1, 1, 1]} : vector<2x2x16x8xf32> to vector<2x2x1x8xf32>
    %439 = vector.extract_strided_slice %437 {offsets = [0, 0, 1, 0], sizes = [2, 2, 1, 8], strides = [1, 1, 1, 1]} : vector<2x2x16x8xf32> to vector<2x2x1x8xf32>
    %440 = arith.maximumf %438, %439 : vector<2x2x1x8xf32>
    %c0_280 = arith.constant 0 : index
    %c7_281 = arith.constant 7 : index
    %c1_282 = arith.constant 1 : index
    %c0_283 = arith.constant 0 : index
    %441 = vector.load %arg7[%c0_280, %c7_281, %c1_282, %c0_283] : memref<2x10x10x8xf32, #tpu.memory_space<vmem>>, vector<2x2x1x8xf32>
    tpu.vector_store %arg7[%c0_280, %c7_281, %c1_282, %c0_283], %440 {strides = array<i32>} : memref<2x10x10x8xf32, #tpu.memory_space<vmem>>, vector<2x2x1x8xf32>,
    %442 = vector.extract_strided_slice %437 {offsets = [0, 0, 2, 0], sizes = [2, 2, 1, 8], strides = [1, 1, 1, 1]} : vector<2x2x16x8xf32> to vector<2x2x1x8xf32>
    %443 = vector.extract_strided_slice %437 {offsets = [0, 0, 3, 0], sizes = [2, 2, 1, 8], strides = [1, 1, 1, 1]} : vector<2x2x16x8xf32> to vector<2x2x1x8xf32>
    %444 = arith.maximumf %442, %443 : vector<2x2x1x8xf32>
    %c0_284 = arith.constant 0 : index
    %c7_285 = arith.constant 7 : index
    %c2_286 = arith.constant 2 : index
    %c0_287 = arith.constant 0 : index
    %445 = vector.load %arg7[%c0_284, %c7_285, %c2_286, %c0_287] : memref<2x10x10x8xf32, #tpu.memory_space<vmem>>, vector<2x2x1x8xf32>
    tpu.vector_store %arg7[%c0_284, %c7_285, %c2_286, %c0_287], %444 {strides = array<i32>} : memref<2x10x10x8xf32, #tpu.memory_space<vmem>>, vector<2x2x1x8xf32>,
    %446 = vector.extract_strided_slice %437 {offsets = [0, 0, 4, 0], sizes = [2, 2, 1, 8], strides = [1, 1, 1, 1]} : vector<2x2x16x8xf32> to vector<2x2x1x8xf32>
    %447 = vector.extract_strided_slice %437 {offsets = [0, 0, 5, 0], sizes = [2, 2, 1, 8], strides = [1, 1, 1, 1]} : vector<2x2x16x8xf32> to vector<2x2x1x8xf32>
    %448 = arith.maximumf %446, %447 : vector<2x2x1x8xf32>
    %c0_288 = arith.constant 0 : index
    %c7_289 = arith.constant 7 : index
    %c3_290 = arith.constant 3 : index
    %c0_291 = arith.constant 0 : index
    %449 = vector.load %arg7[%c0_288, %c7_289, %c3_290, %c0_291] : memref<2x10x10x8xf32, #tpu.memory_space<vmem>>, vector<2x2x1x8xf32>
    tpu.vector_store %arg7[%c0_288, %c7_289, %c3_290, %c0_291], %448 {strides = array<i32>} : memref<2x10x10x8xf32, #tpu.memory_space<vmem>>, vector<2x2x1x8xf32>,
    %450 = vector.extract_strided_slice %437 {offsets = [0, 0, 6, 0], sizes = [2, 2, 1, 8], strides = [1, 1, 1, 1]} : vector<2x2x16x8xf32> to vector<2x2x1x8xf32>
    %451 = vector.extract_strided_slice %437 {offsets = [0, 0, 7, 0], sizes = [2, 2, 1, 8], strides = [1, 1, 1, 1]} : vector<2x2x16x8xf32> to vector<2x2x1x8xf32>
    %452 = arith.maximumf %450, %451 : vector<2x2x1x8xf32>
    %c0_292 = arith.constant 0 : index
    %c7_293 = arith.constant 7 : index
    %c4_294 = arith.constant 4 : index
    %c0_295 = arith.constant 0 : index
    %453 = vector.load %arg7[%c0_292, %c7_293, %c4_294, %c0_295] : memref<2x10x10x8xf32, #tpu.memory_space<vmem>>, vector<2x2x1x8xf32>
    tpu.vector_store %arg7[%c0_292, %c7_293, %c4_294, %c0_295], %452 {strides = array<i32>} : memref<2x10x10x8xf32, #tpu.memory_space<vmem>>, vector<2x2x1x8xf32>,
    %454 = vector.extract_strided_slice %437 {offsets = [0, 0, 8, 0], sizes = [2, 2, 1, 8], strides = [1, 1, 1, 1]} : vector<2x2x16x8xf32> to vector<2x2x1x8xf32>
    %455 = vector.extract_strided_slice %437 {offsets = [0, 0, 9, 0], sizes = [2, 2, 1, 8], strides = [1, 1, 1, 1]} : vector<2x2x16x8xf32> to vector<2x2x1x8xf32>
    %456 = arith.maximumf %454, %455 : vector<2x2x1x8xf32>
    %c0_296 = arith.constant 0 : index
    %c7_297 = arith.constant 7 : index
    %c5_298 = arith.constant 5 : index
    %c0_299 = arith.constant 0 : index
    %457 = vector.load %arg7[%c0_296, %c7_297, %c5_298, %c0_299] : memref<2x10x10x8xf32, #tpu.memory_space<vmem>>, vector<2x2x1x8xf32>
    tpu.vector_store %arg7[%c0_296, %c7_297, %c5_298, %c0_299], %456 {strides = array<i32>} : memref<2x10x10x8xf32, #tpu.memory_space<vmem>>, vector<2x2x1x8xf32>,
    %458 = vector.extract_strided_slice %437 {offsets = [0, 0, 10, 0], sizes = [2, 2, 1, 8], strides = [1, 1, 1, 1]} : vector<2x2x16x8xf32> to vector<2x2x1x8xf32>
    %459 = vector.extract_strided_slice %437 {offsets = [0, 0, 11, 0], sizes = [2, 2, 1, 8], strides = [1, 1, 1, 1]} : vector<2x2x16x8xf32> to vector<2x2x1x8xf32>
    %460 = arith.maximumf %458, %459 : vector<2x2x1x8xf32>
    %c0_300 = arith.constant 0 : index
    %c7_301 = arith.constant 7 : index
    %c6_302 = arith.constant 6 : index
    %c0_303 = arith.constant 0 : index
    %461 = vector.load %arg7[%c0_300, %c7_301, %c6_302, %c0_303] : memref<2x10x10x8xf32, #tpu.memory_space<vmem>>, vector<2x2x1x8xf32>
    tpu.vector_store %arg7[%c0_300, %c7_301, %c6_302, %c0_303], %460 {strides = array<i32>} : memref<2x10x10x8xf32, #tpu.memory_space<vmem>>, vector<2x2x1x8xf32>,
    %462 = vector.extract_strided_slice %437 {offsets = [0, 0, 12, 0], sizes = [2, 2, 1, 8], strides = [1, 1, 1, 1]} : vector<2x2x16x8xf32> to vector<2x2x1x8xf32>
    %463 = vector.extract_strided_slice %437 {offsets = [0, 0, 13, 0], sizes = [2, 2, 1, 8], strides = [1, 1, 1, 1]} : vector<2x2x16x8xf32> to vector<2x2x1x8xf32>
    %464 = arith.maximumf %462, %463 : vector<2x2x1x8xf32>
    %c0_304 = arith.constant 0 : index
    %c7_305 = arith.constant 7 : index
    %c7_306 = arith.constant 7 : index
    %c0_307 = arith.constant 0 : index
    %465 = vector.load %arg7[%c0_304, %c7_305, %c7_306, %c0_307] : memref<2x10x10x8xf32, #tpu.memory_space<vmem>>, vector<2x2x1x8xf32>
    tpu.vector_store %arg7[%c0_304, %c7_305, %c7_306, %c0_307], %464 {strides = array<i32>} : memref<2x10x10x8xf32, #tpu.memory_space<vmem>>, vector<2x2x1x8xf32>,
    %466 = vector.extract_strided_slice %437 {offsets = [0, 0, 14, 0], sizes = [2, 2, 1, 8], strides = [1, 1, 1, 1]} : vector<2x2x16x8xf32> to vector<2x2x1x8xf32>
    %467 = vector.extract_strided_slice %437 {offsets = [0, 0, 15, 0], sizes = [2, 2, 1, 8], strides = [1, 1, 1, 1]} : vector<2x2x16x8xf32> to vector<2x2x1x8xf32>
    %468 = arith.maximumf %466, %467 : vector<2x2x1x8xf32>
    %c0_308 = arith.constant 0 : index
    %c7_309 = arith.constant 7 : index
    %c8_310 = arith.constant 8 : index
    %c0_311 = arith.constant 0 : index
    %469 = vector.load %arg7[%c0_308, %c7_309, %c8_310, %c0_311] : memref<2x10x10x8xf32, #tpu.memory_space<vmem>>, vector<2x2x1x8xf32>
    tpu.vector_store %arg7[%c0_308, %c7_309, %c8_310, %c0_311], %468 {strides = array<i32>} : memref<2x10x10x8xf32, #tpu.memory_space<vmem>>, vector<2x2x1x8xf32>,
    %c0_312 = arith.constant 0 : index
    %c0_313 = arith.constant 0 : index
    %c0_314 = arith.constant 0 : index
    %c0_315 = arith.constant 0 : index
    %470 = vector.load %arg7[%c0_312, %c0_313, %c0_314, %c0_315] : memref<2x10x10x8xf32, #tpu.memory_space<vmem>>, vector<2x8x8x8xf32>
    %c0_316 = arith.constant 0 : index
    %c0_317 = arith.constant 0 : index
    %c1_318 = arith.constant 1 : index
    %c0_319 = arith.constant 0 : index
    %471 = vector.load %arg7[%c0_316, %c0_317, %c1_318, %c0_319] : memref<2x10x10x8xf32, #tpu.memory_space<vmem>>, vector<2x8x8x8xf32>
    %c0_320 = arith.constant 0 : index
    %c0_321 = arith.constant 0 : index
    %c2_322 = arith.constant 2 : index
    %c0_323 = arith.constant 0 : index
    %472 = vector.load %arg7[%c0_320, %c0_321, %c2_322, %c0_323] : memref<2x10x10x8xf32, #tpu.memory_space<vmem>>, vector<2x8x8x8xf32>
    %c0_324 = arith.constant 0 : index
    %c1_325 = arith.constant 1 : index
    %c0_326 = arith.constant 0 : index
    %c0_327 = arith.constant 0 : index
    %473 = vector.load %arg7[%c0_324, %c1_325, %c0_326, %c0_327] : memref<2x10x10x8xf32, #tpu.memory_space<vmem>>, vector<2x8x8x8xf32>
    %c0_328 = arith.constant 0 : index
    %c1_329 = arith.constant 1 : index
    %c1_330 = arith.constant 1 : index
    %c0_331 = arith.constant 0 : index
    %474 = vector.load %arg7[%c0_328, %c1_329, %c1_330, %c0_331] : memref<2x10x10x8xf32, #tpu.memory_space<vmem>>, vector<2x8x8x8xf32>
    %c0_332 = arith.constant 0 : index
    %c1_333 = arith.constant 1 : index
    %c2_334 = arith.constant 2 : index
    %c0_335 = arith.constant 0 : index
    %475 = vector.load %arg7[%c0_332, %c1_333, %c2_334, %c0_335] : memref<2x10x10x8xf32, #tpu.memory_space<vmem>>, vector<2x8x8x8xf32>
    %c0_336 = arith.constant 0 : index
    %c2_337 = arith.constant 2 : index
    %c0_338 = arith.constant 0 : index
    %c0_339 = arith.constant 0 : index
    %476 = vector.load %arg7[%c0_336, %c2_337, %c0_338, %c0_339] : memref<2x10x10x8xf32, #tpu.memory_space<vmem>>, vector<2x8x8x8xf32>
    %c0_340 = arith.constant 0 : index
    %c2_341 = arith.constant 2 : index
    %c1_342 = arith.constant 1 : index
    %c0_343 = arith.constant 0 : index
    %477 = vector.load %arg7[%c0_340, %c2_341, %c1_342, %c0_343] : memref<2x10x10x8xf32, #tpu.memory_space<vmem>>, vector<2x8x8x8xf32>
    %c0_344 = arith.constant 0 : index
    %c2_345 = arith.constant 2 : index
    %c2_346 = arith.constant 2 : index
    %c0_347 = arith.constant 0 : index
    %478 = vector.load %arg7[%c0_344, %c2_345, %c2_346, %c0_347] : memref<2x10x10x8xf32, #tpu.memory_space<vmem>>, vector<2x8x8x8xf32>
    %479 = tpu.concatenate %470, %471, %472, %473, %474, %475, %476, %477, %478 in 3 : vector<2x8x8x8xf32>, vector<2x8x8x8xf32>, vector<2x8x8x8xf32>, vector<2x8x8x8xf32>, vector<2x8x8x8xf32>, vector<2x8x8x8xf32>, vector<2x8x8x8xf32>, vector<2x8x8x8xf32>, vector<2x8x8x8xf32> -> vector<2x8x8x72xf32>
    %480 = vector.shape_cast %479 : vector<2x8x8x72xf32> to vector<128x72xf32>
    %481 = arith.truncf %480 : vector<128x72xf32> to vector<128x72xbf16>
    %c0_348 = arith.constant 0 : index
    %c0_349 = arith.constant 0 : index
    %c0_350 = arith.constant 0 : index
    %482 = vector.load %arg4[%c0_348, %c0_349, %c0_350] : memref<1x72x16xf32, #tpu.memory_space<vmem>>, vector<1x72x16xf32>
    %483 = vector.shape_cast %482 : vector<1x72x16xf32> to vector<72x16xf32>
    %484 = arith.truncf %483 : vector<72x16xf32> to vector<72x16xbf16>
    %cst_351 = arith.constant dense<0.000000e+00> : vector<128x16xf32>
    %485 = tpu.matmul %481, %484, %cst_351 {dimension_numbers = #tpu.dot_dimension_numbers<[1], [0], [0], [1], [0, 0, 1, 1], [], []>} : vector<128x72xbf16>, vector<72x16xbf16>, vector<128x16xf32> -> vector<128x16xf32>
    %c0_352 = arith.constant 0 : index
    %c0_353 = arith.constant 0 : index
    %c0_354 = arith.constant 0 : index
    %486 = vector.load %arg5[%c0_352, %c0_353, %c0_354] : memref<1x1x16xf32, #tpu.memory_space<vmem>>, vector<1x1x16xf32>
    %487 = vector.shape_cast %486 : vector<1x1x16xf32> to vector<1x16xf32>
    %488 = vector.broadcast %487 : vector<1x16xf32> to vector<128x16xf32>
    %489 = arith.addf %485, %488 : vector<128x16xf32>
    %cst_355 = arith.constant 0.000000e+00 : f32
    %490 = vector.broadcast %cst_355 : f32 to vector<128x16xf32>
    %491 = arith.maximumf %489, %490 : vector<128x16xf32>
    %492 = vector.shape_cast %491 : vector<128x16xf32> to vector<2x4x2x8x16xf32>
    %493 = vector.extract_strided_slice %492 {offsets = [0, 0, 0, 0, 0], sizes = [2, 4, 1, 8, 16], strides = [1, 1, 1, 1, 1]} : vector<2x4x2x8x16xf32> to vector<2x4x1x8x16xf32>
    %494 = vector.shape_cast %493 : vector<2x4x1x8x16xf32> to vector<2x4x8x16xf32>
    %495 = vector.extract_strided_slice %492 {offsets = [0, 0, 1, 0, 0], sizes = [2, 4, 1, 8, 16], strides = [1, 1, 1, 1, 1]} : vector<2x4x2x8x16xf32> to vector<2x4x1x8x16xf32>
    %496 = vector.shape_cast %495 : vector<2x4x1x8x16xf32> to vector<2x4x8x16xf32>
    %497 = arith.maximumf %494, %496 : vector<2x4x8x16xf32>
    %498 = vector.extract_strided_slice %497 {offsets = [0, 0, 0, 0], sizes = [2, 4, 1, 16], strides = [1, 1, 1, 1]} : vector<2x4x8x16xf32> to vector<2x4x1x16xf32>
    %499 = vector.extract_strided_slice %497 {offsets = [0, 0, 1, 0], sizes = [2, 4, 1, 16], strides = [1, 1, 1, 1]} : vector<2x4x8x16xf32> to vector<2x4x1x16xf32>
    %500 = arith.maximumf %498, %499 : vector<2x4x1x16xf32>
    %c0_356 = arith.constant 0 : index
    %c0_357 = arith.constant 0 : index
    %c0_358 = arith.constant 0 : index
    %c0_359 = arith.constant 0 : index
    %c0_360 = arith.constant 0 : index
    %501 = vector.load %arg6[%c0_356, %c0_357, %c0_358, %c0_359, %c0_360] : memref<1x2x4x4x16xf32, #tpu.memory_space<vmem>>, vector<1x2x4x1x16xf32>
    %502 = vector.shape_cast %501 : vector<1x2x4x1x16xf32> to vector<2x4x1x16xf32>
    %503 = vector.shape_cast %500 : vector<2x4x1x16xf32> to vector<1x2x4x1x16xf32>
    tpu.vector_store %arg6[%c0_356, %c0_357, %c0_358, %c0_359, %c0_360], %503 {strides = array<i32>} : memref<1x2x4x4x16xf32, #tpu.memory_space<vmem>>, vector<1x2x4x1x16xf32>,
    %504 = vector.extract_strided_slice %497 {offsets = [0, 0, 2, 0], sizes = [2, 4, 1, 16], strides = [1, 1, 1, 1]} : vector<2x4x8x16xf32> to vector<2x4x1x16xf32>
    %505 = vector.extract_strided_slice %497 {offsets = [0, 0, 3, 0], sizes = [2, 4, 1, 16], strides = [1, 1, 1, 1]} : vector<2x4x8x16xf32> to vector<2x4x1x16xf32>
    %506 = arith.maximumf %504, %505 : vector<2x4x1x16xf32>
    %c0_361 = arith.constant 0 : index
    %c0_362 = arith.constant 0 : index
    %c0_363 = arith.constant 0 : index
    %c1_364 = arith.constant 1 : index
    %c0_365 = arith.constant 0 : index
    %507 = vector.load %arg6[%c0_361, %c0_362, %c0_363, %c1_364, %c0_365] : memref<1x2x4x4x16xf32, #tpu.memory_space<vmem>>, vector<1x2x4x1x16xf32>
    %508 = vector.shape_cast %507 : vector<1x2x4x1x16xf32> to vector<2x4x1x16xf32>
    %509 = vector.shape_cast %506 : vector<2x4x1x16xf32> to vector<1x2x4x1x16xf32>
    tpu.vector_store %arg6[%c0_361, %c0_362, %c0_363, %c1_364, %c0_365], %509 {strides = array<i32>} : memref<1x2x4x4x16xf32, #tpu.memory_space<vmem>>, vector<1x2x4x1x16xf32>,
    %510 = vector.extract_strided_slice %497 {offsets = [0, 0, 4, 0], sizes = [2, 4, 1, 16], strides = [1, 1, 1, 1]} : vector<2x4x8x16xf32> to vector<2x4x1x16xf32>
    %511 = vector.extract_strided_slice %497 {offsets = [0, 0, 5, 0], sizes = [2, 4, 1, 16], strides = [1, 1, 1, 1]} : vector<2x4x8x16xf32> to vector<2x4x1x16xf32>
    %512 = arith.maximumf %510, %511 : vector<2x4x1x16xf32>
    %c0_366 = arith.constant 0 : index
    %c0_367 = arith.constant 0 : index
    %c0_368 = arith.constant 0 : index
    %c2_369 = arith.constant 2 : index
    %c0_370 = arith.constant 0 : index
    %513 = vector.load %arg6[%c0_366, %c0_367, %c0_368, %c2_369, %c0_370] : memref<1x2x4x4x16xf32, #tpu.memory_space<vmem>>, vector<1x2x4x1x16xf32>
    %514 = vector.shape_cast %513 : vector<1x2x4x1x16xf32> to vector<2x4x1x16xf32>
    %515 = vector.shape_cast %512 : vector<2x4x1x16xf32> to vector<1x2x4x1x16xf32>
    tpu.vector_store %arg6[%c0_366, %c0_367, %c0_368, %c2_369, %c0_370], %515 {strides = array<i32>} : memref<1x2x4x4x16xf32, #tpu.memory_space<vmem>>, vector<1x2x4x1x16xf32>,
    %516 = vector.extract_strided_slice %497 {offsets = [0, 0, 6, 0], sizes = [2, 4, 1, 16], strides = [1, 1, 1, 1]} : vector<2x4x8x16xf32> to vector<2x4x1x16xf32>
    %517 = vector.extract_strided_slice %497 {offsets = [0, 0, 7, 0], sizes = [2, 4, 1, 16], strides = [1, 1, 1, 1]} : vector<2x4x8x16xf32> to vector<2x4x1x16xf32>
    %518 = arith.maximumf %516, %517 : vector<2x4x1x16xf32>
    %c0_371 = arith.constant 0 : index
    %c0_372 = arith.constant 0 : index
    %c0_373 = arith.constant 0 : index
    %c3_374 = arith.constant 3 : index
    %c0_375 = arith.constant 0 : index
    %519 = vector.load %arg6[%c0_371, %c0_372, %c0_373, %c3_374, %c0_375] : memref<1x2x4x4x16xf32, #tpu.memory_space<vmem>>, vector<1x2x4x1x16xf32>
    %520 = vector.shape_cast %519 : vector<1x2x4x1x16xf32> to vector<2x4x1x16xf32>
    %521 = vector.shape_cast %518 : vector<2x4x1x16xf32> to vector<1x2x4x1x16xf32>
    tpu.vector_store %arg6[%c0_371, %c0_372, %c0_373, %c3_374, %c0_375], %521 {strides = array<i32>} : memref<1x2x4x4x16xf32, #tpu.memory_space<vmem>>, vector<1x2x4x1x16xf32>,
    return
  }
  func.func @transform_0(%arg0: i32) -> (i32, i32, i32, i32, i32) {
    %c0_i32 = arith.constant 0 : i32
    %c0_i32_0 = arith.constant 0 : i32
    %c0_i32_1 = arith.constant 0 : i32
    %c0_i32_2 = arith.constant 0 : i32
    %c0_i32_3 = arith.constant 0 : i32
    return %arg0, %c0_i32, %c0_i32_0, %c0_i32_1, %c0_i32_2 : i32, i32, i32, i32, i32
  }
  func.func @transform_1(%arg0: i32) -> (i32, i32, i32) {
    %c0_i32 = arith.constant 0 : i32
    %c0_i32_0 = arith.constant 0 : i32
    %c0_i32_1 = arith.constant 0 : i32
    return %arg0, %c0_i32, %c0_i32_0 : i32, i32, i32
  }
  func.func @transform_2(%arg0: i32) -> (i32, i32, i32) {
    %c0_i32 = arith.constant 0 : i32
    %c0_i32_0 = arith.constant 0 : i32
    %c0_i32_1 = arith.constant 0 : i32
    return %arg0, %c0_i32, %c0_i32_0 : i32, i32, i32
  }
  func.func @transform_3(%arg0: i32) -> (i32, i32, i32) {
    %c0_i32 = arith.constant 0 : i32
    %c0_i32_0 = arith.constant 0 : i32
    %c0_i32_1 = arith.constant 0 : i32
    return %arg0, %c0_i32, %c0_i32_0 : i32, i32, i32
  }
  func.func @transform_4(%arg0: i32) -> (i32, i32, i32) {
    %c0_i32 = arith.constant 0 : i32
    %c0_i32_0 = arith.constant 0 : i32
    %c0_i32_1 = arith.constant 0 : i32
    return %arg0, %c0_i32, %c0_i32_0 : i32, i32, i32
  }
  func.func @transform_5(%arg0: i32) -> (i32, i32, i32, i32, i32) {
    %c0_i32 = arith.constant 0 : i32
    %c0_i32_0 = arith.constant 0 : i32
    %c0_i32_1 = arith.constant 0 : i32
    %c0_i32_2 = arith.constant 0 : i32
    %c0_i32_3 = arith.constant 0 : i32
    return %arg0, %c0_i32, %c0_i32_0, %c0_i32_1, %c0_i32_2 : i32, i32, i32, i32, i32
  }
}

</mosaic_0001>

<bundles_post_ra>
// kernel: multiviews_forward.1
= control target key start
LH: loop header
LB: loop body
LE: loop exit
PB: predicated region body
PF: predicated region fallthrough
CT: control target
= control target key end

     0   :  { %s7510_s18 = smov 0   ;;  %s11848_s0 = inlined_call_operand.vmem [shape: f32[4,2,18,18,1], index: 0, kind: input, shape index: {}]   ;;  %s11849_s1 = inlined_call_operand.vmem [shape: f32[4,9,8], index: 1, kind: input, shape index: {}]   ;;  %s11850_s2 = inlined_call_operand.vmem [shape: f32[4,1,8], index: 2, kind: input, shape index: {}]   ;;  %s11851_s3 = inlined_call_operand.vmem [shape: f32[4,72,16], index: 3, kind: input, shape index: {}]   ;;  %s11852_s4 = inlined_call_operand.vmem [shape: f32[4,1,16], index: 4, kind: input, shape index: {}]   ;;  %s11853_s5 = inlined_call_operand.vmem [shape: f32[4,2,4,4,16], index: 5, kind: output, shape index: {}]  }
   0x1 LB: > { %s6497_s19 = sadd.s32 4294967295, %s7468_s18   ;;  %p6501_p0 = scmp.ge.s32.totalorder %s7468_s18, 1  ;;  %s7468_s18 = sphi %s7510_s18, %s15_s18  }
   0x2   : > { %p223_p1 = scmp.lt.s32.totalorder %s7468_s18, 5 }
   0x4   : > { %p224_p2 = pnand %p6501_p0, %p223_p1 }
   0x6   : > { %227 = sbr.rel (%p224_p2) target bundleno = 1714 (0x6b2), region = 40 }
   0xd   : > { %p267_p3 = scmp.lt.s32.totalorder %s6497_s19, 3  ;;  %v7470_v0 = vmov 0   ;;  %vm297_vm0 = vcmask 64512   ;;  %vm299_vm1 = vcmask 58368   ;;  %vm1577_vm2 = vcmask 57344   ;;  %s7472_s6 = smov 8  }
   0xe   : > { %7123 = vset.pattern.permute.xlu1 %v7470_v0  ;;  %7122 = vset.pattern.permute.xlu0 %v7470_v0  ;;  %vm1582_vm3 = vcmask 59394   ;;  %vm1587_vm4 = vcmask 61444   ;;  %vm1592_vm5 = vcmask 63494   ;;  %s7473_s7 = smov 16   ;;  %s7474_s8 = smov 24   ;;  %vm6207_vm6 = vcmask 1043456  }
   0xf   : > { %s12740_s19 = smov (!%p267_p3, %s6497_s19), 3  ;;  %s7475_s9 = smov 32   ;;  %vm6034_vm7 = vcmask 130048   ;;  %vm6051_vm8 = vcmask 195584   ;;  %vm6068_vm9 = vcmask 261120   ;;  %vm6085_vm10 = vcmask 326656  }
  0x10   : > { %s7102_s20 = smul.u32 864, %s12740_s19  ;;  %s7049_s24 = sshll.u32 %s12740_s19, 4  ;;  %vm6102_vm11 = vcmask 392192   ;;  %vm6119_vm12 = vcmask 457728   ;;  %vm6136_vm13 = vcmask 523264   ;;  %vm6182_vm14 = vcmask 588800  }
  0x11   : > { %s8128_s27 = scalar_lea.vmem %s11849_s1, %s7049_s24  ;;  %s8153_s30 = scalar_lea.vmem %s11850_s2, %s12740_s19  ;;  %vm6364_vm15 = vcmask 122880  }
  0x12   : > { %s7524_s23 = scalar_lea.vmem %s11848_s0, %s7102_s20  ;;  %s7476_s10 = smov 40  }
  0x13   : > { %v7527_v1 = vld [vmem:[%s7524_s23 + $0x18] sm:$0xff]  ;;  %v346_v2 = vld [vmem:[%s7524_s23] sm:$0xff]  ;;  %v347_v4 = vld [vmem:[%s7524_s23 + $0x8] sm:$0xff]  ;;  %s7477_s11 = smov 48   ;;  %s7103_s12 = smul.u32 72, %s12740_s19 }
  0x14   : > { %374 = vperm.xlu1 %7123, %v7527_v1   ;;  %364 = vperm.xlu0 %7122, %v346_v2   ;;  %v7532_v3 = vld [vmem:[%s7524_s23 + $0x20] sm:$0xff]  ;;  %v7537_v5 = vld [vmem:[%s7524_s23 + $0x38] sm:$0xff]  ;;  %v7540_v6 = vld [vmem:[%s7524_s23 + $0x30] sm:$0xff]  ;;  %s7478_s13 = smov 56   ;;  %s7479_s17 = smov 64  }
  0x15   : > { %v7545_v7 = vld [vmem:[%s7524_s23 + $0x50] sm:$0xff]  ;;  %v7548_v8 = vld [vmem:[%s7524_s23 + $0x48] sm:$0xff]  ;;  %v355_v9 = vld [vmem:[%s7524_s23 + $0x1b8] sm:$0xff]  ;;  %s10906_s16 = scalar_lea.vmem %s11851_s3, %s7103_s12  ;;  %s287_s22 = scalar_lea.vmem %s11852_s4, %s12740_s19 }
  0x16   : > { %v354_v10 = vld [vmem:[%s7524_s23 + $0x1b0] sm:$0xff]  ;;  %v7558_v12 = vld [vmem:[%s7524_s23 + $0x1c8] sm:$0xff]  ;;  %v7566_v14 = vld [vmem:[%s7524_s23 + $0x1e0] sm:$0xff] }
  0x17   : > { %v7555_v11 = vld [vmem:[%s7524_s23 + $0x1d0] sm:$0xff]  ;;  %v7563_v13 = vld [vmem:[%s7524_s23 + $0x1e8] sm:$0xff]  ;;  %v7571_v15 = vld [vmem:[%s7524_s23 + $0x200] sm:$0xff] }
  0x18   : > { %379 = vperm.xlu1 %7123, %v7532_v3   ;;  %369 = vperm.xlu0 %7122, %v347_v4   ;;  %v7574_v16 = vld [vmem:[%s7524_s23 + $0x1f8] sm:$0xff]  ;;  %v479_v17 = vld [vmem:[%s7524_s23 + $0x9] sm:$0xff]  ;;  %v478_v18 = vld [vmem:[%s7524_s23 + $0x1] sm:$0xff] }
  0x19   : > { %v7581_v19 = vld [vmem:[%s7524_s23 + $0x21] sm:$0xff]  ;;  %v7584_v20 = vld [vmem:[%s7524_s23 + $0x19] sm:$0xff]  ;;  %v7592_v22 = vld [vmem:[%s7524_s23 + $0x31] sm:$0xff] }
  0x1a   : > { %v7589_v21 = vld [vmem:[%s7524_s23 + $0x39] sm:$0xff]  ;;  %v7597_v23 = vld [vmem:[%s7524_s23 + $0x51] sm:$0xff]  ;;  %v7600_v24 = vld [vmem:[%s7524_s23 + $0x49] sm:$0xff] }
  0x1b   : > { %v487_v25 = vld [vmem:[%s7524_s23 + $0x1b9] sm:$0xff]  ;;  %v486_v26 = vld [vmem:[%s7524_s23 + $0x1b1] sm:$0xff]  ;;  %v7610_v28 = vld [vmem:[%s7524_s23 + $0x1c9] sm:$0xff] }
  0x1c   : > { %389 = vperm.xlu1 %7123, %v7537_v5   ;;  %384 = vperm.xlu0 %7122, %v7540_v6   ;;  %v7607_v27 = vld [vmem:[%s7524_s23 + $0x1d1] sm:$0xff]  ;;  %v7615_v29 = vld [vmem:[%s7524_s23 + $0x1e9] sm:$0xff]  ;;  %v7618_v30 = vld [vmem:[%s7524_s23 + $0x1e1] sm:$0xff] }
  0x1d   : > { %v7623_v31 = vld [vmem:[%s7524_s23 + $0x201] sm:$0xff]  ;;  %v7626_v32 = vld [vmem:[%s7524_s23 + $0x1f9] sm:$0xff]  ;;  %v611_v33 = vld [vmem:[%s7524_s23 + $0xa] sm:$0xff] }
  0x1e   : > { %v610_v34 = vld [vmem:[%s7524_s23 + $0x2] sm:$0xff]  ;;  %v7636_v36 = vld [vmem:[%s7524_s23 + $0x1a] sm:$0xff]  ;;  %v7644_v38 = vld [vmem:[%s7524_s23 + $0x32] sm:$0xff] }
  0x1f   : > { %v7633_v35 = vld [vmem:[%s7524_s23 + $0x22] sm:$0xff]  ;;  %v7641_v37 = vld [vmem:[%s7524_s23 + $0x3a] sm:$0xff]  ;;  %v7649_v39 = vld [vmem:[%s7524_s23 + $0x52] sm:$0xff] }
  0x20   : > { %399 = vperm.xlu1 %7123, %v7545_v7   ;;  %394 = vperm.xlu0 %7122, %v7548_v8   ;;  %v7652_v40 = vld [vmem:[%s7524_s23 + $0x4a] sm:$0xff]  ;;  %v619_v41 = vld [vmem:[%s7524_s23 + $0x1ba] sm:$0xff]  ;;  %v618_v42 = vld [vmem:[%s7524_s23 + $0x1b2] sm:$0xff] }
  0x21   : > { %v7659_v43 = vld [vmem:[%s7524_s23 + $0x1d2] sm:$0xff]  ;;  %v7662_v44 = vld [vmem:[%s7524_s23 + $0x1ca] sm:$0xff]  ;;  %v7670_v46 = vld [vmem:[%s7524_s23 + $0x1e2] sm:$0xff] }
  0x22   : > { %v7667_v45 = vld [vmem:[%s7524_s23 + $0x1ea] sm:$0xff]  ;;  %v7675_v47 = vld [vmem:[%s7524_s23 + $0x202] sm:$0xff]  ;;  %v7678_v48 = vld [vmem:[%s7524_s23 + $0x1fa] sm:$0xff] }
  0x23   : > { %v7689_v49 = vld [vmem:[%s7524_s23 + $0x68] sm:$0xff]  ;;  %v7692_v50 = vld [vmem:[%s7524_s23 + $0x60] sm:$0xff]  ;;  %v7703_v51 = vld [vmem:[%s7524_s23 + $0x218] sm:$0xff] }
  0x24   : > { %409 = vperm.xlu1 %7123, %v355_v9   ;;  %404 = vperm.xlu0 %7122, %v354_v10   ;;  %v7706_v52 = vld [vmem:[%s7524_s23 + $0x210] sm:$0xff]  ;;  %v7732_v60 = vld [vmem:[%s7524_s23 + $0x61] sm:$0xff]  ;;  %v7759_v9 = vld [vmem:[%s7524_s23 + $0x219] sm:$0xff] }
  0x25   : > { %v7729_v59 = vld [vmem:[%s7524_s23 + $0x69] sm:$0xff]  ;;  %v7762_v10 = vld [vmem:[%s7524_s23 + $0x211] sm:$0xff] }
  0x28   : > { %419 = vperm.xlu1 %7123, %v7555_v11   ;;  %414 = vperm.xlu0 %7122, %v7558_v12  }
  0x2c   : > { %429 = vperm.xlu1 %7123, %v7563_v13   ;;  %424 = vperm.xlu0 %7122, %v7566_v14  }
  0x30   : > { %439 = vperm.xlu1 %7123, %v7571_v15   ;;  %434 = vperm.xlu0 %7122, %v7574_v16  }
  0x34   : > { %501 = vperm.xlu1 %7123, %v479_v17   ;;  %496 = vperm.xlu0 %7122, %v478_v18  }
  0x38   : > { %511 = vperm.xlu1 %7123, %v7581_v19   ;;  %506 = vperm.xlu0 %7122, %v7584_v20  }
  0x3c   : > { %521 = vperm.xlu1 %7123, %v7589_v21   ;;  %516 = vperm.xlu0 %7122, %v7592_v22  }
  0x40   : > { %531 = vperm.xlu1 %7123, %v7597_v23   ;;  %526 = vperm.xlu0 %7122, %v7600_v24  }
  0x44   : > { %541 = vperm.xlu1 %7123, %v487_v25   ;;  %536 = vperm.xlu0 %7122, %v486_v26  }
  0x48   : > { %551 = vperm.xlu1 %7123, %v7607_v27   ;;  %546 = vperm.xlu0 %7122, %v7610_v28  }
  0x4c   : > { %561 = vperm.xlu1 %7123, %v7615_v29   ;;  %556 = vperm.xlu0 %7122, %v7618_v30  }
  0x50   : > { %571 = vperm.xlu1 %7123, %v7623_v31   ;;  %566 = vperm.xlu0 %7122, %v7626_v32  }
  0x54   : > { %633 = vperm.xlu1 %7123, %v611_v33   ;;  %628 = vperm.xlu0 %7122, %v610_v34  }
  0x58   : > { %643 = vperm.xlu1 %7123, %v7633_v35   ;;  %638 = vperm.xlu0 %7122, %v7636_v36  }
  0x5c   : > { %653 = vperm.xlu1 %7123, %v7641_v37   ;;  %648 = vperm.xlu0 %7122, %v7644_v38  }
  0x60   : > { %663 = vperm.xlu1 %7123, %v7649_v39   ;;  %658 = vperm.xlu0 %7122, %v7652_v40  }
  0x64   : > { %673 = vperm.xlu1 %7123, %v619_v41   ;;  %668 = vperm.xlu0 %7122, %v618_v42  }
  0x68   : > { %683 = vperm.xlu1 %7123, %v7659_v43   ;;  %678 = vperm.xlu0 %7122, %v7662_v44  }
  0x6c   : > { %693 = vperm.xlu1 %7123, %v7667_v45   ;;  %688 = vperm.xlu0 %7122, %v7670_v46  }
  0x70   : > { %703 = vperm.xlu1 %7123, %v7675_v47   ;;  %698 = vperm.xlu0 %7122, %v7678_v48  }
  0x74   : > { %766 = vperm.xlu1 %7123, %v7532_v3   ;;  %761 = vperm.xlu0 %7122, %v7527_v1  }
  0x78   : > { %776 = vperm.xlu1 %7123, %v7537_v5   ;;  %771 = vperm.xlu0 %7122, %v7540_v6  }
  0x7c   : > { %786 = vperm.xlu1 %7123, %v7545_v7   ;;  %781 = vperm.xlu0 %7122, %v7548_v8  }
  0x80   : > { %796 = vperm.xlu1 %7123, %v7689_v49   ;;  %791 = vperm.xlu0 %7122, %v7692_v50  }
  0x84   : > { %806 = vperm.xlu1 %7123, %v7555_v11   ;;  %801 = vperm.xlu0 %7122, %v7558_v12  }
  0x88   : > { %816 = vperm.xlu1 %7123, %v7563_v13   ;;  %811 = vperm.xlu0 %7122, %v7566_v14  }
  0x8c   : > { %826 = vperm.xlu1 %7123, %v7571_v15   ;;  %821 = vperm.xlu0 %7122, %v7574_v16  }
  0x90   : > { %836 = vperm.xlu1 %7123, %v7703_v51   ;;  %831 = vperm.xlu0 %7122, %v7706_v52  }
  0x93   : > { %v7710_v53 = vpop.permute.xlu1 %374  ;;  %v7712_v54 = vpop.permute.xlu0 %364 }
  0x94   : > { %898 = vperm.xlu1 %7123, %v7581_v19   ;;  %893 = vperm.xlu0 %7122, %v7584_v20  }
  0x97   : > { %v7716_v55 = vpop.permute.xlu1 %379  ;;  %v7718_v56 = vpop.permute.xlu0 %369 }
  0x98   : > { %908 = vperm.xlu1 %7123, %v7589_v21   ;;  %903 = vperm.xlu0 %7122, %v7592_v22  }
  0x9b   : > { %v7722_v57 = vpop.permute.xlu1 %389  ;;  %v7724_v58 = vpop.permute.xlu0 %384 }
  0x9c   : > { %918 = vperm.xlu1 %7123, %v7597_v23   ;;  %913 = vperm.xlu0 %7122, %v7600_v24  }
  0x9f   : > { %v7734_v61 = vpop.permute.xlu1 %399  ;;  %v7736_v62 = vpop.permute.xlu0 %394 }
  0xa0   : > { %928 = vperm.xlu1 %7123, %v7729_v59   ;;  %923 = vperm.xlu0 %7122, %v7732_v60  }
  0xa3   : > { %v7740_v63 = vpop.permute.xlu1 %409  ;;  %v7742_v0 = vpop.permute.xlu0 %404 }
  0xa4   : > { %938 = vperm.xlu1 %7123, %v7607_v27   ;;  %933 = vperm.xlu0 %7122, %v7610_v28   ;;  %v7789_v27 = vld [vmem:[%s7524_s23 + $0x6a] sm:$0xff]  ;;  %v7792_v28 = vld [vmem:[%s7524_s23 + $0x62] sm:$0xff] }
  0xa7   : > { %v7746_v1 = vpop.permute.xlu1 %419  ;;  %v7748_v2 = vpop.permute.xlu0 %414 }
  0xa8   : > { %948 = vperm.xlu1 %7123, %v7615_v29   ;;  %943 = vperm.xlu0 %7122, %v7618_v30  }
  0xab   : > { %v7752_v3 = vpop.permute.xlu1 %429  ;;  %v7754_v4 = vpop.permute.xlu0 %424 }
  0xac   : > { %958 = vperm.xlu1 %7123, %v7623_v31   ;;  %953 = vperm.xlu0 %7122, %v7626_v32  }
  0xaf   : > { %v7764_v11 = vpop.permute.xlu1 %439  ;;  %v7766_v12 = vpop.permute.xlu0 %434 }
  0xb0   : > { %968 = vperm.xlu1 %7123, %v7759_v9   ;;  %963 = vperm.xlu0 %7122, %v7762_v10  }
  0xb3   : > { %v7770_v17 = vpop.permute.xlu1 %501  ;;  %v7772_v18 = vpop.permute.xlu0 %496 }
  0xb4   : > { %1030 = vperm.xlu1 %7123, %v7633_v35   ;;  %1025 = vperm.xlu0 %7122, %v7636_v36  }
  0xb7   : > { %v7776_v19 = vpop.permute.xlu1 %511  ;;  %v7778_v20 = vpop.permute.xlu0 %506 }
  0xb8   : > { %1040 = vperm.xlu1 %7123, %v7641_v37   ;;  %1035 = vperm.xlu0 %7122, %v7644_v38  }
  0xbb   : > { %v7782_v25 = vpop.permute.xlu1 %521  ;;  %v7784_v26 = vpop.permute.xlu0 %516 }
  0xbc   : > { %1050 = vperm.xlu1 %7123, %v7649_v39   ;;  %1045 = vperm.xlu0 %7122, %v7652_v40  }
  0xbf   : > { %v7794_v33 = vpop.permute.xlu1 %531  ;;  %v7796_v34 = vpop.permute.xlu0 %526 }
  0xc0   : > { %11976 = vst [vmem:[#allocation3_spill] sm:$0xff] %v7794_v33  ;;  %11977 = vst [vmem:[#allocation4_spill] sm:$0xff] %v7796_v34  ;;  %1060 = vperm.xlu1 %7123, %v7789_v27   ;;  %1055 = vperm.xlu0 %7122, %v7792_v28  }
  0xc3   : > { %v7800_v35 = vpop.permute.xlu1 %541  ;;  %v7802_v36 = vpop.permute.xlu0 %536 }
  0xc4   : > { %11978 = vst [vmem:[#allocation5_spill] sm:$0xff] %v7800_v35  ;;  %11979 = vst [vmem:[#allocation6_spill] sm:$0xff] %v7802_v36  ;;  %1070 = vperm.xlu1 %7123, %v7659_v43   ;;  %1065 = vperm.xlu0 %7122, %v7662_v44   ;;  %v7819_v36 = vld [vmem:[%s7524_s23 + $0x21a] sm:$0xff]  ;;  %v7822_v43 = vld [vmem:[%s7524_s23 + $0x212] sm:$0xff] }
  0xc5   : > { %11984 = vst [vmem:[#allocation11_spill] sm:$0xff] %v7822_v43 }
  0xc7   : > { %v7806_v41 = vpop.permute.xlu1 %551  ;;  %v7808_v42 = vpop.permute.xlu0 %546 }
  0xc8   : > { %11980 = vst [vmem:[#allocation7_spill] sm:$0xff] %v7806_v41  ;;  %11981 = vst [vmem:[#allocation8_spill] sm:$0xff] %v7808_v42  ;;  %1080 = vperm.xlu1 %7123, %v7667_v45   ;;  %1075 = vperm.xlu0 %7122, %v7670_v46  }
  0xcb   : > { %v7812_v34 = vpop.permute.xlu1 %561  ;;  %v7814_v33 = vpop.permute.xlu0 %556 }
  0xcc   : > { %11982 = vst [vmem:[#allocation9_spill] sm:$0xff] %v7812_v34  ;;  %11983 = vst [vmem:[#allocation10_spill] sm:$0xff] %v7814_v33  ;;  %1090 = vperm.xlu1 %7123, %v7675_v47   ;;  %1085 = vperm.xlu0 %7122, %v7678_v48  }
  0xcf   : > { %v7824_v44 = vpop.permute.xlu1 %571  ;;  %v7826_v42 = vpop.permute.xlu0 %566 }
  0xd0   : > { %11985 = vst [vmem:[#allocation12_spill] sm:$0xff] %v7824_v44  ;;  %11986 = vst [vmem:[#allocation13_spill] sm:$0xff] %v7826_v42  ;;  %1100 = vperm.xlu1 %7123, %v7819_v36   ;;  %1095 = vperm.xlu0 %7122, %v7822_v43  }
  0xd3   : > { %v7830_v34 = vpop.permute.xlu1 %633  ;;  %v7832_v33 = vpop.permute.xlu0 %628 }
  0xd4   : > { %11987 = vst [vmem:[#allocation14_spill] sm:$0xff] %v7832_v33  ;;  %1163 = vperm.xlu1 %7123, %v7537_v5   ;;  %1158 = vperm.xlu0 %7122, %v7540_v6   ;;  %v7849_v33 = vld [vmem:[%s7524_s23 + $0x80] sm:$0xff]  ;;  %v7852_v5 = vld [vmem:[%s7524_s23 + $0x78] sm:$0xff] }
  0xd5   : > { %11991 = vst [vmem:[#allocation18_spill] sm:$0xff] %v7849_v33  ;;  %11992 = vst [vmem:[#allocation19_spill] sm:$0xff] %v7852_v5 }
  0xd7   : > { %v7836_v41 = vpop.permute.xlu1 %643  ;;  %v7838_v35 = vpop.permute.xlu0 %638 }
  0xd8   : > { %11988 = vst [vmem:[#allocation15_spill] sm:$0xff] %v7838_v35  ;;  %1173 = vperm.xlu1 %7123, %v7545_v7   ;;  %1168 = vperm.xlu0 %7122, %v7548_v8  }
  0xdb   : > { %v7842_v42 = vpop.permute.xlu1 %653  ;;  %v7844_v44 = vpop.permute.xlu0 %648 }
  0xdc   : > { %11989 = vst [vmem:[#allocation16_spill] sm:$0xff] %v7842_v42  ;;  %11990 = vst [vmem:[#allocation17_spill] sm:$0xff] %v7844_v44  ;;  %1183 = vperm.xlu1 %7123, %v7689_v49   ;;  %1178 = vperm.xlu0 %7122, %v7692_v50  }
  0xdf   : > { %v7854_v6 = vpop.permute.xlu1 %663  ;;  %v7856_v35 = vpop.permute.xlu0 %658 }
  0xe0   : > { %11993 = vst [vmem:[#allocation20_spill] sm:$0xff] %v7854_v6  ;;  %11994 = vst [vmem:[#allocation21_spill] sm:$0xff] %v7856_v35  ;;  %1193 = vperm.xlu1 %7123, %v7849_v33   ;;  %1188 = vperm.xlu0 %7122, %v7852_v5  }
  0xe3   : > { %v7860_v7 = vpop.permute.xlu1 %673  ;;  %v7862_v8 = vpop.permute.xlu0 %668 }
  0xe4   : > { %11995 = vst [vmem:[#allocation22_spill] sm:$0xff] %v7862_v8  ;;  %1203 = vperm.xlu1 %7123, %v7563_v13   ;;  %1198 = vperm.xlu0 %7122, %v7566_v14   ;;  %v7879_v8 = vld [vmem:[%s7524_s23 + $0x230] sm:$0xff]  ;;  %v7882_v13 = vld [vmem:[%s7524_s23 + $0x228] sm:$0xff] }
  0xe7   : > { %v7866_v44 = vpop.permute.xlu1 %683  ;;  %v7868_v42 = vpop.permute.xlu0 %678 }
  0xe8   : > { %11996 = vst [vmem:[#allocation23_spill] sm:$0xff] %v7868_v42  ;;  %1213 = vperm.xlu1 %7123, %v7571_v15   ;;  %1208 = vperm.xlu0 %7122, %v7574_v16  }
  0xeb   : > { %v7872_v35 = vpop.permute.xlu1 %693  ;;  %v7874_v6 = vpop.permute.xlu0 %688 }
  0xec   : > { %11997 = vst [vmem:[#allocation24_spill] sm:$0xff] %v7872_v35  ;;  %11998 = vst [vmem:[#allocation25_spill] sm:$0xff] %v7874_v6  ;;  %1223 = vperm.xlu1 %7123, %v7703_v51   ;;  %1218 = vperm.xlu0 %7122, %v7706_v52  }
  0xef   : > { %v7884_v14 = vpop.permute.xlu1 %703  ;;  %v7886_v42 = vpop.permute.xlu0 %698 }
  0xf0   : > { %11999 = vst [vmem:[#allocation26_spill] sm:$0xff] %v7884_v14  ;;  %12000 = vst [vmem:[#allocation27_spill] sm:$0xff] %v7886_v42  ;;  %1233 = vperm.xlu1 %7123, %v7879_v8   ;;  %1228 = vperm.xlu0 %7122, %v7882_v13  }
  0xf3   : > { %v7890_v15 = vpop.permute.xlu1 %766  ;;  %v7892_v16 = vpop.permute.xlu0 %761 }
  0xf4   : > { %12001 = vst [vmem:[#allocation28_spill] sm:$0xff] %v7892_v16  ;;  %1295 = vperm.xlu1 %7123, %v7589_v21   ;;  %1290 = vperm.xlu0 %7122, %v7592_v22   ;;  %v7909_v16 = vld [vmem:[%s7524_s23 + $0x81] sm:$0xff]  ;;  %v7912_v21 = vld [vmem:[%s7524_s23 + $0x79] sm:$0xff] }
  0xf7   : > { %v7896_v6 = vpop.permute.xlu1 %776  ;;  %v7898_v35 = vpop.permute.xlu0 %771 }
  0xf8   : > { %12002 = vst [vmem:[#allocation29_spill] sm:$0xff] %v7898_v35  ;;  %1305 = vperm.xlu1 %7123, %v7597_v23   ;;  %1300 = vperm.xlu0 %7122, %v7600_v24  }
  0xfb   : > { %v7902_v42 = vpop.permute.xlu1 %786  ;;  %v7904_v14 = vpop.permute.xlu0 %781 }
  0xfc   : > { %12003 = vst [vmem:[#allocation30_spill] sm:$0xff] %v7902_v42  ;;  %12004 = vst [vmem:[#allocation31_spill] sm:$0xff] %v7904_v14  ;;  %1315 = vperm.xlu1 %7123, %v7729_v59   ;;  %1310 = vperm.xlu0 %7122, %v7732_v60  }
  0xff   : > { %v7914_v22 = vpop.permute.xlu1 %796  ;;  %v7916_v35 = vpop.permute.xlu0 %791 }
 0x100   : > { %12005 = vst [vmem:[#allocation32_spill] sm:$0xff] %v7914_v22  ;;  %12006 = vst [vmem:[#allocation33_spill] sm:$0xff] %v7916_v35  ;;  %1325 = vperm.xlu1 %7123, %v7909_v16   ;;  %1320 = vperm.xlu0 %7122, %v7912_v21  }
 0x103   : > { %v7920_v23 = vpop.permute.xlu1 %806  ;;  %v7922_v24 = vpop.permute.xlu0 %801 }
 0x104   : > { %12007 = vst [vmem:[#allocation34_spill] sm:$0xff] %v7922_v24  ;;  %1335 = vperm.xlu1 %7123, %v7615_v29   ;;  %1330 = vperm.xlu0 %7122, %v7618_v30   ;;  %v7939_v24 = vld [vmem:[%s7524_s23 + $0x231] sm:$0xff]  ;;  %v7942_v29 = vld [vmem:[%s7524_s23 + $0x229] sm:$0xff] }
 0x107   : > { %v7926_v14 = vpop.permute.xlu1 %816  ;;  %v7928_v42 = vpop.permute.xlu0 %811 }
 0x108   : > { %12008 = vst [vmem:[#allocation35_spill] sm:$0xff] %v7926_v14  ;;  %1345 = vperm.xlu1 %7123, %v7623_v31   ;;  %1340 = vperm.xlu0 %7122, %v7626_v32  }
 0x10b   : > { %v7932_v35 = vpop.permute.xlu1 %826  ;;  %v7934_v22 = vpop.permute.xlu0 %821 }
 0x10c   : > { %12009 = vst [vmem:[#allocation36_spill] sm:$0xff] %v7932_v35  ;;  %12010 = vst [vmem:[#allocation37_spill] sm:$0xff] %v7934_v22  ;;  %1355 = vperm.xlu1 %7123, %v7759_v9   ;;  %1350 = vperm.xlu0 %7122, %v7762_v10  }
 0x10f   : > { %v7944_v30 = vpop.permute.xlu1 %836  ;;  %v7946_v14 = vpop.permute.xlu0 %831 }
 0x110   : > { %12011 = vst [vmem:[#allocation38_spill] sm:$0xff] %v7946_v14  ;;  %1365 = vperm.xlu1 %7123, %v7939_v24   ;;  %1360 = vperm.xlu0 %7122, %v7942_v29   ;;  %v7471_v14 = vmov 0.0  }
 0x111   : > { %301 = vst.msk [vmem:[#allocation2 + $0x10] sm:$0xff] %vm297_vm0, %v7471_v14  ;;  %298 = vst.msk [vmem:[#allocation2] sm:$0xff] %vm297_vm0, %v7471_v14 }
 0x112   : > { %303 = vst.msk [vmem:[#allocation2 + $0x20] sm:$0xff] %vm297_vm0, %v7471_v14  ;;  %305 = vst.msk [vmem:[#allocation2 + $0x30] sm:$0xff] %vm297_vm0, %v7471_v14 }
 0x113   : > { %v7950_v31 = vpop.permute.xlu1 %898  ;;  %v7952_v32 = vpop.permute.xlu0 %893  ;;  %307 = vst.msk [vmem:[#allocation2 + $0x40] sm:$0xff] %vm297_vm0, %v7471_v14  ;;  %309 = vst.msk [vmem:[#allocation2 + $0x50] sm:$0xff] %vm297_vm0, %v7471_v14 }
 0x114   : > { %12012 = vst [vmem:[#allocation39_spill] sm:$0xff] %v7952_v32  ;;  %1427 = vperm.xlu1 %7123, %v7641_v37   ;;  %1422 = vperm.xlu0 %7122, %v7644_v38   ;;  %311 = vst.msk [vmem:[#allocation2 + $0x60] sm:$0xff] %vm297_vm0, %v7471_v14 }
 0x115   : > { %313 = vst.msk [vmem:[#allocation2 + $0x70] sm:$0xff] %vm297_vm0, %v7471_v14  ;;  %315 = vst.msk [vmem:[#allocation2 + $0x80] sm:$0xff] %vm297_vm0, %v7471_v14 }
 0x116   : > { %317 = vst.msk [vmem:[#allocation2 + $0x90] sm:$0xff] %vm297_vm0, %v7471_v14  ;;  %319 = vst.msk [vmem:[#allocation2 + $0xa0] sm:$0xff] %vm297_vm0, %v7471_v14 }
 0x117   : > { %v7956_v22 = vpop.permute.xlu1 %908  ;;  %v7958_v35 = vpop.permute.xlu0 %903  ;;  %321 = vst.msk [vmem:[#allocation2 + $0xb0] sm:$0xff] %vm297_vm0, %v7471_v14  ;;  %323 = vst.msk [vmem:[#allocation2 + $0xc0] sm:$0xff] %vm297_vm0, %v7471_v14 }
 0x118   : > { %12013 = vst [vmem:[#allocation40_spill] sm:$0xff] %v7956_v22  ;;  %12014 = vst [vmem:[#allocation41_spill] sm:$0xff] %v7958_v35  ;;  %1437 = vperm.xlu1 %7123, %v7649_v39   ;;  %1432 = vperm.xlu0 %7122, %v7652_v40   ;;  %v8009_v39 = vld [vmem:[%s7524_s23 + $0x82] sm:$0xff]  ;;  %v8012_v40 = vld [vmem:[%s7524_s23 + $0x7a] sm:$0xff] }
 0x119   : > { %325 = vst.msk [vmem:[#allocation2 + $0xd0] sm:$0xff] %vm297_vm0, %v7471_v14  ;;  %327 = vst.msk [vmem:[#allocation2 + $0xe0] sm:$0xff] %vm297_vm0, %v7471_v14 }
 0x11a   : > { %329 = vst.msk [vmem:[#allocation2 + $0xf0] sm:$0xff] %vm297_vm0, %v7471_v14  ;;  %331 = vst.msk [vmem:[#allocation2 + $0x100] sm:$0xff] %vm297_vm0, %v7471_v14 }
 0x11b   : > { %333 = vst.msk [vmem:[#allocation2 + $0x110] sm:$0xff] %vm297_vm0, %v7471_v14  ;;  %335 = vst.msk [vmem:[#allocation2 + $0x120] sm:$0xff] %vm297_vm0, %v7471_v14  ;;  %v8002_v37 = vpop.permute.xlu1 %918  ;;  %v8004_v38 = vpop.permute.xlu0 %913 }
 0x11c   : > { %337 = vst.msk [vmem:[#allocation2 + $0x130] sm:$0xff] %vm297_vm0, %v7471_v14  ;;  %12015 = vst [vmem:[#allocation42_spill] sm:$0xff] %v8002_v37  ;;  %1447 = vperm.xlu1 %7123, %v7789_v27   ;;  %1442 = vperm.xlu0 %7122, %v7792_v28  }
 0x11d   : > { %302 = vst.msk [vmem:[#allocation2 + $0x18] sm:$0x3] %vm299_vm1, %v7471_v14  ;;  %300 = vst.msk [vmem:[#allocation2 + $0x8] sm:$0x3] %vm299_vm1, %v7471_v14 }
 0x11e   : > { %304 = vst.msk [vmem:[#allocation2 + $0x28] sm:$0x3] %vm299_vm1, %v7471_v14  ;;  %306 = vst.msk [vmem:[#allocation2 + $0x38] sm:$0x3] %vm299_vm1, %v7471_v14 }
 0x11f   : > { %308 = vst.msk [vmem:[#allocation2 + $0x48] sm:$0x3] %vm299_vm1, %v7471_v14  ;;  %310 = vst.msk [vmem:[#allocation2 + $0x58] sm:$0x3] %vm299_vm1, %v7471_v14  ;;  %v8014_v35 = vpop.permute.xlu1 %928  ;;  %v8016_v22 = vpop.permute.xlu0 %923 }
 0x120   : > { %312 = vst.msk [vmem:[#allocation2 + $0x68] sm:$0x3] %vm299_vm1, %v7471_v14  ;;  %314 = vst.msk [vmem:[#allocation2 + $0x78] sm:$0x3] %vm299_vm1, %v7471_v14  ;;  %1457 = vperm.xlu1 %7123, %v8009_v39   ;;  %1452 = vperm.xlu0 %7122, %v8012_v40  }
 0x121   : > { %316 = vst.msk [vmem:[#allocation2 + $0x88] sm:$0x3] %vm299_vm1, %v7471_v14  ;;  %318 = vst.msk [vmem:[#allocation2 + $0x98] sm:$0x3] %vm299_vm1, %v7471_v14 }
 0x122   : > { %320 = vst.msk [vmem:[#allocation2 + $0xa8] sm:$0x3] %vm299_vm1, %v7471_v14  ;;  %322 = vst.msk [vmem:[#allocation2 + $0xb8] sm:$0x3] %vm299_vm1, %v7471_v14 }
 0x123   : > { %324 = vst.msk [vmem:[#allocation2 + $0xc8] sm:$0x3] %vm299_vm1, %v7471_v14  ;;  %326 = vst.msk [vmem:[#allocation2 + $0xd8] sm:$0x3] %vm299_vm1, %v7471_v14 }
 0x124   : > { %328 = vst.msk [vmem:[#allocation2 + $0xe8] sm:$0x3] %vm299_vm1, %v7471_v14  ;;  %330 = vst.msk [vmem:[#allocation2 + $0xf8] sm:$0x3] %vm299_vm1, %v7471_v14  ;;  %1467 = vperm.xlu1 %7123, %v7667_v45   ;;  %1462 = vperm.xlu0 %7122, %v7670_v46   ;;  %v8039_v45 = vld [vmem:[%s7524_s23 + $0x232] sm:$0xff]  ;;  %v8042_v46 = vld [vmem:[%s7524_s23 + $0x22a] sm:$0xff] }
 0x125   : > { %332 = vst.msk [vmem:[#allocation2 + $0x108] sm:$0x3] %vm299_vm1, %v7471_v14  ;;  %334 = vst.msk [vmem:[#allocation2 + $0x118] sm:$0x3] %vm299_vm1, %v7471_v14 }
 0x126   : > { %336 = vst.msk [vmem:[#allocation2 + $0x128] sm:$0x3] %vm299_vm1, %v7471_v14  ;;  %338 = vst.msk [vmem:[#allocation2 + $0x138] sm:$0x3] %vm299_vm1, %v7471_v14  ;;  %v8020_v14 = vpop.permute.xlu1 %938  ;;  %vm6382_vm1 = vcmask 126980  }
 0x127   : > { %12016 = vst [vmem:[#allocation43_spill] sm:$0xff] %v8004_v38  ;;  %12017 = vst [vmem:[#allocation44_spill] sm:$0xff] %v8014_v35  ;;  %v8022_v38 = vpop.permute.xlu0 %933 }
 0x128   : > { %12018 = vst [vmem:[#allocation45_spill] sm:$0xff] %v8016_v22  ;;  %1477 = vperm.xlu1 %7123, %v7675_v47   ;;  %1472 = vperm.xlu0 %7122, %v7678_v48   ;;  %12022 = vst [vmem:[#allocation49_spill] sm:$0xff] %v8039_v45 }
 0x129   : > { %12023 = vst [vmem:[#allocation50_spill] sm:$0xff] %v8042_v46 }
 0x12a   : > { %v8026_v37 = vpop.permute.xlu1 %948 }
 0x12b   : > { %12019 = vst [vmem:[#allocation46_spill] sm:$0xff] %v8026_v37  ;;  %v8028_v32 = vpop.permute.xlu0 %943 }
 0x12c   : > { %12020 = vst [vmem:[#allocation47_spill] sm:$0xff] %v8028_v32  ;;  %1487 = vperm.xlu1 %7123, %v7819_v36   ;;  %1482 = vperm.xlu0 %7122, %v7822_v43  }
 0x12e   : > { %v8032_v22 = vpop.permute.xlu1 %958 }
 0x12f   : > { %v8034_v35 = vpop.permute.xlu0 %953 }
 0x130   : > { %12021 = vst [vmem:[#allocation48_spill] sm:$0xff] %v8034_v35  ;;  %1497 = vperm.xlu1 %7123, %v8039_v45   ;;  %1492 = vperm.xlu0 %7122, %v8042_v46   ;;  %v8063_v45 = vld [vmem:[%s7524_s23 + $0x98] sm:$0xff]  ;;  %v8066_v46 = vld [vmem:[%s7524_s23 + $0x90] sm:$0xff] }
 0x131   : > { %12030 = vst [vmem:[#allocation57_spill] sm:$0xff] %v8063_v45  ;;  %12031 = vst [vmem:[#allocation58_spill] sm:$0xff] %v8066_v46 }
 0x132   : > { %v8044_v37 = vpop.permute.xlu1 %968 }
 0x133   : > { %12024 = vst [vmem:[#allocation51_spill] sm:$0xff] %v8044_v37  ;;  %v8046_v32 = vpop.permute.xlu0 %963 }
 0x134   : > { %12025 = vst [vmem:[#allocation52_spill] sm:$0xff] %v8046_v32  ;;  %1653 = vperm.xlu1 %7123, %v7689_v49   ;;  %1648 = vperm.xlu0 %7122, %v7692_v50   ;;  %v8075_v49 = vld [vmem:[%s7524_s23 + $0xb0] sm:$0xff]  ;;  %v8078_v50 = vld [vmem:[%s7524_s23 + $0xa8] sm:$0xff] }
 0x135   : > { %12034 = vst [vmem:[#allocation61_spill] sm:$0xff] %v8075_v49  ;;  %12035 = vst [vmem:[#allocation62_spill] sm:$0xff] %v8078_v50 }
 0x136   : > { %v8050_v47 = vpop.permute.xlu1 %1030 }
 0x137   : > { %12026 = vst [vmem:[#allocation53_spill] sm:$0xff] %v8050_v47  ;;  %v8052_v48 = vpop.permute.xlu0 %1025 }
 0x138   : > { %12027 = vst [vmem:[#allocation54_spill] sm:$0xff] %v8052_v48  ;;  %1663 = vperm.xlu1 %7123, %v7849_v33   ;;  %1658 = vperm.xlu0 %7122, %v7852_v5  }
 0x13a   : > { %v8056_v35 = vpop.permute.xlu1 %1040 }
 0x13b   : > { %12028 = vst [vmem:[#allocation55_spill] sm:$0xff] %v8056_v35  ;;  %v8058_v43 = vpop.permute.xlu0 %1035 }
 0x13c   : > { %12029 = vst [vmem:[#allocation56_spill] sm:$0xff] %v8058_v43  ;;  %1673 = vperm.xlu1 %7123, %v8063_v45   ;;  %1668 = vperm.xlu0 %7122, %v8066_v46   ;;  %v8186_v43 = vld [vmem:[%s7524_s23 + $0xb1] sm:$0xff] }
 0x13d   : > { %12060 = vst [vmem:[#allocation87_spill] sm:$0xff] %v8186_v43 }
 0x13e   : > { %v8068_v32 = vpop.permute.xlu1 %1050 }
 0x13f   : > { %12032 = vst [vmem:[#allocation59_spill] sm:$0xff] %v8068_v32  ;;  %v8070_v47 = vpop.permute.xlu0 %1045 }
 0x140   : > { %12033 = vst [vmem:[#allocation60_spill] sm:$0xff] %v8070_v47  ;;  %1683 = vperm.xlu1 %7123, %v8075_v49   ;;  %1678 = vperm.xlu0 %7122, %v8078_v50   ;;  %v8099_v50 = vld [vmem:[%s7524_s23 + $0x248] sm:$0xff]  ;;  %v8102_v49 = vld [vmem:[%s7524_s23 + $0x240] sm:$0xff] }
 0x141   : > { %12042 = vst [vmem:[#allocation69_spill] sm:$0xff] %v8099_v50  ;;  %12043 = vst [vmem:[#allocation70_spill] sm:$0xff] %v8102_v49 }
 0x142   : > { %v8080_v33 = vpop.permute.xlu1 %1060 }
 0x143   : > { %12036 = vst [vmem:[#allocation63_spill] sm:$0xff] %v8080_v33  ;;  %v8082_v5 = vpop.permute.xlu0 %1055 }
 0x144   : > { %12037 = vst [vmem:[#allocation64_spill] sm:$0xff] %v8082_v5  ;;  %1693 = vperm.xlu1 %7123, %v7703_v51   ;;  %1688 = vperm.xlu0 %7122, %v7706_v52   ;;  %v8111_v51 = vld [vmem:[%s7524_s23 + $0x260] sm:$0xff]  ;;  %v8114_v52 = vld [vmem:[%s7524_s23 + $0x258] sm:$0xff] }
 0x145   : > { %12046 = vst [vmem:[#allocation73_spill] sm:$0xff] %v8111_v51  ;;  %12047 = vst [vmem:[#allocation74_spill] sm:$0xff] %v8114_v52 }
 0x146   : > { %v8086_v47 = vpop.permute.xlu1 %1070 }
 0x147   : > { %12038 = vst [vmem:[#allocation65_spill] sm:$0xff] %v8086_v47  ;;  %v8088_v45 = vpop.permute.xlu0 %1065  ;;  %v442_v47 = vlaneseq }
 0x148   : > { %12039 = vst [vmem:[#allocation66_spill] sm:$0xff] %v8088_v45  ;;  %1703 = vperm.xlu1 %7123, %v7879_v8   ;;  %1698 = vperm.xlu0 %7122, %v7882_v13  }
 0x149   : > { %v8117_v8 = vshrl.u32 %v442_v47, 7 }
 0x14a   : > { %v8092_v46 = vpop.permute.xlu1 %1080 }
 0x14b   : > { %12040 = vst [vmem:[#allocation67_spill] sm:$0xff] %v8092_v46  ;;  %v8094_v33 = vpop.permute.xlu0 %1075  ;;  %v444_v47 = vsub.s32 0, %v8117_v8  ;;  %v6508_v46 = vld [vmem:[%s8153_s30] ss:$0 sm:$0xff] }
 0x14c   : > { %12041 = vst [vmem:[#allocation68_spill] sm:$0xff] %v8094_v33  ;;  %1713 = vperm.xlu1 %7123, %v8099_v50   ;;  %1708 = vperm.xlu0 %7122, %v8102_v49  }
 0x14e   : > { %v8104_v5 = vpop.permute.xlu1 %1090 }
 0x14f   : > { %12044 = vst [vmem:[#allocation71_spill] sm:$0xff] %v8104_v5  ;;  %v8106_v45 = vpop.permute.xlu0 %1085 }
 0x150   : > { %12045 = vst [vmem:[#allocation72_spill] sm:$0xff] %v8106_v45  ;;  %1723 = vperm.xlu1 %7123, %v8111_v51   ;;  %1718 = vperm.xlu0 %7122, %v8114_v52  }
 0x152   : > { %v8119_v13 = vpop.permute.xlu1 %1100 }
 0x153   : > { %12048 = vst [vmem:[#allocation75_spill] sm:$0xff] %v8119_v13  ;;  %v8121_v33 = vpop.permute.xlu0 %1095  ;;  %v8136_v13 = vld [vmem:[%s8128_s27] sm:$0xff] }
 0x154   : > { %12049 = vst [vmem:[#allocation76_spill] sm:$0xff] %v8121_v33  ;;  %1781 = vperm.xlu1 %7123, %v7729_v59   ;;  %1776 = vperm.xlu0 %7122, %v7732_v60   ;;  %v8141_v52 = vrot.slane %v8136_v13, %v444_v47  ;;  %v576_v59 = vsub.s32 1, %v8117_v8  ;;  %v8157_v60 = vld [vmem:[%s7524_s23 + $0x99] sm:$0xff]  ;;  %v8160_v47 = vld [vmem:[%s7524_s23 + $0x91] sm:$0xff] }
 0x155   : > { %12055 = vst [vmem:[#allocation82_spill] sm:$0xff] %v8157_v60  ;;  %12056 = vst [vmem:[#allocation83_spill] sm:$0xff] %v8160_v47 }
 0x156   : > { %v8131_v49 = vpop.permute.xlu1 %1163  ;;  %12052 = vst [vmem:[#allocation79_spill] sm:$0xff] %v8141_v52  ;;  %v448_v45 = vmul.f32 %v8141_v52, %v7710_v53  ;;  %v447_v32 = vmul.f32 %v8141_v52, %v7718_v56  ;;  %v451_v53 = vmul.f32 %v8141_v52, %v7722_v57  ;;  %v453_v35 = vmul.f32 %v8141_v52, %v7734_v61 }
 0x157   : > { %12050 = vst [vmem:[#allocation77_spill] sm:$0xff] %v8131_v49  ;;  %v8133_v50 = vpop.permute.xlu0 %1158  ;;  %v457_v61 = vmul.f32 %v8141_v52, %v7746_v1 }
 0x158   : > { %12051 = vst [vmem:[#allocation78_spill] sm:$0xff] %v8133_v50  ;;  %1791 = vperm.xlu1 %7123, %v7909_v16   ;;  %1786 = vperm.xlu0 %7122, %v7912_v21   ;;  %v841_v16 = vsub.s32 3, %v8117_v8  ;;  %v973_v21 = vsub.s32 4, %v8117_v8  ;;  %v449_v50 = vmul.f32 %v8141_v52, %v7716_v55  ;;  %v8189_v55 = vld [vmem:[%s7524_s23 + $0xa9] sm:$0xff]  ;;  %v464_v57 = vadd.f32 %v6508_v46, %v448_v45 }
 0x159   : > { %12061 = vst [vmem:[#allocation88_spill] sm:$0xff] %v8189_v55  ;;  %v467_v45 = vadd.f32 %v6508_v46, %v451_v53  ;;  %v469_v53 = vadd.f32 %v6508_v46, %v453_v35 }
 0x15a   : > { %v8143_v51 = vpop.permute.xlu1 %1173  ;;  %v8197_v56 = vrot.slane %v8136_v13, %v841_v16  ;;  %v455_v16 = vmul.f32 %v8141_v52, %v7740_v63  ;;  %v458_v63 = vmul.f32 %v8141_v52, %v7754_v4 }
 0x15b   : > { %12053 = vst [vmem:[#allocation80_spill] sm:$0xff] %v8143_v51  ;;  %v8145_v33 = vpop.permute.xlu0 %1168  ;;  %v446_v51 = vmul.f32 %v8141_v52, %v7712_v54  ;;  %v8183_v54 = vrot.slane %v8136_v13, %v576_v59  ;;  %v465_v59 = vadd.f32 %v6508_v46, %v449_v50  ;;  %v454_v50 = vmul.f32 %v8141_v52, %v7742_v0 }
 0x15c   : > { %12054 = vst [vmem:[#allocation81_spill] sm:$0xff] %v8145_v33  ;;  %v708_v33 = vsub.s32 2, %v8117_v8  ;;  %1801 = vperm.xlu1 %7123, %v8157_v60   ;;  %1796 = vperm.xlu0 %7122, %v8160_v47   ;;  %12063 = vst [vmem:[#allocation90_spill] sm:$0xff] %v8197_v56  ;;  %v8200_v47 = vrot.slane %v8136_v13, %v973_v21  ;;  %v461_v21 = vmul.f32 %v8141_v52, %v7764_v11 }
 0x15d   : > { %12059 = vst [vmem:[#allocation86_spill] sm:$0xff] %v8183_v54  ;;  %v462_v60 = vadd.f32 %v6508_v46, %v446_v51  ;;  %v460_v0 = vmul.f32 %v8141_v52, %v7766_v12  ;;  %v579_v1 = vmul.f32 %v8183_v54, %v7770_v17  ;;  %v578_v4 = vmul.f32 %v8183_v54, %v7772_v18 }
 0x15e   : > { %v8171_v49 = vpop.permute.xlu1 %1183  ;;  %12064 = vst [vmem:[#allocation91_spill] sm:$0xff] %v8200_v47  ;;  %v470_v11 = vadd.f32 %v6508_v46, %v454_v50  ;;  %v473_v12 = vadd.f32 %v6508_v46, %v457_v61  ;;  %v581_v17 = vmul.f32 %v8183_v54, %v7776_v19 }
 0x15f   : > { %12057 = vst [vmem:[#allocation84_spill] sm:$0xff] %v8171_v49  ;;  %v8173_v5 = vpop.permute.xlu0 %1178  ;;  %v8194_v49 = vrot.slane %v8136_v13, %v708_v33  ;;  %v452_v33 = vmul.f32 %v8141_v52, %v7736_v62  ;;  %v459_v62 = vmul.f32 %v8141_v52, %v7752_v3  ;;  %v594_v19 = vadd.f32 %v578_v4, %v462_v60  ;;  %v12078_v4 = vld [vmem:[#allocation7_spill] sm:$0xff] }
 0x160   : > { %12058 = vst [vmem:[#allocation85_spill] sm:$0xff] %v8173_v5  ;;  %v450_v5 = vmul.f32 %v8141_v52, %v7724_v58  ;;  %v463_v58 = vadd.f32 %v6508_v46, %v447_v32  ;;  %1811 = vperm.xlu1 %7123, %v8186_v43   ;;  %1806 = vperm.xlu0 %7122, %v8189_v55   ;;  %v1105_v55 = vsub.s32 5, %v8117_v8 }
 0x161   : > { %12062 = vst [vmem:[#allocation89_spill] sm:$0xff] %v8194_v49  ;;  %v456_v32 = vmul.f32 %v8141_v52, %v7748_v2  ;;  %v468_v3 = vadd.f32 %v6508_v46, %v452_v33  ;;  %v471_v43 = vadd.f32 %v6508_v46, %v455_v16  ;;  %v475_v52 = vadd.f32 %v6508_v46, %v459_v62  ;;  %v12072_v62 = vld [vmem:[#allocation3_spill] sm:$0xff] }
 0x162   : > { %v8204_v48 = vpop.permute.xlu1 %1193  ;;  %v466_v51 = vadd.f32 %v6508_v46, %v450_v5  ;;  %v580_v33 = vmul.f32 %v8183_v54, %v7778_v20  ;;  %v476_v16 = vadd.f32 %v6508_v46, %v460_v0  ;;  %v595_v18 = vadd.f32 %v579_v1, %v463_v58  ;;  %v12074_v58 = vld [vmem:[#allocation5_spill] sm:$0xff] }
 0x163   : > { %12065 = vst [vmem:[#allocation92_spill] sm:$0xff] %v8204_v48  ;;  %v8206_v37 = vpop.permute.xlu0 %1188  ;;  %v472_v35 = vadd.f32 %v6508_v46, %v456_v32  ;;  %v582_v32 = vmul.f32 %v8183_v54, %v7784_v26  ;;  %v585_v20 = vmul.f32 %v8183_v54, %v12072_v62  ;;  %v8265_v0 = vld [vmem:[%s7524_s23 + $0x249] sm:$0xff]  ;;  %v8268_v26 = vld [vmem:[%s7524_s23 + $0x241] sm:$0xff] }
 0x164   : > { %12066 = vst [vmem:[#allocation93_spill] sm:$0xff] %v8206_v37  ;;  %1821 = vperm.xlu1 %7123, %v7759_v9   ;;  %1816 = vperm.xlu0 %7122, %v7762_v10   ;;  %v474_v37 = vadd.f32 %v6508_v46, %v458_v63  ;;  %v583_v9 = vmul.f32 %v8183_v54, %v7782_v25  ;;  %v12073_v25 = vld [vmem:[#allocation4_spill] sm:$0xff]  ;;  %12076 = vst [vmem:[#allocation3_spill] sm:$0xff] %v8265_v0 }
 0x165   : > { %v8246_v10 = vrot.slane %v8136_v13, %v1105_v55  ;;  %v584_v55 = vmul.f32 %v8183_v54, %v12073_v25  ;;  %v587_v63 = vmul.f32 %v8183_v54, %v12074_v58  ;;  %12077 = vst [vmem:[#allocation4_spill] sm:$0xff] %v8268_v26  ;;  %v596_v1 = vadd.f32 %v580_v33, %v464_v57  ;;  %v12079_v62 = vld [vmem:[#allocation8_spill] sm:$0xff] }
 0x166   : > { %v8231_v2 = vpop.permute.xlu1 %1203  ;;  %v599_v25 = vadd.f32 %v583_v9, %v467_v45  ;;  %v601_v48 = vadd.f32 %v585_v20, %v469_v53  ;;  %v711_v45 = vmul.f32 %v8194_v49, %v7830_v34  ;;  %v1238_v9 = vsub.s32 6, %v8117_v8 }
 0x167   : > { %12067 = vst [vmem:[#allocation94_spill] sm:$0xff] %v8231_v2  ;;  %v8233_v5 = vpop.permute.xlu0 %1198  ;;  %v477_v2 = vadd.f32 %v6508_v46, %v461_v21  ;;  %12069 = vst [vmem:[#allocation96_spill] sm:$0xff] %v8246_v10  ;;  %v597_v46 = vadd.f32 %v581_v17, %v465_v59  ;;  %v12075_v21 = vld [vmem:[#allocation6_spill] sm:$0xff]  ;;  %v12080_v59 = vld [vmem:[#allocation9_spill] sm:$0xff]  ;;  %v713_v34 = vmul.f32 %v8194_v49, %v7836_v41 }
 0x168   : > { %12068 = vst [vmem:[#allocation95_spill] sm:$0xff] %v8233_v5  ;;  %1831 = vperm.xlu1 %7123, %v7939_v24   ;;  %1826 = vperm.xlu0 %7122, %v7942_v29   ;;  %v586_v60 = vmul.f32 %v8183_v54, %v12075_v21  ;;  %v589_v24 = vmul.f32 %v8183_v54, %v12078_v4  ;;  %v12082_v21 = vld [vmem:[#allocation12_spill] sm:$0xff]  ;;  %v12083_v5 = vld [vmem:[#allocation13_spill] sm:$0xff]  ;;  %v12086_v10 = vld [vmem:[#allocation14_spill] sm:$0xff] }
 0x169   : > { %v588_v29 = vmul.f32 %v8183_v54, %v12079_v62  ;;  %v591_v17 = vmul.f32 %v8183_v54, %v12080_v59  ;;  %v592_v57 = vmul.f32 %v8183_v54, %v12083_v5  ;;  %v598_v62 = vadd.f32 %v582_v32, %v466_v51 }
 0x16a   : > { %v8248_v50 = vpop.permute.xlu1 %1213  ;;  %v603_v59 = vadd.f32 %v587_v63, %v471_v43  ;;  %v710_v5 = vmul.f32 %v8194_v49, %v12086_v10  ;;  %v605_v51 = vadd.f32 %v589_v24, %v473_v12  ;;  %v727_v10 = vadd.f32 %v711_v45, %v595_v18 }
 0x16b   : > { %12070 = vst [vmem:[#allocation97_spill] sm:$0xff] %v8248_v50  ;;  %v8250_v61 = vpop.permute.xlu0 %1208  ;;  %v593_v50 = vmul.f32 %v8183_v54, %v12082_v21  ;;  %v602_v21 = vadd.f32 %v586_v60, %v470_v11  ;;  %v604_v53 = vadd.f32 %v588_v29, %v472_v35  ;;  %v607_v32 = vadd.f32 %v591_v17, %v475_v52  ;;  %v12094_v17 = vld [vmem:[#allocation23_spill] sm:$0xff] }
 0x16c   : > { %12071 = vst [vmem:[#allocation98_spill] sm:$0xff] %v8250_v61  ;;  %v12081_v61 = vld [vmem:[#allocation10_spill] sm:$0xff]  ;;  %1841 = vperm.xlu1 %7123, %v8265_v0   ;;  %1836 = vperm.xlu0 %7122, %v8268_v26   ;;  %v12087_v26 = vld [vmem:[#allocation15_spill] sm:$0xff]  ;;  %v8310_v12 = vrot.slane %v8136_v13, %v1238_v9  ;;  %v726_v41 = vadd.f32 %v710_v5, %v594_v19  ;;  %v12096_v9 = vld [vmem:[#allocation25_spill] sm:$0xff] }
 0x16d   : > { %v590_v58 = vmul.f32 %v8183_v54, %v12081_v61  ;;  %v600_v61 = vadd.f32 %v584_v55, %v468_v3  ;;  %v8294_v54 = vld [vmem:[%s7524_s23 + $0x261] sm:$0xff]  ;;  %v609_v0 = vadd.f32 %v593_v50, %v477_v2  ;;  %v712_v43 = vmul.f32 %v8194_v49, %v12087_v26  ;;  %v12093_v26 = vld [vmem:[#allocation22_spill] sm:$0xff] }
 0x16e   : > { %v8282_v33 = vpop.permute.xlu1 %1223  ;;  %v12088_v55 = vld [vmem:[#allocation16_spill] sm:$0xff]  ;;  %12089 = vst [vmem:[#allocation7_spill] sm:$0xff] %v8310_v12  ;;  %v729_v50 = vadd.f32 %v713_v34, %v597_v46  ;;  %v719_v60 = vmul.f32 %v8194_v49, %v7860_v7  ;;  %v718_v24 = vmul.f32 %v8194_v49, %v12093_v26  ;;  %v721_v29 = vmul.f32 %v8194_v49, %v7866_v44 }
 0x16f   : > { %12084 = vst [vmem:[#allocation5_spill] sm:$0xff] %v8282_v33  ;;  %v8284_v4 = vpop.permute.xlu0 %1218  ;;  %v606_v20 = vadd.f32 %v590_v58, %v474_v37  ;;  %v608_v33 = vadd.f32 %v592_v57, %v476_v16  ;;  %v715_v63 = vmul.f32 %v8194_v49, %v12088_v55  ;;  %v12090_v37 = vld [vmem:[#allocation17_spill] sm:$0xff]  ;;  %v12091_v2 = vld [vmem:[#allocation20_spill] sm:$0xff]  ;;  %v728_v19 = vadd.f32 %v712_v43, %v596_v1  ;;  %v12097_v55 = vld [vmem:[#allocation26_spill] sm:$0xff] }
 0x170   : > { %12085 = vst [vmem:[#allocation6_spill] sm:$0xff] %v8284_v4  ;;  %v8297_v4 = vld [vmem:[%s7524_s23 + $0x259] sm:$0xff]  ;;  %1851 = vperm.xlu1 %7123, %v8294_v54   ;;  %v714_v52 = vmul.f32 %v8194_v49, %v12090_v37  ;;  %v717_v35 = vmul.f32 %v8194_v49, %v12091_v2  ;;  %v12092_v16 = vld [vmem:[#allocation21_spill] sm:$0xff]  ;;  %v720_v58 = vmul.f32 %v8194_v49, %v12094_v17  ;;  %v12095_v57 = vld [vmem:[#allocation24_spill] sm:$0xff]  ;;  %v1370_v26 = vsub.s32 7, %v8117_v8 }
 0x171   : > { %1846 = vperm.xlu0 %7122, %v8297_v4   ;;  %v716_v18 = vmul.f32 %v8194_v49, %v12092_v16  ;;  %v723_v45 = vmul.f32 %v8194_v49, %v12095_v57  ;;  %v722_v5 = vmul.f32 %v8194_v49, %v12096_v9  ;;  %v731_v7 = vadd.f32 %v715_v63, %v599_v25  ;;  %v12098_v2 = vld [vmem:[#allocation27_spill] sm:$0xff] }
 0x172   : > { %v8303_v3 = vpop.permute.xlu1 %1233  ;;  %v725_v37 = vmul.f32 %v8194_v49, %v12097_v55  ;;  %v724_v44 = vmul.f32 %v8194_v49, %v12098_v2  ;;  %v730_v1 = vadd.f32 %v714_v52, %v598_v62  ;;  %v733_v43 = vadd.f32 %v717_v35, %v601_v48  ;;  %v12099_v49 = vld [vmem:[#allocation28_spill] sm:$0xff] }
 0x173   : > { %v8305_v11 = vpop.permute.xlu0 %1228  ;;  %v732_v16 = vadd.f32 %v716_v18, %v600_v61  ;;  %v735_v17 = vadd.f32 %v719_v60, %v603_v59  ;;  %v734_v57 = vadd.f32 %v718_v24, %v602_v21  ;;  %v737_v9 = vadd.f32 %v721_v29, %v605_v51  ;;  %v12101_v21 = vld [vmem:[#allocation30_spill] sm:$0xff]  ;;  %v12107_v24 = vld [vmem:[#allocation35_spill] sm:$0xff] }
 0x174   : > { %1909 = vperm.xlu1 %7123, %v7789_v27   ;;  %v844_v25 = vmul.f32 %v8197_v56, %v7890_v15  ;;  %v736_v63 = vadd.f32 %v720_v58, %v604_v53  ;;  %v739_v55 = vadd.f32 %v723_v45, %v607_v32  ;;  %v738_v2 = vadd.f32 %v722_v5, %v606_v20  ;;  %v12100_v15 = vld [vmem:[#allocation29_spill] sm:$0xff]  ;;  %v12106_v60 = vld [vmem:[#allocation34_spill] sm:$0xff] }
 0x175   : > { %1904 = vperm.xlu0 %7122, %v7792_v28   ;;  %v843_v27 = vmul.f32 %v8197_v56, %v12099_v49  ;;  %v741_v62 = vadd.f32 %v725_v37, %v609_v0  ;;  %v740_v8 = vadd.f32 %v724_v44, %v608_v33  ;;  %v846_v61 = vmul.f32 %v8197_v56, %v7896_v6  ;;  %v12102_v49 = vld [vmem:[#allocation31_spill] sm:$0xff]  ;;  %v8368_v33 = vld [vmem:[%s7524_s23 + $0x92] sm:$0xff]  ;;  %v12108_v37 = vld [vmem:[#allocation36_spill] sm:$0xff] }
 0x176   : > { %v8332_v46 = vpop.permute.xlu1 %1295  ;;  %v845_v59 = vmul.f32 %v8197_v56, %v12100_v15  ;;  %v848_v51 = vmul.f32 %v8197_v56, %v12101_v21  ;;  %v847_v53 = vmul.f32 %v8197_v56, %v12102_v49  ;;  %v8362_v32 = vrot.slane %v8136_v13, %v1370_v26  ;;  %v8365_v0 = vld [vmem:[%s7524_s23 + $0x9a] sm:$0xff]  ;;  %v12105_v20 = vld [vmem:[#allocation33_spill] sm:$0xff] }
 0x177   : > { %v8334_v34 = vpop.permute.xlu0 %1290  ;;  %v860_v6 = vadd.f32 %v844_v25, %v727_v10  ;;  %v849_v52 = vmul.f32 %v8197_v56, %v12105_v20  ;;  %v852_v35 = vmul.f32 %v8197_v56, %v7920_v23  ;;  %v859_v18 = vadd.f32 %v843_v27, %v726_v41  ;;  %v12109_v44 = vld [vmem:[#allocation37_spill] sm:$0xff] }
 0x178   : > { %1919 = vperm.xlu1 %7123, %v8009_v39   ;;  %12103 = vst [vmem:[#allocation8_spill] sm:$0xff] %v8362_v32  ;;  %v12104_v39 = vld [vmem:[#allocation32_spill] sm:$0xff]  ;;  %v851_v13 = vmul.f32 %v8197_v56, %v12106_v60  ;;  %v854_v29 = vmul.f32 %v8197_v56, %v12107_v24  ;;  %v853_v10 = vmul.f32 %v8197_v56, %v7928_v42  ;;  %v8395_v15 = vld [vmem:[%s7524_s23 + $0xb2] sm:$0xff] }
 0x179   : > { %1914 = vperm.xlu0 %7122, %v8012_v40   ;;  %v850_v40 = vmul.f32 %v8197_v56, %v12104_v39  ;;  %v862_v5 = vadd.f32 %v846_v61, %v729_v50  ;;  %v856_v23 = vmul.f32 %v8197_v56, %v12108_v37  ;;  %v855_v41 = vmul.f32 %v8197_v56, %v12109_v44  ;;  %v8398_v21 = vld [vmem:[%s7524_s23 + $0xaa] sm:$0xff]  ;;  %v12112_v39 = vld [vmem:[#allocation38_spill] sm:$0xff] }
 0x17a   : > { %v8347_v28 = vpop.permute.xlu1 %1305  ;;  %v861_v26 = vadd.f32 %v845_v59, %v728_v19  ;;  %v864_v25 = vadd.f32 %v848_v51, %v731_v7  ;;  %v863_v27 = vadd.f32 %v847_v53, %v730_v1  ;;  %v858_v42 = vmul.f32 %v8197_v56, %v7944_v30  ;;  %12110 = vst [vmem:[#allocation9_spill] sm:$0xff] %v8395_v15  ;;  %v12113_v51 = vld [vmem:[#allocation39_spill] sm:$0xff]  ;;  %v12120_v44 = vld [vmem:[#allocation46_spill] sm:$0xff] }
 0x17b   : > { %v8349_v48 = vpop.permute.xlu0 %1300  ;;  %12111 = vst [vmem:[#allocation10_spill] sm:$0xff] %v8398_v21  ;;  %v866_v50 = vadd.f32 %v850_v40, %v733_v43  ;;  %v865_v61 = vadd.f32 %v849_v52, %v732_v16  ;;  %v868_v49 = vadd.f32 %v852_v35, %v735_v17  ;;  %v857_v20 = vmul.f32 %v8197_v56, %v12112_v39  ;;  %v12114_v17 = vld [vmem:[#allocation40_spill] sm:$0xff] }
 0x17c   : > { %1929 = vperm.xlu1 %7123, %v8365_v0   ;;  %v867_v60 = vadd.f32 %v851_v13, %v734_v57  ;;  %v870_v24 = vadd.f32 %v854_v29, %v737_v9  ;;  %v869_v37 = vadd.f32 %v853_v10, %v736_v63  ;;  %v976_v19 = vmul.f32 %v8200_v47, %v7950_v31  ;;  %v12115_v9 = vld [vmem:[#allocation41_spill] sm:$0xff]  ;;  %v12116_v63 = vld [vmem:[#allocation42_spill] sm:$0xff]  ;;  %v12118_v52 = vld [vmem:[#allocation44_spill] sm:$0xff] }
 0x17d   : > { %1924 = vperm.xlu0 %7122, %v8368_v33   ;;  %v872_v30 = vadd.f32 %v856_v23, %v739_v55  ;;  %v871_v59 = vadd.f32 %v855_v41, %v738_v2  ;;  %v975_v43 = vmul.f32 %v8200_v47, %v12113_v51  ;;  %v874_v16 = vadd.f32 %v858_v42, %v741_v62  ;;  %v12117_v55 = vld [vmem:[#allocation43_spill] sm:$0xff]  ;;  %v12119_v13 = vld [vmem:[#allocation45_spill] sm:$0xff] }
 0x17e   : > { %v8382_v58 = vpop.permute.xlu1 %1315  ;;  %v978_v57 = vmul.f32 %v8200_v47, %v12114_v17  ;;  %v977_v31 = vmul.f32 %v8200_v47, %v12115_v9  ;;  %v980_v53 = vmul.f32 %v8200_v47, %v12116_v63  ;;  %v873_v40 = vadd.f32 %v857_v20, %v740_v8  ;;  %v12121_v20 = vld [vmem:[#allocation47_spill] sm:$0xff]  ;;  %v12123_v9 = vld [vmem:[#allocation48_spill] sm:$0xff] }
 0x17f   : > { %v8384_v45 = vpop.permute.xlu0 %1310  ;;  %v979_v2 = vmul.f32 %v8200_v47, %v12117_v55  ;;  %v982_v35 = vmul.f32 %v8200_v47, %v12118_v52  ;;  %v981_v29 = vmul.f32 %v8200_v47, %v12119_v13  ;;  %v992_v62 = vadd.f32 %v976_v19, %v860_v6  ;;  %v8493_v56 = vld [vmem:[%s7524_s23 + $0x262] sm:$0xff] }
 0x180   : > { %1939 = vperm.xlu1 %7123, %v8395_v15   ;;  %v984_v10 = vmul.f32 %v8200_v47, %v8020_v14  ;;  %v983_v23 = vmul.f32 %v8200_v47, %v8022_v38  ;;  %v986_v41 = vmul.f32 %v8200_v47, %v12120_v44  ;;  %v991_v39 = vadd.f32 %v975_v43, %v859_v18  ;;  %v12122_v14 = vld [vmem:[#allocation11_spill] sm:$0xff]  ;;  %v12145_v15 = vld [vmem:[#allocation77_spill] sm:$0xff] }
 0x181   : > { %1934 = vperm.xlu0 %7122, %v8398_v21   ;;  %v985_v51 = vmul.f32 %v8200_v47, %v12121_v20  ;;  %v988_v6 = vmul.f32 %v8200_v47, %v8032_v22  ;;  %v994_v19 = vadd.f32 %v978_v57, %v862_v5  ;;  %v993_v38 = vadd.f32 %v977_v31, %v861_v26  ;;  %v12124_v18 = vld [vmem:[#allocation51_spill] sm:$0xff]  ;;  %v12128_v31 = vld [vmem:[#allocation49_spill] sm:$0xff] }
 0x182   : > { %v8404_v7 = vpop.permute.xlu1 %1325  ;;  %v996_v17 = vadd.f32 %v980_v53, %v864_v25  ;;  %v987_v63 = vmul.f32 %v8200_v47, %v12123_v9  ;;  %v995_v55 = vadd.f32 %v979_v2, %v863_v27  ;;  %v998_v52 = vadd.f32 %v982_v35, %v866_v50  ;;  %v12126_v27 = vld [vmem:[#allocation53_spill] sm:$0xff]  ;;  %v12127_v50 = vld [vmem:[#allocation96_spill] sm:$0xff]  ;;  %v12129_v53 = vld [vmem:[#allocation50_spill] sm:$0xff] }
 0x183   : > { %v8406_v1 = vpop.permute.xlu0 %1320  ;;  %v997_v13 = vadd.f32 %v981_v29, %v865_v61  ;;  %v990_v43 = vmul.f32 %v8200_v47, %v12124_v18  ;;  %v1000_v44 = vadd.f32 %v984_v10, %v868_v49  ;;  %v999_v22 = vadd.f32 %v983_v23, %v867_v60  ;;  %v12130_v60 = vld [vmem:[#allocation54_spill] sm:$0xff]  ;;  %v12131_v2 = vld [vmem:[#allocation55_spill] sm:$0xff]  ;;  %v12132_v29 = vld [vmem:[#allocation56_spill] sm:$0xff] }
 0x184   : > { %1949 = vperm.xlu1 %7123, %v7819_v36   ;;  %v1002_v20 = vadd.f32 %v986_v41, %v870_v24  ;;  %v12125_v36 = vld [vmem:[#allocation52_spill] sm:$0xff]  ;;  %v1001_v25 = vadd.f32 %v985_v51, %v869_v37  ;;  %v1004_v57 = vadd.f32 %v988_v6, %v872_v30  ;;  %v1108_v61 = vmul.f32 %v12127_v50, %v12126_v27  ;;  %v12135_v41 = vld [vmem:[#allocation59_spill] sm:$0xff] }
 0x185   : > { %1944 = vperm.xlu0 %7122, %v12122_v14   ;;  %v989_v14 = vmul.f32 %v8200_v47, %v12125_v36  ;;  %v8454_v49 = vadd.f32 %v987_v63, %v871_v59  ;;  %v1107_v24 = vmul.f32 %v12127_v50, %v12130_v60  ;;  %v1110_v35 = vmul.f32 %v12127_v50, %v12131_v2  ;;  %v8463_v37 = vld [vmem:[%s7524_s23 + $0x24a] sm:$0xff]  ;;  %v8466_v30 = vld [vmem:[%s7524_s23 + $0x242] sm:$0xff]  ;;  %v12140_v60 = vld [vmem:[#allocation66_spill] sm:$0xff] }
 0x186   : > { %v8430_v8 = vpop.permute.xlu1 %1335  ;;  %v1109_v10 = vmul.f32 %v12127_v50, %v12132_v29  ;;  %12133 = vst [vmem:[#allocation12_spill] sm:$0xff] %v8463_v37  ;;  %12134 = vst [vmem:[#allocation13_spill] sm:$0xff] %v8466_v30  ;;  %v1006_v23 = vadd.f32 %v990_v43, %v874_v16  ;;  %v1112_v51 = vmul.f32 %v12127_v50, %v12135_v41  ;;  %v12136_v6 = vld [vmem:[#allocation60_spill] sm:$0xff]  ;;  %v12137_v9 = vld [vmem:[#allocation63_spill] sm:$0xff] }
 0x187   : > { %v8432_v42 = vpop.permute.xlu0 %1330  ;;  %v1111_v59 = vmul.f32 %v12127_v50, %v12136_v6  ;;  %v1114_v63 = vmul.f32 %v12127_v50, %v12137_v9  ;;  %v1005_v18 = vadd.f32 %v989_v14, %v873_v40  ;;  %v12138_v36 = vld [vmem:[#allocation64_spill] sm:$0xff]  ;;  %v1115_v16 = vmul.f32 %v12127_v50, %v12140_v60  ;;  %v12141_v41 = vld [vmem:[#allocation67_spill] sm:$0xff] }
 0x188   : > { %1959 = vperm.xlu1 %7123, %v12128_v31   ;;  %v1113_v27 = vmul.f32 %v12127_v50, %v12138_v36  ;;  %v12139_v31 = vld [vmem:[#allocation65_spill] sm:$0xff]  ;;  %v1124_v29 = vadd.f32 %v1108_v61, %v992_v62  ;;  %v1118_v6 = vmul.f32 %v12127_v50, %v12141_v41  ;;  %v12142_v9 = vld [vmem:[#allocation68_spill] sm:$0xff]  ;;  %v1123_v14 = vadd.f32 %v1107_v24, %v991_v39  ;;  %v12143_v47 = vld [vmem:[#allocation71_spill] sm:$0xff] }
 0x189   : > { %1954 = vperm.xlu0 %7122, %v12129_v53   ;;  %v1116_v53 = vmul.f32 %v12127_v50, %v12139_v31  ;;  %v1117_v40 = vmul.f32 %v12127_v50, %v12142_v9  ;;  %v1126_v36 = vadd.f32 %v1110_v35, %v994_v19  ;;  %v1125_v31 = vadd.f32 %v1109_v10, %v993_v38  ;;  %v8496_v21 = vld [vmem:[%s7524_s23 + $0x25a] sm:$0xff]  ;;  %v12149_v35 = vld [vmem:[#allocation81_spill] sm:$0xff] }
 0x18a   : > { %v8446_v5 = vpop.permute.xlu1 %1345  ;;  %v1120_v60 = vmul.f32 %v12127_v50, %v12143_v47  ;;  %12144 = vst [vmem:[#allocation14_spill] sm:$0xff] %v8496_v21  ;;  %v1128_v62 = vadd.f32 %v1112_v51, %v996_v17  ;;  %v1127_v61 = vadd.f32 %v1111_v59, %v995_v55  ;;  %v1130_v41 = vadd.f32 %v1114_v63, %v998_v52  ;;  %v12146_v19 = vld [vmem:[#allocation78_spill] sm:$0xff]  ;;  %v12147_v52 = vld [vmem:[#allocation80_spill] sm:$0xff]  ;;  %v12150_v51 = vld [vmem:[#allocation75_spill] sm:$0xff] }
 0x18b   : > { %v8448_v26 = vpop.permute.xlu0 %1340  ;;  %v1241_v9 = vmul.f32 %v8310_v12, %v12145_v15  ;;  %v8504_v39 = vadd.f32 %v1115_v16, %v999_v22  ;;  %v1240_v47 = vmul.f32 %v8310_v12, %v12146_v19  ;;  %v8512_v17 = vadd.f32 %v1118_v6, %v1002_v20  ;;  %v12151_v63 = vld [vmem:[#allocation76_spill] sm:$0xff] }
 0x18c   : > { %1969 = vperm.xlu1 %7123, %v8463_v37   ;;  %v8500_v37 = vadd.f32 %v1113_v27, %v997_v13  ;;  %v8514_v55 = vadd.f32 %v1117_v40, %v1001_v25  ;;  %v1243_v15 = vmul.f32 %v8310_v12, %v12147_v52  ;;  %v8520_v13 = vadd.f32 %v1120_v60, %v1004_v57  ;;  %v8529_v25 = vld [vmem:[%s8128_s27 + $0x8] ss:$0 sm:$0xff] }
 0x18d   : > { %1964 = vperm.xlu0 %7122, %v8466_v30   ;;  %v8502_v30 = vadd.f32 %v1116_v53, %v1000_v44  ;;  %v12148_v44 = vld [vmem:[#allocation72_spill] sm:$0xff]  ;;  %v1242_v10 = vmul.f32 %v8310_v12, %v12149_v35  ;;  %v1373_v20 = vmul.f32 %v8362_v32, %v8332_v46  ;;  %v1122_v59 = vmul.f32 %v12127_v50, %v12150_v51 }
 0x18e   : > { %v8480_v43 = vpop.permute.xlu1 %1355  ;;  %v1119_v22 = vmul.f32 %v12127_v50, %v12148_v44  ;;  %v1121_v27 = vmul.f32 %v12127_v50, %v12151_v63  ;;  %v1257_v53 = vadd.f32 %v1241_v9, %v1124_v29  ;;  %v1372_v57 = vmul.f32 %v8362_v32, %v8334_v34  ;;  %v12152_v6 = vld [vmem:[#allocation84_spill] sm:$0xff]  ;;  %v12153_v9 = vld [vmem:[#allocation18_spill] sm:$0xff]  ;;  %v12154_v34 = vld [vmem:[#allocation19_spill] sm:$0xff] }
 0x18f   : > { %v8482_v2 = vpop.permute.xlu0 %1350  ;;  %v1256_v16 = vadd.f32 %v1240_v47, %v1123_v14  ;;  %v1245_v40 = vmul.f32 %v8310_v12, %v12152_v6  ;;  %v1375_v60 = vmul.f32 %v8362_v32, %v8347_v28  ;;  %v1374_v46 = vmul.f32 %v8362_v32, %v8349_v48  ;;  %v12155_v47 = vld [vmem:[#allocation85_spill] sm:$0xff]  ;;  %v12156_v63 = vld [vmem:[#allocation92_spill] sm:$0xff] }
 0x190   : > { %1979 = vperm.xlu1 %7123, %v8493_v56   ;;  %v1259_v44 = vadd.f32 %v1243_v15, %v1126_v36  ;;  %v1258_v14 = vadd.f32 %v1242_v10, %v1125_v31  ;;  %v1244_v51 = vmul.f32 %v8310_v12, %v12155_v47  ;;  %v1247_v28 = vmul.f32 %v8310_v12, %v12156_v63 }
 0x191   : > { %1974 = vperm.xlu0 %7122, %v8496_v21   ;;  %v1389_v6 = vadd.f32 %v1373_v20, %v1257_v53  ;;  %v8552_v48 = vadd.f32 %v1119_v22, %v8454_v49  ;;  %v8554_v36 = vadd.f32 %v1122_v59, %v1006_v23  ;;  %v8556_v15 = vadd.f32 %v1121_v27, %v1005_v18  ;;  %v12157_v20 = vld [vmem:[#allocation57_spill] sm:$0xff]  ;;  %v12158_v49 = vld [vmem:[#allocation58_spill] sm:$0xff]  ;;  %v12161_v53 = vld [vmem:[#allocation95_spill] sm:$0xff] }
 0x192   : > { %v8508_v38 = vpop.permute.xlu1 %1365  ;;  %v1390_v50 = vadd.f32 %v1374_v46, %v1258_v14  ;;  %v1260_v23 = vadd.f32 %v1244_v51, %v1127_v61  ;;  %v1263_v22 = vadd.f32 %v1247_v28, %v1130_v41  ;;  %v12159_v18 = vld [vmem:[#allocation93_spill] sm:$0xff]  ;;  %v1377_v61 = vmul.f32 %v8362_v32, %v8382_v58  ;;  %v12164_v58 = vld [vmem:[#allocation62_spill] sm:$0xff] }
 0x193   : > { %v8510_v24 = vpop.permute.xlu0 %1360  ;;  %v1246_v59 = vmul.f32 %v8310_v12, %v12159_v18  ;;  %v1376_v41 = vmul.f32 %v8362_v32, %v8384_v45 }
 0x194   : > { %2038 = vperm.xlu1 %7123, %v12153_v9   ;;  %v1391_v9 = vadd.f32 %v1375_v60, %v1259_v44  ;;  %v1379_v44 = vmul.f32 %v8362_v32, %v8404_v7 }
 0x195   : > { %2033 = vperm.xlu0 %7122, %v12154_v34  }
 0x196   : > { %v1428_v19 = vpop.permute.xlu1 %1427  ;;  %v1395_v18 = vadd.f32 %v1379_v44, %v1263_v22  ;;  %v6662_v22 = vld [vmem:[%s7524_s23 + $0x228] sm:$0xff]  ;;  %v1382_v44 = vmul.f32 %v8362_v32, %v8448_v26 }
 0x197   : > { %v1423_v52 = vpop.permute.xlu0 %1422  ;;  %v1505_v35 = vmul.f32 %v8529_v25, %v1428_v19  ;;  %v1388_v19 = vadd.f32 %v1372_v57, %v1256_v16  ;;  %v1248_v57 = vmul.f32 %v8310_v12, %v12161_v53  ;;  %v12162_v16 = vld [vmem:[#allocation97_spill] sm:$0xff]  ;;  %v1381_v53 = vmul.f32 %v8362_v32, %v8430_v8 }
 0x198   : > { %v1504_v29 = vmul.f32 %v8529_v25, %v1423_v52  ;;  %v1261_v52 = vadd.f32 %v1245_v40, %v1128_v62  ;;  %2048 = vperm.xlu1 %7123, %v12157_v20   ;;  %v12160_v62 = vld [vmem:[#allocation94_spill] sm:$0xff]  ;;  %v1251_v40 = vmul.f32 %v8310_v12, %v12162_v16  ;;  %v1383_v8 = vmul.f32 %v8362_v32, %v8446_v5 }
 0x199   : > { %v1521_v34 = vadd.f32 %v1505_v35, %v1389_v6  ;;  %2043 = vperm.xlu0 %7122, %v12158_v49   ;;  %v1249_v27 = vmul.f32 %v8310_v12, %v12160_v62  ;;  %v1378_v35 = vmul.f32 %v8362_v32, %v8406_v1  ;;  %v8588_v1 = vld [vmem:[%s7524_s23 + $0xc0] sm:$0xff] }
 0x19a   : > { %v1438_v31 = vpop.permute.xlu1 %1437  ;;  %v1520_v21 = vadd.f32 %v1504_v29, %v1388_v19  ;;  %v12163_v19 = vld [vmem:[#allocation61_spill] sm:$0xff]  ;;  %v1267_v49 = vadd.f32 %v1251_v40, %v8512_v17  ;;  %v1380_v40 = vmul.f32 %v8362_v32, %v8432_v42 }
 0x19b   : > { %v1433_v10 = vpop.permute.xlu0 %1432  ;;  %v1507_v47 = vmul.f32 %v8529_v25, %v1438_v31  ;;  %v1537_v51 = vmax.f32 %v1521_v34, 0.0  ;;  %v1265_v45 = vadd.f32 %v1249_v27, %v8502_v30  ;;  %v12165_v34 = vld [vmem:[#allocation98_spill] sm:$0xff]  ;;  %v1392_v30 = vadd.f32 %v1376_v41, %v1260_v23  ;;  %v6663_v23 = vld [vmem:[%s7524_s23 + $0x230] sm:$0xff] }
 0x19c   : > { %v1506_v63 = vmul.f32 %v8529_v25, %v1433_v10  ;;  %v1536_v28 = vmax.f32 %v1520_v21, 0.0  ;;  %2058 = vperm.xlu1 %7123, %v12163_v19   ;;  %v8585_v10 = vld [vmem:[%s7524_s23 + $0xc8] sm:$0xff]  ;;  %v1264_v21 = vadd.f32 %v1248_v57, %v8504_v39  ;;  %v12166_v19 = vld [vmem:[#allocation5_spill] sm:$0xff] }
 0x19d   : > { %v1523_v60 = vadd.f32 %v1507_v47, %v1391_v9  ;;  %2053 = vperm.xlu0 %7122, %v12164_v58   ;;  %v1262_v9 = vadd.f32 %v1246_v59, %v8500_v37  ;;  %v1250_v47 = vmul.f32 %v8310_v12, %v12165_v34  ;;  %v1393_v37 = vadd.f32 %v1377_v61, %v1261_v52 }
 0x19e   : > { %v1522_v46 = vadd.f32 %v1506_v63, %v1390_v50  ;;  %v1448_v29 = vpop.permute.xlu1 %1447  ;;  %v1253_v58 = vmul.f32 %v8310_v12, %v12166_v19 }
 0x19f   : > { %v1443_v14 = vpop.permute.xlu0 %1442  ;;  %v1539_v6 = vmax.f32 %v1523_v60, 0.0  ;;  %v1509_v31 = vmul.f32 %v8529_v25, %v1448_v29  ;;  %v1394_v27 = vadd.f32 %v1378_v35, %v1262_v9  ;;  %v1266_v41 = vadd.f32 %v1250_v47, %v8514_v55  ;;  %v12167_v9 = vld [vmem:[#allocation6_spill] sm:$0xff] }
 0x1a0   : > { %v1538_v50 = vmax.f32 %v1522_v46, 0.0  ;;  %v1508_v7 = vmul.f32 %v8529_v25, %v1443_v14  ;;  %2068 = vperm.xlu1 %7123, %v8585_v10  }
 0x1a1   : > { %v1553_v63 = vmax.f32 %v1537_v51, %v1539_v6  ;;  %2063 = vperm.xlu0 %7122, %v8588_v1   ;;  %v1525_v57 = vadd.f32 %v1509_v31, %v1393_v37  ;;  %v1396_v31 = vadd.f32 %v1380_v40, %v1264_v21  ;;  %v1398_v34 = vadd.f32 %v1382_v44, %v1266_v41  ;;  %v12170_v44 = vld [vmem:[#allocation73_spill] sm:$0xff] }
 0x1a2   : > { %v1552_v20 = vmax.f32 %v1536_v28, %v1538_v50  ;;  %v1458_v59 = vpop.permute.xlu1 %1457  ;;  %v1524_v60 = vadd.f32 %v1508_v7, %v1392_v30  ;;  %v1397_v28 = vadd.f32 %v1381_v53, %v1265_v45  ;;  %v1252_v45 = vmul.f32 %v8310_v12, %v12167_v9  ;;  %v12169_v53 = vld [vmem:[#allocation70_spill] sm:$0xff] }
 0x1a3   : > { %v1453_v62 = vpop.permute.xlu0 %1452  ;;  %v1601_v16 = vrot.slane %v1553_v63, 1  ;;  %v1511_v17 = vmul.f32 %v8529_v25, %v1458_v59  ;;  %v1541_v26 = vmax.f32 %v1525_v57, 0.0  ;;  %v1399_v7 = vadd.f32 %v1383_v8, %v1267_v49 }
 0x1a4   : > { %v1564_v39 = vrot.slane %v1552_v20, 1  ;;  %v1510_v52 = vmul.f32 %v8529_v25, %v1453_v62  ;;  %2078 = vperm.xlu1 %7123, %v6663_v23   ;;  %v1540_v55 = vmax.f32 %v1524_v60, 0.0  ;;  %v1254_v21 = vmul.f32 %v8310_v12, %v8305_v11 }
 0x1a5   : > { %v1609_v46 = vmax.f32 %v1553_v63, %v1601_v16  ;;  %v1527_v35 = vadd.f32 %v1511_v17, %v1395_v18  ;;  %2073 = vperm.xlu0 %7122, %v6662_v22   ;;  %v1255_v16 = vmul.f32 %v8310_v12, %v8303_v3  ;;  %v1385_v57 = vmul.f32 %v8362_v32, %v8480_v43 }
 0x1a6   : > { %v1572_v61 = vmax.f32 %v1552_v20, %v1564_v39  ;;  %v1526_v29 = vadd.f32 %v1510_v52, %v1394_v27  ;;  %v1468_v14 = vpop.permute.xlu1 %1467  ;;  %v12168_v27 = vld [vmem:[#allocation69_spill] sm:$0xff]  ;;  %v1384_v60 = vmul.f32 %v8362_v32, %v8482_v2  ;;  %v1387_v23 = vmul.f32 %v8362_v32, %v8508_v38  ;;  %v12171_v2 = vld [vmem:[#allocation74_spill] sm:$0xff] }
 0x1a7   : > { %v1463_v51 = vpop.permute.xlu0 %1462  ;;  %1613 = vst.msk [vmem:[#allocation2 + $0x15] sm:$0x1] %vm1577_vm2, %v1609_v46  ;;  %v1513_v42 = vmul.f32 %v8529_v25, %v1468_v14  ;;  %v1543_v6 = vmax.f32 %v1527_v35, 0.0  ;;  %v1386_v22 = vmul.f32 %v8362_v32, %v8510_v24  ;;  %v1269_v35 = vadd.f32 %v1253_v58, %v8520_v13 }
 0x1a8   : > { %1617 = vst.msk [vmem:[#allocation2 + $0x14] sm:$0x4] %vm1582_vm3, %v1609_v46  ;;  %1583 = vst.msk [vmem:[#allocation2 + $0x10] sm:$0x4] %vm1582_vm3, %v1572_v61  ;;  %v1512_v5 = vmul.f32 %v8529_v25, %v1463_v51  ;;  %v1542_v50 = vmax.f32 %v1526_v29, 0.0  ;;  %2088 = vperm.xlu1 %7123, %v12168_v27   ;;  %v1268_v38 = vadd.f32 %v1252_v45, %v8552_v48  ;;  %v8654_v48 = vld [vmem:[%s7524_s23 + $0x278] sm:$0xff] }
 0x1a9   : > { %1621 = vst.msk [vmem:[#allocation2 + $0x13] sm:$0x10] %vm1587_vm4, %v1609_v46  ;;  %1588 = vst.msk [vmem:[#allocation2 + $0xf] sm:$0x10] %vm1587_vm4, %v1572_v61  ;;  %v1555_v47 = vmax.f32 %v1541_v26, %v1543_v6  ;;  %v1529_v20 = vadd.f32 %v1513_v42, %v1397_v28  ;;  %2083 = vperm.xlu0 %7122, %v12169_v53   ;;  %v8657_v29 = vld [vmem:[%s7524_s23 + $0x270] sm:$0xff]  ;;  %v1271_v14 = vadd.f32 %v1255_v16, %v8554_v36 }
 0x1aa   : > { %1625 = vst.msk [vmem:[#allocation2 + $0x12] sm:$0x40] %vm1592_vm5, %v1609_v46  ;;  %1593 = vst.msk [vmem:[#allocation2 + $0xe] sm:$0x40] %vm1592_vm5, %v1572_v61  ;;  %v1554_v63 = vmax.f32 %v1540_v55, %v1542_v50  ;;  %v1478_v37 = vpop.permute.xlu1 %1477  ;;  %v1528_v18 = vadd.f32 %v1512_v5, %v1396_v31  ;;  %v1270_v51 = vadd.f32 %v1254_v21, %v8556_v15 }
 0x1ab   : > { %1578 = vst.msk [vmem:[#allocation2 + $0x11] sm:$0x1] %vm1577_vm2, %v1572_v61  ;;  %v1473_v30 = vpop.permute.xlu0 %1472  ;;  %v1515_v59 = vmul.f32 %v8529_v25, %v1478_v37  ;;  %v1602_v49 = vrot.slane %v1555_v47, 1  ;;  %v1545_v46 = vmax.f32 %v1529_v20, 0.0  ;;  %v1401_v5 = vadd.f32 %v1385_v57, %v1269_v35  ;;  %v12173_v57 = vld [vmem:[#allocation83_spill] sm:$0xff] }
 0x1ac   : > { %v1514_v62 = vmul.f32 %v8529_v25, %v1473_v30  ;;  %v1565_v39 = vrot.slane %v1554_v63, 1  ;;  %v1544_v61 = vmax.f32 %v1528_v18, 0.0  ;;  %2098 = vperm.xlu1 %7123, %v12170_v44   ;;  %v1400_v26 = vadd.f32 %v1384_v60, %v1268_v38  ;;  %v6678_v44 = vld [vmem:[%s7524_s23 + $0x229] sm:$0xff] }
 0x1ad   : > { %v1531_v17 = vadd.f32 %v1515_v59, %v1399_v7  ;;  %v1610_v3 = vmax.f32 %v1555_v47, %v1602_v49  ;;  %2093 = vperm.xlu0 %7122, %v12171_v2   ;;  %v1403_v50 = vadd.f32 %v1387_v23, %v1271_v14  ;;  %v1402_v19 = vadd.f32 %v1386_v22, %v1270_v51  ;;  %v6671_v7 = vld [vmem:[%s7524_s23 + $0x81] sm:$0xff] }
 0x1ae   : > { %v1530_v52 = vadd.f32 %v1514_v62, %v1398_v34  ;;  %v1573_v40 = vmax.f32 %v1554_v63, %v1565_v39  ;;  %v1488_v8 = vpop.permute.xlu1 %1487  ;;  %v6670_v34 = vld [vmem:[%s7524_s23 + $0x79] sm:$0xff]  ;;  %v12177_v14 = vld [vmem:[#allocation4_spill] sm:$0xff] }
 0x1af   : > { %v1483_v11 = vpop.permute.xlu0 %1482  ;;  %v1547_v41 = vmax.f32 %v1531_v17, 0.0  ;;  %1614 = vst.msk [vmem:[#allocation2 + $0x25] sm:$0x1] %vm1577_vm2, %v1610_v3  ;;  %v1517_v24 = vmul.f32 %v8529_v25, %v1488_v8  ;;  %v12172_v39 = vld [vmem:[#allocation82_spill] sm:$0xff]  ;;  %v12175_v8 = vld [vmem:[#allocation88_spill] sm:$0xff] }
 0x1b0   : > { %v1546_v43 = vmax.f32 %v1530_v52, 0.0  ;;  %1618 = vst.msk [vmem:[#allocation2 + $0x24] sm:$0x4] %vm1582_vm3, %v1610_v3  ;;  %1584 = vst.msk [vmem:[#allocation2 + $0x20] sm:$0x4] %vm1582_vm3, %v1573_v40  ;;  %v1516_v13 = vmul.f32 %v8529_v25, %v1483_v11  ;;  %2108 = vperm.xlu1 %7123, %v8654_v48   ;;  %v8700_v11 = vld [vmem:[%s7524_s23 + $0xc9] sm:$0xff] }
 0x1b1   : > { %1622 = vst.msk [vmem:[#allocation2 + $0x23] sm:$0x10] %vm1587_vm4, %v1610_v3  ;;  %1589 = vst.msk [vmem:[#allocation2 + $0x1f] sm:$0x10] %vm1587_vm4, %v1573_v40  ;;  %v1557_v28 = vmax.f32 %v1545_v46, %v1547_v41  ;;  %2103 = vperm.xlu0 %7122, %v8657_v29   ;;  %v1533_v45 = vadd.f32 %v1517_v24, %v1401_v5  ;;  %v8703_v46 = vld [vmem:[%s7524_s23 + $0xc1] sm:$0xff]  ;;  %v8733_v5 = vld [vmem:[%s7524_s23 + $0x271] sm:$0xff] }
 0x1b2   : > { %1626 = vst.msk [vmem:[#allocation2 + $0x22] sm:$0x40] %vm1592_vm5, %v1610_v3  ;;  %1594 = vst.msk [vmem:[#allocation2 + $0x1e] sm:$0x40] %vm1592_vm5, %v1573_v40  ;;  %v1556_v42 = vmax.f32 %v1544_v61, %v1546_v43  ;;  %v1498_v55 = vpop.permute.xlu1 %1497  ;;  %v1532_v36 = vadd.f32 %v1516_v13, %v1400_v26  ;;  %v6679_v43 = vld [vmem:[%s7524_s23 + $0x231] sm:$0xff]  ;;  %v12176_v13 = vld [vmem:[#allocation3_spill] sm:$0xff] }
 0x1b3   : > { %1579 = vst.msk [vmem:[#allocation2 + $0x21] sm:$0x1] %vm1577_vm2, %v1573_v40  ;;  %v1493_v6 = vpop.permute.xlu0 %1492  ;;  %v1603_v58 = vrot.slane %v1557_v28, 1  ;;  %v1519_v15 = vmul.f32 %v8529_v25, %v1498_v55  ;;  %v12174_v40 = vld [vmem:[#allocation87_spill] sm:$0xff] }
 0x1b4   : > { %v1566_v9 = vrot.slane %v1556_v42, 1  ;;  %v1518_v31 = vmul.f32 %v8529_v25, %v1493_v6  ;;  %2166 = vperm.xlu1 %7123, %v6671_v7   ;;  %v1549_v25 = vmax.f32 %v1533_v45, 0.0  ;;  %v1548_v59 = vmax.f32 %v1532_v36, 0.0  ;;  %v6687_v6 = vld [vmem:[%s7524_s23 + $0x82] sm:$0xff]  ;;  %v12178_v36 = vld [vmem:[#allocation9_spill] sm:$0xff] }
 0x1b5   : > { %v1611_v47 = vmax.f32 %v1557_v28, %v1603_v58  ;;  %v1535_v20 = vadd.f32 %v1519_v15, %v1403_v50  ;;  %2161 = vperm.xlu0 %7122, %v6670_v34   ;;  %v6686_v50 = vld [vmem:[%s7524_s23 + $0x7a] sm:$0xff]  ;;  %v8763_v7 = vld [vmem:[%s7524_s23 + $0xc2] sm:$0xff] }
 0x1b6   : > { %v1574_v63 = vmax.f32 %v1556_v42, %v1566_v9  ;;  %v1534_v37 = vadd.f32 %v1518_v31, %v1402_v19  ;;  %v8667_v30 = vpop.permute.xlu1 %1653  ;;  %v8730_v42 = vld [vmem:[%s7524_s23 + $0x279] sm:$0xff]  ;;  %v8760_v31 = vld [vmem:[%s7524_s23 + $0xca] sm:$0xff]  ;;  %12180 = vst [vmem:[#allocation15_spill] sm:$0xff] %v8763_v7 }
 0x1b7   : > { %v8669_v18 = vpop.permute.xlu0 %1648  ;;  %1615 = vst.msk [vmem:[#allocation2 + $0xb5] sm:$0x1] %vm1577_vm2, %v1611_v47  ;;  %v1551_v62 = vmax.f32 %v1535_v20, 0.0  ;;  %v12179_v15 = vld [vmem:[#allocation10_spill] sm:$0xff] }
 0x1b8   : > { %1619 = vst.msk [vmem:[#allocation2 + $0xb4] sm:$0x4] %vm1582_vm3, %v1611_v47  ;;  %1585 = vst.msk [vmem:[#allocation2 + $0xb0] sm:$0x4] %vm1582_vm3, %v1574_v63  ;;  %v1550_v27 = vmax.f32 %v1534_v37, 0.0  ;;  %2176 = vperm.xlu1 %7123, %v12172_v39   ;;  %v8790_v39 = vld [vmem:[%s7524_s23 + $0x27a] sm:$0xff] }
 0x1b9   : > { %1623 = vst.msk [vmem:[#allocation2 + $0xb3] sm:$0x10] %vm1587_vm4, %v1611_v47  ;;  %1590 = vst.msk [vmem:[#allocation2 + $0xaf] sm:$0x10] %vm1587_vm4, %v1574_v63  ;;  %v1559_v53 = vmax.f32 %v1549_v25, %v1551_v62  ;;  %2171 = vperm.xlu0 %7122, %v12173_v57   ;;  %v12182_v62 = vld [vmem:[#allocation13_spill] sm:$0xff] }
 0x1ba   : > { %1627 = vst.msk [vmem:[#allocation2 + $0xb2] sm:$0x40] %vm1592_vm5, %v1611_v47  ;;  %1595 = vst.msk [vmem:[#allocation2 + $0xae] sm:$0x40] %vm1592_vm5, %v1574_v63  ;;  %v1558_v16 = vmax.f32 %v1548_v59, %v1550_v27  ;;  %v8679_v21 = vpop.permute.xlu1 %1663  ;;  %v12181_v59 = vld [vmem:[#allocation12_spill] sm:$0xff]  ;;  %v8793_v57 = vld [vmem:[%s7524_s23 + $0x272] sm:$0xff] }
 0x1bb   : > { %1580 = vst.msk [vmem:[#allocation2 + $0xb1] sm:$0x1] %vm1577_vm2, %v1574_v63  ;;  %v8681_v49 = vpop.permute.xlu0 %1658  ;;  %v1604_v60 = vrot.slane %v1559_v53, 1  ;;  %12184 = vst [vmem:[#allocation16_spill] sm:$0xff] %v8793_v57 }
 0x1bc   : > { %v1567_v17 = vrot.slane %v1558_v16, 1  ;;  %2186 = vperm.xlu1 %7123, %v12174_v40  }
 0x1bd   : > { %v1612_v52 = vmax.f32 %v1559_v53, %v1604_v60  ;;  %2181 = vperm.xlu0 %7122, %v12175_v8   ;;  %v6705_v8 = vld [vmem:[%s7524_s23 + $0xb0] sm:$0xff] }
 0x1be   : > { %v1575_v23 = vmax.f32 %v1558_v16, %v1567_v17  ;;  %v8685_v22 = vpop.permute.xlu1 %1673  ;;  %v12183_v16 = vld [vmem:[#allocation14_spill] sm:$0xff] }
 0x1bf   : > { %v8687_v3 = vpop.permute.xlu0 %1668  ;;  %1616 = vst.msk [vmem:[#allocation2 + $0xc5] sm:$0x1] %vm1577_vm2, %v1612_v52 }
 0x1c0   : > { %1620 = vst.msk [vmem:[#allocation2 + $0xc4] sm:$0x4] %vm1582_vm3, %v1612_v52  ;;  %1586 = vst.msk [vmem:[#allocation2 + $0xc0] sm:$0x4] %vm1582_vm3, %v1575_v23  ;;  %2196 = vperm.xlu1 %7123, %v8700_v11  }
 0x1c1   : > { %1624 = vst.msk [vmem:[#allocation2 + $0xc3] sm:$0x10] %vm1587_vm4, %v1612_v52  ;;  %1591 = vst.msk [vmem:[#allocation2 + $0xbf] sm:$0x10] %vm1587_vm4, %v1575_v23  ;;  %2191 = vperm.xlu0 %7122, %v8703_v46  }
 0x1c2   : > { %1628 = vst.msk [vmem:[#allocation2 + $0xc2] sm:$0x40] %vm1592_vm5, %v1612_v52  ;;  %1596 = vst.msk [vmem:[#allocation2 + $0xbe] sm:$0x40] %vm1592_vm5, %v1575_v23  ;;  %v8705_v61 = vpop.permute.xlu1 %1683  ;;  %v6703_v52 = vld [vmem:[%s7524_s23 + $0x98] sm:$0xff] }
 0x1c3   : > { %1581 = vst.msk [vmem:[#allocation2 + $0xc1] sm:$0x1] %vm1577_vm2, %v1575_v23  ;;  %v8707_v41 = vpop.permute.xlu0 %1678  ;;  %v6702_v23 = vld [vmem:[%s7524_s23 + $0x90] sm:$0xff] }
 0x1c4   : > { %2206 = vperm.xlu1 %7123, %v6679_v43   ;;  %v6704_v43 = vld [vmem:[%s7524_s23 + $0xa8] sm:$0xff] }
 0x1c5   : > { %2201 = vperm.xlu0 %7122, %v6678_v44  }
 0x1c6   : > { %v8713_v2 = vpop.permute.xlu1 %1693 }
 0x1c7   : > { %v8715_v35 = vpop.permute.xlu0 %1688 }
 0x1c8   : > { %2216 = vperm.xlu1 %7123, %v12176_v13  }
 0x1c9   : > { %2211 = vperm.xlu0 %7122, %v12177_v14  }
 0x1ca   : > { %v8717_v38 = vpop.permute.xlu1 %1703 }
 0x1cb   : > { %v8719_v24 = vpop.permute.xlu0 %1698 }
 0x1cc   : > { %2226 = vperm.xlu1 %7123, %v8294_v54  }
 0x1cd   : > { %2221 = vperm.xlu0 %7122, %v8297_v4  }
 0x1ce   : > { %v8723_v51 = vpop.permute.xlu1 %1713 }
 0x1cf   : > { %v8725_v28 = vpop.permute.xlu0 %1708 }
 0x1d0   : > { %2236 = vperm.xlu1 %7123, %v8730_v42  }
 0x1d1   : > { %2231 = vperm.xlu0 %7122, %v8733_v5  }
 0x1d2   : > { %v8735_v26 = vpop.permute.xlu1 %1723 }
 0x1d3   : > { %v8737_v55 = vpop.permute.xlu0 %1718 }
 0x1d4   : > { %2294 = vperm.xlu1 %7123, %v6687_v6  }
 0x1d5   : > { %2289 = vperm.xlu0 %7122, %v6686_v50   ;;  %v8820_v50 = vld [vmem:[%s7524_s23 + $0xe0] sm:$0xff] }
 0x1d6   : > { %v8743_v19 = vpop.permute.xlu1 %1781  ;;  %12189 = vst [vmem:[#allocation23_spill] sm:$0xff] %v8820_v50 }
 0x1d7   : > { %v8745_v54 = vpop.permute.xlu0 %1776 }
 0x1d8   : > { %2304 = vperm.xlu1 %7123, %v8365_v0   ;;  %v6695_v0 = vld [vmem:[%s7524_s23 + $0x232] sm:$0xff] }
 0x1d9   : > { %2299 = vperm.xlu0 %7122, %v8368_v33   ;;  %v6694_v33 = vld [vmem:[%s7524_s23 + $0x22a] sm:$0xff] }
 0x1da   : > { %v8747_v4 = vpop.permute.xlu1 %1791 }
 0x1db   : > { %v8749_v58 = vpop.permute.xlu0 %1786 }
 0x1dc   : > { %2314 = vperm.xlu1 %7123, %v12178_v36   ;;  %v8823_v36 = vld [vmem:[%s7524_s23 + $0xd8] sm:$0xff] }
 0x1dd   : > { %2309 = vperm.xlu0 %7122, %v12179_v15   ;;  %12190 = vst [vmem:[#allocation24_spill] sm:$0xff] %v8823_v36 }
 0x1de   : > { %v8753_v9 = vpop.permute.xlu1 %1801 }
 0x1df   : > { %v8755_v45 = vpop.permute.xlu0 %1796 }
 0x1e0   : > { %2324 = vperm.xlu1 %7123, %v8760_v31  }
 0x1e1   : > { %2319 = vperm.xlu0 %7122, %v8763_v7  }
 0x1e2   : > { %v8765_v34 = vpop.permute.xlu1 %1811 }
 0x1e3   : > { %v8767_v47 = vpop.permute.xlu0 %1806 }
 0x1e4   : > { %2334 = vperm.xlu1 %7123, %v6695_v0  }
 0x1e5   : > { %2329 = vperm.xlu0 %7122, %v6694_v33   ;;  %v6711_v33 = vld [vmem:[%s7524_s23 + $0x248] sm:$0xff] }
 0x1e6   : > { %v8773_v63 = vpop.permute.xlu1 %1821 }
 0x1e7   : > { %v8775_v20 = vpop.permute.xlu0 %1816 }
 0x1e8   : > { %2344 = vperm.xlu1 %7123, %v12181_v59   ;;  %v6710_v59 = vld [vmem:[%s7524_s23 + $0x240] sm:$0xff] }
 0x1e9   : > { %2339 = vperm.xlu0 %7122, %v12182_v62  }
 0x1ea   : > { %v8777_v37 = vpop.permute.xlu1 %1831 }
 0x1eb   : > { %v8779_v25 = vpop.permute.xlu0 %1826 }
 0x1ec   : > { %2354 = vperm.xlu1 %7123, %v8493_v56  }
 0x1ed   : > { %2349 = vperm.xlu0 %7122, %v12183_v16  }
 0x1ee   : > { %v8783_v27 = vpop.permute.xlu1 %1841 }
 0x1ef   : > { %v8785_v53 = vpop.permute.xlu0 %1836 }
 0x1f0   : > { %2364 = vperm.xlu1 %7123, %v8790_v39  }
 0x1f1   : > { %2359 = vperm.xlu0 %7122, %v8793_v57  }
 0x1f2   : > { %v8795_v60 = vpop.permute.xlu1 %1851 }
 0x1f3   : > { %v8797_v17 = vpop.permute.xlu0 %1846 }
 0x1f4   : > { %2423 = vperm.xlu1 %7123, %v6703_v52   ;;  %v6713_v52 = vld [vmem:[%s7524_s23 + $0x260] sm:$0xff] }
 0x1f5   : > { %2418 = vperm.xlu0 %7122, %v6702_v23   ;;  %v6712_v23 = vld [vmem:[%s7524_s23 + $0x258] sm:$0xff] }
 0x1f6   : > { %v8803_v40 = vpop.permute.xlu1 %1909 }
 0x1f7   : > { %v8805_v56 = vpop.permute.xlu0 %1904 }
 0x1f8   : > { %2433 = vperm.xlu1 %7123, %v6705_v8  }
 0x1f9   : > { %2428 = vperm.xlu0 %7122, %v6704_v43  }
 0x1fa   : > { %v8809_v44 = vpop.permute.xlu1 %1919 }
 0x1fb   : > { %12185 = vst [vmem:[#allocation17_spill] sm:$0xff] %v8809_v44  ;;  %v8811_v13 = vpop.permute.xlu0 %1914 }
 0x1fc   : > { %12186 = vst [vmem:[#allocation20_spill] sm:$0xff] %v8811_v13  ;;  %2443 = vperm.xlu1 %7123, %v8585_v10  }
 0x1fd   : > { %2438 = vperm.xlu0 %7122, %v8588_v1  }
 0x1fe   : > { %v8813_v14 = vpop.permute.xlu1 %1929 }
 0x1ff   : > { %12187 = vst [vmem:[#allocation21_spill] sm:$0xff] %v8813_v14  ;;  %v8815_v6 = vpop.permute.xlu0 %1924 }
 0x200   : > { %12188 = vst [vmem:[#allocation22_spill] sm:$0xff] %v8815_v6  ;;  %2453 = vperm.xlu1 %7123, %v8820_v50  }
 0x201   : > { %2448 = vperm.xlu0 %7122, %v8823_v36  }
 0x202   : > { %v8825_v15 = vpop.permute.xlu1 %1939 }
 0x203   : > { %12191 = vst [vmem:[#allocation25_spill] sm:$0xff] %v8825_v15  ;;  %v8827_v0 = vpop.permute.xlu0 %1934 }
 0x204   : > { %12192 = vst [vmem:[#allocation26_spill] sm:$0xff] %v8827_v0  ;;  %2463 = vperm.xlu1 %7123, %v6711_v33   ;;  %v8850_v33 = vld [vmem:[%s7524_s23 + $0x290] sm:$0xff] }
 0x205   : > { %2458 = vperm.xlu0 %7122, %v6710_v59   ;;  %12199 = vst [vmem:[#allocation33_spill] sm:$0xff] %v8850_v33  ;;  %v8853_v59 = vld [vmem:[%s7524_s23 + $0x288] sm:$0xff] }
 0x206   : > { %v8833_v62 = vpop.permute.xlu1 %1949  ;;  %12200 = vst [vmem:[#allocation34_spill] sm:$0xff] %v8853_v59 }
 0x207   : > { %12193 = vst [vmem:[#allocation27_spill] sm:$0xff] %v8833_v62  ;;  %v8835_v16 = vpop.permute.xlu0 %1944  ;;  %v6720_v62 = vld [vmem:[%s7524_s23 + $0xa9] sm:$0xff] }
 0x208   : > { %12194 = vst [vmem:[#allocation28_spill] sm:$0xff] %v8835_v16  ;;  %2473 = vperm.xlu1 %7123, %v6713_v52   ;;  %v6719_v52 = vld [vmem:[%s7524_s23 + $0x99] sm:$0xff] }
 0x209   : > { %2468 = vperm.xlu0 %7122, %v6712_v23   ;;  %v6718_v23 = vld [vmem:[%s7524_s23 + $0x91] sm:$0xff] }
 0x20a   : > { %v8839_v8 = vpop.permute.xlu1 %1959 }
 0x20b   : > { %12195 = vst [vmem:[#allocation29_spill] sm:$0xff] %v8839_v8  ;;  %v8841_v43 = vpop.permute.xlu0 %1954 }
 0x20c   : > { %12196 = vst [vmem:[#allocation30_spill] sm:$0xff] %v8841_v43  ;;  %2483 = vperm.xlu1 %7123, %v8654_v48   ;;  %v6721_v43 = vld [vmem:[%s7524_s23 + $0xb1] sm:$0xff] }
 0x20d   : > { %2478 = vperm.xlu0 %7122, %v8657_v29  }
 0x20e   : > { %v8843_v32 = vpop.permute.xlu1 %1969 }
 0x20f   : > { %12197 = vst [vmem:[#allocation31_spill] sm:$0xff] %v8843_v32  ;;  %v8845_v12 = vpop.permute.xlu0 %1964 }
 0x210   : > { %12198 = vst [vmem:[#allocation32_spill] sm:$0xff] %v8845_v12  ;;  %2493 = vperm.xlu1 %7123, %v8850_v33  }
 0x211   : > { %2488 = vperm.xlu0 %7122, %v8853_v59  }
 0x212   : > { %v8855_v16 = vpop.permute.xlu1 %1979 }
 0x213   : > { %12201 = vst [vmem:[#allocation35_spill] sm:$0xff] %v8855_v16  ;;  %v8857_v8 = vpop.permute.xlu0 %1974 }
 0x214   : > { %12202 = vst [vmem:[#allocation36_spill] sm:$0xff] %v8857_v8  ;;  %2551 = vperm.xlu1 %7123, %v6719_v52   ;;  %v8880_v52 = vld [vmem:[%s7524_s23 + $0xe1] sm:$0xff] }
 0x215   : > { %2546 = vperm.xlu0 %7122, %v6718_v23   ;;  %v8883_v23 = vld [vmem:[%s7524_s23 + $0xd9] sm:$0xff] }
 0x216   : > { %v8863_v12 = vpop.permute.xlu1 %2038 }
 0x217   : > { %12203 = vst [vmem:[#allocation37_spill] sm:$0xff] %v8863_v12  ;;  %v8865_v32 = vpop.permute.xlu0 %2033  ;;  %v6728_v12 = vld [vmem:[%s7524_s23 + $0x259] sm:$0xff] }
 0x218   : > { %12204 = vst [vmem:[#allocation38_spill] sm:$0xff] %v8865_v32  ;;  %2561 = vperm.xlu1 %7123, %v6721_v43   ;;  %v6726_v43 = vld [vmem:[%s7524_s23 + $0x241] sm:$0xff] }
 0x219   : > { %2556 = vperm.xlu0 %7122, %v6720_v62   ;;  %v6727_v62 = vld [vmem:[%s7524_s23 + $0x249] sm:$0xff] }
 0x21a   : > { %v8869_v16 = vpop.permute.xlu1 %2048 }
 0x21b   : > { %12205 = vst [vmem:[#allocation39_spill] sm:$0xff] %v8869_v16  ;;  %v8871_v8 = vpop.permute.xlu0 %2043 }
 0x21c   : > { %12206 = vst [vmem:[#allocation40_spill] sm:$0xff] %v8871_v8  ;;  %2571 = vperm.xlu1 %7123, %v8700_v11   ;;  %v6729_v8 = vld [vmem:[%s7524_s23 + $0x261] sm:$0xff] }
 0x21d   : > { %2566 = vperm.xlu0 %7122, %v8703_v46  }
 0x21e   : > { %v8873_v0 = vpop.permute.xlu1 %2058 }
 0x21f   : > { %12207 = vst [vmem:[#allocation41_spill] sm:$0xff] %v8873_v0  ;;  %v8875_v15 = vpop.permute.xlu0 %2053 }
 0x220   : > { %12208 = vst [vmem:[#allocation42_spill] sm:$0xff] %v8875_v15  ;;  %2581 = vperm.xlu1 %7123, %v8880_v52  }
 0x221   : > { %2576 = vperm.xlu0 %7122, %v8883_v23  }
 0x222   : > { %v8885_v32 = vpop.permute.xlu1 %2068 }
 0x223   : > { %12209 = vst [vmem:[#allocation43_spill] sm:$0xff] %v8885_v32  ;;  %v8887_v16 = vpop.permute.xlu0 %2063 }
 0x224   : > { %12210 = vst [vmem:[#allocation44_spill] sm:$0xff] %v8887_v16  ;;  %2591 = vperm.xlu1 %7123, %v6727_v62   ;;  %v8910_v62 = vld [vmem:[%s7524_s23 + $0x291] sm:$0xff] }
 0x225   : > { %2586 = vperm.xlu0 %7122, %v6726_v43   ;;  %v8913_v43 = vld [vmem:[%s7524_s23 + $0x289] sm:$0xff] }
 0x226   : > { %v8893_v15 = vpop.permute.xlu1 %2078 }
 0x227   : > { %12211 = vst [vmem:[#allocation45_spill] sm:$0xff] %v8893_v15  ;;  %v8895_v0 = vpop.permute.xlu0 %2073  ;;  %v6736_v15 = vld [vmem:[%s7524_s23 + $0xaa] sm:$0xff] }
 0x228   : > { %12212 = vst [vmem:[#allocation46_spill] sm:$0xff] %v8895_v0  ;;  %2601 = vperm.xlu1 %7123, %v6729_v8   ;;  %v6734_v8 = vld [vmem:[%s7524_s23 + $0x92] sm:$0xff] }
 0x229   : > { %2596 = vperm.xlu0 %7122, %v6728_v12   ;;  %v6735_v12 = vld [vmem:[%s7524_s23 + $0x9a] sm:$0xff] }
 0x22a   : > { %v8899_v32 = vpop.permute.xlu1 %2088 }
 0x22b   : > { %12213 = vst [vmem:[#allocation47_spill] sm:$0xff] %v8899_v32  ;;  %v8901_v16 = vpop.permute.xlu0 %2083 }
 0x22c   : > { %12214 = vst [vmem:[#allocation11_spill] sm:$0xff] %v8901_v16  ;;  %2611 = vperm.xlu1 %7123, %v8730_v42   ;;  %v6737_v16 = vld [vmem:[%s7524_s23 + $0xb2] sm:$0xff] }
 0x22d   : > { %2606 = vperm.xlu0 %7122, %v8733_v5  }
 0x22e   : > { %v8903_v6 = vpop.permute.xlu1 %2098 }
 0x22f   : > { %12215 = vst [vmem:[#allocation48_spill] sm:$0xff] %v8903_v6  ;;  %v8905_v14 = vpop.permute.xlu0 %2093 }
 0x230   : > { %12216 = vst [vmem:[#allocation51_spill] sm:$0xff] %v8905_v14  ;;  %2621 = vperm.xlu1 %7123, %v8910_v62  }
 0x231   : > { %2616 = vperm.xlu0 %7122, %v8913_v43  }
 0x232   : > { %v8915_v0 = vpop.permute.xlu1 %2108 }
 0x233   : > { %12217 = vst [vmem:[#allocation52_spill] sm:$0xff] %v8915_v0  ;;  %v8917_v32 = vpop.permute.xlu0 %2103 }
 0x234   : > { %12218 = vst [vmem:[#allocation53_spill] sm:$0xff] %v8917_v32  ;;  %2679 = vperm.xlu1 %7123, %v6735_v12   ;;  %v8940_v12 = vld [vmem:[%s7524_s23 + $0xe2] sm:$0xff] }
 0x235   : > { %2674 = vperm.xlu0 %7122, %v6734_v8   ;;  %v8943_v8 = vld [vmem:[%s7524_s23 + $0xda] sm:$0xff] }
 0x236   : > { %v8923_v14 = vpop.permute.xlu1 %2166  ;;  %12225 = vst [vmem:[#allocation60_spill] sm:$0xff] %v8943_v8 }
 0x237   : > { %12219 = vst [vmem:[#allocation49_spill] sm:$0xff] %v8923_v14  ;;  %v8925_v6 = vpop.permute.xlu0 %2161  ;;  %v6744_v14 = vld [vmem:[%s7524_s23 + $0x25a] sm:$0xff] }
 0x238   : > { %12220 = vst [vmem:[#allocation50_spill] sm:$0xff] %v8925_v6  ;;  %2689 = vperm.xlu1 %7123, %v6737_v16   ;;  %v6742_v16 = vld [vmem:[%s7524_s23 + $0x242] sm:$0xff] }
 0x239   : > { %2684 = vperm.xlu0 %7122, %v6736_v15   ;;  %v6743_v15 = vld [vmem:[%s7524_s23 + $0x24a] sm:$0xff] }
 0x23a   : > { %v8929_v0 = vpop.permute.xlu1 %2176 }
 0x23b   : > { %12221 = vst [vmem:[#allocation54_spill] sm:$0xff] %v8929_v0  ;;  %v8931_v32 = vpop.permute.xlu0 %2171 }
 0x23c   : > { %12222 = vst [vmem:[#allocation55_spill] sm:$0xff] %v8931_v32  ;;  %2699 = vperm.xlu1 %7123, %v8760_v31   ;;  %v6745_v32 = vld [vmem:[%s7524_s23 + $0x262] sm:$0xff] }
 0x23d   : > { %2694 = vperm.xlu0 %7122, %v8763_v7  }
 0x23e   : > { %v8933_v13 = vpop.permute.xlu1 %2186 }
 0x23f   : > { %12223 = vst [vmem:[#allocation56_spill] sm:$0xff] %v8933_v13  ;;  %v8935_v44 = vpop.permute.xlu0 %2181 }
 0x240   : > { %12224 = vst [vmem:[#allocation59_spill] sm:$0xff] %v8935_v44  ;;  %2709 = vperm.xlu1 %7123, %v8940_v12  }
 0x241   : > { %2704 = vperm.xlu0 %7122, %v8943_v8  }
 0x242   : > { %v8945_v6 = vpop.permute.xlu1 %2196 }
 0x243   : > { %12226 = vst [vmem:[#allocation63_spill] sm:$0xff] %v8945_v6  ;;  %v8947_v0 = vpop.permute.xlu0 %2191 }
 0x244   : > { %12227 = vst [vmem:[#allocation64_spill] sm:$0xff] %v8947_v0  ;;  %2719 = vperm.xlu1 %7123, %v6743_v15   ;;  %v8970_v15 = vld [vmem:[%s7524_s23 + $0x292] sm:$0xff] }
 0x245   : > { %2714 = vperm.xlu0 %7122, %v6742_v16   ;;  %12231 = vst [vmem:[#allocation68_spill] sm:$0xff] %v8970_v15  ;;  %v8973_v16 = vld [vmem:[%s7524_s23 + $0x28a] sm:$0xff] }
 0x246   : > { %v8953_v44 = vpop.permute.xlu1 %2206  ;;  %12232 = vst [vmem:[#allocation71_spill] sm:$0xff] %v8973_v16 }
 0x247   : > { %v8955_v13 = vpop.permute.xlu0 %2201 }
 0x248   : > { %12228 = vst [vmem:[#allocation65_spill] sm:$0xff] %v8955_v13  ;;  %2729 = vperm.xlu1 %7123, %v6745_v32  }
 0x249   : > { %2724 = vperm.xlu0 %7122, %v6744_v14  }
 0x24a   : > { %v8959_v7 = vpop.permute.xlu1 %2216 }
 0x24b   : > { %12229 = vst [vmem:[#allocation66_spill] sm:$0xff] %v8959_v7  ;;  %v8961_v6 = vpop.permute.xlu0 %2211 }
 0x24c   : > { %2739 = vperm.xlu1 %7123, %v8790_v39  }
 0x24d   : > { %2734 = vperm.xlu0 %7122, %v8793_v57  }
 0x24e   : > { %v8963_v0 = vpop.permute.xlu1 %2226 }
 0x24f   : > { %v8965_v8 = vpop.permute.xlu0 %2221 }
 0x250   : > { %12230 = vst [vmem:[#allocation67_spill] sm:$0xff] %v8965_v8  ;;  %2749 = vperm.xlu1 %7123, %v8970_v15   ;;  %v8994_v15 = vld [vmem:[%s7524_s23 + $0xf8] sm:$0xff] }
 0x251   : > { %2744 = vperm.xlu0 %7122, %v8973_v16   ;;  %12235 = vst [vmem:[#allocation80_spill] sm:$0xff] %v8994_v15  ;;  %v8997_v16 = vld [vmem:[%s7524_s23 + $0xf0] sm:$0xff] }
 0x252   : > { %v8975_v13 = vpop.permute.xlu1 %2236  ;;  %12236 = vst [vmem:[#allocation72_spill] sm:$0xff] %v8997_v16 }
 0x253   : > { %v8977_v7 = vpop.permute.xlu0 %2231 }
 0x254   : > { %12233 = vst [vmem:[#allocation77_spill] sm:$0xff] %v8977_v7  ;;  %2897 = vperm.xlu1 %7123, %v8585_v10   ;;  %v9006_v10 = vld [vmem:[%s7524_s23 + $0x110] sm:$0xff] }
 0x255   : > { %2892 = vperm.xlu0 %7122, %v8588_v1   ;;  %12239 = vst [vmem:[#allocation76_spill] sm:$0xff] %v9006_v10  ;;  %v9009_v1 = vld [vmem:[%s7524_s23 + $0x108] sm:$0xff] }
 0x256   : > { %v8981_v32 = vpop.permute.xlu1 %2294  ;;  %12240 = vst [vmem:[#allocation84_spill] sm:$0xff] %v9009_v1 }
 0x257   : > { %12234 = vst [vmem:[#allocation78_spill] sm:$0xff] %v8981_v32  ;;  %v8983_v14 = vpop.permute.xlu0 %2289 }
 0x258   : > { %2907 = vperm.xlu1 %7123, %v8820_v50  }
 0x259   : > { %2902 = vperm.xlu0 %7122, %v8823_v36  }
 0x25a   : > { %v8987_v8 = vpop.permute.xlu1 %2304 }
 0x25b   : > { %v8989_v57 = vpop.permute.xlu0 %2299 }
 0x25c   : > { %2917 = vperm.xlu1 %7123, %v8994_v15  }
 0x25d   : > { %2912 = vperm.xlu0 %7122, %v8997_v16  }
 0x25e   : > { %v8999_v7 = vpop.permute.xlu1 %2314 }
 0x25f   : > { %12237 = vst [vmem:[#allocation81_spill] sm:$0xff] %v8999_v7  ;;  %v9001_v32 = vpop.permute.xlu0 %2309 }
 0x260   : > { %12238 = vst [vmem:[#allocation75_spill] sm:$0xff] %v9001_v32  ;;  %2927 = vperm.xlu1 %7123, %v9006_v10   ;;  %v9030_v10 = vld [vmem:[%s7524_s23 + $0x2a8] sm:$0xff] }
 0x261   : > { %2922 = vperm.xlu0 %7122, %v9009_v1   ;;  %12244 = vst [vmem:[#allocation92_spill] sm:$0xff] %v9030_v10  ;;  %v9033_v1 = vld [vmem:[%s7524_s23 + $0x2a0] sm:$0xff] }
 0x262   : > { %v9011_v50 = vpop.permute.xlu1 %2324  ;;  %12245 = vst [vmem:[#allocation57_spill] sm:$0xff] %v9033_v1 }
 0x263   : > { %v9013_v36 = vpop.permute.xlu0 %2319 }
 0x264   : > { %12241 = vst [vmem:[#allocation18_spill] sm:$0xff] %v9013_v36  ;;  %2937 = vperm.xlu1 %7123, %v8654_v48   ;;  %v9042_v48 = vld [vmem:[%s7524_s23 + $0x2c0] sm:$0xff] }
 0x265   : > { %2932 = vperm.xlu0 %7122, %v8657_v29   ;;  %12248 = vst [vmem:[#allocation94_spill] sm:$0xff] %v9042_v48  ;;  %v9045_v29 = vld [vmem:[%s7524_s23 + $0x2b8] sm:$0xff] }
 0x266   : > { %v9017_v32 = vpop.permute.xlu1 %2334  ;;  %12249 = vst [vmem:[#allocation95_spill] sm:$0xff] %v9045_v29 }
 0x267   : > { %12242 = vst [vmem:[#allocation19_spill] sm:$0xff] %v9017_v32  ;;  %v9019_v15 = vpop.permute.xlu0 %2329 }
 0x268   : > { %2947 = vperm.xlu1 %7123, %v8850_v33  }
 0x269   : > { %2942 = vperm.xlu0 %7122, %v8853_v59  }
 0x26a   : > { %v9023_v16 = vpop.permute.xlu1 %2344 }
 0x26b   : > { %v9025_v7 = vpop.permute.xlu0 %2339 }
 0x26c   : > { %12243 = vst [vmem:[#allocation85_spill] sm:$0xff] %v9025_v7  ;;  %2957 = vperm.xlu1 %7123, %v9030_v10  }
 0x26d   : > { %2952 = vperm.xlu0 %7122, %v9033_v1  }
 0x26e   : > { %v9035_v36 = vpop.permute.xlu1 %2354 }
 0x26f   : > { %12246 = vst [vmem:[#allocation58_spill] sm:$0xff] %v9035_v36  ;;  %v9037_v32 = vpop.permute.xlu0 %2349 }
 0x270   : > { %12247 = vst [vmem:[#allocation93_spill] sm:$0xff] %v9037_v32  ;;  %2967 = vperm.xlu1 %7123, %v9042_v48   ;;  %v9069_v48 = vld [vmem:[%s7524_s23 + $0xf1] sm:$0xff] }
 0x271   : > { %2962 = vperm.xlu0 %7122, %v9045_v29   ;;  %v9066_v29 = vld [vmem:[%s7524_s23 + $0xf9] sm:$0xff]  ;;  %12257 = vst [vmem:[#allocation70_spill] sm:$0xff] %v9069_v48 }
 0x272   : > { %v9047_v33 = vpop.permute.xlu1 %2364  ;;  %12256 = vst [vmem:[#allocation69_spill] sm:$0xff] %v9066_v29 }
 0x273   : > { %12250 = vst [vmem:[#allocation97_spill] sm:$0xff] %v9047_v33  ;;  %v9049_v59 = vpop.permute.xlu0 %2359 }
 0x274   : > { %12251 = vst [vmem:[#allocation61_spill] sm:$0xff] %v9049_v59  ;;  %3025 = vperm.xlu1 %7123, %v8700_v11   ;;  %v12260_v11 = vld [vmem:[#allocation79_spill] sm:$0xff] }
 0x275   : > { %3020 = vperm.xlu0 %7122, %v8703_v46   ;;  %v1727_v46 = vmul.f32 %v8667_v30, %v12260_v11  ;;  %v1731_v30 = vmul.f32 %v8685_v22, %v12260_v11  ;;  %v1732_v22 = vmul.f32 %v8707_v41, %v12260_v11  ;;  %v1738_v41 = vmul.f32 %v8725_v28, %v12260_v11 }
 0x276   : > { %v9053_v36 = vpop.permute.xlu1 %2423 }
 0x277   : > { %12252 = vst [vmem:[#allocation62_spill] sm:$0xff] %v9053_v36  ;;  %v9055_v32 = vpop.permute.xlu0 %2418 }
 0x278   : > { %12253 = vst [vmem:[#allocation98_spill] sm:$0xff] %v9055_v32  ;;  %3035 = vperm.xlu1 %7123, %v8880_v52   ;;  %v1729_v52 = vmul.f32 %v8679_v21, %v12260_v11  ;;  %v1730_v21 = vmul.f32 %v8687_v3, %v12260_v11  ;;  %v1737_v3 = vmul.f32 %v8717_v38, %v12260_v11 }
 0x279   : > { %3030 = vperm.xlu0 %7122, %v8883_v23   ;;  %v9084_v23 = vld [vmem:[%s7524_s23 + $0x111] sm:$0xff]  ;;  %v1740_v38 = vmul.f32 %v8737_v55, %v12260_v11 }
 0x27a   : > { %v9059_v1 = vpop.permute.xlu1 %2433  ;;  %12261 = vst [vmem:[#allocation82_spill] sm:$0xff] %v9084_v23 }
 0x27b   : > { %12254 = vst [vmem:[#allocation5_spill] sm:$0xff] %v9059_v1  ;;  %v9061_v10 = vpop.permute.xlu0 %2428  ;;  %v1726_v1 = vmul.f32 %v8669_v18, %v12260_v11 }
 0x27c   : > { %12255 = vst [vmem:[#allocation6_spill] sm:$0xff] %v9061_v10  ;;  %3045 = vperm.xlu1 %7123, %v9066_v29   ;;  %v9087_v10 = vld [vmem:[%s7524_s23 + $0x109] sm:$0xff]  ;;  %v7444_v29 = vld [vmem:[%s8153_s30] ss:$0 sm:$0xff] }
 0x27d   : > { %3040 = vperm.xlu0 %7122, %v9069_v48   ;;  %12262 = vst [vmem:[#allocation83_spill] sm:$0xff] %v9087_v10  ;;  %v1743_v32 = vadd.f32 %v7444_v29, %v1727_v46  ;;  %v1742_v48 = vadd.f32 %v7444_v29, %v1726_v1  ;;  %v1745_v36 = vadd.f32 %v7444_v29, %v1729_v52 }
 0x27e   : > { %v9071_v59 = vpop.permute.xlu1 %2443  ;;  %v1734_v1 = vmul.f32 %v8715_v35, %v12260_v11  ;;  %v1736_v46 = vmul.f32 %v8719_v24, %v12260_v11  ;;  %v1747_v52 = vadd.f32 %v7444_v29, %v1731_v30  ;;  %v1746_v35 = vadd.f32 %v7444_v29, %v1730_v21 }
 0x27f   : > { %12258 = vst [vmem:[#allocation73_spill] sm:$0xff] %v9071_v59  ;;  %v9073_v33 = vpop.permute.xlu0 %2438  ;;  %v1748_v28 = vadd.f32 %v7444_v29, %v1732_v22  ;;  %v1753_v7 = vadd.f32 %v7444_v29, %v1737_v3 }
 0x280   : > { %12259 = vst [vmem:[#allocation74_spill] sm:$0xff] %v9073_v33  ;;  %v1728_v33 = vmul.f32 %v8681_v49, %v12260_v11  ;;  %3055 = vperm.xlu1 %7123, %v9084_v23   ;;  %v1733_v49 = vmul.f32 %v8705_v61, %v12260_v11  ;;  %v1739_v61 = vmul.f32 %v8723_v51, %v12260_v11  ;;  %v12267_v23 = vld [vmem:[#allocation86_spill] sm:$0xff] }
 0x281   : > { %3050 = vperm.xlu0 %7122, %v9087_v10   ;;  %v1855_v24 = vmul.f32 %v8743_v19, %v12267_v23  ;;  %v1857_v21 = vmul.f32 %v8747_v4, %v12267_v23  ;;  %v1754_v19 = vadd.f32 %v7444_v29, %v1738_v41  ;;  %v1859_v22 = vmul.f32 %v8753_v9, %v12267_v23  ;;  %v12271_v41 = vld [vmem:[#allocation89_spill] sm:$0xff] }
 0x282   : > { %v9093_v59 = vpop.permute.xlu1 %2453  ;;  %v1749_v51 = vadd.f32 %v7444_v29, %v1733_v49  ;;  %v1755_v55 = vadd.f32 %v7444_v29, %v1739_v61  ;;  %v1756_v49 = vadd.f32 %v7444_v29, %v1740_v38  ;;  %v1860_v3 = vmul.f32 %v8767_v47, %v12267_v23  ;;  %v9184_v38 = vld [vmem:[%s7524_s23 + $0x2b9] sm:$0xff] }
 0x283   : > { %12263 = vst [vmem:[#allocation87_spill] sm:$0xff] %v9093_v59  ;;  %v9095_v18 = vpop.permute.xlu0 %2448  ;;  %v1744_v59 = vadd.f32 %v7444_v29, %v1728_v33  ;;  %v1863_v9 = vmul.f32 %v8773_v63, %v12267_v23  ;;  %v1867_v47 = vmul.f32 %v8783_v27, %v12267_v23  ;;  %12273 = vst [vmem:[#allocation14_spill] sm:$0xff] %v9184_v38 }
 0x284   : > { %12264 = vst [vmem:[#allocation88_spill] sm:$0xff] %v9095_v18  ;;  %v1735_v18 = vmul.f32 %v8713_v2, %v12260_v11  ;;  %v1741_v2 = vmul.f32 %v8735_v26, %v12260_v11  ;;  %3065 = vperm.xlu1 %7123, %v8730_v42   ;;  %v1854_v26 = vmul.f32 %v8745_v54, %v12267_v23 }
 0x285   : > { %3060 = vperm.xlu0 %7122, %v8733_v5   ;;  %v1856_v42 = vmul.f32 %v8749_v58, %v12267_v23  ;;  %v1871_v54 = vadd.f32 %v1855_v24, %v1743_v32  ;;  %v1861_v58 = vmul.f32 %v8765_v34, %v12267_v23  ;;  %v9154_v32 = vld [vmem:[%s7524_s23 + $0x2a1] sm:$0xff]  ;;  %v1864_v34 = vmul.f32 %v8779_v25, %v12267_v23 }
 0x286   : > { %v9120_v33 = vpop.permute.xlu1 %2463  ;;  %v1751_v30 = vadd.f32 %v7444_v29, %v1735_v18  ;;  %v1757_v11 = vadd.f32 %v7444_v29, %v1741_v2  ;;  %v1870_v4 = vadd.f32 %v1854_v26, %v1742_v48  ;;  %12269 = vst [vmem:[#allocation10_spill] sm:$0xff] %v9154_v32  ;;  %v1876_v61 = vadd.f32 %v1860_v3, %v1748_v28  ;;  %v9181_v2 = vld [vmem:[%s7524_s23 + $0x2c1] sm:$0xff] }
 0x287   : > { %12265 = vst [vmem:[#allocation3_spill] sm:$0xff] %v9120_v33  ;;  %v9122_v10 = vpop.permute.xlu0 %2458  ;;  %v1750_v33 = vadd.f32 %v7444_v29, %v1734_v1  ;;  %v1858_v1 = vmul.f32 %v8755_v45, %v12267_v23  ;;  %v1865_v45 = vmul.f32 %v8777_v37, %v12267_v23  ;;  %v1869_v37 = vmul.f32 %v8795_v60, %v12267_v23 }
 0x288   : > { %12266 = vst [vmem:[#allocation4_spill] sm:$0xff] %v9122_v10  ;;  %v1752_v10 = vadd.f32 %v7444_v29, %v1736_v46  ;;  %3075 = vperm.xlu1 %7123, %v8910_v62   ;;  %v9151_v46 = vld [vmem:[%s7524_s23 + $0x2a9] sm:$0xff]  ;;  %v1873_v29 = vadd.f32 %v1857_v21, %v1745_v36  ;;  %v1862_v62 = vmul.f32 %v8775_v20, %v12267_v23  ;;  %12272 = vst [vmem:[#allocation13_spill] sm:$0xff] %v9181_v2 }
 0x289   : > { %3070 = vperm.xlu0 %7122, %v8913_v43   ;;  %12268 = vst [vmem:[#allocation9_spill] sm:$0xff] %v9151_v46  ;;  %v1872_v43 = vadd.f32 %v1856_v42, %v1744_v59  ;;  %v1866_v36 = vmul.f32 %v8785_v53, %v12267_v23  ;;  %v1875_v20 = vadd.f32 %v1859_v22, %v1747_v52 }
 0x28a   : > { %v9136_v5 = vpop.permute.xlu1 %2473  ;;  %v1868_v59 = vmul.f32 %v8797_v17, %v12267_v23  ;;  %v1874_v25 = vadd.f32 %v1858_v1, %v1746_v35  ;;  %v1877_v27 = vadd.f32 %v1861_v58, %v1749_v51  ;;  %v1983_v53 = vmul.f32 %v8803_v40, %v12271_v41  ;;  %v12274_v35 = vld [vmem:[#allocation17_spill] sm:$0xff]  ;;  %v12277_v58 = vld [vmem:[#allocation20_spill] sm:$0xff] }
 0x28b   : > { %v9138_v18 = vpop.permute.xlu0 %2468  ;;  %v1879_v52 = vadd.f32 %v1863_v9, %v1751_v30  ;;  %v1878_v24 = vadd.f32 %v1862_v62, %v1750_v33  ;;  %v1881_v60 = vadd.f32 %v1865_v45, %v1753_v7  ;;  %v1982_v17 = vmul.f32 %v8805_v56, %v12271_v41  ;;  %v12278_v56 = vld [vmem:[#allocation21_spill] sm:$0xff]  ;;  %v12279_v33 = vld [vmem:[#allocation22_spill] sm:$0xff]  ;;  %v12282_v62 = vld [vmem:[#allocation27_spill] sm:$0xff] }
 0x28c   : > { %3085 = vperm.xlu1 %7123, %v9151_v46   ;;  %v1880_v26 = vadd.f32 %v1864_v34, %v1752_v10  ;;  %v1883_v21 = vadd.f32 %v1867_v47, %v1755_v55  ;;  %v1882_v42 = vadd.f32 %v1866_v36, %v1754_v19  ;;  %v1985_v51 = vmul.f32 %v12274_v35, %v12271_v41  ;;  %v12280_v19 = vld [vmem:[#allocation25_spill] sm:$0xff]  ;;  %v12283_v34 = vld [vmem:[#allocation28_spill] sm:$0xff]  ;;  %v12286_v35 = vld [vmem:[#allocation31_spill] sm:$0xff] }
 0x28d   : > { %3080 = vperm.xlu0 %7122, %v9154_v32   ;;  %v1885_v40 = vadd.f32 %v1869_v37, %v1757_v11  ;;  %v1884_v1 = vadd.f32 %v1868_v59, %v1756_v49  ;;  %v1984_v30 = vmul.f32 %v12277_v58, %v12271_v41  ;;  %v1999_v7 = vadd.f32 %v1983_v53, %v1871_v54  ;;  %v12281_v11 = vld [vmem:[#allocation26_spill] sm:$0xff]  ;;  %v12284_v36 = vld [vmem:[#allocation29_spill] sm:$0xff] }
 0x28e   : > { %v9168_v48 = vpop.permute.xlu1 %2483  ;;  %v1987_v10 = vmul.f32 %v12278_v56, %v12271_v41  ;;  %v1986_v55 = vmul.f32 %v12279_v33, %v12271_v41  ;;  %v1989_v3 = vmul.f32 %v12280_v19, %v12271_v41  ;;  %v1998_v9 = vadd.f32 %v1982_v17, %v1870_v4  ;;  %v12285_v59 = vld [vmem:[#allocation30_spill] sm:$0xff]  ;;  %v12287_v33 = vld [vmem:[#allocation32_spill] sm:$0xff] }
 0x28f   : > { %v9170_v63 = vpop.permute.xlu0 %2478  ;;  %v1988_v49 = vmul.f32 %v12281_v11, %v12271_v41  ;;  %v1991_v45 = vmul.f32 %v12282_v62, %v12271_v41  ;;  %v1990_v47 = vmul.f32 %v12283_v34, %v12271_v41  ;;  %v2001_v54 = vadd.f32 %v1985_v51, %v1873_v29  ;;  %v12288_v11 = vld [vmem:[#allocation35_spill] sm:$0xff] }
 0x290   : > { %12270 = vst [vmem:[#allocation12_spill] sm:$0xff] %v9170_v63  ;;  %3095 = vperm.xlu1 %7123, %v9181_v2   ;;  %v1993_v37 = vmul.f32 %v12284_v36, %v12271_v41  ;;  %v1992_v53 = vmul.f32 %v12285_v59, %v12271_v41  ;;  %v1995_v58 = vmul.f32 %v12286_v35, %v12271_v41  ;;  %v12289_v51 = vld [vmem:[#allocation15_spill] sm:$0xff]  ;;  %v12290_v59 = vld [vmem:[#allocation36_spill] sm:$0xff] }
 0x291   : > { %3090 = vperm.xlu0 %7122, %v9184_v38   ;;  %v2000_v56 = vadd.f32 %v1984_v30, %v1872_v43  ;;  %v1994_v19 = vmul.f32 %v12287_v33, %v12271_v41  ;;  %v1997_v29 = vmul.f32 %v12288_v11, %v12271_v41  ;;  %v2003_v62 = vadd.f32 %v1987_v10, %v1875_v20  ;;  %v12291_v43 = vld [vmem:[#allocation90_spill] sm:$0xff]  ;;  %v12292_v30 = vld [vmem:[#allocation37_spill] sm:$0xff] }
 0x292   : > { %v9190_v28 = vpop.permute.xlu1 %2493  ;;  %v2002_v34 = vadd.f32 %v1986_v55, %v1874_v25  ;;  %v2005_v36 = vadd.f32 %v1989_v3, %v1877_v27  ;;  %v1996_v35 = vmul.f32 %v12290_v59, %v12271_v41  ;;  %v2004_v23 = vadd.f32 %v1988_v49, %v1876_v61  ;;  %v12294_v61 = vld [vmem:[#allocation39_spill] sm:$0xff]  ;;  %v12297_v55 = vld [vmem:[#allocation41_spill] sm:$0xff]  ;;  %v12298_v49 = vld [vmem:[#allocation42_spill] sm:$0xff] }
 0x293   : > { %12275 = vst [vmem:[#allocation17_spill] sm:$0xff] %v9190_v28  ;;  %v9192_v22 = vpop.permute.xlu0 %2488  ;;  %v2007_v38 = vadd.f32 %v1991_v45, %v1879_v52  ;;  %v2006_v2 = vadd.f32 %v1990_v47, %v1878_v24  ;;  %v2112_v32 = vmul.f32 %v12292_v30, %v12291_v43  ;;  %v2009_v33 = vadd.f32 %v1993_v37, %v1881_v60  ;;  %v12295_v24 = vld [vmem:[#allocation60_spill] sm:$0xff]  ;;  %v9247_v47 = vld [vmem:[%s7524_s23 + $0xfa] sm:$0xff] }
 0x294   : > { %12276 = vst [vmem:[#allocation99_spill] sm:$0xff] %v9192_v22  ;;  %3153 = vperm.xlu1 %7123, %v8760_v31   ;;  %v2008_v11 = vadd.f32 %v1992_v53, %v1880_v26  ;;  %v2011_v46 = vadd.f32 %v1995_v58, %v1883_v21  ;;  %v12293_v31 = vld [vmem:[#allocation38_spill] sm:$0xff]  ;;  %v2010_v27 = vadd.f32 %v1994_v19, %v1882_v42  ;;  %v12296_v26 = vld [vmem:[#allocation40_spill] sm:$0xff]  ;;  %12299 = vst [vmem:[#allocation20_spill] sm:$0xff] %v9247_v47 }
 0x295   : > { %3148 = vperm.xlu0 %7122, %v12289_v51   ;;  %v2111_v51 = vmul.f32 %v12293_v31, %v12291_v43  ;;  %v2013_v10 = vadd.f32 %v1997_v29, %v1885_v40  ;;  %v2114_v52 = vmul.f32 %v12294_v61, %v12291_v43  ;;  %v2012_v60 = vadd.f32 %v1996_v35, %v1884_v1  ;;  %v9250_v42 = vld [vmem:[%s7524_s23 + $0xf2] sm:$0xff]  ;;  %v12301_v37 = vld [vmem:[#allocation43_spill] sm:$0xff]  ;;  %v12302_v53 = vld [vmem:[#allocation44_spill] sm:$0xff] }
 0x296   : > { %v9216_v4 = vpop.permute.xlu1 %2551  ;;  %v2113_v21 = vmul.f32 %v12296_v26, %v12291_v43  ;;  %v2116_v3 = vmul.f32 %v12297_v55, %v12291_v43  ;;  %v2115_v45 = vmul.f32 %v12298_v49, %v12291_v43  ;;  %12300 = vst [vmem:[#allocation21_spill] sm:$0xff] %v9250_v42  ;;  %v2128_v40 = vadd.f32 %v2112_v32, %v1999_v7  ;;  %v12303_v58 = vld [vmem:[#allocation45_spill] sm:$0xff]  ;;  %v12304_v59 = vld [vmem:[#allocation46_spill] sm:$0xff]  ;;  %v12305_v30 = vld [vmem:[#allocation47_spill] sm:$0xff] }
 0x297   : > { %v9218_v17 = vpop.permute.xlu0 %2546  ;;  %v2117_v1 = vmul.f32 %v12302_v53, %v12291_v43  ;;  %v2120_v19 = vmul.f32 %v12303_v58, %v12291_v43  ;;  %v2127_v29 = vadd.f32 %v2111_v51, %v1998_v9  ;;  %v2119_v35 = vmul.f32 %v12304_v59, %v12291_v43  ;;  %v12306_v32 = vld [vmem:[#allocation11_spill] sm:$0xff]  ;;  %v12307_v55 = vld [vmem:[#allocation48_spill] sm:$0xff]  ;;  %v12310_v22 = vld [vmem:[#allocation53_spill] sm:$0xff] }
 0x298   : > { %3163 = vperm.xlu1 %7123, %v8940_v12   ;;  %v2118_v12 = vmul.f32 %v12301_v37, %v12291_v43  ;;  %v2122_v31 = vmul.f32 %v12305_v30, %v12291_v43  ;;  %v2121_v7 = vmul.f32 %v12306_v32, %v12291_v43  ;;  %v2130_v26 = vadd.f32 %v2114_v52, %v2001_v54  ;;  %v12308_v9 = vld [vmem:[#allocation51_spill] sm:$0xff]  ;;  %v12309_v59 = vld [vmem:[#allocation52_spill] sm:$0xff]  ;;  %v9277_v32 = vld [vmem:[%s7524_s23 + $0x112] sm:$0xff] }
 0x299   : > { %3158 = vperm.xlu0 %7122, %v12295_v24   ;;  %v2124_v49 = vmul.f32 %v12307_v55, %v12291_v43  ;;  %v2123_v51 = vmul.f32 %v12308_v9, %v12291_v43  ;;  %v2129_v37 = vadd.f32 %v2113_v21, %v2000_v56  ;;  %v2132_v53 = vadd.f32 %v2116_v3, %v2003_v62  ;;  %v9280_v41 = vld [vmem:[%s7524_s23 + $0x10a] sm:$0xff] }
 0x29a   : > { %v9232_v20 = vpop.permute.xlu1 %2561  ;;  %v2131_v58 = vadd.f32 %v2115_v45, %v2002_v34  ;;  %v2126_v30 = vmul.f32 %v12309_v59, %v12291_v43  ;;  %v2134_v54 = vadd.f32 %v2118_v12, %v2005_v36  ;;  %v2133_v52 = vadd.f32 %v2117_v1, %v2004_v23  ;;  %v12312_v56 = vld [vmem:[#allocation49_spill] sm:$0xff]  ;;  %v12313_v59 = vld [vmem:[#allocation50_spill] sm:$0xff] }
 0x29b   : > { %v9234_v25 = vpop.permute.xlu0 %2556  ;;  %v2136_v55 = vadd.f32 %v2120_v19, %v2007_v38  ;;  %v2125_v9 = vmul.f32 %v12310_v22, %v12291_v43  ;;  %v2135_v28 = vadd.f32 %v2119_v35, %v2006_v2  ;;  %v2137_v63 = vadd.f32 %v2121_v7, %v2008_v11  ;;  %v12314_v2 = vld [vmem:[#allocation54_spill] sm:$0xff]  ;;  %v12315_v22 = vld [vmem:[#allocation55_spill] sm:$0xff]  ;;  %v12316_v11 = vld [vmem:[#allocation56_spill] sm:$0xff] }
 0x29c   : > { %3173 = vperm.xlu1 %7123, %v9247_v47   ;;  %v2138_v47 = vadd.f32 %v2122_v31, %v2009_v33  ;;  %v2140_v3 = vadd.f32 %v2124_v49, %v2011_v46  ;;  %v2139_v45 = vadd.f32 %v2123_v51, %v2010_v27  ;;  %v2142_v23 = vadd.f32 %v2126_v30, %v2013_v10  ;;  %v12317_v46 = vld [vmem:[#allocation59_spill] sm:$0xff]  ;;  %v12319_v31 = vld [vmem:[#allocation64_spill] sm:$0xff]  ;;  %v12320_v51 = vld [vmem:[#allocation65_spill] sm:$0xff] }
 0x29d   : > { %3168 = vperm.xlu0 %7122, %v9250_v42   ;;  %v12311_v42 = vld [vmem:[#allocation91_spill] sm:$0xff]  ;;  %v2141_v1 = vadd.f32 %v2125_v9, %v2012_v60 }
 0x29e   : > { %v9264_v61 = vpop.permute.xlu1 %2571  ;;  %v2240_v62 = vmul.f32 %v12312_v56, %v12311_v42  ;;  %v2239_v36 = vmul.f32 %v12313_v59, %v12311_v42  ;;  %v2242_v38 = vmul.f32 %v12314_v2, %v12311_v42  ;;  %v2241_v33 = vmul.f32 %v12315_v22, %v12311_v42  ;;  %v12318_v19 = vld [vmem:[#allocation63_spill] sm:$0xff]  ;;  %v12321_v56 = vld [vmem:[#allocation66_spill] sm:$0xff] }
 0x29f   : > { %v9266_v24 = vpop.permute.xlu0 %2566  ;;  %v2244_v12 = vmul.f32 %v12316_v11, %v12311_v42  ;;  %v2243_v27 = vmul.f32 %v12317_v46, %v12311_v42  ;;  %v2246_v35 = vmul.f32 %v12318_v19, %v12311_v42  ;;  %v2245_v7 = vmul.f32 %v12319_v31, %v12311_v42  ;;  %v12323_v19 = vld [vmem:[#allocation67_spill] sm:$0xff] }
 0x2a0   : > { %3183 = vperm.xlu1 %7123, %v9277_v32   ;;  %v2256_v10 = vadd.f32 %v2240_v62, %v2128_v40  ;;  %v2248_v49 = vmul.f32 %v8953_v44, %v12311_v42  ;;  %v2247_v30 = vmul.f32 %v12320_v51, %v12311_v42  ;;  %v2250_v59 = vmul.f32 %v12321_v56, %v12311_v42  ;;  %v12322_v44 = vld [vmem:[#allocation16_spill] sm:$0xff] }
 0x2a1   : > { %3178 = vperm.xlu0 %7122, %v9280_v41   ;;  %v2255_v2 = vadd.f32 %v2239_v36, %v2127_v29  ;;  %v2249_v22 = vmul.f32 %v8961_v6, %v12311_v42  ;;  %v2252_v40 = vmul.f32 %v8963_v0, %v12311_v42  ;;  %v2258_v62 = vadd.f32 %v2242_v38, %v2130_v26 }
 0x2a2   : > { %v9286_v34 = vpop.permute.xlu1 %2581  ;;  %v2257_v11 = vadd.f32 %v2241_v33, %v2129_v37  ;;  %v2260_v46 = vadd.f32 %v2244_v12, %v2132_v53  ;;  %v2251_v31 = vmul.f32 %v12323_v19, %v12311_v42  ;;  %v2259_v51 = vadd.f32 %v2243_v27, %v2131_v58  ;;  %v12325_v58 = vld [vmem:[#allocation96_spill] sm:$0xff] }
 0x2a3   : > { %v9288_v21 = vpop.permute.xlu0 %2576  ;;  %v2262_v56 = vadd.f32 %v2246_v35, %v2134_v54  ;;  %v2261_v43 = vadd.f32 %v2245_v7, %v2133_v52  ;;  %v2254_v29 = vmul.f32 %v8975_v13, %v12311_v42  ;;  %v2264_v6 = vadd.f32 %v2248_v49, %v2136_v55  ;;  %v12326_v54 = vld [vmem:[#allocation78_spill] sm:$0xff]  ;;  %v12327_v33 = vld [vmem:[#allocation68_spill] sm:$0xff]  ;;  %v12328_v13 = vld [vmem:[#allocation71_spill] sm:$0xff] }
 0x2a4   : > { %3193 = vperm.xlu1 %7123, %v8790_v39   ;;  %v2263_v0 = vadd.f32 %v2247_v30, %v2135_v28  ;;  %v2266_v36 = vadd.f32 %v2250_v59, %v2138_v47  ;;  %v12324_v39 = vld [vmem:[#allocation77_spill] sm:$0xff]  ;;  %v2265_v53 = vadd.f32 %v2249_v22, %v2137_v63  ;;  %v2268_v38 = vadd.f32 %v2252_v40, %v2140_v3  ;;  %v9348_v3 = vld [vmem:[%s7524_s23 + $0x2a2] sm:$0xff] }
 0x2a5   : > { %3188 = vperm.xlu0 %7122, %v12322_v44   ;;  %v2253_v44 = vmul.f32 %v12324_v39, %v12311_v42  ;;  %v2368_v52 = vmul.f32 %v12326_v54, %v12325_v58  ;;  %v9336_v55 = vadd.f32 %v2251_v31, %v2139_v45  ;;  %v2367_v28 = vmul.f32 %v8983_v14, %v12325_v58  ;;  %v9345_v63 = vld [vmem:[%s7524_s23 + $0x2aa] sm:$0xff]  ;;  %v12330_v45 = vld [vmem:[#allocation75_spill] sm:$0xff] }
 0x2a6   : > { %v9312_v60 = vpop.permute.xlu1 %2591  ;;  %v2370_v47 = vmul.f32 %v8987_v8, %v12325_v58  ;;  %v2369_v12 = vmul.f32 %v8989_v57, %v12325_v58  ;;  %v2270_v27 = vadd.f32 %v2254_v29, %v2142_v23  ;;  %v12329_v35 = vld [vmem:[#allocation81_spill] sm:$0xff]  ;;  %v2371_v49 = vmul.f32 %v12330_v45, %v12325_v58  ;;  %v12331_v8 = vld [vmem:[#allocation18_spill] sm:$0xff]  ;;  %v12332_v59 = vld [vmem:[#allocation19_spill] sm:$0xff] }
 0x2a7   : > { %v9314_v9 = vpop.permute.xlu0 %2586  ;;  %v2372_v7 = vmul.f32 %v12329_v35, %v12325_v58  ;;  %v2374_v14 = vmul.f32 %v9011_v50, %v12325_v58  ;;  %v2269_v30 = vadd.f32 %v2253_v44, %v2141_v1  ;;  %v2373_v57 = vmul.f32 %v12331_v8, %v12325_v58  ;;  %v12333_v1 = vld [vmem:[#allocation85_spill] sm:$0xff]  ;;  %v9378_v35 = vld [vmem:[%s7524_s23 + $0x2ba] sm:$0xff] }
 0x2a8   : > { %3203 = vperm.xlu1 %7123, %v12327_v33   ;;  %v2376_v22 = vmul.f32 %v12332_v59, %v12325_v58  ;;  %v2375_v23 = vmul.f32 %v9019_v15, %v12325_v58  ;;  %v2384_v31 = vadd.f32 %v2368_v52, %v2256_v10  ;;  %v2378_v50 = vmul.f32 %v9023_v16, %v12325_v58  ;;  %v12334_v15 = vld [vmem:[#allocation58_spill] sm:$0xff]  ;;  %v12337_v45 = vld [vmem:[#allocation7_spill] sm:$0xff] }
 0x2a9   : > { %3198 = vperm.xlu0 %7122, %v12328_v13   ;;  %v2377_v29 = vmul.f32 %v12333_v1, %v12325_v58  ;;  %v2383_v39 = vadd.f32 %v2367_v28, %v2255_v2  ;;  %v2386_v44 = vadd.f32 %v2370_v47, %v2258_v62  ;;  %v2385_v54 = vadd.f32 %v2369_v12, %v2257_v11  ;;  %v9375_v13 = vld [vmem:[%s7524_s23 + $0x2c2] sm:$0xff]  ;;  %v12338_v8 = vld [vmem:[#allocation62_spill] sm:$0xff] }
 0x2aa   : > { %v9328_v26 = vpop.permute.xlu1 %2601  ;;  %v2380_v33 = vmul.f32 %v12334_v15, %v12325_v58  ;;  %12335 = vst [vmem:[#allocation22_spill] sm:$0xff] %v9375_v13  ;;  %12336 = vst [vmem:[#allocation25_spill] sm:$0xff] %v9378_v35  ;;  %v2388_v10 = vadd.f32 %v2372_v7, %v2260_v46  ;;  %v2387_v52 = vadd.f32 %v2371_v49, %v2259_v51  ;;  %v12339_v62 = vld [vmem:[#allocation98_spill] sm:$0xff]  ;;  %v12340_v51 = vld [vmem:[#allocation5_spill] sm:$0xff] }
 0x2ab   : > { %v9330_v37 = vpop.permute.xlu0 %2596  ;;  %v2390_v16 = vadd.f32 %v2374_v14, %v2262_v56  ;;  %v2497_v59 = vmul.f32 %v12338_v8, %v12337_v45  ;;  %v9382_v1 = vadd.f32 %v2373_v57, %v2261_v43  ;;  %v9384_v42 = vadd.f32 %v2376_v22, %v2264_v6  ;;  %v12341_v6 = vld [vmem:[#allocation93_spill] sm:$0xff]  ;;  %v12342_v7 = vld [vmem:[#allocation6_spill] sm:$0xff] }
 0x2ac   : > { %3213 = vperm.xlu1 %7123, %v9345_v63   ;;  %v9386_v2 = vadd.f32 %v2375_v23, %v2263_v0  ;;  %v2496_v11 = vmul.f32 %v12339_v62, %v12337_v45  ;;  %v9394_v12 = vadd.f32 %v2378_v50, %v2266_v36  ;;  %v9396_v46 = vadd.f32 %v2377_v29, %v2265_v53  ;;  %v12343_v36 = vld [vmem:[#allocation8_spill] sm:$0xff]  ;;  %v12344_v14 = vld [vmem:[#allocation97_spill] sm:$0xff] }
 0x2ad   : > { %3208 = vperm.xlu0 %7122, %v9348_v3   ;;  %v2499_v56 = vmul.f32 %v12340_v51, %v12337_v45  ;;  %v9402_v43 = vadd.f32 %v2380_v33, %v2268_v38  ;;  %v2379_v0 = vmul.f32 %v12341_v6, %v12325_v58  ;;  %v2498_v49 = vmul.f32 %v12342_v7, %v12337_v45  ;;  %v12345_v22 = vld [vmem:[#allocation61_spill] sm:$0xff]  ;;  %v9423_v7 = vld [vmem:[%s8128_s27 + $0x8] ss:$0 sm:$0xff] }
 0x2ae   : > { %v9362_v40 = vpop.permute.xlu1 %2611  ;;  %v2625_v53 = vmul.f32 %v9216_v4, %v12343_v36  ;;  %v2382_v57 = vmul.f32 %v12344_v14, %v12325_v58  ;;  %v2381_v23 = vmul.f32 %v12345_v22, %v12325_v58  ;;  %v2513_v50 = vadd.f32 %v2497_v59, %v2384_v31  ;;  %v12346_v15 = vld [vmem:[#allocation73_spill] sm:$0xff]  ;;  %v12349_v14 = vld [vmem:[#allocation74_spill] sm:$0xff]  ;;  %v12350_v22 = vld [vmem:[#allocation87_spill] sm:$0xff] }
 0x2af   : > { %v9364_v19 = vpop.permute.xlu0 %2606  ;;  %v2624_v38 = vmul.f32 %v9218_v17, %v12343_v36  ;;  %v2512_v29 = vadd.f32 %v2496_v11, %v2383_v39  ;;  %v2501_v33 = vmul.f32 %v12346_v15, %v12337_v45  ;;  %v2627_v8 = vmul.f32 %v9232_v20, %v12343_v36  ;;  %v12347_v17 = vld [vmem:[#allocation23_spill] sm:$0xff]  ;;  %v12348_v39 = vld [vmem:[#allocation24_spill] sm:$0xff] }
 0x2b0   : > { %3223 = vperm.xlu1 %7123, %v9375_v13   ;;  %v2626_v4 = vmul.f32 %v9234_v25, %v12343_v36  ;;  %v2515_v6 = vadd.f32 %v2499_v56, %v2386_v44  ;;  %v2514_v11 = vadd.f32 %v2498_v49, %v2385_v54  ;;  %v2500_v20 = vmul.f32 %v12349_v14, %v12337_v45 }
 0x2b1   : > { %3218 = vperm.xlu0 %7122, %v9378_v35   ;;  %v2503_v25 = vmul.f32 %v12350_v22, %v12337_v45  ;;  %v2641_v15 = vadd.f32 %v2625_v53, %v2513_v50  ;;  %v9434_v44 = vadd.f32 %v2379_v0, %v9336_v55  ;;  %v9436_v56 = vadd.f32 %v2382_v57, %v2270_v27  ;;  %v12351_v53 = vld [vmem:[#allocation80_spill] sm:$0xff] }
 0x2b2   : > { %v9390_v28 = vpop.permute.xlu1 %2621  ;;  %v2517_v58 = vadd.f32 %v2501_v33, %v2388_v10  ;;  %v2642_v35 = vadd.f32 %v2626_v4, %v2514_v11  ;;  %v12352_v55 = vld [vmem:[#allocation72_spill] sm:$0xff]  ;;  %v2516_v27 = vadd.f32 %v2500_v20, %v2387_v52  ;;  %v12354_v10 = vld [vmem:[#allocation3_spill] sm:$0xff]  ;;  %v2629_v4 = vmul.f32 %v9264_v61, %v12343_v36 }
 0x2b3   : > { %v9392_v47 = vpop.permute.xlu0 %2616  ;;  %v2519_v0 = vadd.f32 %v2503_v25, %v2390_v16  ;;  %v12355_v50 = vld [vmem:[#allocation4_spill] sm:$0xff]  ;;  %v2628_v52 = vmul.f32 %v9266_v24, %v12343_v36  ;;  %v2631_v16 = vmul.f32 %v9286_v34, %v12343_v36 }
 0x2b4   : > { %3282 = vperm.xlu1 %7123, %v12347_v17   ;;  %v2643_v17 = vadd.f32 %v2627_v8, %v2515_v6  ;;  %v2630_v6 = vmul.f32 %v9288_v21, %v12343_v36  ;;  %v12356_v25 = vld [vmem:[#allocation76_spill] sm:$0xff]  ;;  %v9470_v21 = vld [vmem:[%s7524_s23 + $0x120] sm:$0xff] }
 0x2b5   : > { %3277 = vperm.xlu0 %7122, %v12348_v39   ;;  %v12357_v61 = vld [vmem:[#allocation84_spill] sm:$0xff] }
 0x2b6   : > { %v2680_v62 = vpop.permute.xlu1 %2679 }
 0x2b7   : > { %v2675_v51 = vpop.permute.xlu0 %2674  ;;  %v2753_v31 = vmul.f32 %v9423_v7, %v2680_v62  ;;  %v9438_v62 = vadd.f32 %v2381_v23, %v2269_v30  ;;  %v12353_v30 = vld [vmem:[#allocation88_spill] sm:$0xff]  ;;  %v2505_v23 = vmul.f32 %v12354_v10, %v12337_v45 }
 0x2b8   : > { %v2752_v59 = vmul.f32 %v9423_v7, %v2675_v51  ;;  %v2640_v51 = vadd.f32 %v2624_v38, %v2512_v29  ;;  %3292 = vperm.xlu1 %7123, %v12351_v53   ;;  %v2502_v57 = vmul.f32 %v12353_v30, %v12337_v45  ;;  %v2504_v38 = vmul.f32 %v12355_v50, %v12337_v45 }
 0x2b9   : > { %v2769_v39 = vadd.f32 %v2753_v31, %v2641_v15  ;;  %3287 = vperm.xlu0 %7122, %v12352_v55   ;;  %v2507_v29 = vmul.f32 %v9136_v5, %v12337_v45  ;;  %v2521_v24 = vadd.f32 %v2505_v23, %v9384_v42  ;;  %v2647_v42 = vadd.f32 %v2631_v16, %v2519_v0 }
 0x2ba   : > { %v2690_v54 = vpop.permute.xlu1 %2689  ;;  %v2768_v13 = vadd.f32 %v2752_v59, %v2640_v51  ;;  %v2518_v15 = vadd.f32 %v2502_v57, %v9382_v1  ;;  %v2645_v1 = vadd.f32 %v2629_v4, %v2517_v58  ;;  %v2633_v57 = vmul.f32 %v9312_v60, %v12343_v36 }
 0x2bb   : > { %v2685_v49 = vpop.permute.xlu0 %2684  ;;  %v2755_v14 = vmul.f32 %v9423_v7, %v2690_v54  ;;  %v2785_v11 = vmax.f32 %v2769_v39, 0.0  ;;  %v2506_v39 = vmul.f32 %v9138_v18, %v12337_v45 }
 0x2bc   : > { %v2754_v22 = vmul.f32 %v9423_v7, %v2685_v49  ;;  %v2784_v5 = vmax.f32 %v2768_v13, 0.0  ;;  %3302 = vperm.xlu1 %7123, %v12356_v25   ;;  %v2520_v13 = vadd.f32 %v2504_v38, %v9386_v2  ;;  %v2646_v30 = vadd.f32 %v2630_v6, %v2518_v15 }
 0x2bd   : > { %v2771_v33 = vadd.f32 %v2755_v14, %v2643_v17  ;;  %3297 = vperm.xlu0 %7122, %v12357_v61   ;;  %v9467_v17 = vld [vmem:[%s7524_s23 + $0x128] sm:$0xff]  ;;  %v2523_v14 = vadd.f32 %v2507_v29, %v9394_v12  ;;  %v2632_v12 = vmul.f32 %v9314_v9, %v12343_v36  ;;  %v2522_v38 = vadd.f32 %v2506_v39, %v9396_v46  ;;  %v12359_v46 = vld [vmem:[#allocation34_spill] sm:$0xff] }
 0x2be   : > { %v2770_v8 = vadd.f32 %v2754_v22, %v2642_v35  ;;  %v2700_v31 = vpop.permute.xlu1 %2699  ;;  %v2644_v22 = vadd.f32 %v2628_v52, %v2516_v27  ;;  %v2635_v27 = vmul.f32 %v9328_v26, %v12343_v36  ;;  %v2634_v29 = vmul.f32 %v9330_v37, %v12343_v36  ;;  %v12358_v37 = vld [vmem:[#allocation33_spill] sm:$0xff] }
 0x2bf   : > { %v2695_v59 = vpop.permute.xlu0 %2694  ;;  %v2787_v20 = vmax.f32 %v2771_v33, 0.0  ;;  %v2757_v51 = vmul.f32 %v9423_v7, %v2700_v31  ;;  %v2649_v16 = vadd.f32 %v2633_v57, %v2521_v24  ;;  %v2648_v25 = vadd.f32 %v2632_v12, %v2520_v13  ;;  %v12364_v13 = vld [vmem:[#allocation99_spill] sm:$0xff] }
 0x2c0   : > { %v2786_v35 = vmax.f32 %v2770_v8, 0.0  ;;  %v2756_v34 = vmul.f32 %v9423_v7, %v2695_v59  ;;  %3312 = vperm.xlu1 %7123, %v9467_v17   ;;  %v2651_v61 = vadd.f32 %v2635_v27, %v2523_v14  ;;  %v2650_v15 = vadd.f32 %v2634_v29, %v2522_v38 }
 0x2c1   : > { %v2801_v54 = vmax.f32 %v2785_v11, %v2787_v20  ;;  %3307 = vperm.xlu0 %7122, %v9470_v21   ;;  %v2773_v18 = vadd.f32 %v2757_v51, %v2645_v1  ;;  %v12360_v20 = vld [vmem:[#allocation12_spill] sm:$0xff]  ;;  %v2510_v14 = vmul.f32 %v12364_v13, %v12337_v45 }
 0x2c2   : > { %v2800_v49 = vmax.f32 %v2784_v5, %v2786_v35  ;;  %v2710_v53 = vpop.permute.xlu1 %2709  ;;  %v2772_v2 = vadd.f32 %v2756_v34, %v2644_v22  ;;  %v2509_v5 = vmul.f32 %v9168_v48, %v12337_v45  ;;  %v2508_v35 = vmul.f32 %v12360_v20, %v12337_v45  ;;  %v12363_v48 = vld [vmem:[#allocation17_spill] sm:$0xff] }
 0x2c3   : > { %v2705_v55 = vpop.permute.xlu0 %2704  ;;  %v2845_v10 = vrot.slane %v2801_v54, 1  ;;  %v2759_v50 = vmul.f32 %v9423_v7, %v2710_v53  ;;  %v2789_v6 = vmax.f32 %v2773_v18, 0.0  ;;  %v12362_v53 = vld [vmem:[#allocation57_spill] sm:$0xff] }
 0x2c4   : > { %v2812_v23 = vrot.slane %v2800_v49, 1  ;;  %v2758_v58 = vmul.f32 %v9423_v7, %v2705_v55  ;;  %3322 = vperm.xlu1 %7123, %v12358_v37   ;;  %v2788_v31 = vmax.f32 %v2772_v2, 0.0  ;;  %v2511_v55 = vmul.f32 %v12363_v48, %v12337_v45 }
 0x2c5   : > { %v2853_v0 = vmax.f32 %v2801_v54, %v2845_v10  ;;  %v2775_v33 = vadd.f32 %v2759_v50, %v2647_v42  ;;  %3317 = vperm.xlu0 %7122, %v12359_v46   ;;  %v12361_v42 = vld [vmem:[#allocation92_spill] sm:$0xff]  ;;  %v2637_v10 = vmul.f32 %v9362_v40, %v12343_v36  ;;  %v2639_v50 = vmul.f32 %v9390_v28, %v12343_v36 }
 0x2c6   : > { %v2820_v60 = vmax.f32 %v2800_v49, %v2812_v23  ;;  %v2774_v8 = vadd.f32 %v2758_v58, %v2646_v30  ;;  %v2720_v4 = vpop.permute.xlu1 %2719  ;;  %v2636_v23 = vmul.f32 %v9364_v19, %v12343_v36  ;;  %v2638_v58 = vmul.f32 %v9392_v47, %v12343_v36  ;;  %v12366_v19 = vld [vmem:[#allocation95_spill] sm:$0xff] }
 0x2c7   : > { %v2715_v52 = vpop.permute.xlu0 %2714  ;;  %2857 = vst.msk [vmem:[#allocation2 + $0x35] sm:$0x1] %vm1577_vm2, %v2853_v0  ;;  %v2761_v9 = vmul.f32 %v9423_v7, %v2720_v4  ;;  %v2791_v59 = vmax.f32 %v2775_v33, 0.0  ;;  %v2525_v4 = vadd.f32 %v2509_v5, %v9402_v43  ;;  %v2524_v28 = vadd.f32 %v2508_v35, %v9434_v44  ;;  %v9536_v44 = vld [vmem:[%s7524_s23 + $0x2d8] sm:$0xff] }
 0x2c8   : > { %2861 = vst.msk [vmem:[#allocation2 + $0x34] sm:$0x4] %vm1582_vm3, %v2853_v0  ;;  %2829 = vst.msk [vmem:[#allocation2 + $0x30] sm:$0x4] %vm1582_vm3, %v2820_v60  ;;  %v2760_v26 = vmul.f32 %v9423_v7, %v2715_v52  ;;  %v2790_v11 = vmax.f32 %v2774_v8, 0.0  ;;  %3332 = vperm.xlu1 %7123, %v12361_v42   ;;  %v12365_v8 = vld [vmem:[#allocation94_spill] sm:$0xff] }
 0x2c9   : > { %2865 = vst.msk [vmem:[#allocation2 + $0x33] sm:$0x10] %vm1587_vm4, %v2853_v0  ;;  %2833 = vst.msk [vmem:[#allocation2 + $0x2f] sm:$0x10] %vm1587_vm4, %v2820_v60  ;;  %v2803_v24 = vmax.f32 %v2789_v6, %v2791_v59  ;;  %v2777_v34 = vadd.f32 %v2761_v9, %v2649_v16  ;;  %3327 = vperm.xlu0 %7122, %v12362_v53   ;;  %v9539_v52 = vld [vmem:[%s7524_s23 + $0x2d0] sm:$0xff]  ;;  %v2527_v16 = vadd.f32 %v2511_v55, %v9436_v56 }
 0x2ca   : > { %2869 = vst.msk [vmem:[#allocation2 + $0x32] sm:$0x40] %vm1592_vm5, %v2853_v0  ;;  %2837 = vst.msk [vmem:[#allocation2 + $0x2e] sm:$0x40] %vm1592_vm5, %v2820_v60  ;;  %v2802_v51 = vmax.f32 %v2788_v31, %v2790_v11  ;;  %v2730_v39 = vpop.permute.xlu1 %2729  ;;  %v2776_v49 = vadd.f32 %v2760_v26, %v2648_v25  ;;  %v2526_v9 = vadd.f32 %v2510_v14, %v9438_v62 }
 0x2cb   : > { %2825 = vst.msk [vmem:[#allocation2 + $0x31] sm:$0x1] %vm1577_vm2, %v2820_v60  ;;  %v2725_v54 = vpop.permute.xlu0 %2724  ;;  %v2763_v1 = vmul.f32 %v9423_v7, %v2730_v39  ;;  %v2846_v30 = vrot.slane %v2803_v24, 1  ;;  %v2793_v38 = vmax.f32 %v2777_v34, 0.0  ;;  %v2653_v46 = vadd.f32 %v2637_v10, %v2525_v4 }
 0x2cc   : > { %v2762_v22 = vmul.f32 %v9423_v7, %v2725_v54  ;;  %v2813_v57 = vrot.slane %v2802_v51, 1  ;;  %v2792_v29 = vmax.f32 %v2776_v49, 0.0  ;;  %3342 = vperm.xlu1 %7123, %v12365_v8   ;;  %v2652_v6 = vadd.f32 %v2636_v23, %v2524_v28 }
 0x2cd   : > { %v2779_v18 = vadd.f32 %v2763_v1, %v2651_v61  ;;  %v2854_v12 = vmax.f32 %v2803_v24, %v2846_v30  ;;  %3337 = vperm.xlu0 %7122, %v12366_v19   ;;  %v2655_v11 = vadd.f32 %v2639_v50, %v2527_v16  ;;  %v2654_v5 = vadd.f32 %v2638_v58, %v2526_v9  ;;  %v6814_v24 = vld [vmem:[%s7524_s23 + $0xd9] sm:$0xff]  ;;  %v12367_v30 = vld [vmem:[#allocation69_spill] sm:$0xff] }
 0x2ce   : > { %v2778_v2 = vadd.f32 %v2762_v22, %v2650_v15  ;;  %v2821_v27 = vmax.f32 %v2802_v51, %v2813_v57  ;;  %v2740_v0 = vpop.permute.xlu1 %2739  ;;  %v6815_v15 = vld [vmem:[%s7524_s23 + $0xe1] sm:$0xff]  ;;  %v12368_v57 = vld [vmem:[#allocation70_spill] sm:$0xff] }
 0x2cf   : > { %v2735_v60 = vpop.permute.xlu0 %2734  ;;  %v2795_v33 = vmax.f32 %v2779_v18, 0.0  ;;  %2858 = vst.msk [vmem:[#allocation2 + $0x45] sm:$0x1] %vm1577_vm2, %v2854_v12  ;;  %v2765_v47 = vmul.f32 %v9423_v7, %v2740_v0  ;;  %v9582_v0 = vld [vmem:[%s7524_s23 + $0x129] sm:$0xff] }
 0x2d0   : > { %v2794_v40 = vmax.f32 %v2778_v2, 0.0  ;;  %2862 = vst.msk [vmem:[#allocation2 + $0x44] sm:$0x4] %vm1582_vm3, %v2854_v12  ;;  %2830 = vst.msk [vmem:[#allocation2 + $0x40] sm:$0x4] %vm1582_vm3, %v2821_v27  ;;  %v2764_v43 = vmul.f32 %v9423_v7, %v2735_v60  ;;  %3352 = vperm.xlu1 %7123, %v9536_v44   ;;  %v9585_v60 = vld [vmem:[%s7524_s23 + $0x121] sm:$0xff] }
 0x2d1   : > { %2866 = vst.msk [vmem:[#allocation2 + $0x43] sm:$0x10] %vm1587_vm4, %v2854_v12  ;;  %2834 = vst.msk [vmem:[#allocation2 + $0x3f] sm:$0x10] %vm1587_vm4, %v2821_v27  ;;  %v2805_v26 = vmax.f32 %v2793_v38, %v2795_v33  ;;  %3347 = vperm.xlu0 %7122, %v9539_v52   ;;  %v2781_v25 = vadd.f32 %v2765_v47, %v2653_v46  ;;  %v6823_v33 = vld [vmem:[%s7524_s23 + $0x291] sm:$0xff]  ;;  %v9612_v46 = vld [vmem:[%s7524_s23 + $0x2d9] sm:$0xff] }
 0x2d2   : > { %2870 = vst.msk [vmem:[#allocation2 + $0x42] sm:$0x40] %vm1592_vm5, %v2854_v12  ;;  %2838 = vst.msk [vmem:[#allocation2 + $0x3e] sm:$0x40] %vm1592_vm5, %v2821_v27  ;;  %v2804_v37 = vmax.f32 %v2792_v29, %v2794_v40  ;;  %v2750_v31 = vpop.permute.xlu1 %2749  ;;  %v2780_v56 = vadd.f32 %v2764_v43, %v2652_v6  ;;  %v12369_v12 = vld [vmem:[#allocation82_spill] sm:$0xff]  ;;  %v6822_v40 = vld [vmem:[%s7524_s23 + $0x289] sm:$0xff] }
 0x2d3   : > { %2826 = vst.msk [vmem:[#allocation2 + $0x41] sm:$0x1] %vm1577_vm2, %v2821_v27  ;;  %v2745_v59 = vpop.permute.xlu0 %2744  ;;  %v2847_v20 = vrot.slane %v2805_v26, 1  ;;  %v2767_v62 = vmul.f32 %v9423_v7, %v2750_v31  ;;  %v12370_v27 = vld [vmem:[#allocation83_spill] sm:$0xff]  ;;  %v12371_v47 = vld [vmem:[#allocation9_spill] sm:$0xff]  ;;  %v12372_v43 = vld [vmem:[#allocation10_spill] sm:$0xff] }
 0x2d4   : > { %v2814_v35 = vrot.slane %v2804_v37, 1  ;;  %v2766_v61 = vmul.f32 %v9423_v7, %v2745_v59  ;;  %3410 = vperm.xlu1 %7123, %v6815_v15   ;;  %v2797_v7 = vmax.f32 %v2781_v25, 0.0  ;;  %v2796_v22 = vmax.f32 %v2780_v56, 0.0  ;;  %v9615_v6 = vld [vmem:[%s7524_s23 + $0x2d1] sm:$0xff] }
 0x2d5   : > { %v2855_v51 = vmax.f32 %v2805_v26, %v2847_v20  ;;  %v2783_v39 = vadd.f32 %v2767_v62, %v2655_v11  ;;  %3405 = vperm.xlu0 %7122, %v6814_v24   ;;  %v12373_v26 = vld [vmem:[#allocation13_spill] sm:$0xff]  ;;  %v6831_v11 = vld [vmem:[%s7524_s23 + $0xe2] sm:$0xff] }
 0x2d6   : > { %v2822_v34 = vmax.f32 %v2804_v37, %v2814_v35  ;;  %v2782_v54 = vadd.f32 %v2766_v61, %v2654_v5  ;;  %v9549_v49 = vpop.permute.xlu1 %2897  ;;  %v12374_v37 = vld [vmem:[#allocation14_spill] sm:$0xff]  ;;  %v12375_v62 = vld [vmem:[#allocation20_spill] sm:$0xff]  ;;  %v12376_v61 = vld [vmem:[#allocation21_spill] sm:$0xff] }
 0x2d7   : > { %v9551_v1 = vpop.permute.xlu0 %2892  ;;  %2859 = vst.msk [vmem:[#allocation2 + $0xd5] sm:$0x1] %vm1577_vm2, %v2855_v51  ;;  %v2799_v42 = vmax.f32 %v2783_v39, 0.0  ;;  %v6830_v5 = vld [vmem:[%s7524_s23 + $0xda] sm:$0xff] }
 0x2d8   : > { %2863 = vst.msk [vmem:[#allocation2 + $0xd4] sm:$0x4] %vm1582_vm3, %v2855_v51  ;;  %2831 = vst.msk [vmem:[#allocation2 + $0xd0] sm:$0x4] %vm1582_vm3, %v2822_v34  ;;  %v2798_v53 = vmax.f32 %v2782_v54, 0.0  ;;  %3420 = vperm.xlu1 %7123, %v12367_v30   ;;  %v12378_v30 = vld [vmem:[#allocation22_spill] sm:$0xff] }
 0x2d9   : > { %2867 = vst.msk [vmem:[#allocation2 + $0xd3] sm:$0x10] %vm1587_vm4, %v2855_v51  ;;  %2835 = vst.msk [vmem:[#allocation2 + $0xcf] sm:$0x10] %vm1587_vm4, %v2822_v34  ;;  %v2807_v48 = vmax.f32 %v2797_v7, %v2799_v42  ;;  %3415 = vperm.xlu0 %7122, %v12368_v57   ;;  %v6839_v7 = vld [vmem:[%s7524_s23 + $0x292] sm:$0xff] }
 0x2da   : > { %2871 = vst.msk [vmem:[#allocation2 + $0xd2] sm:$0x40] %vm1592_vm5, %v2855_v51  ;;  %2839 = vst.msk [vmem:[#allocation2 + $0xce] sm:$0x40] %vm1592_vm5, %v2822_v34  ;;  %v2806_v55 = vmax.f32 %v2796_v22, %v2798_v53  ;;  %v9561_v13 = vpop.permute.xlu1 %2907  ;;  %v9642_v51 = vld [vmem:[%s7524_s23 + $0x12a] sm:$0xff] }
 0x2db   : > { %2827 = vst.msk [vmem:[#allocation2 + $0xd1] sm:$0x1] %vm1577_vm2, %v2822_v34  ;;  %v9563_v14 = vpop.permute.xlu0 %2902  ;;  %v2848_v10 = vrot.slane %v2807_v48, 1  ;;  %v9645_v34 = vld [vmem:[%s7524_s23 + $0x122] sm:$0xff]  ;;  %v6838_v22 = vld [vmem:[%s7524_s23 + $0x28a] sm:$0xff] }
 0x2dc   : > { %v2815_v23 = vrot.slane %v2806_v55, 1  ;;  %3430 = vperm.xlu1 %7123, %v12369_v12   ;;  %12377 = vst [vmem:[#allocation26_spill] sm:$0xff] %v9645_v34  ;;  %v12379_v57 = vld [vmem:[#allocation25_spill] sm:$0xff] }
 0x2dd   : > { %v2856_v18 = vmax.f32 %v2807_v48, %v2848_v10  ;;  %3425 = vperm.xlu0 %7122, %v12370_v27   ;;  %v9672_v10 = vld [vmem:[%s7524_s23 + $0x2da] sm:$0xff] }
 0x2de   : > { %v2823_v2 = vmax.f32 %v2806_v55, %v2815_v23  ;;  %v9567_v50 = vpop.permute.xlu1 %2917  ;;  %v9675_v23 = vld [vmem:[%s7524_s23 + $0x2d2] sm:$0xff] }
 0x2df   : > { %v9569_v58 = vpop.permute.xlu0 %2912  ;;  %2860 = vst.msk [vmem:[#allocation2 + $0xe5] sm:$0x1] %vm1577_vm2, %v2856_v18  ;;  %12380 = vst [vmem:[#allocation27_spill] sm:$0xff] %v9675_v23 }
 0x2e0   : > { %2864 = vst.msk [vmem:[#allocation2 + $0xe4] sm:$0x4] %vm1582_vm3, %v2856_v18  ;;  %2832 = vst.msk [vmem:[#allocation2 + $0xe0] sm:$0x4] %vm1582_vm3, %v2823_v2  ;;  %3440 = vperm.xlu1 %7123, %v9582_v0  }
 0x2e1   : > { %2868 = vst.msk [vmem:[#allocation2 + $0xe3] sm:$0x10] %vm1587_vm4, %v2856_v18  ;;  %2836 = vst.msk [vmem:[#allocation2 + $0xdf] sm:$0x10] %vm1587_vm4, %v2823_v2  ;;  %3435 = vperm.xlu0 %7122, %v9585_v60  }
 0x2e2   : > { %2872 = vst.msk [vmem:[#allocation2 + $0xe2] sm:$0x40] %vm1592_vm5, %v2856_v18  ;;  %2840 = vst.msk [vmem:[#allocation2 + $0xde] sm:$0x40] %vm1592_vm5, %v2823_v2  ;;  %v9587_v38 = vpop.permute.xlu1 %2927 }
 0x2e3   : > { %2828 = vst.msk [vmem:[#allocation2 + $0xe1] sm:$0x1] %vm1577_vm2, %v2823_v2  ;;  %v9589_v29 = vpop.permute.xlu0 %2922 }
 0x2e4   : > { %3450 = vperm.xlu1 %7123, %v6823_v33   ;;  %v6849_v33 = vld [vmem:[%s7524_s23 + $0x110] sm:$0xff] }
 0x2e5   : > { %3445 = vperm.xlu0 %7122, %v6822_v40   ;;  %v6848_v40 = vld [vmem:[%s7524_s23 + $0x108] sm:$0xff] }
 0x2e6   : > { %v9595_v8 = vpop.permute.xlu1 %2937 }
 0x2e7   : > { %v9597_v19 = vpop.permute.xlu0 %2932 }
 0x2e8   : > { %3460 = vperm.xlu1 %7123, %v12371_v47  }
 0x2e9   : > { %3455 = vperm.xlu0 %7122, %v12372_v43  }
 0x2ea   : > { %v9599_v4 = vpop.permute.xlu1 %2947 }
 0x2eb   : > { %v9601_v28 = vpop.permute.xlu0 %2942 }
 0x2ec   : > { %3470 = vperm.xlu1 %7123, %v12373_v26  }
 0x2ed   : > { %3465 = vperm.xlu0 %7122, %v12374_v37  }
 0x2ee   : > { %v9605_v16 = vpop.permute.xlu1 %2957 }
 0x2ef   : > { %v9607_v9 = vpop.permute.xlu0 %2952 }
 0x2f0   : > { %3480 = vperm.xlu1 %7123, %v9612_v46  }
 0x2f1   : > { %3475 = vperm.xlu0 %7122, %v9615_v6  }
 0x2f2   : > { %v9617_v31 = vpop.permute.xlu1 %2967 }
 0x2f3   : > { %v9619_v59 = vpop.permute.xlu0 %2962 }
 0x2f4   : > { %3538 = vperm.xlu1 %7123, %v6831_v11   ;;  %v9702_v11 = vld [vmem:[%s7524_s23 + $0x140] sm:$0xff] }
 0x2f5   : > { %3533 = vperm.xlu0 %7122, %v6830_v5   ;;  %12385 = vst [vmem:[#allocation32_spill] sm:$0xff] %v9702_v11  ;;  %v9705_v5 = vld [vmem:[%s7524_s23 + $0x138] sm:$0xff] }
 0x2f6   : > { %v9625_v20 = vpop.permute.xlu1 %3025  ;;  %12386 = vst [vmem:[#allocation35_spill] sm:$0xff] %v9705_v5 }
 0x2f7   : > { %v9627_v35 = vpop.permute.xlu0 %3020 }
 0x2f8   : > { %3548 = vperm.xlu1 %7123, %v12375_v62  }
 0x2f9   : > { %3543 = vperm.xlu0 %7122, %v12376_v61  }
 0x2fa   : > { %v9629_v25 = vpop.permute.xlu1 %3035 }
 0x2fb   : > { %v9631_v56 = vpop.permute.xlu0 %3030 }
 0x2fc   : > { %3558 = vperm.xlu1 %7123, %v9277_v32  }
 0x2fd   : > { %3553 = vperm.xlu0 %7122, %v9280_v41  }
 0x2fe   : > { %v9635_v15 = vpop.permute.xlu1 %3045 }
 0x2ff   : > { %v9637_v24 = vpop.permute.xlu0 %3040 }
 0x300   : > { %3568 = vperm.xlu1 %7123, %v9642_v51  }
 0x301   : > { %3563 = vperm.xlu0 %7122, %v9645_v34  }
 0x302   : > { %v9647_v39 = vpop.permute.xlu1 %3055 }
 0x303   : > { %v9649_v54 = vpop.permute.xlu0 %3050 }
 0x304   : > { %3578 = vperm.xlu1 %7123, %v6839_v7   ;;  %v6855_v7 = vld [vmem:[%s7524_s23 + $0x2a8] sm:$0xff] }
 0x305   : > { %3573 = vperm.xlu0 %7122, %v6838_v22   ;;  %v6854_v22 = vld [vmem:[%s7524_s23 + $0x2a0] sm:$0xff] }
 0x306   : > { %v9655_v42 = vpop.permute.xlu1 %3065 }
 0x307   : > { %v9657_v32 = vpop.permute.xlu0 %3060 }
 0x308   : > { %3588 = vperm.xlu1 %7123, %v9345_v63   ;;  %v6847_v63 = vld [vmem:[%s7524_s23 + $0xf8] sm:$0xff] }
 0x309   : > { %3583 = vperm.xlu0 %7122, %v9348_v3   ;;  %v6846_v3 = vld [vmem:[%s7524_s23 + $0xf0] sm:$0xff] }
 0x30a   : > { %v9659_v41 = vpop.permute.xlu1 %3075 }
 0x30b   : > { %v9661_v53 = vpop.permute.xlu0 %3070 }
 0x30c   : > { %3598 = vperm.xlu1 %7123, %v12378_v30  }
 0x30d   : > { %3593 = vperm.xlu0 %7122, %v12379_v57  }
 0x30e   : > { %v9665_v48 = vpop.permute.xlu1 %3085 }
 0x30f   : > { %v9667_v55 = vpop.permute.xlu0 %3080 }
 0x310   : > { %3608 = vperm.xlu1 %7123, %v9672_v10  }
 0x311   : > { %3603 = vperm.xlu0 %7122, %v9675_v23  }
 0x312   : > { %v9677_v18 = vpop.permute.xlu1 %3095 }
 0x313   : > { %v9679_v2 = vpop.permute.xlu0 %3090 }
 0x314   : > { %3667 = vperm.xlu1 %7123, %v6847_v63   ;;  %v6857_v63 = vld [vmem:[%s7524_s23 + $0x2c0] sm:$0xff] }
 0x315   : > { %3662 = vperm.xlu0 %7122, %v6846_v3   ;;  %v6856_v3 = vld [vmem:[%s7524_s23 + $0x2b8] sm:$0xff] }
 0x316   : > { %v9685_v12 = vpop.permute.xlu1 %3153 }
 0x317   : > { %v9687_v27 = vpop.permute.xlu0 %3148 }
 0x318   : > { %3677 = vperm.xlu1 %7123, %v6849_v33  }
 0x319   : > { %3672 = vperm.xlu0 %7122, %v6848_v40  }
 0x31a   : > { %v9691_v47 = vpop.permute.xlu1 %3163 }
 0x31b   : > { %12381 = vst [vmem:[#allocation28_spill] sm:$0xff] %v9691_v47  ;;  %v9693_v43 = vpop.permute.xlu0 %3158 }
 0x31c   : > { %12382 = vst [vmem:[#allocation29_spill] sm:$0xff] %v9693_v43  ;;  %3687 = vperm.xlu1 %7123, %v9467_v17  }
 0x31d   : > { %3682 = vperm.xlu0 %7122, %v9470_v21  }
 0x31e   : > { %v9695_v26 = vpop.permute.xlu1 %3173 }
 0x31f   : > { %12383 = vst [vmem:[#allocation30_spill] sm:$0xff] %v9695_v26  ;;  %v9697_v37 = vpop.permute.xlu0 %3168 }
 0x320   : > { %12384 = vst [vmem:[#allocation31_spill] sm:$0xff] %v9697_v37  ;;  %3697 = vperm.xlu1 %7123, %v9702_v11  }
 0x321   : > { %3692 = vperm.xlu0 %7122, %v9705_v5  }
 0x322   : > { %v9707_v62 = vpop.permute.xlu1 %3183 }
 0x323   : > { %12387 = vst [vmem:[#allocation15_spill] sm:$0xff] %v9707_v62  ;;  %v9709_v61 = vpop.permute.xlu0 %3178 }
 0x324   : > { %12388 = vst [vmem:[#allocation36_spill] sm:$0xff] %v9709_v61  ;;  %3707 = vperm.xlu1 %7123, %v6855_v7   ;;  %v9732_v7 = vld [vmem:[%s7524_s23 + $0x2f0] sm:$0xff] }
 0x325   : > { %3702 = vperm.xlu0 %7122, %v6854_v22   ;;  %12395 = vst [vmem:[#allocation42_spill] sm:$0xff] %v9732_v7  ;;  %v9735_v22 = vld [vmem:[%s7524_s23 + $0x2e8] sm:$0xff] }
 0x326   : > { %v9715_v30 = vpop.permute.xlu1 %3193  ;;  %12396 = vst [vmem:[#allocation43_spill] sm:$0xff] %v9735_v22 }
 0x327   : > { %12389 = vst [vmem:[#allocation37_spill] sm:$0xff] %v9715_v30  ;;  %v9717_v57 = vpop.permute.xlu0 %3188  ;;  %v6864_v30 = vld [vmem:[%s7524_s23 + $0x109] sm:$0xff] }
 0x328   : > { %12390 = vst [vmem:[#allocation38_spill] sm:$0xff] %v9717_v57  ;;  %3717 = vperm.xlu1 %7123, %v6857_v63   ;;  %v6863_v63 = vld [vmem:[%s7524_s23 + $0xf9] sm:$0xff] }
 0x329   : > { %3712 = vperm.xlu0 %7122, %v6856_v3   ;;  %v6862_v3 = vld [vmem:[%s7524_s23 + $0xf1] sm:$0xff] }
 0x32a   : > { %v9721_v33 = vpop.permute.xlu1 %3203 }
 0x32b   : > { %12391 = vst [vmem:[#allocation39_spill] sm:$0xff] %v9721_v33  ;;  %v9723_v40 = vpop.permute.xlu0 %3198 }
 0x32c   : > { %12392 = vst [vmem:[#allocation60_spill] sm:$0xff] %v9723_v40  ;;  %3727 = vperm.xlu1 %7123, %v9536_v44   ;;  %v6865_v40 = vld [vmem:[%s7524_s23 + $0x111] sm:$0xff] }
 0x32d   : > { %3722 = vperm.xlu0 %7122, %v9539_v52  }
 0x32e   : > { %v9725_v36 = vpop.permute.xlu1 %3213 }
 0x32f   : > { %12393 = vst [vmem:[#allocation40_spill] sm:$0xff] %v9725_v36  ;;  %v9727_v45 = vpop.permute.xlu0 %3208 }
 0x330   : > { %12394 = vst [vmem:[#allocation41_spill] sm:$0xff] %v9727_v45  ;;  %3737 = vperm.xlu1 %7123, %v9732_v7  }
 0x331   : > { %3732 = vperm.xlu0 %7122, %v9735_v22  }
 0x332   : > { %v9737_v57 = vpop.permute.xlu1 %3223 }
 0x333   : > { %12397 = vst [vmem:[#allocation44_spill] sm:$0xff] %v9737_v57  ;;  %v9739_v33 = vpop.permute.xlu0 %3218 }
 0x334   : > { %12398 = vst [vmem:[#allocation45_spill] sm:$0xff] %v9739_v33  ;;  %3795 = vperm.xlu1 %7123, %v6863_v63   ;;  %v9762_v63 = vld [vmem:[%s7524_s23 + $0x141] sm:$0xff] }
 0x335   : > { %3790 = vperm.xlu0 %7122, %v6862_v3   ;;  %v9765_v3 = vld [vmem:[%s7524_s23 + $0x139] sm:$0xff] }
 0x336   : > { %v9745_v45 = vpop.permute.xlu1 %3282 }
 0x337   : > { %12399 = vst [vmem:[#allocation46_spill] sm:$0xff] %v9745_v45  ;;  %v9747_v36 = vpop.permute.xlu0 %3277  ;;  %v6872_v45 = vld [vmem:[%s7524_s23 + $0x2b9] sm:$0xff] }
 0x338   : > { %12400 = vst [vmem:[#allocation47_spill] sm:$0xff] %v9747_v36  ;;  %3805 = vperm.xlu1 %7123, %v6865_v40   ;;  %v6870_v40 = vld [vmem:[%s7524_s23 + $0x2a1] sm:$0xff] }
 0x339   : > { %3800 = vperm.xlu0 %7122, %v6864_v30   ;;  %v6871_v30 = vld [vmem:[%s7524_s23 + $0x2a9] sm:$0xff] }
 0x33a   : > { %v9751_v57 = vpop.permute.xlu1 %3292 }
 0x33b   : > { %12401 = vst [vmem:[#allocation11_spill] sm:$0xff] %v9751_v57  ;;  %v9753_v33 = vpop.permute.xlu0 %3287 }
 0x33c   : > { %12402 = vst [vmem:[#allocation48_spill] sm:$0xff] %v9753_v33  ;;  %3815 = vperm.xlu1 %7123, %v9582_v0   ;;  %v6873_v33 = vld [vmem:[%s7524_s23 + $0x2c1] sm:$0xff] }
 0x33d   : > { %3810 = vperm.xlu0 %7122, %v9585_v60  }
 0x33e   : > { %v9755_v61 = vpop.permute.xlu1 %3302 }
 0x33f   : > { %12403 = vst [vmem:[#allocation51_spill] sm:$0xff] %v9755_v61  ;;  %v9757_v62 = vpop.permute.xlu0 %3297 }
 0x340   : > { %12404 = vst [vmem:[#allocation52_spill] sm:$0xff] %v9757_v62  ;;  %3825 = vperm.xlu1 %7123, %v9762_v63  }
 0x341   : > { %3820 = vperm.xlu0 %7122, %v9765_v3  }
 0x342   : > { %v9767_v36 = vpop.permute.xlu1 %3312 }
 0x343   : > { %12405 = vst [vmem:[#allocation53_spill] sm:$0xff] %v9767_v36  ;;  %v9769_v57 = vpop.permute.xlu0 %3307 }
 0x344   : > { %12406 = vst [vmem:[#allocation49_spill] sm:$0xff] %v9769_v57  ;;  %3835 = vperm.xlu1 %7123, %v6871_v30   ;;  %v9792_v30 = vld [vmem:[%s7524_s23 + $0x2f1] sm:$0xff] }
 0x345   : > { %3830 = vperm.xlu0 %7122, %v6870_v40   ;;  %v9795_v40 = vld [vmem:[%s7524_s23 + $0x2e9] sm:$0xff] }
 0x346   : > { %v9775_v62 = vpop.permute.xlu1 %3322 }
 0x347   : > { %12407 = vst [vmem:[#allocation50_spill] sm:$0xff] %v9775_v62  ;;  %v9777_v61 = vpop.permute.xlu0 %3317  ;;  %v6880_v62 = vld [vmem:[%s7524_s23 + $0x10a] sm:$0xff] }
 0x348   : > { %12408 = vst [vmem:[#allocation54_spill] sm:$0xff] %v9777_v61  ;;  %3845 = vperm.xlu1 %7123, %v6873_v33   ;;  %v6878_v33 = vld [vmem:[%s7524_s23 + $0xf2] sm:$0xff] }
 0x349   : > { %3840 = vperm.xlu0 %7122, %v6872_v45   ;;  %v6879_v45 = vld [vmem:[%s7524_s23 + $0xfa] sm:$0xff] }
 0x34a   : > { %v9781_v36 = vpop.permute.xlu1 %3332 }
 0x34b   : > { %12409 = vst [vmem:[#allocation55_spill] sm:$0xff] %v9781_v36  ;;  %v9783_v57 = vpop.permute.xlu0 %3327 }
 0x34c   : > { %12410 = vst [vmem:[#allocation56_spill] sm:$0xff] %v9783_v57  ;;  %3855 = vperm.xlu1 %7123, %v9612_v46   ;;  %v6881_v57 = vld [vmem:[%s7524_s23 + $0x112] sm:$0xff] }
 0x34d   : > { %3850 = vperm.xlu0 %7122, %v9615_v6  }
 0x34e   : > { %v9785_v37 = vpop.permute.xlu1 %3342 }
 0x34f   : > { %12411 = vst [vmem:[#allocation59_spill] sm:$0xff] %v9785_v37  ;;  %v9787_v26 = vpop.permute.xlu0 %3337 }
 0x350   : > { %12412 = vst [vmem:[#allocation63_spill] sm:$0xff] %v9787_v26  ;;  %3865 = vperm.xlu1 %7123, %v9792_v30  }
 0x351   : > { %3860 = vperm.xlu0 %7122, %v9795_v40  }
 0x352   : > { %v9797_v61 = vpop.permute.xlu1 %3352 }
 0x353   : > { %12413 = vst [vmem:[#allocation64_spill] sm:$0xff] %v9797_v61  ;;  %v9799_v36 = vpop.permute.xlu0 %3347 }
 0x354   : > { %12414 = vst [vmem:[#allocation65_spill] sm:$0xff] %v9799_v36  ;;  %3923 = vperm.xlu1 %7123, %v6879_v45   ;;  %v9822_v45 = vld [vmem:[%s7524_s23 + $0x142] sm:$0xff] }
 0x355   : > { %3918 = vperm.xlu0 %7122, %v6878_v33   ;;  %v9825_v33 = vld [vmem:[%s7524_s23 + $0x13a] sm:$0xff] }
 0x356   : > { %v9805_v26 = vpop.permute.xlu1 %3410  ;;  %12421 = vst [vmem:[#allocation71_spill] sm:$0xff] %v9825_v33 }
 0x357   : > { %12415 = vst [vmem:[#allocation66_spill] sm:$0xff] %v9805_v26  ;;  %v9807_v37 = vpop.permute.xlu0 %3405  ;;  %v6888_v26 = vld [vmem:[%s7524_s23 + $0x2ba] sm:$0xff] }
 0x358   : > { %12416 = vst [vmem:[#allocation16_spill] sm:$0xff] %v9807_v37  ;;  %3933 = vperm.xlu1 %7123, %v6881_v57   ;;  %v6886_v57 = vld [vmem:[%s7524_s23 + $0x2a2] sm:$0xff] }
 0x359   : > { %3928 = vperm.xlu0 %7122, %v6880_v62   ;;  %v6887_v62 = vld [vmem:[%s7524_s23 + $0x2aa] sm:$0xff] }
 0x35a   : > { %v9811_v61 = vpop.permute.xlu1 %3420 }
 0x35b   : > { %12417 = vst [vmem:[#allocation67_spill] sm:$0xff] %v9811_v61  ;;  %v9813_v36 = vpop.permute.xlu0 %3415 }
 0x35c   : > { %12418 = vst [vmem:[#allocation77_spill] sm:$0xff] %v9813_v36  ;;  %3943 = vperm.xlu1 %7123, %v9642_v51   ;;  %v6889_v36 = vld [vmem:[%s7524_s23 + $0x2c2] sm:$0xff] }
 0x35d   : > { %3938 = vperm.xlu0 %7122, %v9645_v34  }
 0x35e   : > { %v9815_v43 = vpop.permute.xlu1 %3430 }
 0x35f   : > { %12419 = vst [vmem:[#allocation78_spill] sm:$0xff] %v9815_v43  ;;  %v9817_v47 = vpop.permute.xlu0 %3425 }
 0x360   : > { %12420 = vst [vmem:[#allocation68_spill] sm:$0xff] %v9817_v47  ;;  %3953 = vperm.xlu1 %7123, %v9822_v45  }
 0x361   : > { %3948 = vperm.xlu0 %7122, %v9825_v33  }
 0x362   : > { %v9827_v37 = vpop.permute.xlu1 %3440 }
 0x363   : > { %12422 = vst [vmem:[#allocation81_spill] sm:$0xff] %v9827_v37  ;;  %v9829_v61 = vpop.permute.xlu0 %3435 }
 0x364   : > { %12423 = vst [vmem:[#allocation75_spill] sm:$0xff] %v9829_v61  ;;  %3963 = vperm.xlu1 %7123, %v6887_v62   ;;  %v9852_v62 = vld [vmem:[%s7524_s23 + $0x2f2] sm:$0xff] }
 0x365   : > { %3958 = vperm.xlu0 %7122, %v6886_v57   ;;  %12427 = vst [vmem:[#allocation58_spill] sm:$0xff] %v9852_v62  ;;  %v9855_v57 = vld [vmem:[%s7524_s23 + $0x2ea] sm:$0xff] }
 0x366   : > { %v9835_v47 = vpop.permute.xlu1 %3450  ;;  %12428 = vst [vmem:[#allocation62_spill] sm:$0xff] %v9855_v57 }
 0x367   : > { %v9837_v43 = vpop.permute.xlu0 %3445 }
 0x368   : > { %12424 = vst [vmem:[#allocation18_spill] sm:$0xff] %v9837_v43  ;;  %3973 = vperm.xlu1 %7123, %v6889_v36  }
 0x369   : > { %3968 = vperm.xlu0 %7122, %v6888_v26  }
 0x36a   : > { %v9841_v34 = vpop.permute.xlu1 %3460 }
 0x36b   : > { %12425 = vst [vmem:[#allocation19_spill] sm:$0xff] %v9841_v34  ;;  %v9843_v37 = vpop.permute.xlu0 %3455 }
 0x36c   : > { %3983 = vperm.xlu1 %7123, %v9672_v10  }
 0x36d   : > { %3978 = vperm.xlu0 %7122, %v9675_v23  }
 0x36e   : > { %v9845_v61 = vpop.permute.xlu1 %3470 }
 0x36f   : > { %v9847_v33 = vpop.permute.xlu0 %3465 }
 0x370   : > { %12426 = vst [vmem:[#allocation85_spill] sm:$0xff] %v9847_v33  ;;  %3993 = vperm.xlu1 %7123, %v9852_v62   ;;  %v9876_v62 = vld [vmem:[%s7524_s23 + $0x158] sm:$0xff] }
 0x371   : > { %3988 = vperm.xlu0 %7122, %v9855_v57   ;;  %12431 = vst [vmem:[#allocation93_spill] sm:$0xff] %v9876_v62  ;;  %v9879_v57 = vld [vmem:[%s7524_s23 + $0x150] sm:$0xff] }
 0x372   : > { %v9857_v43 = vpop.permute.xlu1 %3480  ;;  %12432 = vst [vmem:[#allocation6_spill] sm:$0xff] %v9879_v57 }
 0x373   : > { %v9859_v34 = vpop.permute.xlu0 %3475 }
 0x374   : > { %12429 = vst [vmem:[#allocation98_spill] sm:$0xff] %v9859_v34  ;;  %4141 = vperm.xlu1 %7123, %v9467_v17   ;;  %v9888_v17 = vld [vmem:[%s7524_s23 + $0x170] sm:$0xff] }
 0x375   : > { %4136 = vperm.xlu0 %7122, %v9470_v21   ;;  %12435 = vst [vmem:[#allocation73_spill] sm:$0xff] %v9888_v17  ;;  %v9891_v21 = vld [vmem:[%s7524_s23 + $0x168] sm:$0xff] }
 0x376   : > { %v9863_v36 = vpop.permute.xlu1 %3538  ;;  %12436 = vst [vmem:[#allocation23_spill] sm:$0xff] %v9891_v21 }
 0x377   : > { %12430 = vst [vmem:[#allocation5_spill] sm:$0xff] %v9863_v36  ;;  %v9865_v26 = vpop.permute.xlu0 %3533 }
 0x378   : > { %4151 = vperm.xlu1 %7123, %v9702_v11  }
 0x379   : > { %4146 = vperm.xlu0 %7122, %v9705_v5  }
 0x37a   : > { %v9869_v33 = vpop.permute.xlu1 %3548 }
 0x37b   : > { %v9871_v23 = vpop.permute.xlu0 %3543 }
 0x37c   : > { %4161 = vperm.xlu1 %7123, %v9876_v62  }
 0x37d   : > { %4156 = vperm.xlu0 %7122, %v9879_v57  }
 0x37e   : > { %v9881_v34 = vpop.permute.xlu1 %3558 }
 0x37f   : > { %12433 = vst [vmem:[#allocation97_spill] sm:$0xff] %v9881_v34  ;;  %v9883_v36 = vpop.permute.xlu0 %3553 }
 0x380   : > { %12434 = vst [vmem:[#allocation61_spill] sm:$0xff] %v9883_v36  ;;  %4171 = vperm.xlu1 %7123, %v9888_v17   ;;  %v9912_v17 = vld [vmem:[%s7524_s23 + $0x308] sm:$0xff] }
 0x381   : > { %4166 = vperm.xlu0 %7122, %v9891_v21   ;;  %12440 = vst [vmem:[#allocation80_spill] sm:$0xff] %v9912_v17  ;;  %v9915_v21 = vld [vmem:[%s7524_s23 + $0x300] sm:$0xff] }
 0x382   : > { %v9893_v11 = vpop.permute.xlu1 %3568  ;;  %12441 = vst [vmem:[#allocation72_spill] sm:$0xff] %v9915_v21 }
 0x383   : > { %v9895_v5 = vpop.permute.xlu0 %3563 }
 0x384   : > { %12437 = vst [vmem:[#allocation24_spill] sm:$0xff] %v9895_v5  ;;  %4181 = vperm.xlu1 %7123, %v9536_v44   ;;  %v9924_v44 = vld [vmem:[%s7524_s23 + $0x320] sm:$0xff] }
 0x385   : > { %4176 = vperm.xlu0 %7122, %v9539_v52   ;;  %12444 = vst [vmem:[#allocation4_spill] sm:$0xff] %v9924_v44  ;;  %v9927_v52 = vld [vmem:[%s7524_s23 + $0x318] sm:$0xff] }
 0x386   : > { %v9899_v36 = vpop.permute.xlu1 %3578  ;;  %12445 = vst [vmem:[#allocation76_spill] sm:$0xff] %v9927_v52 }
 0x387   : > { %12438 = vst [vmem:[#allocation74_spill] sm:$0xff] %v9899_v36  ;;  %v9901_v62 = vpop.permute.xlu0 %3573 }
 0x388   : > { %4191 = vperm.xlu1 %7123, %v9732_v7  }
 0x389   : > { %4186 = vperm.xlu0 %7122, %v9735_v22  }
 0x38a   : > { %v9905_v57 = vpop.permute.xlu1 %3588 }
 0x38b   : > { %v9907_v34 = vpop.permute.xlu0 %3583 }
 0x38c   : > { %12439 = vst [vmem:[#allocation87_spill] sm:$0xff] %v9907_v34  ;;  %4201 = vperm.xlu1 %7123, %v9912_v17  }
 0x38d   : > { %4196 = vperm.xlu0 %7122, %v9915_v21  }
 0x38e   : > { %v9917_v5 = vpop.permute.xlu1 %3598 }
 0x38f   : > { %12442 = vst [vmem:[#allocation88_spill] sm:$0xff] %v9917_v5  ;;  %v9919_v36 = vpop.permute.xlu0 %3593 }
 0x390   : > { %12443 = vst [vmem:[#allocation3_spill] sm:$0xff] %v9919_v36  ;;  %4211 = vperm.xlu1 %7123, %v9924_v44   ;;  %v9951_v44 = vld [vmem:[%s7524_s23 + $0x151] sm:$0xff] }
 0x391   : > { %4206 = vperm.xlu0 %7122, %v9927_v52   ;;  %v9948_v52 = vld [vmem:[%s7524_s23 + $0x159] sm:$0xff]  ;;  %12453 = vst [vmem:[#allocation99_spill] sm:$0xff] %v9951_v44 }
 0x392   : > { %v9929_v7 = vpop.permute.xlu1 %3608  ;;  %12452 = vst [vmem:[#allocation17_spill] sm:$0xff] %v9948_v52 }
 0x393   : > { %12446 = vst [vmem:[#allocation84_spill] sm:$0xff] %v9929_v7  ;;  %v9931_v22 = vpop.permute.xlu0 %3603 }
 0x394   : > { %12447 = vst [vmem:[#allocation33_spill] sm:$0xff] %v9931_v22  ;;  %4269 = vperm.xlu1 %7123, %v9582_v0   ;;  %v12456_v0 = vld [vmem:[#allocation79_spill] sm:$0xff] }
 0x395   : > { %4264 = vperm.xlu0 %7122, %v9585_v60   ;;  %v2971_v60 = vmul.f32 %v9549_v49, %v12456_v0  ;;  %v2975_v49 = vmul.f32 %v9567_v50, %v12456_v0  ;;  %v2976_v50 = vmul.f32 %v9589_v29, %v12456_v0  ;;  %v2982_v29 = vmul.f32 %v9607_v9, %v12456_v0 }
 0x396   : > { %v9935_v5 = vpop.permute.xlu1 %3667 }
 0x397   : > { %12448 = vst [vmem:[#allocation34_spill] sm:$0xff] %v9935_v5  ;;  %v9937_v36 = vpop.permute.xlu0 %3662 }
 0x398   : > { %12449 = vst [vmem:[#allocation12_spill] sm:$0xff] %v9937_v36  ;;  %4279 = vperm.xlu1 %7123, %v9762_v63   ;;  %v2973_v63 = vmul.f32 %v9561_v13, %v12456_v0  ;;  %v2974_v13 = vmul.f32 %v9569_v58, %v12456_v0  ;;  %v2981_v58 = vmul.f32 %v9599_v4, %v12456_v0 }
 0x399   : > { %4274 = vperm.xlu0 %7122, %v9765_v3   ;;  %v9966_v3 = vld [vmem:[%s7524_s23 + $0x171] sm:$0xff]  ;;  %v2984_v4 = vmul.f32 %v9619_v59, %v12456_v0 }
 0x39a   : > { %v9941_v21 = vpop.permute.xlu1 %3677  ;;  %12457 = vst [vmem:[#allocation69_spill] sm:$0xff] %v9966_v3 }
 0x39b   : > { %12450 = vst [vmem:[#allocation92_spill] sm:$0xff] %v9941_v21  ;;  %v9943_v17 = vpop.permute.xlu0 %3672  ;;  %v2970_v21 = vmul.f32 %v9551_v1, %v12456_v0 }
 0x39c   : > { %12451 = vst [vmem:[#allocation57_spill] sm:$0xff] %v9943_v17  ;;  %4289 = vperm.xlu1 %7123, %v9948_v52   ;;  %v9969_v17 = vld [vmem:[%s7524_s23 + $0x169] sm:$0xff]  ;;  %v7446_v52 = vld [vmem:[%s8153_s30] ss:$0 sm:$0xff] }
 0x39d   : > { %4284 = vperm.xlu0 %7122, %v9951_v44   ;;  %12458 = vst [vmem:[#allocation70_spill] sm:$0xff] %v9969_v17  ;;  %v2987_v36 = vadd.f32 %v7446_v52, %v2971_v60  ;;  %v2986_v44 = vadd.f32 %v7446_v52, %v2970_v21  ;;  %v2989_v5 = vadd.f32 %v7446_v52, %v2973_v63 }
 0x39e   : > { %v9953_v22 = vpop.permute.xlu1 %3687  ;;  %v2978_v21 = vmul.f32 %v9597_v19, %v12456_v0  ;;  %v2980_v60 = vmul.f32 %v9601_v28, %v12456_v0  ;;  %v2991_v63 = vadd.f32 %v7446_v52, %v2975_v49  ;;  %v2990_v19 = vadd.f32 %v7446_v52, %v2974_v13 }
 0x39f   : > { %12454 = vst [vmem:[#allocation94_spill] sm:$0xff] %v9953_v22  ;;  %v9955_v7 = vpop.permute.xlu0 %3682  ;;  %v2992_v9 = vadd.f32 %v7446_v52, %v2976_v50  ;;  %v2997_v34 = vadd.f32 %v7446_v52, %v2981_v58 }
 0x3a0   : > { %12455 = vst [vmem:[#allocation95_spill] sm:$0xff] %v9955_v7  ;;  %v2972_v7 = vmul.f32 %v9563_v14, %v12456_v0  ;;  %4299 = vperm.xlu1 %7123, %v9966_v3   ;;  %v2977_v14 = vmul.f32 %v9587_v38, %v12456_v0  ;;  %v2983_v38 = vmul.f32 %v9605_v16, %v12456_v0  ;;  %v12463_v3 = vld [vmem:[#allocation86_spill] sm:$0xff] }
 0x3a1   : > { %4294 = vperm.xlu0 %7122, %v9969_v17   ;;  %v3099_v28 = vmul.f32 %v9625_v20, %v12463_v3  ;;  %v3101_v13 = vmul.f32 %v9629_v25, %v12463_v3  ;;  %v2998_v20 = vadd.f32 %v7446_v52, %v2982_v29  ;;  %v3103_v50 = vmul.f32 %v9635_v15, %v12463_v3  ;;  %v12467_v29 = vld [vmem:[#allocation89_spill] sm:$0xff] }
 0x3a2   : > { %v9975_v22 = vpop.permute.xlu1 %3697  ;;  %v2993_v16 = vadd.f32 %v7446_v52, %v2977_v14  ;;  %v2999_v59 = vadd.f32 %v7446_v52, %v2983_v38  ;;  %v3000_v14 = vadd.f32 %v7446_v52, %v2984_v4  ;;  %v3104_v58 = vmul.f32 %v9649_v54, %v12463_v3  ;;  %v10066_v4 = vld [vmem:[%s7524_s23 + $0x319] sm:$0xff] }
 0x3a3   : > { %12459 = vst [vmem:[#allocation82_spill] sm:$0xff] %v9975_v22  ;;  %v9977_v1 = vpop.permute.xlu0 %3692  ;;  %v2988_v22 = vadd.f32 %v7446_v52, %v2972_v7  ;;  %v3107_v15 = vmul.f32 %v9655_v42, %v12463_v3  ;;  %v3111_v54 = vmul.f32 %v9665_v48, %v12463_v3  ;;  %12469 = vst [vmem:[#allocation22_spill] sm:$0xff] %v10066_v4 }
 0x3a4   : > { %12460 = vst [vmem:[#allocation83_spill] sm:$0xff] %v9977_v1  ;;  %v2979_v1 = vmul.f32 %v9595_v8, %v12456_v0  ;;  %v2985_v8 = vmul.f32 %v9617_v31, %v12456_v0  ;;  %4309 = vperm.xlu1 %7123, %v9612_v46   ;;  %v3098_v31 = vmul.f32 %v9627_v35, %v12463_v3 }
 0x3a5   : > { %4304 = vperm.xlu0 %7122, %v9615_v6   ;;  %v3100_v46 = vmul.f32 %v9631_v56, %v12463_v3  ;;  %v3115_v35 = vadd.f32 %v3099_v28, %v2987_v36  ;;  %v3105_v56 = vmul.f32 %v9647_v39, %v12463_v3  ;;  %v10036_v36 = vld [vmem:[%s7524_s23 + $0x301] sm:$0xff]  ;;  %v3108_v39 = vmul.f32 %v9661_v53, %v12463_v3 }
 0x3a6   : > { %v10002_v7 = vpop.permute.xlu1 %3707  ;;  %v2995_v49 = vadd.f32 %v7446_v52, %v2979_v1  ;;  %v3001_v0 = vadd.f32 %v7446_v52, %v2985_v8  ;;  %v3114_v25 = vadd.f32 %v3098_v31, %v2986_v44  ;;  %12465 = vst [vmem:[#allocation14_spill] sm:$0xff] %v10036_v36  ;;  %v3120_v38 = vadd.f32 %v3104_v58, %v2992_v9  ;;  %v10063_v8 = vld [vmem:[%s7524_s23 + $0x321] sm:$0xff] }
 0x3a7   : > { %12461 = vst [vmem:[#allocation9_spill] sm:$0xff] %v10002_v7  ;;  %v10004_v17 = vpop.permute.xlu0 %3702  ;;  %v2994_v7 = vadd.f32 %v7446_v52, %v2978_v21  ;;  %v3102_v21 = vmul.f32 %v9637_v24, %v12463_v3  ;;  %v3109_v24 = vmul.f32 %v9659_v41, %v12463_v3  ;;  %v3113_v41 = vmul.f32 %v9677_v18, %v12463_v3 }
 0x3a8   : > { %12462 = vst [vmem:[#allocation10_spill] sm:$0xff] %v10004_v17  ;;  %v2996_v17 = vadd.f32 %v7446_v52, %v2980_v60  ;;  %4319 = vperm.xlu1 %7123, %v9792_v30   ;;  %v10033_v60 = vld [vmem:[%s7524_s23 + $0x309] sm:$0xff]  ;;  %v3117_v52 = vadd.f32 %v3101_v13, %v2989_v5  ;;  %v3106_v30 = vmul.f32 %v9657_v32, %v12463_v3  ;;  %12468 = vst [vmem:[#allocation21_spill] sm:$0xff] %v10063_v8 }
 0x3a9   : > { %4314 = vperm.xlu0 %7122, %v9795_v40   ;;  %12464 = vst [vmem:[#allocation13_spill] sm:$0xff] %v10033_v60  ;;  %v3116_v40 = vadd.f32 %v3100_v46, %v2988_v22  ;;  %v3110_v5 = vmul.f32 %v9667_v55, %v12463_v3  ;;  %v3119_v32 = vadd.f32 %v3103_v50, %v2991_v63 }
 0x3aa   : > { %v10018_v6 = vpop.permute.xlu1 %3717  ;;  %v3112_v22 = vmul.f32 %v9679_v2, %v12463_v3  ;;  %v3118_v53 = vadd.f32 %v3102_v21, %v2990_v19  ;;  %v3121_v48 = vadd.f32 %v3105_v56, %v2993_v16  ;;  %v3227_v55 = vmul.f32 %v9685_v12, %v12467_v29  ;;  %v12470_v19 = vld [vmem:[#allocation28_spill] sm:$0xff]  ;;  %v12473_v56 = vld [vmem:[#allocation29_spill] sm:$0xff] }
 0x3ab   : > { %v10020_v1 = vpop.permute.xlu0 %3712  ;;  %v3123_v63 = vadd.f32 %v3107_v15, %v2995_v49  ;;  %v3122_v28 = vadd.f32 %v3106_v30, %v2994_v7  ;;  %v3125_v18 = vadd.f32 %v3109_v24, %v2997_v34  ;;  %v3226_v2 = vmul.f32 %v9687_v27, %v12467_v29  ;;  %v12474_v27 = vld [vmem:[#allocation30_spill] sm:$0xff]  ;;  %v12475_v7 = vld [vmem:[#allocation31_spill] sm:$0xff]  ;;  %v12478_v30 = vld [vmem:[#allocation37_spill] sm:$0xff] }
 0x3ac   : > { %4329 = vperm.xlu1 %7123, %v10033_v60   ;;  %v3124_v31 = vadd.f32 %v3108_v39, %v2996_v17  ;;  %v3127_v13 = vadd.f32 %v3111_v54, %v2999_v59  ;;  %v3126_v46 = vadd.f32 %v3110_v5, %v2998_v20  ;;  %v3229_v16 = vmul.f32 %v12470_v19, %v12467_v29  ;;  %v12476_v20 = vld [vmem:[#allocation15_spill] sm:$0xff]  ;;  %v12479_v39 = vld [vmem:[#allocation38_spill] sm:$0xff]  ;;  %v12482_v19 = vld [vmem:[#allocation40_spill] sm:$0xff] }
 0x3ad   : > { %4324 = vperm.xlu0 %7122, %v10036_v36   ;;  %v3129_v12 = vadd.f32 %v3113_v41, %v3001_v0  ;;  %v3128_v21 = vadd.f32 %v3112_v22, %v3000_v14  ;;  %v3228_v49 = vmul.f32 %v12473_v56, %v12467_v29  ;;  %v3243_v34 = vadd.f32 %v3227_v55, %v3115_v35  ;;  %v12477_v0 = vld [vmem:[#allocation36_spill] sm:$0xff]  ;;  %v12480_v5 = vld [vmem:[#allocation39_spill] sm:$0xff] }
 0x3ae   : > { %v10050_v44 = vpop.permute.xlu1 %3727  ;;  %v3231_v17 = vmul.f32 %v12474_v27, %v12467_v29  ;;  %v3230_v59 = vmul.f32 %v12475_v7, %v12467_v29  ;;  %v3233_v58 = vmul.f32 %v12476_v20, %v12467_v29  ;;  %v3242_v15 = vadd.f32 %v3226_v2, %v3114_v25  ;;  %v12481_v22 = vld [vmem:[#allocation60_spill] sm:$0xff]  ;;  %v12483_v7 = vld [vmem:[#allocation41_spill] sm:$0xff] }
 0x3af   : > { %v10052_v42 = vpop.permute.xlu0 %3722  ;;  %v3232_v14 = vmul.f32 %v12477_v0, %v12467_v29  ;;  %v3235_v24 = vmul.f32 %v12478_v30, %v12467_v29  ;;  %v3234_v54 = vmul.f32 %v12479_v39, %v12467_v29  ;;  %v3245_v35 = vadd.f32 %v3229_v16, %v3117_v52  ;;  %v12484_v0 = vld [vmem:[#allocation44_spill] sm:$0xff]  ;;  %v12485_v16 = vld [vmem:[#allocation26_spill] sm:$0xff] }
 0x3b0   : > { %12466 = vst [vmem:[#allocation20_spill] sm:$0xff] %v10052_v42  ;;  %4339 = vperm.xlu1 %7123, %v10063_v8   ;;  %v3237_v41 = vmul.f32 %v12480_v5, %v12467_v29  ;;  %v3236_v55 = vmul.f32 %v12481_v22, %v12467_v29  ;;  %v3239_v56 = vmul.f32 %v12482_v19, %v12467_v29  ;;  %v12486_v22 = vld [vmem:[#allocation45_spill] sm:$0xff] }
 0x3b1   : > { %4334 = vperm.xlu0 %7122, %v10066_v4   ;;  %v3244_v27 = vadd.f32 %v3228_v49, %v3116_v40  ;;  %v3238_v20 = vmul.f32 %v12483_v7, %v12467_v29  ;;  %v3241_v52 = vmul.f32 %v12484_v0, %v12467_v29  ;;  %v3247_v30 = vadd.f32 %v3231_v17, %v3119_v32  ;;  %v12487_v40 = vld [vmem:[#allocation90_spill] sm:$0xff] }
 0x3b2   : > { %v10072_v9 = vpop.permute.xlu1 %3737  ;;  %v3246_v39 = vadd.f32 %v3230_v59, %v3118_v53  ;;  %v3249_v5 = vadd.f32 %v3233_v58, %v3121_v48  ;;  %v3240_v19 = vmul.f32 %v12486_v22, %v12467_v29  ;;  %v3248_v3 = vadd.f32 %v3232_v14, %v3120_v38  ;;  %v12488_v49 = vld [vmem:[#allocation46_spill] sm:$0xff]  ;;  %v12490_v38 = vld [vmem:[#allocation11_spill] sm:$0xff]  ;;  %v12494_v14 = vld [vmem:[#allocation52_spill] sm:$0xff] }
 0x3b3   : > { %12471 = vst [vmem:[#allocation25_spill] sm:$0xff] %v10072_v9  ;;  %v10074_v50 = vpop.permute.xlu0 %3732  ;;  %v3251_v4 = vadd.f32 %v3235_v24, %v3123_v63  ;;  %v3250_v8 = vadd.f32 %v3234_v54, %v3122_v28  ;;  %v3356_v36 = vmul.f32 %v12488_v49, %v12487_v40  ;;  %v3253_v7 = vadd.f32 %v3237_v41, %v3125_v18  ;;  %v12491_v28 = vld [vmem:[#allocation71_spill] sm:$0xff]  ;;  %v12497_v41 = vld [vmem:[#allocation53_spill] sm:$0xff]  ;;  %v12500_v22 = vld [vmem:[#allocation54_spill] sm:$0xff] }
 0x3b4   : > { %12472 = vst [vmem:[#allocation28_spill] sm:$0xff] %v10074_v50  ;;  %4397 = vperm.xlu1 %7123, %v9642_v51   ;;  %v3252_v0 = vadd.f32 %v3236_v55, %v3124_v31  ;;  %v3255_v60 = vadd.f32 %v3239_v56, %v3127_v13  ;;  %v12489_v51 = vld [vmem:[#allocation47_spill] sm:$0xff]  ;;  %v3254_v48 = vadd.f32 %v3238_v20, %v3126_v46  ;;  %v12492_v31 = vld [vmem:[#allocation48_spill] sm:$0xff]  ;;  %v10132_v46 = vld [vmem:[%s7524_s23 + $0x152] sm:$0xff] }
 0x3b5   : > { %4392 = vperm.xlu0 %7122, %v12485_v16   ;;  %v3355_v16 = vmul.f32 %v12489_v51, %v12487_v40  ;;  %v3257_v17 = vadd.f32 %v3241_v52, %v3129_v12  ;;  %v3358_v63 = vmul.f32 %v12490_v38, %v12487_v40  ;;  %v3256_v18 = vadd.f32 %v3240_v19, %v3128_v21  ;;  %v12493_v59 = vld [vmem:[#allocation51_spill] sm:$0xff]  ;;  %v12498_v55 = vld [vmem:[#allocation49_spill] sm:$0xff]  ;;  %v12499_v56 = vld [vmem:[#allocation50_spill] sm:$0xff] }
 0x3b6   : > { %v10098_v25 = vpop.permute.xlu1 %3795  ;;  %v3357_v13 = vmul.f32 %v12492_v31, %v12487_v40  ;;  %v3360_v58 = vmul.f32 %v12493_v59, %v12487_v40  ;;  %v3359_v24 = vmul.f32 %v12494_v14, %v12487_v40  ;;  %v10129_v54 = vld [vmem:[%s7524_s23 + $0x15a] sm:$0xff]  ;;  %12496 = vst [vmem:[#allocation30_spill] sm:$0xff] %v10132_v46  ;;  %v3372_v12 = vadd.f32 %v3356_v36, %v3243_v34  ;;  %v12502_v36 = vld [vmem:[#allocation56_spill] sm:$0xff]  ;;  %v12506_v50 = vld [vmem:[#allocation65_spill] sm:$0xff] }
 0x3b7   : > { %v10100_v2 = vpop.permute.xlu0 %3790  ;;  %12495 = vst [vmem:[#allocation29_spill] sm:$0xff] %v10129_v54  ;;  %v3361_v21 = vmul.f32 %v12498_v55, %v12487_v40  ;;  %v3364_v20 = vmul.f32 %v12499_v56, %v12487_v40  ;;  %v3371_v52 = vadd.f32 %v3355_v16, %v3242_v15  ;;  %v3363_v19 = vmul.f32 %v12500_v22, %v12487_v40  ;;  %v12501_v49 = vld [vmem:[#allocation55_spill] sm:$0xff]  ;;  %v12505_v22 = vld [vmem:[#allocation64_spill] sm:$0xff] }
 0x3b8   : > { %4407 = vperm.xlu1 %7123, %v9822_v45   ;;  %v3362_v45 = vmul.f32 %v12497_v41, %v12487_v40  ;;  %v3366_v51 = vmul.f32 %v12501_v49, %v12487_v40  ;;  %v3365_v34 = vmul.f32 %v12502_v36, %v12487_v40  ;;  %v3374_v31 = vadd.f32 %v3358_v63, %v3245_v35  ;;  %v12503_v59 = vld [vmem:[#allocation59_spill] sm:$0xff]  ;;  %v10159_v36 = vld [vmem:[%s7524_s23 + $0x172] sm:$0xff]  ;;  %v10162_v29 = vld [vmem:[%s7524_s23 + $0x16a] sm:$0xff] }
 0x3b9   : > { %4402 = vperm.xlu0 %7122, %v12491_v28   ;;  %v3368_v14 = vmul.f32 %v12503_v59, %v12487_v40  ;;  %v12504_v15 = vld [vmem:[#allocation63_spill] sm:$0xff]  ;;  %v3373_v41 = vadd.f32 %v3357_v13, %v3244_v27  ;;  %v3376_v55 = vadd.f32 %v3360_v58, %v3247_v30  ;;  %v3375_v56 = vadd.f32 %v3359_v24, %v3246_v39  ;;  %v12508_v27 = vld [vmem:[#allocation66_spill] sm:$0xff] }
 0x3ba   : > { %v10114_v32 = vpop.permute.xlu1 %3805  ;;  %v3367_v16 = vmul.f32 %v12504_v15, %v12487_v40  ;;  %v3370_v49 = vmul.f32 %v12505_v22, %v12487_v40  ;;  %v3378_v35 = vadd.f32 %v3362_v45, %v3249_v5  ;;  %v3377_v63 = vadd.f32 %v3361_v21, %v3248_v3  ;;  %v12509_v22 = vld [vmem:[#allocation16_spill] sm:$0xff] }
 0x3bb   : > { %v10116_v53 = vpop.permute.xlu0 %3800  ;;  %v3380_v59 = vadd.f32 %v3364_v20, %v3251_v4  ;;  %v3369_v15 = vmul.f32 %v12506_v50, %v12487_v40  ;;  %v3379_v9 = vadd.f32 %v3363_v19, %v3250_v8  ;;  %v3381_v42 = vadd.f32 %v3365_v34, %v3252_v0  ;;  %v12510_v8 = vld [vmem:[#allocation67_spill] sm:$0xff]  ;;  %v12511_v50 = vld [vmem:[#allocation77_spill] sm:$0xff]  ;;  %v12512_v0 = vld [vmem:[#allocation78_spill] sm:$0xff] }
 0x3bc   : > { %4417 = vperm.xlu1 %7123, %v10129_v54   ;;  %v3382_v54 = vadd.f32 %v3366_v51, %v3253_v7  ;;  %v3384_v58 = vadd.f32 %v3368_v14, %v3255_v60  ;;  %v3383_v24 = vadd.f32 %v3367_v16, %v3254_v48  ;;  %v3386_v3 = vadd.f32 %v3370_v49, %v3257_v17  ;;  %v12513_v60 = vld [vmem:[#allocation68_spill] sm:$0xff]  ;;  %v12514_v20 = vld [vmem:[#allocation81_spill] sm:$0xff]  ;;  %v12515_v51 = vld [vmem:[#allocation75_spill] sm:$0xff] }
 0x3bd   : > { %4412 = vperm.xlu0 %7122, %v10132_v46   ;;  %v12507_v46 = vld [vmem:[#allocation91_spill] sm:$0xff]  ;;  %v3385_v21 = vadd.f32 %v3369_v15, %v3256_v18  ;;  %v12516_v16 = vld [vmem:[#allocation18_spill] sm:$0xff] }
 0x3be   : > { %v10146_v38 = vpop.permute.xlu1 %3815  ;;  %v3484_v30 = vmul.f32 %v12508_v27, %v12507_v46  ;;  %v3483_v5 = vmul.f32 %v12509_v22, %v12507_v46  ;;  %v3486_v4 = vmul.f32 %v12510_v8, %v12507_v46  ;;  %v3485_v7 = vmul.f32 %v12511_v50, %v12507_v46  ;;  %v12517_v27 = vld [vmem:[#allocation19_spill] sm:$0xff] }
 0x3bf   : > { %v10148_v28 = vpop.permute.xlu0 %3810  ;;  %v3488_v45 = vmul.f32 %v12512_v0, %v12507_v46  ;;  %v3487_v48 = vmul.f32 %v12513_v60, %v12507_v46  ;;  %v3490_v19 = vmul.f32 %v12514_v20, %v12507_v46  ;;  %v3489_v34 = vmul.f32 %v12515_v51, %v12507_v46  ;;  %v12519_v20 = vld [vmem:[#allocation85_spill] sm:$0xff] }
 0x3c0   : > { %4427 = vperm.xlu1 %7123, %v10159_v36   ;;  %v3500_v17 = vadd.f32 %v3484_v30, %v3372_v12  ;;  %v3492_v14 = vmul.f32 %v9835_v47, %v12507_v46  ;;  %v3491_v49 = vmul.f32 %v12516_v16, %v12507_v46  ;;  %v3494_v22 = vmul.f32 %v12517_v27, %v12507_v46  ;;  %v12518_v47 = vld [vmem:[#allocation27_spill] sm:$0xff] }
 0x3c1   : > { %4422 = vperm.xlu0 %7122, %v10162_v29   ;;  %v3499_v8 = vadd.f32 %v3483_v5, %v3371_v52  ;;  %v3493_v50 = vmul.f32 %v9843_v37, %v12507_v46  ;;  %v3496_v12 = vmul.f32 %v9845_v61, %v12507_v46  ;;  %v3502_v30 = vadd.f32 %v3486_v4, %v3374_v31 }
 0x3c2   : > { %v10168_v39 = vpop.permute.xlu1 %3825  ;;  %v3501_v0 = vadd.f32 %v3485_v7, %v3373_v41  ;;  %v3504_v60 = vadd.f32 %v3488_v45, %v3376_v55  ;;  %v3495_v51 = vmul.f32 %v12519_v20, %v12507_v46  ;;  %v3503_v16 = vadd.f32 %v3487_v48, %v3375_v56  ;;  %v12521_v56 = vld [vmem:[#allocation96_spill] sm:$0xff]  ;;  %v12523_v7 = vld [vmem:[#allocation58_spill] sm:$0xff] }
 0x3c3   : > { %v10170_v13 = vpop.permute.xlu0 %3820  ;;  %v3506_v27 = vadd.f32 %v3490_v19, %v3378_v35  ;;  %v3505_v40 = vadd.f32 %v3489_v34, %v3377_v63  ;;  %v3498_v52 = vmul.f32 %v9857_v43, %v12507_v46  ;;  %v3508_v37 = vadd.f32 %v3492_v14, %v3380_v59  ;;  %v12522_v35 = vld [vmem:[#allocation5_spill] sm:$0xff]  ;;  %v12524_v43 = vld [vmem:[#allocation62_spill] sm:$0xff] }
 0x3c4   : > { %4437 = vperm.xlu1 %7123, %v9672_v10   ;;  %v3507_v61 = vadd.f32 %v3491_v49, %v3379_v9  ;;  %v3510_v5 = vadd.f32 %v3494_v22, %v3382_v54  ;;  %v12520_v10 = vld [vmem:[#allocation98_spill] sm:$0xff]  ;;  %v3509_v55 = vadd.f32 %v3493_v50, %v3381_v42  ;;  %v3512_v4 = vadd.f32 %v3496_v12, %v3384_v58  ;;  %v10227_v42 = vld [vmem:[%s7524_s23 + $0x30a] sm:$0xff]  ;;  %v10230_v58 = vld [vmem:[%s7524_s23 + $0x302] sm:$0xff] }
 0x3c5   : > { %4432 = vperm.xlu0 %7122, %v12518_v47   ;;  %v3497_v47 = vmul.f32 %v12520_v10, %v12507_v46  ;;  %v3612_v63 = vmul.f32 %v12522_v35, %v12521_v56  ;;  %v10218_v59 = vadd.f32 %v3495_v51, %v3383_v24  ;;  %v3611_v9 = vmul.f32 %v9865_v26, %v12521_v56  ;;  %v12525_v19 = vld [vmem:[#allocation97_spill] sm:$0xff]  ;;  %v12528_v22 = vld [vmem:[#allocation74_spill] sm:$0xff] }
 0x3c6   : > { %v10194_v18 = vpop.permute.xlu1 %3835  ;;  %v3614_v54 = vmul.f32 %v9869_v33, %v12521_v56  ;;  %v3613_v45 = vmul.f32 %v9871_v23, %v12521_v56  ;;  %v3514_v48 = vadd.f32 %v3498_v52, %v3386_v3  ;;  %v3616_v34 = vmul.f32 %v12525_v19, %v12521_v56  ;;  %v12526_v24 = vld [vmem:[#allocation61_spill] sm:$0xff]  ;;  %v12527_v33 = vld [vmem:[#allocation24_spill] sm:$0xff]  ;;  %v10260_v19 = vld [vmem:[%s7524_s23 + $0x31a] sm:$0xff] }
 0x3c7   : > { %v10196_v15 = vpop.permute.xlu0 %3830  ;;  %v3615_v14 = vmul.f32 %v12526_v24, %v12521_v56  ;;  %v3618_v26 = vmul.f32 %v9893_v11, %v12521_v56  ;;  %v3513_v49 = vadd.f32 %v3497_v47, %v3385_v21  ;;  %v3617_v23 = vmul.f32 %v12527_v33, %v12521_v56  ;;  %v12529_v21 = vld [vmem:[#allocation87_spill] sm:$0xff]  ;;  %12532 = vst [vmem:[#allocation15_spill] sm:$0xff] %v10260_v19  ;;  %v12534_v33 = vld [vmem:[#allocation34_spill] sm:$0xff] }
 0x3c8   : > { %4447 = vperm.xlu1 %7123, %v12523_v7   ;;  %v3620_v50 = vmul.f32 %v12528_v22, %v12521_v56  ;;  %v3619_v3 = vmul.f32 %v9901_v62, %v12521_v56  ;;  %v3628_v51 = vadd.f32 %v3612_v63, %v3500_v17  ;;  %v3622_v11 = vmul.f32 %v9905_v57, %v12521_v56  ;;  %v12530_v62 = vld [vmem:[#allocation88_spill] sm:$0xff]  ;;  %v12533_v24 = vld [vmem:[#allocation7_spill] sm:$0xff] }
 0x3c9   : > { %4442 = vperm.xlu0 %7122, %v12524_v43   ;;  %v3621_v52 = vmul.f32 %v12529_v21, %v12521_v56  ;;  %v3627_v10 = vadd.f32 %v3611_v9, %v3499_v8  ;;  %v3630_v47 = vadd.f32 %v3614_v54, %v3502_v30  ;;  %v3629_v35 = vadd.f32 %v3613_v45, %v3501_v0  ;;  %v10257_v43 = vld [vmem:[%s7524_s23 + $0x322] sm:$0xff] }
 0x3ca   : > { %v10210_v31 = vpop.permute.xlu1 %3845  ;;  %v3624_v7 = vmul.f32 %v12530_v62, %v12521_v56  ;;  %12531 = vst [vmem:[#allocation31_spill] sm:$0xff] %v10257_v43  ;;  %v3632_v17 = vadd.f32 %v3616_v34, %v3504_v60  ;;  %v3631_v63 = vadd.f32 %v3615_v14, %v3503_v16  ;;  %v3634_v57 = vadd.f32 %v3618_v26, %v3506_v27  ;;  %v12535_v30 = vld [vmem:[#allocation12_spill] sm:$0xff]  ;;  %v12538_v34 = vld [vmem:[#allocation57_spill] sm:$0xff]  ;;  %v12542_v62 = vld [vmem:[#allocation94_spill] sm:$0xff] }
 0x3cb   : > { %v10212_v41 = vpop.permute.xlu0 %3840  ;;  %v3741_v22 = vmul.f32 %v12534_v33, %v12533_v24  ;;  %v10264_v21 = vadd.f32 %v3617_v23, %v3505_v40  ;;  %v10266_v46 = vadd.f32 %v3620_v50, %v3508_v37  ;;  %v10268_v8 = vadd.f32 %v3619_v3, %v3507_v61  ;;  %v12536_v16 = vld [vmem:[#allocation92_spill] sm:$0xff]  ;;  %v12537_v37 = vld [vmem:[#allocation3_spill] sm:$0xff]  ;;  %v12541_v50 = vld [vmem:[#allocation33_spill] sm:$0xff] }
 0x3cc   : > { %4457 = vperm.xlu1 %7123, %v10227_v42   ;;  %v3740_v0 = vmul.f32 %v12535_v30, %v12533_v24  ;;  %v10276_v45 = vadd.f32 %v3622_v11, %v3510_v5  ;;  %v10278_v60 = vadd.f32 %v3621_v52, %v3509_v55  ;;  %v3743_v27 = vmul.f32 %v12536_v16, %v12533_v24  ;;  %v12539_v5 = vld [vmem:[#allocation8_spill] sm:$0xff] }
 0x3cd   : > { %4452 = vperm.xlu0 %7122, %v10230_v58   ;;  %v10284_v40 = vadd.f32 %v3624_v7, %v3512_v4  ;;  %v3623_v61 = vmul.f32 %v12537_v37, %v12521_v56  ;;  %v3742_v14 = vmul.f32 %v12538_v34, %v12533_v24  ;;  %v3869_v55 = vmul.f32 %v10098_v25, %v12539_v5  ;;  %v12540_v26 = vld [vmem:[#allocation84_spill] sm:$0xff] }
 0x3ce   : > { %v10244_v12 = vpop.permute.xlu1 %3855  ;;  %v3626_v23 = vmul.f32 %v12540_v26, %v12521_v56  ;;  %v3625_v3 = vmul.f32 %v12541_v50, %v12521_v56  ;;  %v3757_v11 = vadd.f32 %v3741_v22, %v3628_v51  ;;  %v3868_v4 = vmul.f32 %v10100_v2, %v12539_v5  ;;  %v10305_v34 = vld [vmem:[%s8128_s27 + $0x8] ss:$0 sm:$0xff]  ;;  %v12545_v26 = vld [vmem:[#allocation95_spill] sm:$0xff]  ;;  %v12546_v50 = vld [vmem:[#allocation82_spill] sm:$0xff] }
 0x3cf   : > { %v10246_v20 = vpop.permute.xlu0 %3850  ;;  %v3756_v52 = vadd.f32 %v3740_v0, %v3627_v10  ;;  %v3745_v7 = vmul.f32 %v12542_v62, %v12533_v24  ;;  %v3871_v33 = vmul.f32 %v10114_v32, %v12539_v5  ;;  %v3870_v25 = vmul.f32 %v10116_v53, %v12539_v5  ;;  %v12543_v2 = vld [vmem:[#allocation32_spill] sm:$0xff]  ;;  %v12544_v10 = vld [vmem:[#allocation35_spill] sm:$0xff] }
 0x3d0   : > { %4467 = vperm.xlu1 %7123, %v10257_v43   ;;  %v3759_v37 = vadd.f32 %v3743_v27, %v3630_v47  ;;  %v3758_v0 = vadd.f32 %v3742_v14, %v3629_v35  ;;  %v3744_v32 = vmul.f32 %v12545_v26, %v12533_v24  ;;  %v3747_v53 = vmul.f32 %v12546_v50, %v12533_v24 }
 0x3d1   : > { %4462 = vperm.xlu0 %7122, %v10260_v19   ;;  %v3885_v62 = vadd.f32 %v3869_v55, %v3757_v11  ;;  %v10316_v47 = vadd.f32 %v3623_v61, %v10218_v59  ;;  %v10318_v27 = vadd.f32 %v3626_v23, %v3514_v48  ;;  %v3761_v56 = vadd.f32 %v3745_v7, %v3632_v17  ;;  %v12547_v55 = vld [vmem:[#allocation93_spill] sm:$0xff]  ;;  %v12548_v59 = vld [vmem:[#allocation6_spill] sm:$0xff] }
 0x3d2   : > { %v10272_v9 = vpop.permute.xlu1 %3865  ;;  %v3886_v19 = vadd.f32 %v3870_v25, %v3758_v0  ;;  %v3760_v48 = vadd.f32 %v3744_v32, %v3631_v63  ;;  %v3763_v61 = vadd.f32 %v3747_v53, %v3634_v57  ;;  %v12550_v17 = vld [vmem:[#allocation9_spill] sm:$0xff]  ;;  %v12551_v11 = vld [vmem:[#allocation10_spill] sm:$0xff]  ;;  %v3873_v25 = vmul.f32 %v10146_v38, %v12539_v5  ;;  %v12553_v38 = vld [vmem:[#allocation23_spill] sm:$0xff] }
 0x3d3   : > { %v10274_v54 = vpop.permute.xlu0 %3860  ;;  %v3872_v63 = vmul.f32 %v10148_v28, %v12539_v5  ;;  %v3875_v57 = vmul.f32 %v10168_v39, %v12539_v5  ;;  %v12552_v53 = vld [vmem:[#allocation73_spill] sm:$0xff] }
 0x3d4   : > { %4526 = vperm.xlu1 %7123, %v12543_v2   ;;  %v3887_v2 = vadd.f32 %v3871_v33, %v3759_v37  ;;  %v3874_v37 = vmul.f32 %v10170_v13, %v12539_v5  ;;  %v10352_v13 = vld [vmem:[%s7524_s23 + $0x180] sm:$0xff] }
 0x3d5   : > { %4521 = vperm.xlu0 %7122, %v12544_v10  }
 0x3d6   : > { %v3924_v30 = vpop.permute.xlu1 %3923 }
 0x3d7   : > { %v3919_v16 = vpop.permute.xlu0 %3918  ;;  %v3997_v51 = vmul.f32 %v10305_v34, %v3924_v30  ;;  %v10320_v30 = vadd.f32 %v3625_v3, %v3513_v49  ;;  %v12549_v49 = vld [vmem:[#allocation83_spill] sm:$0xff]  ;;  %v3749_v3 = vmul.f32 %v12550_v17, %v12533_v24 }
 0x3d8   : > { %v3996_v22 = vmul.f32 %v10305_v34, %v3919_v16  ;;  %v3884_v16 = vadd.f32 %v3868_v4, %v3756_v52  ;;  %4536 = vperm.xlu1 %7123, %v12547_v55   ;;  %v3746_v23 = vmul.f32 %v12549_v49, %v12533_v24  ;;  %v3748_v4 = vmul.f32 %v12551_v11, %v12533_v24 }
 0x3d9   : > { %v4013_v10 = vadd.f32 %v3997_v51, %v3885_v62  ;;  %4531 = vperm.xlu0 %7122, %v12548_v59   ;;  %v3751_v52 = vmul.f32 %v10018_v6, %v12533_v24  ;;  %v3765_v28 = vadd.f32 %v3749_v3, %v10266_v46  ;;  %v3891_v46 = vadd.f32 %v3875_v57, %v3763_v61 }
 0x3da   : > { %v3934_v35 = vpop.permute.xlu1 %3933  ;;  %v4012_v43 = vadd.f32 %v3996_v22, %v3884_v16  ;;  %v3762_v62 = vadd.f32 %v3746_v23, %v10264_v21  ;;  %v3889_v21 = vadd.f32 %v3873_v25, %v3761_v56  ;;  %v3877_v23 = vmul.f32 %v10194_v18, %v12539_v5 }
 0x3db   : > { %v3929_v14 = vpop.permute.xlu0 %3928  ;;  %v3999_v26 = vmul.f32 %v10305_v34, %v3934_v35  ;;  %v4029_v0 = vmax.f32 %v4013_v10, 0.0  ;;  %v3750_v10 = vmul.f32 %v10020_v1, %v12533_v24 }
 0x3dc   : > { %v3998_v50 = vmul.f32 %v10305_v34, %v3929_v14  ;;  %v4028_v6 = vmax.f32 %v4012_v43, 0.0  ;;  %4546 = vperm.xlu1 %7123, %v12552_v53   ;;  %v3764_v43 = vadd.f32 %v3748_v4, %v10268_v8  ;;  %v3890_v49 = vadd.f32 %v3874_v37, %v3762_v62 }
 0x3dd   : > { %v4015_v7 = vadd.f32 %v3999_v26, %v3887_v2  ;;  %4541 = vperm.xlu0 %7122, %v12553_v38   ;;  %v10349_v2 = vld [vmem:[%s7524_s23 + $0x188] sm:$0xff]  ;;  %v3767_v26 = vadd.f32 %v3751_v52, %v10276_v45  ;;  %v3876_v45 = vmul.f32 %v10196_v15, %v12539_v5  ;;  %v3766_v4 = vadd.f32 %v3750_v10, %v10278_v60  ;;  %v12555_v60 = vld [vmem:[#allocation43_spill] sm:$0xff] }
 0x3de   : > { %v4014_v33 = vadd.f32 %v3998_v50, %v3886_v19  ;;  %v3944_v51 = vpop.permute.xlu1 %3943  ;;  %v3888_v50 = vadd.f32 %v3872_v63, %v3760_v48  ;;  %v3879_v48 = vmul.f32 %v10210_v31, %v12539_v5  ;;  %v3878_v52 = vmul.f32 %v10212_v41, %v12539_v5  ;;  %v12554_v41 = vld [vmem:[#allocation42_spill] sm:$0xff] }
 0x3df   : > { %v3939_v22 = vpop.permute.xlu0 %3938  ;;  %v4031_v32 = vmax.f32 %v4015_v7, 0.0  ;;  %v4001_v16 = vmul.f32 %v10305_v34, %v3944_v51  ;;  %v3893_v57 = vadd.f32 %v3877_v23, %v3765_v28  ;;  %v3892_v53 = vadd.f32 %v3876_v45, %v3764_v43  ;;  %v12560_v43 = vld [vmem:[#allocation28_spill] sm:$0xff] }
 0x3e0   : > { %v4030_v19 = vmax.f32 %v4014_v33, 0.0  ;;  %v4000_v39 = vmul.f32 %v10305_v34, %v3939_v22  ;;  %4556 = vperm.xlu1 %7123, %v10349_v2   ;;  %v3895_v38 = vadd.f32 %v3879_v48, %v3767_v26  ;;  %v3894_v62 = vadd.f32 %v3878_v52, %v3766_v4 }
 0x3e1   : > { %v4045_v35 = vmax.f32 %v4029_v0, %v4031_v32  ;;  %4551 = vperm.xlu0 %7122, %v10352_v13   ;;  %v4017_v1 = vadd.f32 %v4001_v16, %v3889_v21  ;;  %v12556_v32 = vld [vmem:[#allocation20_spill] sm:$0xff]  ;;  %v3754_v26 = vmul.f32 %v12560_v43, %v12533_v24 }
 0x3e2   : > { %v4044_v14 = vmax.f32 %v4028_v6, %v4030_v19  ;;  %v3954_v55 = vpop.permute.xlu1 %3953  ;;  %v4016_v8 = vadd.f32 %v4000_v39, %v3888_v50  ;;  %v3753_v6 = vmul.f32 %v10050_v44, %v12533_v24  ;;  %v3752_v19 = vmul.f32 %v12556_v32, %v12533_v24  ;;  %v12559_v44 = vld [vmem:[#allocation25_spill] sm:$0xff] }
 0x3e3   : > { %v3949_v59 = vpop.permute.xlu0 %3948  ;;  %v4089_v17 = vrot.slane %v4045_v35, 1  ;;  %v4003_v11 = vmul.f32 %v10305_v34, %v3954_v55  ;;  %v4033_v37 = vmax.f32 %v4017_v1, 0.0  ;;  %v12558_v55 = vld [vmem:[#allocation72_spill] sm:$0xff] }
 0x3e4   : > { %v4056_v3 = vrot.slane %v4044_v14, 1  ;;  %v4002_v56 = vmul.f32 %v10305_v34, %v3949_v59  ;;  %4566 = vperm.xlu1 %7123, %v12554_v41   ;;  %v4032_v51 = vmax.f32 %v4016_v8, 0.0  ;;  %v3755_v59 = vmul.f32 %v12559_v44, %v12533_v24 }
 0x3e5   : > { %v4097_v61 = vmax.f32 %v4045_v35, %v4089_v17  ;;  %v4019_v7 = vadd.f32 %v4003_v11, %v3891_v46  ;;  %4561 = vperm.xlu0 %7122, %v12555_v60   ;;  %v12557_v46 = vld [vmem:[#allocation80_spill] sm:$0xff]  ;;  %v3881_v17 = vmul.f32 %v10244_v12, %v12539_v5  ;;  %v3883_v11 = vmul.f32 %v10272_v9, %v12539_v5 }
 0x3e6   : > { %v4064_v18 = vmax.f32 %v4044_v14, %v4056_v3  ;;  %v4018_v33 = vadd.f32 %v4002_v56, %v3890_v49  ;;  %v3964_v25 = vpop.permute.xlu1 %3963  ;;  %v3880_v3 = vmul.f32 %v10246_v20, %v12539_v5  ;;  %v3882_v56 = vmul.f32 %v10274_v54, %v12539_v5  ;;  %v12562_v20 = vld [vmem:[#allocation76_spill] sm:$0xff] }
 0x3e7   : > { %v3959_v63 = vpop.permute.xlu0 %3958  ;;  %4101 = vst.msk [vmem:[#allocation2 + $0x55] sm:$0x1] %vm1577_vm2, %v4097_v61  ;;  %v4005_v15 = vmul.f32 %v10305_v34, %v3964_v25  ;;  %v4035_v22 = vmax.f32 %v4019_v7, 0.0  ;;  %v3769_v25 = vadd.f32 %v3753_v6, %v10284_v40  ;;  %v3768_v9 = vadd.f32 %v3752_v19, %v10316_v47  ;;  %v10418_v47 = vld [vmem:[%s7524_s23 + $0x338] sm:$0xff] }
 0x3e8   : > { %4105 = vst.msk [vmem:[#allocation2 + $0x54] sm:$0x4] %vm1582_vm3, %v4097_v61  ;;  %4073 = vst.msk [vmem:[#allocation2 + $0x50] sm:$0x4] %vm1582_vm3, %v4064_v18  ;;  %v4004_v31 = vmul.f32 %v10305_v34, %v3959_v63  ;;  %v4034_v0 = vmax.f32 %v4018_v33, 0.0  ;;  %4576 = vperm.xlu1 %7123, %v12557_v46   ;;  %v12561_v33 = vld [vmem:[#allocation4_spill] sm:$0xff] }
 0x3e9   : > { %4109 = vst.msk [vmem:[#allocation2 + $0x53] sm:$0x10] %vm1587_vm4, %v4097_v61  ;;  %4077 = vst.msk [vmem:[#allocation2 + $0x4f] sm:$0x10] %vm1587_vm4, %v4064_v18  ;;  %v4047_v28 = vmax.f32 %v4033_v37, %v4035_v22  ;;  %v4021_v39 = vadd.f32 %v4005_v15, %v3893_v57  ;;  %4571 = vperm.xlu0 %7122, %v12558_v55   ;;  %v10421_v63 = vld [vmem:[%s7524_s23 + $0x330] sm:$0xff]  ;;  %v3771_v57 = vadd.f32 %v3755_v59, %v10318_v27 }
 0x3ea   : > { %4113 = vst.msk [vmem:[#allocation2 + $0x52] sm:$0x40] %vm1592_vm5, %v4097_v61  ;;  %4081 = vst.msk [vmem:[#allocation2 + $0x4e] sm:$0x40] %vm1592_vm5, %v4064_v18  ;;  %v4046_v16 = vmax.f32 %v4032_v51, %v4034_v0  ;;  %v3974_v10 = vpop.permute.xlu1 %3973  ;;  %v4020_v14 = vadd.f32 %v4004_v31, %v3892_v53  ;;  %v3770_v15 = vadd.f32 %v3754_v26, %v10320_v30 }
 0x3eb   : > { %4069 = vst.msk [vmem:[#allocation2 + $0x51] sm:$0x1] %vm1577_vm2, %v4064_v18  ;;  %v3969_v35 = vpop.permute.xlu0 %3968  ;;  %v4007_v21 = vmul.f32 %v10305_v34, %v3974_v10  ;;  %v4090_v49 = vrot.slane %v4047_v28, 1  ;;  %v4037_v4 = vmax.f32 %v4021_v39, 0.0  ;;  %v3897_v60 = vadd.f32 %v3881_v17, %v3769_v25 }
 0x3ec   : > { %v4006_v50 = vmul.f32 %v10305_v34, %v3969_v35  ;;  %v4057_v23 = vrot.slane %v4046_v16, 1  ;;  %v4036_v52 = vmax.f32 %v4020_v14, 0.0  ;;  %4586 = vperm.xlu1 %7123, %v12561_v33   ;;  %v3896_v37 = vadd.f32 %v3880_v3, %v3768_v9 }
 0x3ed   : > { %v4023_v1 = vadd.f32 %v4007_v21, %v3895_v38  ;;  %v4098_v45 = vmax.f32 %v4047_v28, %v4090_v49  ;;  %4581 = vperm.xlu0 %7122, %v12562_v20   ;;  %v3899_v0 = vadd.f32 %v3883_v11, %v3771_v57  ;;  %v3898_v6 = vadd.f32 %v3882_v56, %v3770_v15  ;;  %v6958_v28 = vld [vmem:[%s7524_s23 + $0x139] sm:$0xff]  ;;  %v12563_v49 = vld [vmem:[#allocation17_spill] sm:$0xff] }
 0x3ee   : > { %v4022_v8 = vadd.f32 %v4006_v50, %v3894_v62  ;;  %v4065_v48 = vmax.f32 %v4046_v16, %v4057_v23  ;;  %v3984_v61 = vpop.permute.xlu1 %3983  ;;  %v6959_v62 = vld [vmem:[%s7524_s23 + $0x141] sm:$0xff] }
 0x3ef   : > { %v3979_v18 = vpop.permute.xlu0 %3978  ;;  %v4039_v7 = vmax.f32 %v4023_v1, 0.0  ;;  %4102 = vst.msk [vmem:[#allocation2 + $0x65] sm:$0x1] %vm1577_vm2, %v4098_v45  ;;  %v4009_v54 = vmul.f32 %v10305_v34, %v3984_v61  ;;  %v12564_v23 = vld [vmem:[#allocation99_spill] sm:$0xff]  ;;  %v10464_v61 = vld [vmem:[%s7524_s23 + $0x189] sm:$0xff] }
 0x3f0   : > { %v4038_v12 = vmax.f32 %v4022_v8, 0.0  ;;  %4106 = vst.msk [vmem:[#allocation2 + $0x64] sm:$0x4] %vm1582_vm3, %v4098_v45  ;;  %4074 = vst.msk [vmem:[#allocation2 + $0x60] sm:$0x4] %vm1582_vm3, %v4065_v48  ;;  %v4008_v40 = vmul.f32 %v10305_v34, %v3979_v18  ;;  %4596 = vperm.xlu1 %7123, %v10418_v47   ;;  %v10467_v18 = vld [vmem:[%s7524_s23 + $0x181] sm:$0xff] }
 0x3f1   : > { %4110 = vst.msk [vmem:[#allocation2 + $0x63] sm:$0x10] %vm1587_vm4, %v4098_v45  ;;  %4078 = vst.msk [vmem:[#allocation2 + $0x5f] sm:$0x10] %vm1587_vm4, %v4065_v48  ;;  %v4049_v31 = vmax.f32 %v4037_v4, %v4039_v7  ;;  %4591 = vperm.xlu0 %7122, %v10421_v63   ;;  %v4025_v53 = vadd.f32 %v4009_v54, %v3897_v60  ;;  %v6967_v7 = vld [vmem:[%s7524_s23 + $0x2f1] sm:$0xff]  ;;  %v10494_v60 = vld [vmem:[%s7524_s23 + $0x339] sm:$0xff] }
 0x3f2   : > { %4114 = vst.msk [vmem:[#allocation2 + $0x62] sm:$0x40] %vm1592_vm5, %v4098_v45  ;;  %4082 = vst.msk [vmem:[#allocation2 + $0x5e] sm:$0x40] %vm1592_vm5, %v4065_v48  ;;  %v4048_v41 = vmax.f32 %v4036_v52, %v4038_v12  ;;  %v3994_v51 = vpop.permute.xlu1 %3993  ;;  %v4024_v27 = vadd.f32 %v4008_v40, %v3896_v37  ;;  %v12565_v45 = vld [vmem:[#allocation69_spill] sm:$0xff]  ;;  %v12568_v40 = vld [vmem:[#allocation14_spill] sm:$0xff] }
 0x3f3   : > { %4070 = vst.msk [vmem:[#allocation2 + $0x61] sm:$0x1] %vm1577_vm2, %v4065_v48  ;;  %v3989_v22 = vpop.permute.xlu0 %3988  ;;  %v4091_v32 = vrot.slane %v4049_v31, 1  ;;  %v4011_v30 = vmul.f32 %v10305_v34, %v3994_v51  ;;  %v12566_v48 = vld [vmem:[#allocation70_spill] sm:$0xff]  ;;  %v6966_v12 = vld [vmem:[%s7524_s23 + $0x2e9] sm:$0xff] }
 0x3f4   : > { %v4058_v19 = vrot.slane %v4048_v41, 1  ;;  %v4010_v38 = vmul.f32 %v10305_v34, %v3989_v22  ;;  %4654 = vperm.xlu1 %7123, %v6959_v62   ;;  %v4041_v34 = vmax.f32 %v4025_v53, 0.0  ;;  %v4040_v50 = vmax.f32 %v4024_v27, 0.0  ;;  %v12567_v54 = vld [vmem:[#allocation13_spill] sm:$0xff] }
 0x3f5   : > { %v4099_v16 = vmax.f32 %v4049_v31, %v4091_v32  ;;  %v4027_v10 = vadd.f32 %v4011_v30, %v3899_v0  ;;  %4649 = vperm.xlu0 %7122, %v6958_v28   ;;  %v12569_v31 = vld [vmem:[#allocation21_spill] sm:$0xff]  ;;  %v6975_v0 = vld [vmem:[%s7524_s23 + $0x142] sm:$0xff] }
 0x3f6   : > { %v4066_v39 = vmax.f32 %v4048_v41, %v4058_v19  ;;  %v4026_v35 = vadd.f32 %v4010_v38, %v3898_v6  ;;  %v10431_v14 = vpop.permute.xlu1 %4141  ;;  %v12570_v41 = vld [vmem:[#allocation22_spill] sm:$0xff]  ;;  %v12571_v30 = vld [vmem:[#allocation29_spill] sm:$0xff] }
 0x3f7   : > { %v10433_v21 = vpop.permute.xlu0 %4136  ;;  %4103 = vst.msk [vmem:[#allocation2 + $0xf5] sm:$0x1] %vm1577_vm2, %v4099_v16  ;;  %v4043_v46 = vmax.f32 %v4027_v10, 0.0  ;;  %v10497_v37 = vld [vmem:[%s7524_s23 + $0x331] sm:$0xff]  ;;  %v6974_v6 = vld [vmem:[%s7524_s23 + $0x13a] sm:$0xff] }
 0x3f8   : > { %4107 = vst.msk [vmem:[#allocation2 + $0xf4] sm:$0x4] %vm1582_vm3, %v4099_v16  ;;  %4075 = vst.msk [vmem:[#allocation2 + $0xf0] sm:$0x4] %vm1582_vm3, %v4066_v39  ;;  %v4042_v55 = vmax.f32 %v4026_v35, 0.0  ;;  %4664 = vperm.xlu1 %7123, %v12563_v49   ;;  %v12572_v38 = vld [vmem:[#allocation30_spill] sm:$0xff] }
 0x3f9   : > { %4111 = vst.msk [vmem:[#allocation2 + $0xf3] sm:$0x10] %vm1587_vm4, %v4099_v16  ;;  %4079 = vst.msk [vmem:[#allocation2 + $0xef] sm:$0x10] %vm1587_vm4, %v4066_v39  ;;  %v4051_v44 = vmax.f32 %v4041_v34, %v4043_v46  ;;  %4659 = vperm.xlu0 %7122, %v12564_v23   ;;  %v6983_v34 = vld [vmem:[%s7524_s23 + $0x2f2] sm:$0xff]  ;;  %v12573_v49 = vld [vmem:[#allocation31_spill] sm:$0xff] }
 0x3fa   : > { %4115 = vst.msk [vmem:[#allocation2 + $0xf2] sm:$0x40] %vm1592_vm5, %v4099_v16  ;;  %4083 = vst.msk [vmem:[#allocation2 + $0xee] sm:$0x40] %vm1592_vm5, %v4066_v39  ;;  %v4050_v59 = vmax.f32 %v4040_v50, %v4042_v55  ;;  %v10443_v43 = vpop.permute.xlu1 %4151  ;;  %v10524_v16 = vld [vmem:[%s7524_s23 + $0x18a] sm:$0xff]  ;;  %v12574_v23 = vld [vmem:[#allocation15_spill] sm:$0xff] }
 0x3fb   : > { %4071 = vst.msk [vmem:[#allocation2 + $0xf1] sm:$0x1] %vm1577_vm2, %v4066_v39  ;;  %v10445_v26 = vpop.permute.xlu0 %4146  ;;  %v4092_v17 = vrot.slane %v4051_v44, 1  ;;  %v10527_v39 = vld [vmem:[%s7524_s23 + $0x182] sm:$0xff]  ;;  %v6982_v50 = vld [vmem:[%s7524_s23 + $0x2ea] sm:$0xff] }
 0x3fc   : > { %v4059_v3 = vrot.slane %v4050_v59, 1  ;;  %4674 = vperm.xlu1 %7123, %v12565_v45   ;;  %v6991_v45 = vld [vmem:[%s7524_s23 + $0x158] sm:$0xff] }
 0x3fd   : > { %v4100_v1 = vmax.f32 %v4051_v44, %v4092_v17  ;;  %4669 = vperm.xlu0 %7122, %v12566_v48   ;;  %v10554_v17 = vld [vmem:[%s7524_s23 + $0x33a] sm:$0xff]  ;;  %v6990_v48 = vld [vmem:[%s7524_s23 + $0x150] sm:$0xff] }
 0x3fe   : > { %v4067_v8 = vmax.f32 %v4050_v59, %v4059_v3  ;;  %v10449_v11 = vpop.permute.xlu1 %4161  ;;  %v10557_v3 = vld [vmem:[%s7524_s23 + $0x332] sm:$0xff] }
 0x3ff   : > { %v10451_v56 = vpop.permute.xlu0 %4156  ;;  %4104 = vst.msk [vmem:[#allocation2 + $0x105] sm:$0x1] %vm1577_vm2, %v4100_v1 }
 0x400   : > { %4108 = vst.msk [vmem:[#allocation2 + $0x104] sm:$0x4] %vm1582_vm3, %v4100_v1  ;;  %4076 = vst.msk [vmem:[#allocation2 + $0x100] sm:$0x4] %vm1582_vm3, %v4067_v8  ;;  %4684 = vperm.xlu1 %7123, %v10464_v61  }
 0x401   : > { %4112 = vst.msk [vmem:[#allocation2 + $0x103] sm:$0x10] %vm1587_vm4, %v4100_v1  ;;  %4080 = vst.msk [vmem:[#allocation2 + $0xff] sm:$0x10] %vm1587_vm4, %v4067_v8  ;;  %4679 = vperm.xlu0 %7122, %v10467_v18  }
 0x402   : > { %4116 = vst.msk [vmem:[#allocation2 + $0x102] sm:$0x40] %vm1592_vm5, %v4100_v1  ;;  %4084 = vst.msk [vmem:[#allocation2 + $0xfe] sm:$0x40] %vm1592_vm5, %v4067_v8  ;;  %v10469_v4 = vpop.permute.xlu1 %4171 }
 0x403   : > { %4072 = vst.msk [vmem:[#allocation2 + $0x101] sm:$0x1] %vm1577_vm2, %v4067_v8  ;;  %v10471_v52 = vpop.permute.xlu0 %4166 }
 0x404   : > { %4694 = vperm.xlu1 %7123, %v6967_v7  }
 0x405   : > { %4689 = vperm.xlu0 %7122, %v6966_v12  }
 0x406   : > { %v10477_v33 = vpop.permute.xlu1 %4181 }
 0x407   : > { %v10479_v20 = vpop.permute.xlu0 %4176 }
 0x408   : > { %4704 = vperm.xlu1 %7123, %v12567_v54   ;;  %v6993_v54 = vld [vmem:[%s7524_s23 + $0x170] sm:$0xff] }
 0x409   : > { %4699 = vperm.xlu0 %7122, %v12568_v40   ;;  %v6992_v40 = vld [vmem:[%s7524_s23 + $0x168] sm:$0xff] }
 0x40a   : > { %v10481_v25 = vpop.permute.xlu1 %4191 }
 0x40b   : > { %v10483_v9 = vpop.permute.xlu0 %4186 }
 0x40c   : > { %4714 = vperm.xlu1 %7123, %v12569_v31  }
 0x40d   : > { %4709 = vperm.xlu0 %7122, %v12570_v41  }
 0x40e   : > { %v10487_v57 = vpop.permute.xlu1 %4201 }
 0x40f   : > { %v10489_v15 = vpop.permute.xlu0 %4196 }
 0x410   : > { %4724 = vperm.xlu1 %7123, %v10494_v60  }
 0x411   : > { %4719 = vperm.xlu0 %7122, %v10497_v37  }
 0x412   : > { %v10499_v51 = vpop.permute.xlu1 %4211 }
 0x413   : > { %v10501_v22 = vpop.permute.xlu0 %4206 }
 0x414   : > { %4782 = vperm.xlu1 %7123, %v6975_v0  }
 0x415   : > { %4777 = vperm.xlu0 %7122, %v6974_v6  }
 0x416   : > { %v10507_v32 = vpop.permute.xlu1 %4269 }
 0x417   : > { %v10509_v19 = vpop.permute.xlu0 %4264 }
 0x418   : > { %4792 = vperm.xlu1 %7123, %v12571_v30   ;;  %v6997_v30 = vld [vmem:[%s7524_s23 + $0x1a0] sm:$0xff] }
 0x419   : > { %4787 = vperm.xlu0 %7122, %v12572_v38   ;;  %v6996_v38 = vld [vmem:[%s7524_s23 + $0x198] sm:$0xff] }
 0x41a   : > { %v10511_v53 = vpop.permute.xlu1 %4279 }
 0x41b   : > { %v10513_v27 = vpop.permute.xlu0 %4274 }
 0x41c   : > { %4802 = vperm.xlu1 %7123, %v10159_v36  }
 0x41d   : > { %4797 = vperm.xlu0 %7122, %v10162_v29  }
 0x41e   : > { %v10517_v62 = vpop.permute.xlu1 %4289 }
 0x41f   : > { %v10519_v28 = vpop.permute.xlu0 %4284 }
 0x420   : > { %4812 = vperm.xlu1 %7123, %v10524_v16  }
 0x421   : > { %4807 = vperm.xlu0 %7122, %v10527_v39  }
 0x422   : > { %v10529_v10 = vpop.permute.xlu1 %4299 }
 0x423   : > { %v10531_v35 = vpop.permute.xlu0 %4294 }
 0x424   : > { %4822 = vperm.xlu1 %7123, %v6983_v34  }
 0x425   : > { %4817 = vperm.xlu0 %7122, %v6982_v50  }
 0x426   : > { %v10537_v46 = vpop.permute.xlu1 %4309 }
 0x427   : > { %v10539_v36 = vpop.permute.xlu0 %4304 }
 0x428   : > { %4832 = vperm.xlu1 %7123, %v10227_v42  }
 0x429   : > { %4827 = vperm.xlu0 %7122, %v10230_v58  }
 0x42a   : > { %v10541_v29 = vpop.permute.xlu1 %4319 }
 0x42b   : > { %v10543_v55 = vpop.permute.xlu0 %4314 }
 0x42c   : > { %4842 = vperm.xlu1 %7123, %v12573_v49  }
 0x42d   : > { %4837 = vperm.xlu0 %7122, %v12574_v23  }
 0x42e   : > { %v10547_v44 = vpop.permute.xlu1 %4329 }
 0x42f   : > { %v10549_v59 = vpop.permute.xlu0 %4324 }
 0x430   : > { %4852 = vperm.xlu1 %7123, %v10554_v17  }
 0x431   : > { %4847 = vperm.xlu0 %7122, %v10557_v3  }
 0x432   : > { %v10559_v1 = vpop.permute.xlu1 %4339 }
 0x433   : > { %v10561_v8 = vpop.permute.xlu0 %4334 }
 0x434   : > { %4911 = vperm.xlu1 %7123, %v6991_v45   ;;  %v6999_v45 = vld [vmem:[%s7524_s23 + $0x308] sm:$0xff] }
 0x435   : > { %4906 = vperm.xlu0 %7122, %v6990_v48   ;;  %v6998_v48 = vld [vmem:[%s7524_s23 + $0x300] sm:$0xff] }
 0x436   : > { %v10567_v7 = vpop.permute.xlu1 %4397 }
 0x437   : > { %12575 = vst [vmem:[#allocation36_spill] sm:$0xff] %v10567_v7  ;;  %v10569_v12 = vpop.permute.xlu0 %4392  ;;  %v5428_v7 = vld [vmem:[#allocation2 + $0x41] sm:$0xff] }
 0x438   : > { %12576 = vst [vmem:[#allocation37_spill] sm:$0xff] %v10569_v12  ;;  %4921 = vperm.xlu1 %7123, %v6993_v54   ;;  %v5436_v12 = vld [vmem:[#allocation2 + $0xe1] sm:$0xff] }
 0x439   : > { %4916 = vperm.xlu0 %7122, %v6992_v40  }
 0x43a   : > { %v10573_v31 = vpop.permute.xlu1 %4407 }
 0x43b   : > { %12577 = vst [vmem:[#allocation38_spill] sm:$0xff] %v10573_v31  ;;  %v10575_v41 = vpop.permute.xlu0 %4402 }
 0x43c   : > { %12578 = vst [vmem:[#allocation39_spill] sm:$0xff] %v10575_v41  ;;  %4931 = vperm.xlu1 %7123, %v10349_v2   ;;  %v7001_v2 = vld [vmem:[%s7524_s23 + $0x320] sm:$0xff] }
 0x43d   : > { %4926 = vperm.xlu0 %7122, %v10352_v13   ;;  %v7000_v13 = vld [vmem:[%s7524_s23 + $0x318] sm:$0xff] }
 0x43e   : > { %v10577_v0 = vpop.permute.xlu1 %4417 }
 0x43f   : > { %12579 = vst [vmem:[#allocation60_spill] sm:$0xff] %v10577_v0  ;;  %v10579_v6 = vpop.permute.xlu0 %4412  ;;  %v5411_v0 = vld [vmem:[#allocation2 + $0x30] sm:$0xff] }
 0x440   : > { %12580 = vst [vmem:[#allocation40_spill] sm:$0xff] %v10579_v6  ;;  %4941 = vperm.xlu1 %7123, %v6997_v30   ;;  %v5419_v6 = vld [vmem:[#allocation2 + $0xd0] sm:$0xff] }
 0x441   : > { %4936 = vperm.xlu0 %7122, %v6996_v38  }
 0x442   : > { %v10585_v34 = vpop.permute.xlu1 %4427 }
 0x443   : > { %12581 = vst [vmem:[#allocation41_spill] sm:$0xff] %v10585_v34  ;;  %v10587_v50 = vpop.permute.xlu0 %4422  ;;  %v10775_v34 = vld [vmem:[#allocation2 + $0x40] sm:$0xff] }
 0x444   : > { %12582 = vst [vmem:[#allocation44_spill] sm:$0xff] %v10587_v50  ;;  %4951 = vperm.xlu1 %7123, %v6999_v45   ;;  %v7005_v45 = vld [vmem:[%s7524_s23 + $0x350] sm:$0xff] }
 0x445   : > { %4946 = vperm.xlu0 %7122, %v6998_v48   ;;  %v7004_v48 = vld [vmem:[%s7524_s23 + $0x348] sm:$0xff] }
 0x446   : > { %v10591_v54 = vpop.permute.xlu1 %4437 }
 0x447   : > { %12583 = vst [vmem:[#allocation26_spill] sm:$0xff] %v10591_v54  ;;  %v10593_v40 = vpop.permute.xlu0 %4432 }
 0x448   : > { %12584 = vst [vmem:[#allocation45_spill] sm:$0xff] %v10593_v40  ;;  %4961 = vperm.xlu1 %7123, %v7001_v2   ;;  %v7007_v2 = vld [vmem:[%s7524_s23 + $0x159] sm:$0xff] }
 0x449   : > { %4956 = vperm.xlu0 %7122, %v7000_v13   ;;  %v7006_v13 = vld [vmem:[%s7524_s23 + $0x151] sm:$0xff] }
 0x44a   : > { %v10597_v5 = vpop.permute.xlu1 %4447 }
 0x44b   : > { %12585 = vst [vmem:[#allocation46_spill] sm:$0xff] %v10597_v5  ;;  %v10599_v24 = vpop.permute.xlu0 %4442 }
 0x44c   : > { %12586 = vst [vmem:[#allocation47_spill] sm:$0xff] %v10599_v24  ;;  %4971 = vperm.xlu1 %7123, %v10418_v47   ;;  %v7009_v47 = vld [vmem:[%s7524_s23 + $0x171] sm:$0xff] }
 0x44d   : > { %4966 = vperm.xlu0 %7122, %v10421_v63   ;;  %v7008_v63 = vld [vmem:[%s7524_s23 + $0x169] sm:$0xff] }
 0x44e   : > { %v10601_v30 = vpop.permute.xlu1 %4457 }
 0x44f   : > { %12587 = vst [vmem:[#allocation11_spill] sm:$0xff] %v10601_v30  ;;  %v10603_v38 = vpop.permute.xlu0 %4452 }
 0x450   : > { %12588 = vst [vmem:[#allocation71_spill] sm:$0xff] %v10603_v38  ;;  %4981 = vperm.xlu1 %7123, %v7005_v45  }
 0x451   : > { %4976 = vperm.xlu0 %7122, %v7004_v48  }
 0x452   : > { %v10609_v40 = vpop.permute.xlu1 %4467 }
 0x453   : > { %12589 = vst [vmem:[#allocation48_spill] sm:$0xff] %v10609_v40  ;;  %v10611_v54 = vpop.permute.xlu0 %4462 }
 0x454   : > { %12590 = vst [vmem:[#allocation51_spill] sm:$0xff] %v10611_v54  ;;  %5039 = vperm.xlu1 %7123, %v7007_v2   ;;  %v7449_v2 = vld [vmem:[%s7524_s23 + $0x301] sm:$0xff] }
 0x455   : > { %5034 = vperm.xlu0 %7122, %v7006_v13   ;;  %v7450_v54 = vld [vmem:[%s7524_s23 + $0x321] sm:$0xff] }
 0x456   : > { %v10615_v30 = vpop.permute.xlu1 %4526 }
 0x457   : > { %12591 = vst [vmem:[#allocation52_spill] sm:$0xff] %v10615_v30  ;;  %v10617_v38 = vpop.permute.xlu0 %4521  ;;  %v7448_v30 = vld [vmem:[%s7524_s23 + $0x309] sm:$0xff] }
 0x458   : > { %12592 = vst [vmem:[#allocation53_spill] sm:$0xff] %v10617_v38  ;;  %5049 = vperm.xlu1 %7123, %v7009_v47  }
 0x459   : > { %5044 = vperm.xlu0 %7122, %v7008_v63  }
 0x45a   : > { %v10621_v24 = vpop.permute.xlu1 %4536 }
 0x45b   : > { %12593 = vst [vmem:[#allocation49_spill] sm:$0xff] %v10621_v24  ;;  %v10623_v40 = vpop.permute.xlu0 %4531  ;;  %v7451_v24 = vld [vmem:[%s7524_s23 + $0x319] sm:$0xff] }
 0x45c   : > { %12594 = vst [vmem:[#allocation50_spill] sm:$0xff] %v10623_v40  ;;  %5079 = vperm.xlu1 %7123, %v7448_v30   ;;  %v7013_v30 = vld [vmem:[%s7524_s23 + $0x1a1] sm:$0xff] }
 0x45d   : > { %5074 = vperm.xlu0 %7122, %v7449_v2   ;;  %v7012_v2 = vld [vmem:[%s7524_s23 + $0x199] sm:$0xff] }
 0x45e   : > { %v10625_v45 = vpop.permute.xlu1 %4546 }
 0x45f   : > { %12595 = vst [vmem:[#allocation54_spill] sm:$0xff] %v10625_v45  ;;  %v10627_v48 = vpop.permute.xlu0 %4541 }
 0x460   : > { %12596 = vst [vmem:[#allocation55_spill] sm:$0xff] %v10627_v48  ;;  %5089 = vperm.xlu1 %7123, %v7450_v54  }
 0x461   : > { %5084 = vperm.xlu0 %7122, %v7451_v24  }
 0x462   : > { %v10631_v13 = vpop.permute.xlu1 %4556 }
 0x463   : > { %12597 = vst [vmem:[#allocation56_spill] sm:$0xff] %v10631_v13  ;;  %v10633_v38 = vpop.permute.xlu0 %4551 }
 0x464   : > { %12598 = vst [vmem:[#allocation59_spill] sm:$0xff] %v10633_v38  ;;  %5059 = vperm.xlu1 %7123, %v10464_v61   ;;  %v7021_v61 = vld [vmem:[%s7524_s23 + $0x351] sm:$0xff] }
 0x465   : > { %5054 = vperm.xlu0 %7122, %v10467_v18   ;;  %v7020_v18 = vld [vmem:[%s7524_s23 + $0x349] sm:$0xff] }
 0x466   : > { %v10637_v47 = vpop.permute.xlu1 %4566 }
 0x467   : > { %12599 = vst [vmem:[#allocation63_spill] sm:$0xff] %v10637_v47  ;;  %v10639_v63 = vpop.permute.xlu0 %4561 }
 0x468   : > { %12600 = vst [vmem:[#allocation64_spill] sm:$0xff] %v10639_v63  ;;  %5069 = vperm.xlu1 %7123, %v7013_v30   ;;  %v7023_v30 = vld [vmem:[%s7524_s23 + $0x15a] sm:$0xff] }
 0x469   : > { %5064 = vperm.xlu0 %7122, %v7012_v2   ;;  %v7022_v2 = vld [vmem:[%s7524_s23 + $0x152] sm:$0xff] }
 0x46a   : > { %v10645_v13 = vpop.permute.xlu1 %4576 }
 0x46b   : > { %12601 = vst [vmem:[#allocation65_spill] sm:$0xff] %v10645_v13  ;;  %v10647_v38 = vpop.permute.xlu0 %4571 }
 0x46c   : > { %12602 = vst [vmem:[#allocation66_spill] sm:$0xff] %v10647_v38  ;;  %5099 = vperm.xlu1 %7123, %v10494_v60   ;;  %v7024_v60 = vld [vmem:[%s7524_s23 + $0x16a] sm:$0xff] }
 0x46d   : > { %5094 = vperm.xlu0 %7122, %v10497_v37  }
 0x46e   : > { %v10649_v24 = vpop.permute.xlu1 %4586 }
 0x46f   : > { %12603 = vst [vmem:[#allocation16_spill] sm:$0xff] %v10649_v24  ;;  %v10651_v54 = vpop.permute.xlu0 %4581 }
 0x470   : > { %12604 = vst [vmem:[#allocation67_spill] sm:$0xff] %v10651_v54  ;;  %5109 = vperm.xlu1 %7123, %v7021_v61   ;;  %v7025_v54 = vld [vmem:[%s7524_s23 + $0x172] sm:$0xff] }
 0x471   : > { %5104 = vperm.xlu0 %7122, %v7020_v18  }
 0x472   : > { %v10657_v63 = vpop.permute.xlu1 %4596 }
 0x473   : > { %12605 = vst [vmem:[#allocation77_spill] sm:$0xff] %v10657_v63  ;;  %v10659_v47 = vpop.permute.xlu0 %4591  ;;  %v5395_v63 = vld [vmem:[#allocation2 + $0x22] sm:$0xff] }
 0x474   : > { %12606 = vst [vmem:[#allocation78_spill] sm:$0xff] %v10659_v47  ;;  %5167 = vperm.xlu1 %7123, %v7023_v30   ;;  %v5403_v47 = vld [vmem:[#allocation2 + $0xc2] sm:$0xff] }
 0x475   : > { %5162 = vperm.xlu0 %7122, %v7022_v2  }
 0x476   : > { %v10663_v38 = vpop.permute.xlu1 %4654 }
 0x477   : > { %12607 = vst [vmem:[#allocation68_spill] sm:$0xff] %v10663_v38  ;;  %v10665_v24 = vpop.permute.xlu0 %4649  ;;  %v5396_v38 = vld [vmem:[#allocation2 + $0x32] sm:$0xff] }
 0x478   : > { %12608 = vst [vmem:[#allocation81_spill] sm:$0xff] %v10665_v24  ;;  %5177 = vperm.xlu1 %7123, %v7025_v54   ;;  %v10753_v45 = vpack.i.bf16 %v5396_v38, %v5395_v63 }
 0x479   : > { %5172 = vperm.xlu0 %7122, %v7024_v60  }
 0x47a   : > { %v10669_v13 = vpop.permute.xlu1 %4664 }
 0x47b   : > { %12609 = vst [vmem:[#allocation75_spill] sm:$0xff] %v10669_v13  ;;  %v10671_v37 = vpop.permute.xlu0 %4659  ;;  %v10737_v13 = vld [vmem:[#allocation2 + $0x12] sm:$0xff] }
 0x47c   : > { %12610 = vst [vmem:[#allocation18_spill] sm:$0xff] %v10671_v37  ;;  %5207 = vperm.xlu1 %7123, %v10227_v42   ;;  %v7029_v42 = vld [vmem:[%s7524_s23 + $0x1a2] sm:$0xff]  ;;  %v10735_v37 = vld [vmem:[#allocation2 + $0xb2] sm:$0xff] }
 0x47d   : > { %5202 = vperm.xlu0 %7122, %v10230_v58   ;;  %v7028_v58 = vld [vmem:[%s7524_s23 + $0x19a] sm:$0xff] }
 0x47e   : > { %v10673_v61 = vpop.permute.xlu1 %4674 }
 0x47f   : > { %12611 = vst [vmem:[#allocation19_spill] sm:$0xff] %v10673_v61  ;;  %v10675_v18 = vpop.permute.xlu0 %4669  ;;  %v10709_v61 = vld [vmem:[#allocation2 + $0xb1] sm:$0xff] }
 0x480   : > { %12612 = vst [vmem:[#allocation27_spill] sm:$0xff] %v10675_v18  ;;  %5217 = vperm.xlu1 %7123, %v12573_v49  }
 0x481   : > { %5212 = vperm.xlu0 %7122, %v12574_v23  }
 0x482   : > { %v10679_v30 = vpop.permute.xlu1 %4684 }
 0x483   : > { %12613 = vst [vmem:[#allocation85_spill] sm:$0xff] %v10679_v30  ;;  %v10681_v2 = vpop.permute.xlu0 %4679 }
 0x484   : > { %12614 = vst [vmem:[#allocation98_spill] sm:$0xff] %v10681_v2  ;;  %5187 = vperm.xlu1 %7123, %v10524_v16   ;;  %v7036_v16 = vld [vmem:[%s7524_s23 + $0x34a] sm:$0xff] }
 0x485   : > { %5182 = vperm.xlu0 %7122, %v10527_v39  }
 0x486   : > { %v10685_v54 = vpop.permute.xlu1 %4694 }
 0x487   : > { %12615 = vst [vmem:[#allocation5_spill] sm:$0xff] %v10685_v54  ;;  %v10687_v60 = vpop.permute.xlu0 %4689  ;;  %v5377_v54 = vld [vmem:[#allocation2 + $0x1] sm:$0xff] }
 0x488   : > { %12616 = vst [vmem:[#allocation58_spill] sm:$0xff] %v10687_v60  ;;  %5197 = vperm.xlu1 %7123, %v7029_v42   ;;  %v7037_v60 = vld [vmem:[%s7524_s23 + $0x352] sm:$0xff]  ;;  %s7050_s23 = sshll.u32 %s12740_s19, 5 }
 0x489   : > { %5192 = vperm.xlu0 %7122, %v7028_v58   ;;  %v10711_v42 = vld [vmem:[#allocation2 + $0x11] sm:$0xff]  ;;  %s11771_s26 = scalar_lea.vmem %s11853_s5, %s7050_s23 }
 0x48a   : > { %v10693_v18 = vpop.permute.xlu1 %4704 }
 0x48b   : > { %12617 = vst [vmem:[#allocation62_spill] sm:$0xff] %v10693_v18  ;;  %v10695_v30 = vpop.permute.xlu0 %4699  ;;  %v5385_v18 = vld [vmem:[#allocation2 + $0xa1] sm:$0xff] }
 0x48c   : > { %12618 = vst [vmem:[#allocation97_spill] sm:$0xff] %v10695_v30  ;;  %5227 = vperm.xlu1 %7123, %v10554_v17   ;;  %v7129_v58 = vpack.i.bf16 %v10709_v61, %v5385_v18  ;;  %v7124_v17 = vpack.i.bf16 %v10711_v42, %v5377_v54  ;;  %v5393_v54 = vld [vmem:[#allocation2 + $0x2] sm:$0xff] }
 0x48d   : > { %5222 = vperm.xlu0 %7122, %v10557_v3   ;;  %v5401_v30 = vld [vmem:[#allocation2 + $0xa2] sm:$0xff] }
 0x48e   : > { %v10697_v49 = vpop.permute.xlu1 %4714 }
 0x48f   : > { %12619 = vst [vmem:[#allocation61_spill] sm:$0xff] %v10697_v49  ;;  %v10699_v23 = vpop.permute.xlu0 %4709  ;;  %v10719_v49 = vld [vmem:[#allocation2 + $0xd1] sm:$0xff] }
 0x490   : > { %12620 = vst [vmem:[#allocation24_spill] sm:$0xff] %v10699_v23  ;;  %5237 = vperm.xlu1 %7123, %v7037_v60   ;;  %v5379_v60 = vld [vmem:[#allocation2 + $0x21] sm:$0xff] }
 0x491   : > { %5232 = vperm.xlu0 %7122, %v7036_v16  }
 0x492   : > { %v10705_v39 = vpop.permute.xlu1 %4724 }
 0x493   : > { %12621 = vst [vmem:[#allocation74_spill] sm:$0xff] %v10705_v39  ;;  %v10707_v2 = vpop.permute.xlu0 %4719  ;;  %v10721_v39 = vld [vmem:[#allocation2 + $0x31] sm:$0xff] }
 0x494   : > { %12622 = vst [vmem:[#allocation87_spill] sm:$0xff] %v10707_v2  ;;  %7130 = vrot.lane.b32.xlu1 %v7129_v58, %s7472_s6  ;;  %v5387_v2 = vld [vmem:[#allocation2 + $0xc1] sm:$0xff]  ;;  %v10729_v18 = vpack.i.bf16 %v10721_v39, %v5379_v60  ;;  %v7149_v58 = vpack.i.bf16 %v10735_v37, %v5401_v30 }
 0x495   : > { %7125 = vrot.lane.b32.xlu0 %v7124_v17, %s7472_s6  ;;  %v10726_v16 = vpack.i.bf16 %v10719_v49, %v5387_v2  ;;  %v7144_v17 = vpack.i.bf16 %v10737_v13, %v5393_v54 }
 0x496   : > { %v10715_v23 = vpop.permute.xlu1 %4782 }
 0x497   : > { %12623 = vst [vmem:[#allocation88_spill] sm:$0xff] %v10715_v23  ;;  %v10717_v3 = vpop.permute.xlu0 %4777 }
 0x498   : > { %12624 = vst [vmem:[#allocation34_spill] sm:$0xff] %v10717_v3  ;;  %7140 = vrot.lane.b32.xlu1 %v10726_v16, %s7472_s6 }
 0x499   : > { %7135 = vrot.lane.b32.xlu0 %v10729_v18, %s7472_s6 }
 0x49a   : > { %v10731_v23 = vpop.permute.xlu1 %4792 }
 0x49b   : > { %12625 = vst [vmem:[#allocation12_spill] sm:$0xff] %v10731_v23  ;;  %v10733_v3 = vpop.permute.xlu0 %4787 }
 0x49c   : > { %12626 = vst [vmem:[#allocation92_spill] sm:$0xff] %v10733_v3  ;;  %v5404_v3 = vld [vmem:[#allocation2 + $0xd2] sm:$0xff]  ;;  %7150 = vrot.lane.b32.xlu1 %v7149_v58, %s7473_s7 }
 0x49d   : > { %7145 = vrot.lane.b32.xlu0 %v7144_v17, %s7473_s7  ;;  %v10751_v48 = vpack.i.bf16 %v5404_v3, %v5403_v47  ;;  %v5417_v58 = vld [vmem:[#allocation2 + $0xb0] sm:$0xff] }
 0x49e   : > { %v10745_v24 = vpop.permute.xlu1 %4802  ;;  %v5409_v17 = vld [vmem:[#allocation2 + $0x10] sm:$0xff] }
 0x49f   : > { %12627 = vst [vmem:[#allocation3_spill] sm:$0xff] %v10745_v24  ;;  %v10747_v23 = vpop.permute.xlu0 %4797  ;;  %v10759_v24 = vld [vmem:[#allocation2 + $0xc0] sm:$0xff] }
 0x4a0   : > { %12628 = vst [vmem:[#allocation57_spill] sm:$0xff] %v10747_v23  ;;  %v10761_v23 = vld [vmem:[#allocation2 + $0x20] sm:$0xff]  ;;  %7160 = vrot.lane.b32.xlu1 %v10751_v48, %s7473_s7  ;;  %v7169_v40 = vpack.i.bf16 %v10759_v24, %v5417_v58  ;;  %v7174_v58 = vpack.i.bf16 %v10775_v34, %v5411_v0 }
 0x4a1   : > { %7155 = vrot.lane.b32.xlu0 %v10753_v45, %s7473_s7  ;;  %v7164_v5 = vpack.i.bf16 %v10761_v23, %v5409_v17 }
 0x4a2   : > { %v10755_v30 = vpop.permute.xlu1 %4812 }
 0x4a3   : > { %12629 = vst [vmem:[#allocation84_spill] sm:$0xff] %v10755_v30  ;;  %v10757_v54 = vpop.permute.xlu0 %4807 }
 0x4a4   : > { %12630 = vst [vmem:[#allocation33_spill] sm:$0xff] %v10757_v54  ;;  %v10773_v54 = vld [vmem:[#allocation2 + $0xe0] sm:$0xff]  ;;  %7170 = vrot.lane.b32.xlu1 %v7169_v40, %s7474_s8  ;;  %v7184_v40 = vpack.i.bf16 %v5379_v60, %v10711_v42  ;;  %v7204_v42 = vpack.i.bf16 %v5395_v63, %v10737_v13  ;;  %v10817_v13 = vld [vmem:[#allocation2 + $0x50] sm:$0xff] }
 0x4a5   : > { %7165 = vrot.lane.b32.xlu0 %v7164_v5, %s7474_s8  ;;  %v7179_v41 = vpack.i.bf16 %v10773_v54, %v5419_v6  ;;  %12637 = vst [vmem:[#allocation6_spill] sm:$0xff] %v10817_v13 }
 0x4a6   : > { %v10769_v50 = vpop.permute.xlu1 %4822 }
 0x4a7   : > { %12631 = vst [vmem:[#allocation94_spill] sm:$0xff] %v10769_v50  ;;  %v10771_v30 = vpop.permute.xlu0 %4817 }
 0x4a8   : > { %12632 = vst [vmem:[#allocation32_spill] sm:$0xff] %v10771_v30  ;;  %7180 = vrot.lane.b32.xlu1 %v7179_v41, %s7474_s8  ;;  %v7189_v30 = vpack.i.bf16 %v5387_v2, %v10709_v61  ;;  %v7194_v41 = vpack.i.bf16 %v5428_v7, %v10721_v39  ;;  %v7209_v2 = vpack.i.bf16 %v5403_v47, %v10735_v37  ;;  %v12638_v47 = vld [vmem:[#allocation79_spill] sm:$0xff] }
 0x4a9   : > { %7175 = vrot.lane.b32.xlu0 %v7174_v58, %s7474_s8  ;;  %v4215_v63 = vmul.f32 %v10431_v14, %v12638_v47  ;;  %v4214_v37 = vmul.f32 %v10433_v21, %v12638_v47  ;;  %v7234_v21 = vpack.i.bf16 %v10817_v13, %v10775_v34  ;;  %v4221_v34 = vmul.f32 %v10469_v4, %v12638_v47 }
 0x4aa   : > { %v10781_v17 = vpop.permute.xlu1 %4832 }
 0x4ab   : > { %v10783_v50 = vpop.permute.xlu0 %4827 }
 0x4ac   : > { %12633 = vst [vmem:[#allocation35_spill] sm:$0xff] %v10783_v50  ;;  %7190 = vrot.lane.b32.xlu1 %v7189_v30, %s7475_s9  ;;  %v7199_v50 = vpack.i.bf16 %v5436_v12, %v10719_v49  ;;  %v5444_v49 = vld [vmem:[#allocation2 + $0x42] sm:$0xff] }
 0x4ad   : > { %7185 = vrot.lane.b32.xlu0 %v7184_v40, %s7475_s9  ;;  %v5452_v40 = vld [vmem:[#allocation2 + $0xe2] sm:$0xff] }
 0x4ae   : > { %v10789_v31 = vpop.permute.xlu1 %4842  ;;  %v7219_v39 = vpack.i.bf16 %v5452_v40, %v5404_v3  ;;  %v10825_v3 = vld [vmem:[#allocation2 + $0x51] sm:$0xff] }
 0x4af   : > { %v10791_v5 = vpop.permute.xlu0 %4837  ;;  %12639 = vst [vmem:[#allocation83_spill] sm:$0xff] %v10825_v3 }
 0x4b0   : > { %12634 = vst [vmem:[#allocation95_spill] sm:$0xff] %v10791_v5  ;;  %7200 = vrot.lane.b32.xlu1 %v7199_v50, %s7475_s9  ;;  %v10835_v5 = vld [vmem:[#allocation2 + $0xf0] sm:$0xff] }
 0x4b1   : > { %7195 = vrot.lane.b32.xlu0 %v7194_v41, %s7475_s9  ;;  %12642 = vst [vmem:[#allocation73_spill] sm:$0xff] %v10835_v5 }
 0x4b2   : > { %v10797_v58 = vpop.permute.xlu1 %4852 }
 0x4b3   : > { %12635 = vst [vmem:[#allocation82_spill] sm:$0xff] %v10797_v58  ;;  %v10799_v61 = vpop.permute.xlu0 %4847 }
 0x4b4   : > { %12636 = vst [vmem:[#allocation93_spill] sm:$0xff] %v10799_v61  ;;  %7210 = vrot.lane.b32.xlu1 %v7209_v2, %s7476_s10  ;;  %v7214_v61 = vpack.i.bf16 %v5444_v49, %v5396_v38  ;;  %v7229_v2 = vpack.i.bf16 %v5419_v6, %v10759_v24  ;;  %v7224_v38 = vpack.i.bf16 %v5411_v0, %v10761_v23  ;;  %v10845_v0 = vld [vmem:[#allocation2 + $0xf1] sm:$0xff] }
 0x4b5   : > { %7205 = vrot.lane.b32.xlu0 %v7204_v42, %s7476_s10  ;;  %v5493_v42 = vld [vmem:[#allocation2 + $0x52] sm:$0xff]  ;;  %12643 = vst [vmem:[#allocation23_spill] sm:$0xff] %v10845_v0  ;;  %v10848_v6 = vpack.i.bf16 %v10825_v3, %v5428_v7  ;;  %v4223_v7 = vmul.f32 %v10477_v33, %v12638_v47  ;;  %v10870_v4 = vpack.i.bf16 %v10845_v0, %v5436_v12 }
 0x4b6   : > { %v10805_v60 = vpop.permute.xlu1 %4911  ;;  %v5501_v24 = vld [vmem:[#allocation2 + $0xf2] sm:$0xff]  ;;  %v10850_v23 = vpack.i.bf16 %v5493_v42, %v5444_v49  ;;  %v4225_v33 = vmul.f32 %v10481_v25, %v12638_v47  ;;  %v4229_v12 = vmul.f32 %v10499_v51, %v12638_v47  ;;  %v4228_v25 = vmul.f32 %v10501_v22, %v12638_v47 }
 0x4b7   : > { %v10807_v30 = vpop.permute.xlu0 %4906 }
 0x4b8   : > { %7220 = vrot.lane.b32.xlu1 %v7219_v39, %s7476_s10  ;;  %v4217_v39 = vmul.f32 %v10443_v43, %v12638_v47  ;;  %v4219_v43 = vmul.f32 %v10449_v11, %v12638_v47  ;;  %12644 = vst [vmem:[#allocation42_spill] sm:$0xff] %v10850_v23  ;;  %v7239_v11 = vpack.i.bf16 %v10835_v5, %v10773_v54 }
 0x4b9   : > { %7215 = vrot.lane.b32.xlu0 %v7214_v61, %s7476_s10  ;;  %v4216_v61 = vmul.f32 %v10445_v26, %v12638_v47  ;;  %v4218_v26 = vmul.f32 %v10451_v56, %v12638_v47  ;;  %v4220_v56 = vmul.f32 %v10471_v52, %v12638_v47  ;;  %v10872_v54 = vpack.i.bf16 %v5501_v24, %v5452_v40 }
 0x4ba   : > { %v10811_v50 = vpop.permute.xlu1 %4921 }
 0x4bb   : > { %v10813_v41 = vpop.permute.xlu0 %4916  ;;  %12646 = vst [vmem:[#allocation20_spill] sm:$0xff] %v10872_v54 }
 0x4bc   : > { %7230 = vrot.lane.b32.xlu1 %v7229_v2, %s7477_s11  ;;  %v7452_v2 = vld [vmem:[%s8153_s30] ss:$0 sm:$0xff] }
 0x4bd   : > { %7225 = vrot.lane.b32.xlu0 %v7224_v38, %s7477_s11  ;;  %v4230_v38 = vadd.f32 %v7452_v2, %v4214_v37  ;;  %v4233_v13 = vadd.f32 %v7452_v2, %v4217_v39  ;;  %v4235_v52 = vadd.f32 %v7452_v2, %v4219_v43  ;;  %v4234_v37 = vadd.f32 %v7452_v2, %v4218_v26  ;;  %v12647_v26 = vld [vmem:[#allocation86_spill] sm:$0xff] }
 0x4be   : > { %v10831_v58 = vpop.permute.xlu1 %4931  ;;  %v4224_v39 = vmul.f32 %v10483_v9, %v12638_v47  ;;  %v4236_v40 = vadd.f32 %v7452_v2, %v4220_v56  ;;  %v10885_v43 = vadd.f32 %v7452_v2, %v4223_v7  ;;  %v4343_v9 = vmul.f32 %v10507_v32, %v12647_v26 }
 0x4bf   : > { %12640 = vst [vmem:[#allocation9_spill] sm:$0xff] %v10831_v58  ;;  %v10833_v14 = vpop.permute.xlu0 %4926  ;;  %v4232_v58 = vadd.f32 %v7452_v2, %v4216_v61  ;;  %v4237_v61 = vadd.f32 %v7452_v2, %v4221_v34  ;;  %v4345_v51 = vmul.f32 %v10511_v53, %v12647_v26  ;;  %v4241_v22 = vadd.f32 %v7452_v2, %v4225_v33 }
 0x4c0   : > { %12641 = vst [vmem:[#allocation10_spill] sm:$0xff] %v10833_v14  ;;  %v4231_v14 = vadd.f32 %v7452_v2, %v4215_v63  ;;  %v4222_v63 = vmul.f32 %v10479_v20, %v12638_v47  ;;  %7240 = vrot.lane.b32.xlu1 %v7239_v11, %s7477_s11  ;;  %v4227_v20 = vmul.f32 %v10487_v57, %v12638_v47 }
 0x4c1   : > { %7235 = vrot.lane.b32.xlu0 %v7234_v21, %s7477_s11  ;;  %v4226_v21 = vmul.f32 %v10489_v15, %v12638_v47  ;;  %v4342_v15 = vmul.f32 %v10509_v19, %v12647_v26  ;;  %v4240_v32 = vadd.f32 %v7452_v2, %v4224_v39  ;;  %v4344_v19 = vmul.f32 %v10513_v27, %v12647_v26  ;;  %v6161_v47 = vld [vmem:[%s10906_s16] sm:$0xff] }
 0x4c2   : > { %v10861_v49 = vpop.permute.xlu1 %4941  ;;  %v4238_v57 = vadd.f32 %v7452_v2, %v4222_v63  ;;  %v4347_v53 = vmul.f32 %v10517_v62, %v12647_v26  ;;  %v4243_v11 = vadd.f32 %v7452_v2, %v4227_v20  ;;  %v4244_v63 = vadd.f32 %v7452_v2, %v4228_v25 }
 0x4c3   : > { %v10863_v42 = vpop.permute.xlu0 %4936  ;;  %v4242_v56 = vadd.f32 %v7452_v2, %v4226_v21  ;;  %v4359_v0 = vadd.f32 %v4343_v9, %v4231_v14  ;;  %v4346_v33 = vmul.f32 %v10519_v28, %v12647_v26  ;;  %v4349_v39 = vmul.f32 %v10529_v10, %v12647_v26 }
 0x4c4   : > { %12645 = vst [vmem:[#allocation43_spill] sm:$0xff] %v10863_v42  ;;  %7250 = vrot.lane.b32.xlu1 %v10726_v16, %s7478_s13  ;;  %v6162_v16 = vld [vmem:[%s10906_s16 + $0x8] sm:$0xff]  ;;  %v10922_v62 = vadd.f32 %v4342_v15, %v4230_v38  ;;  %v10924_v20 = vadd.f32 %v4345_v51, %v4233_v13  ;;  %v10932_v28 = vadd.f32 %v4344_v19, %v4232_v58  ;;  %v6163_v13 = vld [vmem:[%s10906_s16 + $0x10] sm:$0xff]  ;;  %v6164_v38 = vld [vmem:[%s10906_s16 + $0x18] sm:$0xff] }
 0x4c5   : > { %7245 = vrot.lane.b32.xlu0 %v10729_v18, %s7478_s13  ;;  %v4245_v18 = vadd.f32 %v7452_v2, %v4229_v12  ;;  %v6170_v7 = vpack.c.bf16 %v6162_v16, %v6161_v47  ;;  %v4348_v2 = vmul.f32 %v10531_v35, %v12647_v26  ;;  %v10934_v10 = vadd.f32 %v4347_v53, %v4235_v52  ;;  %v12651_v51 = vld [vmem:[#allocation36_spill] sm:$0xff]  ;;  %v12652_v16 = vld [vmem:[#allocation37_spill] sm:$0xff] }
 0x4c6   : > { %v10891_v24 = vpop.permute.xlu1 %4951  ;;  %v4351_v14 = vmul.f32 %v10537_v46, %v12647_v26  ;;  %v4350_v35 = vmul.f32 %v10539_v36, %v12647_v26  ;;  %v4353_v21 = vmul.f32 %v10541_v29, %v12647_v26  ;;  %v6171_v58 = vpack.c.bf16 %v6164_v38, %v6163_v13  ;;  %v6167_v13 = vld [vmem:[%s10906_s16 + $0x30] sm:$0xff]  ;;  %v6168_v38 = vld [vmem:[%s10906_s16 + $0x38] sm:$0xff] }
 0x4c7   : > { %v10893_v34 = vpop.permute.xlu0 %4946  ;;  %7064 = vmatprep.subr.bf16.mxu0 %v6170_v7  ;;  %7090 = vmatprep.subr.bf16.mxu1 %v6170_v7  ;;  %v10944_v52 = vadd.f32 %v4346_v33, %v4234_v37  ;;  %v10946_v12 = vadd.f32 %v4349_v39, %v4237_v61  ;;  %v4352_v46 = vmul.f32 %v10543_v55, %v12647_v26  ;;  %v6165_v55 = vld [vmem:[%s10906_s16 + $0x20] sm:$0xff] }
 0x4c8   : > { %7260 = vrot.lane.b32.xlu1 %v10870_v4, %s7478_s13  ;;  %7065 = vmatpush3.bf16.msra.mxu0 %v6170_v7  ;;  %v4355_v25 = vmul.f32 %v10547_v44, %v12647_v26  ;;  %v10956_v29 = vadd.f32 %v4348_v2, %v4236_v40  ;;  %v4354_v15 = vmul.f32 %v10549_v59, %v12647_v26  ;;  %v6166_v44 = vld [vmem:[%s10906_s16 + $0x28] sm:$0xff]  ;;  %v12650_v40 = vld [vmem:[#allocation89_spill] sm:$0xff] }
 0x4c9   : > { %7255 = vrot.lane.b32.xlu0 %v10848_v6, %s7478_s13  ;;  %7095 = vmatpush3.bf16.msra.mxu1 %v6170_v7  ;;  %v4357_v37 = vmul.f32 %v10559_v1, %v12647_v26  ;;  %v4356_v61 = vmul.f32 %v10561_v8, %v12647_v26  ;;  %v4471_v19 = vmul.f32 %v12651_v51, %v12650_v40 }
 0x4ca   : > { %v10918_v27 = vpop.permute.xlu1 %4961  ;;  %7066 = vmatprep.subr.bf16.mxu0 %v6171_v58  ;;  %7091 = vmatprep.subr.bf16.mxu1 %v6171_v58  ;;  %v6172_v59 = vpack.c.bf16 %v6166_v44, %v6165_v55  ;;  %v4367_v1 = vadd.f32 %v4351_v14, %v10885_v43  ;;  %v4366_v53 = vadd.f32 %v4350_v35, %v4238_v57  ;;  %v12655_v43 = vld [vmem:[#allocation38_spill] sm:$0xff]  ;;  %v12658_v35 = vld [vmem:[#allocation40_spill] sm:$0xff] }
 0x4cb   : > { %v10920_v3 = vpop.permute.xlu0 %4956  ;;  %v4369_v47 = vadd.f32 %v4353_v21, %v4241_v22  ;;  %v4470_v7 = vmul.f32 %v12652_v16, %v12650_v40  ;;  %v10979_v33 = vadd.f32 %v4354_v15, %v4242_v56  ;;  %v4473_v57 = vmul.f32 %v12655_v43, %v12650_v40  ;;  %v12656_v22 = vld [vmem:[#allocation39_spill] sm:$0xff]  ;;  %v12657_v56 = vld [vmem:[#allocation60_spill] sm:$0xff]  ;;  %v12662_v15 = vld [vmem:[#allocation45_spill] sm:$0xff] }
 0x4cc   : > { %7270 = vrot.lane.b32.xlu1 %v10751_v48, %s7479_s17  ;;  %7067 = vmatpush3.bf16.msra.mxu0 %v6171_v58  ;;  %v4368_v48 = vadd.f32 %v4352_v46, %v4240_v32  ;;  %v4472_v32 = vmul.f32 %v12656_v22, %v12650_v40  ;;  %v10989_v39 = vadd.f32 %v4356_v61, %v4244_v63  ;;  %v12661_v63 = vld [vmem:[#allocation26_spill] sm:$0xff]  ;;  %v12664_v16 = vld [vmem:[#allocation47_spill] sm:$0xff] }
 0x4cd   : > { %7265 = vrot.lane.b32.xlu0 %v10753_v45, %s7479_s17  ;;  %7096 = vmatpush3.bf16.msra.mxu1 %v6171_v58  ;;  %v4371_v45 = vadd.f32 %v4355_v25, %v4243_v11  ;;  %v4373_v11 = vadd.f32 %v4357_v37, %v4245_v18  ;;  %v10991_v2 = vadd.f32 %v4471_v19, %v4359_v0  ;;  %v12659_v58 = vld [vmem:[#allocation41_spill] sm:$0xff]  ;;  %v12660_v18 = vld [vmem:[#allocation44_spill] sm:$0xff]  ;;  %v12665_v43 = vld [vmem:[#allocation11_spill] sm:$0xff] }
 0x4ce   : > { %v10952_v9 = vpop.permute.xlu1 %4971  ;;  %7068 = vmatprep.subr.bf16.mxu0 %v6172_v59  ;;  %7092 = vmatprep.subr.bf16.mxu1 %v6172_v59  ;;  %v4475_v14 = vmul.f32 %v12657_v56, %v12650_v40  ;;  %v4474_v21 = vmul.f32 %v12658_v35, %v12650_v40  ;;  %v4477_v46 = vmul.f32 %v12659_v58, %v12650_v40  ;;  %v12666_v58 = vld [vmem:[#allocation71_spill] sm:$0xff] }
 0x4cf   : > { %12648 = vst [vmem:[#allocation80_spill] sm:$0xff] %v10952_v9  ;;  %v10954_v36 = vpop.permute.xlu0 %4966  ;;  %v4476_v0 = vmul.f32 %v12660_v18, %v12650_v40  ;;  %v4479_v25 = vmul.f32 %v12661_v63, %v12650_v40  ;;  %v4478_v37 = vmul.f32 %v12662_v15, %v12650_v40  ;;  %v4489_v61 = vadd.f32 %v4473_v57, %v10924_v20  ;;  %v6169_v20 = vld [vmem:[%s10906_s16 + $0x40] sm:$0xff]  ;;  %v12672_v15 = vld [vmem:[#allocation49_spill] sm:$0xff] }
 0x4d0   : > { %12649 = vst [vmem:[#allocation72_spill] sm:$0xff] %v10954_v36  ;;  %7280 = vrot.lane.b32.xlu1 %v10870_v4, %s7472_s6  ;;  %7069 = vmatpush3.bf16.msra.mxu0 %v6172_v59  ;;  %v6173_v4 = vpack.c.bf16 %v6168_v38, %v6167_v13  ;;  %v4488_v51 = vadd.f32 %v4472_v32, %v10932_v28 }
 0x4d1   : > { %7275 = vrot.lane.b32.xlu0 %v10848_v6, %s7472_s6  ;;  %7097 = vmatpush3.bf16.msra.mxu1 %v6172_v59  ;;  %v4486_v6 = vadd.f32 %v4470_v7, %v10922_v62  ;;  %v12663_v62 = vld [vmem:[#allocation46_spill] sm:$0xff]  ;;  %v4491_v59 = vadd.f32 %v4475_v14, %v10934_v10  ;;  %v4480_v7 = vmul.f32 %v12664_v16, %v12650_v40  ;;  %v12675_v16 = vld [vmem:[#allocation55_spill] sm:$0xff] }
 0x4d2   : > { %v10975_v8 = vpop.permute.xlu1 %4981  ;;  %v4481_v19 = vmul.f32 %v12663_v62, %v12650_v40  ;;  %v4483_v22 = vmul.f32 %v12665_v43, %v12650_v40  ;;  %7070 = vmatprep.subr.bf16.mxu0 %v6173_v4  ;;  %7093 = vmatprep.subr.bf16.mxu1 %v6173_v4  ;;  %v4490_v28 = vadd.f32 %v4474_v21, %v10944_v52  ;;  %v12667_v52 = vld [vmem:[#allocation48_spill] sm:$0xff]  ;;  %v12673_v62 = vld [vmem:[#allocation50_spill] sm:$0xff] }
 0x4d3   : > { %12653 = vst [vmem:[#allocation25_spill] sm:$0xff] %v10975_v8  ;;  %v10977_v26 = vpop.permute.xlu0 %4976  ;;  %v4493_v57 = vadd.f32 %v4477_v46, %v10946_v12  ;;  %v6174_v32 = vpack.c.bf16 %v6169_v20, %v6169_v20  ;;  %v4492_v56 = vadd.f32 %v4476_v0, %v10956_v29  ;;  %v4495_v13 = vadd.f32 %v4479_v25, %v4367_v1  ;;  %v12668_v29 = vld [vmem:[#allocation51_spill] sm:$0xff]  ;;  %v12670_v0 = vld [vmem:[#allocation52_spill] sm:$0xff]  ;;  %v12671_v25 = vld [vmem:[#allocation53_spill] sm:$0xff] }
 0x4d4   : > { %12654 = vst [vmem:[#allocation28_spill] sm:$0xff] %v10977_v26  ;;  %7290 = vrot.lane.b32.xlu1 %v10872_v54, %s7479_s17  ;;  %7071 = vmatpush3.bf16.msra.mxu0 %v6173_v4  ;;  %v4494_v10 = vadd.f32 %v4478_v37, %v4366_v53  ;;  %v4497_v35 = vadd.f32 %v4481_v19, %v4369_v47  ;;  %v12669_v53 = vld [vmem:[#allocation90_spill] sm:$0xff] }
 0x4d5   : > { %7285 = vrot.lane.b32.xlu0 %v10850_v23, %s7479_s17  ;;  %7098 = vmatpush3.bf16.msra.mxu1 %v6173_v4  ;;  %v4482_v18 = vmul.f32 %v12666_v58, %v12650_v40  ;;  %v4485_v21 = vmul.f32 %v12667_v52, %v12650_v40  ;;  %v6209_v12 = vsel %vm6207_vm6, %v6174_v32, 0  ;;  %v4496_v46 = vadd.f32 %v4480_v7, %v4368_v48  ;;  %v12674_v48 = vld [vmem:[#allocation54_spill] sm:$0xff]  ;;  %v12676_v7 = vld [vmem:[#allocation56_spill] sm:$0xff] }
 0x4d6   : > { %v11008_v55 = vpop.permute.xlu1 %5039  ;;  %7100 = vmatprep.subr.msk.bf16.mxu0 %vm6207_vm6, %v6174_v32  ;;  %7101 = vmatprep.subr.msk.bf16.mxu1 %vm6207_vm6, %v6174_v32  ;;  %v4499_v4 = vadd.f32 %v4483_v22, %v4371_v45  ;;  %v4484_v1 = vmul.f32 %v12668_v29, %v12650_v40  ;;  %v4600_v63 = vmul.f32 %v12670_v0, %v12669_v53  ;;  %v12677_v22 = vld [vmem:[#allocation59_spill] sm:$0xff] }
 0x4d7   : > { %v11010_v44 = vpop.permute.xlu0 %5034  ;;  %v4599_v47 = vmul.f32 %v12671_v25, %v12669_v53  ;;  %v4602_v37 = vmul.f32 %v12672_v15, %v12669_v53  ;;  %v4601_v19 = vmul.f32 %v12673_v62, %v12669_v53  ;;  %v4604_v45 = vmul.f32 %v12674_v48, %v12669_v53  ;;  %v12679_v25 = vld [vmem:[#allocation64_spill] sm:$0xff] }
 0x4d8   : > { %7073 = vmatpush3.bf16.msra.mxu0 %v6209_v12  ;;  %v4603_v40 = vmul.f32 %v12675_v16, %v12669_v53  ;;  %v4606_v43 = vmul.f32 %v12676_v7, %v12669_v53  ;;  %v4605_v20 = vmul.f32 %v12677_v22, %v12669_v53  ;;  %v4498_v52 = vadd.f32 %v4482_v18, %v10979_v33  ;;  %v12680_v16 = vld [vmem:[#allocation65_spill] sm:$0xff]  ;;  %v12681_v22 = vld [vmem:[#allocation66_spill] sm:$0xff] }
 0x4d9   : > { %7099 = vmatpush3.bf16.msra.mxu1 %v6209_v12  ;;  %v4501_v29 = vadd.f32 %v4485_v21, %v4373_v11  ;;  %v12678_v12 = vld [vmem:[#allocation63_spill] sm:$0xff]  ;;  %v4607_v15 = vmul.f32 %v12679_v25, %v12669_v53  ;;  %v4500_v62 = vadd.f32 %v4484_v1, %v10989_v39  ;;  %v4616_v48 = vadd.f32 %v4600_v63, %v10991_v2  ;;  %v12682_v11 = vld [vmem:[#allocation16_spill] sm:$0xff] }
 0x4da   : > { %v11029_v14 = vpop.permute.xlu1 %5049  ;;  %v4608_v0 = vmul.f32 %v12678_v12, %v12669_v53  ;;  %v4610_v7 = vmul.f32 %v12680_v16, %v12669_v53  ;;  %v4609_v5 = vmul.f32 %v12681_v22, %v12669_v53  ;;  %v4615_v54 = vadd.f32 %v4599_v47, %v4486_v6  ;;  %v12683_v63 = vld [vmem:[#allocation67_spill] sm:$0xff]  ;;  %v12684_v6 = vld [vmem:[#allocation77_spill] sm:$0xff] }
 0x4db   : > { %v11031_v38 = vpop.permute.xlu0 %5044  ;;  %v4618_v23 = vadd.f32 %v4602_v37, %v4489_v61  ;;  %v4617_v33 = vadd.f32 %v4601_v19, %v4488_v51  ;;  %v4612_v18 = vmul.f32 %v12682_v11, %v12669_v53  ;;  %v4620_v21 = vadd.f32 %v4604_v45, %v4491_v59  ;;  %v12685_v37 = vld [vmem:[#allocation78_spill] sm:$0xff]  ;;  %v12688_v45 = vld [vmem:[#allocation81_spill] sm:$0xff] }
 0x4dc   : > { %v4619_v12 = vadd.f32 %v4603_v40, %v4490_v28  ;;  %v4622_v26 = vadd.f32 %v4606_v43, %v4493_v57  ;;  %v4621_v25 = vadd.f32 %v4605_v20, %v4492_v56  ;;  %v4624_v2 = vadd.f32 %v4608_v0, %v4495_v13  ;;  %v12686_v28 = vld [vmem:[#allocation91_spill] sm:$0xff]  ;;  %v12687_v57 = vld [vmem:[#allocation68_spill] sm:$0xff]  ;;  %v12690_v43 = vld [vmem:[#allocation18_spill] sm:$0xff] }
 0x4dd   : > { %v4623_v1 = vadd.f32 %v4607_v15, %v4494_v10  ;;  %v4611_v16 = vmul.f32 %v12683_v63, %v12669_v53  ;;  %v4614_v61 = vmul.f32 %v12684_v6, %v12669_v53  ;;  %v4626_v51 = vadd.f32 %v4610_v7, %v4497_v35  ;;  %v12689_v13 = vld [vmem:[#allocation75_spill] sm:$0xff]  ;;  %v12697_v6 = vld [vmem:[#allocation5_spill] sm:$0xff] }
 0x4de   : > { %v11055_v32 = vpop.permute.xlu1 %5079  ;;  %v4625_v47 = vadd.f32 %v4609_v5, %v4496_v46  ;;  %v4613_v59 = vmul.f32 %v12685_v37, %v12669_v53  ;;  %v4728_v56 = vmul.f32 %v12687_v57, %v12686_v28  ;;  %v4628_v19 = vadd.f32 %v4612_v18, %v4499_v4  ;;  %v12691_v0 = vld [vmem:[#allocation19_spill] sm:$0xff]  ;;  %v12693_v53 = vld [vmem:[#allocation85_spill] sm:$0xff]  ;;  %v12694_v4 = vld [vmem:[#allocation98_spill] sm:$0xff] }
 0x4df   : > { %v11057_v58 = vpop.permute.xlu0 %5074  ;;  %v4727_v40 = vmul.f32 %v12688_v45, %v12686_v28  ;;  %v4730_v10 = vmul.f32 %v12689_v13, %v12686_v28  ;;  %v4729_v20 = vmul.f32 %v12690_v43, %v12686_v28  ;;  %v4732_v35 = vmul.f32 %v12691_v0, %v12686_v28  ;;  %v12692_v5 = vld [vmem:[#allocation27_spill] sm:$0xff]  ;;  %v12698_v57 = vld [vmem:[#allocation58_spill] sm:$0xff] }
 0x4e0   : > { %v4731_v46 = vmul.f32 %v12692_v5, %v12686_v28  ;;  %v4734_v15 = vmul.f32 %v12693_v53, %v12686_v28  ;;  %v4733_v7 = vmul.f32 %v12694_v4, %v12686_v28  ;;  %v4627_v18 = vadd.f32 %v4611_v16, %v4498_v52  ;;  %v12699_v0 = vld [vmem:[#allocation62_spill] sm:$0xff]  ;;  %v12700_v53 = vld [vmem:[#allocation97_spill] sm:$0xff] }
 0x4e1   : > { %v4630_v63 = vadd.f32 %v4614_v61, %v4501_v29  ;;  %v4736_v37 = vmul.f32 %v12697_v6, %v12686_v28  ;;  %v4735_v45 = vmul.f32 %v12698_v57, %v12686_v28  ;;  %v4629_v13 = vadd.f32 %v4613_v59, %v4500_v62  ;;  %v12701_v52 = vld [vmem:[#allocation61_spill] sm:$0xff] }
 0x4e2   : > { %v11072_v8 = vpop.permute.xlu1 %5089  ;;  %v4744_v43 = vadd.f32 %v4728_v56, %v4616_v48  ;;  %v4738_v5 = vmul.f32 %v12699_v0, %v12686_v28  ;;  %v4737_v4 = vmul.f32 %v12700_v53, %v12686_v28  ;;  %v4743_v36 = vadd.f32 %v4727_v40, %v4615_v54  ;;  %v12702_v56 = vld [vmem:[#allocation24_spill] sm:$0xff]  ;;  %v12703_v54 = vld [vmem:[#allocation74_spill] sm:$0xff] }
 0x4e3   : > { %v11074_v39 = vpop.permute.xlu0 %5084  ;;  %v4746_v9 = vadd.f32 %v4730_v10, %v4618_v23  ;;  %v4740_v29 = vmul.f32 %v12701_v52, %v12686_v28  ;;  %v4748_v16 = vadd.f32 %v4732_v35, %v4620_v21  ;;  %v4747_v61 = vadd.f32 %v4731_v46, %v4619_v12  ;;  %v12704_v10 = vld [vmem:[#allocation87_spill] sm:$0xff]  ;;  %v12705_v12 = vld [vmem:[#allocation96_spill] sm:$0xff]  ;;  %v12707_v35 = vld [vmem:[#allocation34_spill] sm:$0xff] }
 0x4e4   : > { %v4750_v6 = vadd.f32 %v4734_v15, %v4622_v26  ;;  %v4752_v48 = vadd.f32 %v4736_v37, %v4624_v2  ;;  %v4751_v59 = vadd.f32 %v4735_v45, %v4623_v1  ;;  %v4739_v57 = vmul.f32 %v12702_v56, %v12686_v28  ;;  %v12706_v26 = vld [vmem:[#allocation88_spill] sm:$0xff]  ;;  %v12710_v37 = vld [vmem:[#allocation3_spill] sm:$0xff]  ;;  %v12715_v56 = vld [vmem:[#allocation94_spill] sm:$0xff] }
 0x4e5   : > { %v4742_v23 = vmul.f32 %v12703_v54, %v12686_v28  ;;  %v4753_v40 = vadd.f32 %v4737_v4, %v4625_v47  ;;  %v4741_v21 = vmul.f32 %v12704_v10, %v12686_v28  ;;  %v4855_v46 = vmul.f32 %v12707_v35, %v12705_v12  ;;  %v12708_v2 = vld [vmem:[#allocation12_spill] sm:$0xff]  ;;  %v12711_v47 = vld [vmem:[#allocation57_spill] sm:$0xff] }
 0x4e6   : > { %v11098_v22 = vpop.permute.xlu1 %5059  ;;  %v4858_v1 = vmul.f32 %v12708_v2, %v12705_v12  ;;  %v12709_v15 = vld [vmem:[#allocation92_spill] sm:$0xff]  ;;  %v4859_v45 = vmul.f32 %v12711_v47, %v12705_v12  ;;  %v4755_v52 = vadd.f32 %v4739_v57, %v4627_v18  ;;  %v4864_v54 = vmul.f32 %v12715_v56, %v12705_v12 }
 0x4e7   : > { %12695 = vst [vmem:[#allocation4_spill] sm:$0xff] %v11098_v22  ;;  %v11100_v11 = vpop.permute.xlu0 %5054  ;;  %v4745_v22 = vadd.f32 %v4729_v20, %v4617_v33  ;;  %v4754_v33 = vadd.f32 %v4738_v5, %v4626_v51  ;;  %v4756_v20 = vadd.f32 %v4740_v29, %v4628_v19  ;;  %v4860_v51 = vmul.f32 %v12710_v37, %v12705_v12  ;;  %v12712_v28 = vld [vmem:[#allocation84_spill] sm:$0xff]  ;;  %v12713_v19 = vld [vmem:[#allocation33_spill] sm:$0xff]  ;;  %v12717_v37 = vld [vmem:[#allocation35_spill] sm:$0xff] }
 0x4e8   : > { %12696 = vst [vmem:[#allocation76_spill] sm:$0xff] %v11100_v11  ;;  %v4749_v11 = vadd.f32 %v4733_v7, %v4621_v25  ;;  %v4856_v25 = vmul.f32 %v12706_v26, %v12705_v12  ;;  %v4857_v7 = vmul.f32 %v12709_v15, %v12705_v12  ;;  %v4862_v0 = vmul.f32 %v12712_v28, %v12705_v12  ;;  %v12716_v10 = vld [vmem:[#allocation32_spill] sm:$0xff] }
 0x4e9   : > { %v4861_v5 = vmul.f32 %v12713_v19, %v12705_v12  ;;  %v4758_v29 = vadd.f32 %v4742_v23, %v4630_v63  ;;  %v4863_v26 = vmul.f32 %v12716_v10, %v12705_v12  ;;  %v4757_v35 = vadd.f32 %v4741_v21, %v4629_v13 }
 0x4ea   : > { %v11112_v42 = vpop.permute.xlu1 %5069  ;;  %v4872_v2 = vadd.f32 %v4856_v25, %v4744_v43  ;;  %v4866_v15 = vmul.f32 %v10781_v17, %v12705_v12  ;;  %v4865_v47 = vmul.f32 %v12717_v37, %v12705_v12  ;;  %v4871_v28 = vadd.f32 %v4855_v46, %v4743_v36  ;;  %v12718_v25 = vld [vmem:[#allocation7_spill] sm:$0xff]  ;;  %v12722_v46 = vld [vmem:[#allocation93_spill] sm:$0xff] }
 0x4eb   : > { %v11114_v62 = vpop.permute.xlu0 %5064  ;;  %v4874_v19 = vadd.f32 %v4858_v1, %v4746_v9  ;;  %v4868_v18 = vmul.f32 %v10789_v31, %v12705_v12  ;;  %v4876_v63 = vadd.f32 %v4860_v51, %v4748_v16  ;;  %v4875_v57 = vadd.f32 %v4859_v45, %v4747_v61 }
 0x4ec   : > { %v11152_v23 = vadd.f32 %v4862_v0, %v4750_v6  ;;  %v11154_v56 = vadd.f32 %v4861_v5, %v4749_v11  ;;  %v4880_v17 = vadd.f32 %v4864_v54, %v4752_v48  ;;  %v4879_v21 = vadd.f32 %v4863_v26, %v4751_v59  ;;  %v12719_v6 = vld [vmem:[#allocation95_spill] sm:$0xff]  ;;  %v12720_v59 = vld [vmem:[#allocation8_spill] sm:$0xff] }
 0x4ed   : > { %v4985_v36 = vmul.f32 %v10805_v60, %v12718_v25  ;;  %v4984_v9 = vmul.f32 %v10807_v30, %v12718_v25  ;;  %v4881_v31 = vadd.f32 %v4865_v47, %v4753_v40  ;;  %v4987_v16 = vmul.f32 %v10811_v50, %v12718_v25 }
 0x4ee   : > { %v11138_v53 = vpop.permute.xlu1 %5099  ;;  %v4986_v11 = vmul.f32 %v10813_v41, %v12718_v25  ;;  %v11168_v61 = vadd.f32 %v4868_v18, %v4756_v20  ;;  %v4867_v48 = vmul.f32 %v12719_v6, %v12705_v12  ;;  %v5113_v60 = vmul.f32 %v11008_v55, %v12720_v59  ;;  %v11185_v55 = vld [vmem:[%s8128_s27 + $0x8] ss:$0 sm:$0xff] }
 0x4ef   : > { %12714 = vst [vmem:[#allocation17_spill] sm:$0xff] %v11138_v53  ;;  %v11140_v4 = vpop.permute.xlu0 %5094  ;;  %v4873_v53 = vadd.f32 %v4857_v7, %v4745_v22  ;;  %v4882_v22 = vadd.f32 %v4866_v15, %v4754_v33  ;;  %v5112_v30 = vmul.f32 %v11010_v44, %v12720_v59  ;;  %v12721_v33 = vld [vmem:[#allocation82_spill] sm:$0xff]  ;;  %v4869_v50 = vmul.f32 %v12722_v46, %v12705_v12 }
 0x4f0   : > { %v4870_v40 = vmul.f32 %v12721_v33, %v12705_v12  ;;  %v5115_v41 = vmul.f32 %v11029_v14, %v12720_v59  ;;  %v5114_v20 = vmul.f32 %v11031_v38, %v12720_v59  ;;  %v5001_v51 = vadd.f32 %v4985_v36, %v4872_v2  ;;  %v12723_v12 = vld [vmem:[#allocation9_spill] sm:$0xff]  ;;  %v12724_v14 = vld [vmem:[#allocation10_spill] sm:$0xff] }
 0x4f1   : > { %v5000_v45 = vadd.f32 %v4984_v9, %v4871_v28  ;;  %v5003_v5 = vadd.f32 %v4987_v16, %v4874_v19  ;;  %v5002_v54 = vadd.f32 %v4986_v11, %v4873_v53  ;;  %v4989_v10 = vmul.f32 %v12723_v12, %v12718_v25 }
 0x4f2   : > { %v11156_v13 = vpop.permute.xlu1 %5109  ;;  %v4988_v26 = vmul.f32 %v12724_v14, %v12718_v25  ;;  %v11193_v15 = vadd.f32 %v4867_v48, %v4755_v52  ;;  %v4993_v38 = vmul.f32 %v10891_v24, %v12718_v25  ;;  %v5129_v2 = vadd.f32 %v5113_v60, %v5001_v51 }
 0x4f3   : > { %v11158_v43 = vpop.permute.xlu0 %5104  ;;  %v5128_v37 = vadd.f32 %v5112_v30, %v5000_v45  ;;  %v11197_v47 = vadd.f32 %v4870_v40, %v4758_v29  ;;  %v11199_v28 = vadd.f32 %v4869_v50, %v4757_v35  ;;  %v5131_v18 = vadd.f32 %v5115_v41, %v5003_v5 }
 0x4f4   : > { %v5130_v19 = vadd.f32 %v5114_v20, %v5002_v54  ;;  %v5005_v6 = vadd.f32 %v4989_v10, %v4876_v63  ;;  %v11203_v48 = vadd.f32 %v4988_v26, %v4875_v57  ;;  %v4992_v24 = vmul.f32 %v10893_v34, %v12718_v25 }
 0x4f5   : > { %v4995_v29 = vmul.f32 %v10918_v27, %v12718_v25  ;;  %v5009_v35 = vadd.f32 %v4993_v38, %v4880_v17  ;;  %v4994_v60 = vmul.f32 %v10920_v3, %v12718_v25  ;;  %v5121_v40 = vmul.f32 %v11055_v32, %v12720_v59 }
 0x4f6   : > { %v5168_v1 = vpop.permute.xlu1 %5167  ;;  %v5120_v63 = vmul.f32 %v11057_v58, %v12720_v59  ;;  %v5123_v57 = vmul.f32 %v11072_v8, %v12720_v59  ;;  %v5122_v34 = vmul.f32 %v11074_v39, %v12720_v59  ;;  %v5008_v20 = vadd.f32 %v4992_v24, %v4879_v21  ;;  %v12725_v39 = vld [vmem:[#allocation43_spill] sm:$0xff] }
 0x4f7   : > { %v5163_v7 = vpop.permute.xlu0 %5162  ;;  %v5241_v44 = vmul.f32 %v11185_v55, %v5168_v1  ;;  %v5011_v1 = vadd.f32 %v4995_v29, %v4882_v22  ;;  %v4991_v58 = vmul.f32 %v10861_v49, %v12718_v25  ;;  %v5010_v51 = vadd.f32 %v4994_v60, %v4881_v31  ;;  %v12726_v22 = vld [vmem:[#allocation4_spill] sm:$0xff] }
 0x4f8   : > { %v5240_v0 = vmul.f32 %v11185_v55, %v5163_v7  ;;  %v5136_v5 = vadd.f32 %v5120_v63, %v5008_v20  ;;  %v5117_v14 = vmul.f32 %v12726_v22, %v12720_v59 }
 0x4f9   : > { %v5257_v9 = vadd.f32 %v5241_v44, %v5129_v2  ;;  %v4990_v44 = vmul.f32 %v12725_v39, %v12718_v25  ;;  %v5139_v54 = vadd.f32 %v5123_v57, %v5011_v1  ;;  %v5138_v21 = vadd.f32 %v5122_v34, %v5010_v51 }
 0x4fa   : > { %v5178_v53 = vpop.permute.xlu1 %5177  ;;  %v5256_v16 = vadd.f32 %v5240_v0, %v5128_v37  ;;  %v5137_v0 = vadd.f32 %v5121_v40, %v5009_v35 }
 0x4fb   : > { %v5173_v36 = vpop.permute.xlu0 %5172  ;;  %v5243_v11 = vmul.f32 %v11185_v55, %v5178_v53  ;;  %v5273_v17 = vmax.f32 %v5257_v9, 0.0  ;;  %v12728_v53 = vld [vmem:[#allocation76_spill] sm:$0xff]  ;;  %v5006_v57 = vadd.f32 %v4990_v44, %v11154_v56  ;;  %v12730_v56 = vld [vmem:[#allocation25_spill] sm:$0xff] }
 0x4fc   : > { %v5242_v52 = vmul.f32 %v11185_v55, %v5173_v36  ;;  %v5272_v50 = vmax.f32 %v5256_v16, 0.0  ;;  %v5116_v36 = vmul.f32 %v12728_v53, %v12720_v59  ;;  %v5126_v53 = vmul.f32 %v11158_v43, %v12720_v59 }
 0x4fd   : > { %v5259_v30 = vadd.f32 %v5243_v11, %v5131_v18  ;;  %v12727_v18 = vld [vmem:[#allocation80_spill] sm:$0xff]  ;;  %v5007_v11 = vadd.f32 %v4991_v58, %v11152_v23 }
 0x4fe   : > { %v5258_v33 = vadd.f32 %v5242_v52, %v5130_v19  ;;  %v5208_v46 = vpop.permute.xlu1 %5207  ;;  %v4997_v19 = vmul.f32 %v12727_v18, %v12718_v25  ;;  %v5119_v52 = vmul.f32 %v11112_v42, %v12720_v59 }
 0x4ff   : > { %v5203_v27 = vpop.permute.xlu0 %5202  ;;  %v5275_v41 = vmax.f32 %v5259_v30, 0.0  ;;  %v5249_v7 = vmul.f32 %v11185_v55, %v5208_v46  ;;  %v5133_v30 = vadd.f32 %v5117_v14, %v5005_v6  ;;  %v12729_v46 = vld [vmem:[#allocation72_spill] sm:$0xff] }
 0x500   : > { %v5274_v3 = vmax.f32 %v5258_v33, 0.0  ;;  %v5248_v32 = vmul.f32 %v11185_v55, %v5203_v27  ;;  %v5118_v33 = vmul.f32 %v11114_v62, %v12720_v59  ;;  %v5013_v34 = vadd.f32 %v4997_v19, %v11168_v61  ;;  %v11268_v19 = vld [vmem:[#allocation2 + $0x61] sm:$0xff] }
 0x501   : > { %v5289_v8 = vmax.f32 %v5273_v17, %v5275_v41  ;;  %v5265_v2 = vadd.f32 %v5249_v7, %v5137_v0  ;;  %v4996_v27 = vmul.f32 %v12729_v46, %v12718_v25  ;;  %v5132_v17 = vadd.f32 %v5116_v36, %v11203_v48  ;;  %v12732_v0 = vld [vmem:[#allocation17_spill] sm:$0xff] }
 0x502   : > { %v5288_v45 = vmax.f32 %v5272_v50, %v5274_v3  ;;  %v5218_v12 = vpop.permute.xlu1 %5217  ;;  %v5264_v37 = vadd.f32 %v5248_v32, %v5136_v5  ;;  %v5135_v50 = vadd.f32 %v5119_v52, %v5007_v11  ;;  %v5134_v32 = vadd.f32 %v5118_v33, %v5006_v57  ;;  %v12733_v57 = vld [vmem:[#allocation42_spill] sm:$0xff] }
 0x503   : > { %v5213_v10 = vpop.permute.xlu0 %5212  ;;  %v5333_v26 = vrot.slane %v5289_v8, 1  ;;  %v5251_v49 = vmul.f32 %v11185_v55, %v5218_v12  ;;  %v5281_v23 = vmax.f32 %v5265_v2, 0.0  ;;  %v4999_v61 = vmul.f32 %v12730_v56, %v12718_v25 }
 0x504   : > { %v5300_v38 = vrot.slane %v5288_v45, 1  ;;  %v5250_v31 = vmul.f32 %v11185_v55, %v5213_v10  ;;  %v5280_v6 = vmax.f32 %v5264_v37, 0.0  ;;  %v5125_v5 = vmul.f32 %v12732_v0, %v12720_v59 }
 0x505   : > { %v5341_v9 = vmax.f32 %v5289_v8, %v5333_v26  ;;  %v5267_v24 = vadd.f32 %v5251_v49, %v5139_v54  ;;  %v5124_v54 = vmul.f32 %v11140_v4, %v12720_v59  ;;  %v5012_v4 = vadd.f32 %v4996_v27, %v11193_v15  ;;  %v11300_v27 = vld [vmem:[#allocation2 + $0x62] sm:$0xff] }
 0x506   : > { %v5308_v16 = vmax.f32 %v5288_v45, %v5300_v38  ;;  %v5266_v29 = vadd.f32 %v5250_v31, %v5138_v21  ;;  %v5188_v35 = vpop.permute.xlu1 %5187  ;;  %v12731_v45 = vld [vmem:[#allocation28_spill] sm:$0xff]  ;;  %v5127_v21 = vmul.f32 %v11156_v13, %v12720_v59  ;;  %v5015_v59 = vadd.f32 %v4999_v61, %v11197_v47 }
 0x507   : > { %v5183_v60 = vpop.permute.xlu0 %5182  ;;  %5345 = vst.msk [vmem:[#allocation2 + $0x75] sm:$0x1] %vm1577_vm2, %v5341_v9  ;;  %v5245_v42 = vmul.f32 %v11185_v55, %v5188_v35  ;;  %v5283_v40 = vmax.f32 %v5267_v24, 0.0  ;;  %v4998_v39 = vmul.f32 %v12731_v45, %v12718_v25  ;;  %v5141_v15 = vadd.f32 %v5125_v5, %v5013_v34 }
 0x508   : > { %5349 = vst.msk [vmem:[#allocation2 + $0x74] sm:$0x4] %vm1582_vm3, %v5341_v9  ;;  %5317 = vst.msk [vmem:[#allocation2 + $0x70] sm:$0x4] %vm1582_vm3, %v5308_v16  ;;  %v5244_v62 = vmul.f32 %v11185_v55, %v5183_v60  ;;  %v5282_v63 = vmax.f32 %v5266_v29, 0.0  ;;  %v5140_v11 = vadd.f32 %v5124_v54, %v5012_v4  ;;  %v5143_v29 = vadd.f32 %v5127_v21, %v5015_v59  ;;  %v12735_v54 = vld [vmem:[#allocation20_spill] sm:$0xff] }
 0x509   : > { %5353 = vst.msk [vmem:[#allocation2 + $0x73] sm:$0x10] %vm1587_vm4, %v5341_v9  ;;  %5321 = vst.msk [vmem:[#allocation2 + $0x6f] sm:$0x10] %vm1587_vm4, %v5308_v16  ;;  %v5293_v41 = vmax.f32 %v5281_v23, %v5283_v40  ;;  %v5261_v20 = vadd.f32 %v5245_v42, %v5133_v30  ;;  %v12737_v4 = vld [vmem:[#allocation83_spill] sm:$0xff] }
 0x50a   : > { %5357 = vst.msk [vmem:[#allocation2 + $0x72] sm:$0x40] %vm1592_vm5, %v5341_v9  ;;  %5325 = vst.msk [vmem:[#allocation2 + $0x6e] sm:$0x40] %vm1592_vm5, %v5308_v16  ;;  %v5292_v3 = vmax.f32 %v5280_v6, %v5282_v63  ;;  %v5198_v1 = vpop.permute.xlu1 %5197  ;;  %v5260_v58 = vadd.f32 %v5244_v62, %v5132_v17 }
 0x50b   : > { %5313 = vst.msk [vmem:[#allocation2 + $0x71] sm:$0x1] %vm1577_vm2, %v5308_v16  ;;  %v5193_v7 = vpop.permute.xlu0 %5192  ;;  %v5247_v51 = vmul.f32 %v11185_v55, %v5198_v1  ;;  %v5335_v44 = vrot.slane %v5293_v41, 1  ;;  %v5277_v26 = vmax.f32 %v5261_v20, 0.0  ;;  %v5014_v16 = vadd.f32 %v4998_v39, %v11199_v28  ;;  %v12734_v39 = vld [vmem:[#allocation6_spill] sm:$0xff] }
 0x50c   : > { %v5246_v8 = vmul.f32 %v11185_v55, %v5193_v7  ;;  %v5302_v48 = vrot.slane %v5292_v3, 1  ;;  %v5276_v25 = vmax.f32 %v5260_v58, 0.0 }
 0x50d   : > { %v5263_v12 = vadd.f32 %v5247_v51, %v5135_v50  ;;  %v5343_v22 = vmax.f32 %v5293_v41, %v5335_v44  ;;  %v5142_v33 = vadd.f32 %v5126_v53, %v5014_v16  ;;  %v5391_v50 = vld [vmem:[#allocation2 + $0x101] sm:$0xff]  ;;  %v7344_v53 = vpack.i.bf16 %v11268_v19, %v12737_v4 }
 0x50e   : > { %v5262_v10 = vadd.f32 %v5246_v8, %v5134_v32  ;;  %v5310_v14 = vmax.f32 %v5292_v3, %v5302_v48  ;;  %v5228_v38 = vpop.permute.xlu1 %5227  ;;  %v11319_v32 = vld [vmem:[#allocation2 + $0x60] sm:$0xff] }
 0x50f   : > { %v5223_v2 = vpop.permute.xlu0 %5222  ;;  %v5279_v49 = vmax.f32 %v5263_v12, 0.0  ;;  %v5253_v18 = vmul.f32 %v11185_v55, %v5228_v38  ;;  %5347 = vst.msk [vmem:[#allocation2 + $0x115] sm:$0x1] %vm1577_vm2, %v5343_v22  ;;  %v7324_v44 = vpack.i.bf16 %v11319_v32, %v12734_v39  ;;  %v7458_v4 = vld [vmem:[#allocation2 + $0xc0] sm:$0xff] }
 0x510   : > { %v5278_v31 = vmax.f32 %v5262_v10, 0.0  ;;  %5351 = vst.msk [vmem:[#allocation2 + $0x114] sm:$0x4] %vm1582_vm3, %v5343_v22  ;;  %5319 = vst.msk [vmem:[#allocation2 + $0x110] sm:$0x4] %vm1582_vm3, %v5310_v14  ;;  %v5252_v13 = vmul.f32 %v11185_v55, %v5223_v2  ;;  %v11357_v2 = vld [vmem:[#allocation2 + $0x100] sm:$0xff] }
 0x511   : > { %5355 = vst.msk [vmem:[#allocation2 + $0x113] sm:$0x10] %vm1587_vm4, %v5343_v22  ;;  %5323 = vst.msk [vmem:[#allocation2 + $0x10f] sm:$0x10] %vm1587_vm4, %v5310_v14  ;;  %v5291_v36 = vmax.f32 %v5277_v26, %v5279_v49  ;;  %v5269_v30 = vadd.f32 %v5253_v18, %v5141_v15  ;;  %v11292_v23 = vld [vmem:[#allocation2 + $0x72] sm:$0xff] }
 0x512   : > { %v11265_v37 = vld [vmem:[#allocation2 + $0x71] sm:$0xff]  ;;  %5359 = vst.msk [vmem:[#allocation2 + $0x112] sm:$0x40] %vm1592_vm5, %v5343_v22  ;;  %5327 = vst.msk [vmem:[#allocation2 + $0x10e] sm:$0x40] %vm1592_vm5, %v5310_v14  ;;  %v5290_v9 = vmax.f32 %v5276_v25, %v5278_v31  ;;  %v5238_v52 = vpop.permute.xlu1 %5237  ;;  %v5268_v42 = vadd.f32 %v5252_v13, %v5140_v11  ;;  %v11312_v17 = vpack.i.bf16 %v11292_v23, %v11300_v27  ;;  %v5407_v22 = vld [vmem:[#allocation2 + $0x102] sm:$0xff] }
 0x513   : > { %5315 = vst.msk [vmem:[#allocation2 + $0x111] sm:$0x1] %vm1577_vm2, %v5310_v14  ;;  %v11284_v43 = vpack.i.bf16 %v11265_v37, %v11268_v19  ;;  %v5233_v24 = vpop.permute.xlu0 %5232  ;;  %v5334_v35 = vrot.slane %v5291_v36, 1  ;;  %v5255_v62 = vmul.f32 %v11185_v55, %v5238_v52  ;;  %v11342_v14 = vld [vmem:[#allocation2 + $0x70] sm:$0xff] }
 0x514   : > { %v5301_v60 = vrot.slane %v5290_v9, 1  ;;  %v5254_v47 = vmul.f32 %v11185_v55, %v5233_v24  ;;  %v5285_v55 = vmax.f32 %v5269_v30, 0.0  ;;  %v5284_v3 = vmax.f32 %v5268_v42, 0.0  ;;  %v12736_v31 = vld [vmem:[#allocation73_spill] sm:$0xff] }
 0x515   : > { %7295 = vrot.lane.b32.xlu0 %v11284_v43, %s7472_s6  ;;  %v5342_v6 = vmax.f32 %v5291_v36, %v5334_v35  ;;  %v5271_v40 = vadd.f32 %v5255_v62, %v5143_v29  ;;  %v7329_v18 = vpack.i.bf16 %v11357_v2, %v12736_v31  ;;  %v7454_v24 = vld [vmem:[#allocation2 + $0x52] sm:$0xff]  ;;  %v12738_v35 = vld [vmem:[#allocation23_spill] sm:$0xff] }
 0x516   : > { %v5309_v28 = vmax.f32 %v5290_v9, %v5301_v60  ;;  %v5270_v63 = vadd.f32 %v5254_v47, %v5142_v33  ;;  %v11296_v34 = vpop.permute.xlu1 %7130  ;;  %v7364_v29 = vpack.i.bf16 %v11300_v27, %v7454_v24  ;;  %v7349_v60 = vpack.i.bf16 %v5391_v50, %v12738_v35  ;;  %v5465_v27 = vld [vmem:[#allocation2 + $0x90] sm:$0xff] }
 0x517   : > { %v11298_v46 = vpop.permute.xlu0 %7125  ;;  %5346 = vst.msk [vmem:[#allocation2 + $0x85] sm:$0x1] %vm1577_vm2, %v5342_v6  ;;  %v5287_v20 = vmax.f32 %v5271_v40, 0.0  ;;  %v7384_v40 = vpack.i.bf16 %v11342_v14, %v11319_v32  ;;  %v7460_v24 = vld [vmem:[#allocation2 + $0x30] sm:$0xff] }
 0x518   : > { %5350 = vst.msk [vmem:[#allocation2 + $0x84] sm:$0x4] %vm1582_vm3, %v5342_v6  ;;  %5318 = vst.msk [vmem:[#allocation2 + $0x80] sm:$0x4] %vm1582_vm3, %v5309_v28  ;;  %v5286_v1 = vmax.f32 %v5270_v63, 0.0  ;;  %v7455_v63 = vld [vmem:[#allocation2 + $0xf2] sm:$0xff] }
 0x519   : > { %7305 = vrot.lane.b32.xlu0 %v12733_v57, %s7473_s7  ;;  %5354 = vst.msk [vmem:[#allocation2 + $0x83] sm:$0x10] %vm1587_vm4, %v5342_v6  ;;  %5322 = vst.msk [vmem:[#allocation2 + $0x7f] sm:$0x10] %vm1587_vm4, %v5309_v28  ;;  %v5295_v58 = vmax.f32 %v5285_v55, %v5287_v20  ;;  %v11331_v48 = vld [vmem:[#allocation2 + $0x112] sm:$0xff]  ;;  %v7369_v57 = vpack.i.bf16 %v5407_v22, %v7455_v63  ;;  %v7133_v20 = vunpack.i.h.bf16 %v11296_v34 }
 0x51a   : > { %5358 = vst.msk [vmem:[#allocation2 + $0x82] sm:$0x40] %vm1592_vm5, %v5342_v6  ;;  %5326 = vst.msk [vmem:[#allocation2 + $0x7e] sm:$0x40] %vm1592_vm5, %v5309_v28  ;;  %v11314_v41 = vld [vmem:[#allocation2 + $0x111] sm:$0xff]  ;;  %v5294_v51 = vmax.f32 %v5284_v3, %v5286_v1  ;;  %v11325_v8 = vpop.permute.xlu1 %7140  ;;  %v11353_v26 = vpack.i.bf16 %v11331_v48, %v5407_v22  ;;  %v5369_v3 = vld [vmem:[#allocation2 + $0xa0] sm:$0xff]  ;;  %v7128_v1 = vunpack.i.h.bf16 %v11298_v46 }
 0x51b   : > { %5314 = vst.msk [vmem:[#allocation2 + $0x81] sm:$0x1] %vm1577_vm2, %v5309_v28  ;;  %v11317_v7 = vpack.i.bf16 %v11314_v41, %v5391_v50  ;;  %v11327_v56 = vpop.permute.xlu0 %7135  ;;  %v5336_v61 = vrot.slane %v5295_v58, 1  ;;  %v11378_v36 = vld [vmem:[#allocation2 + $0x110] sm:$0xff] }
 0x51c   : > { %v5303_v45 = vrot.slane %v5294_v51, 1  ;;  %v7138_v39 = vunpack.i.h.bf16 %v11327_v56  ;;  %v7389_v35 = vpack.i.bf16 %v11378_v36, %v11357_v2 }
 0x51d   : > { %7315 = vrot.lane.b32.xlu0 %v11312_v17, %s7473_s7  ;;  %7300 = vrot.lane.b32.xlu1 %v11317_v7, %s7472_s6  ;;  %v5344_v0 = vmax.f32 %v5295_v58, %v5336_v61  ;;  %v7127_v58 = vunpack.i.l.bf16 %v11298_v46  ;;  %v5361_v61 = vld [vmem:[#allocation2] sm:$0xff] }
 0x51e   : > { %v5311_v5 = vmax.f32 %v5294_v51, %v5303_v45  ;;  %v11336_v12 = vpop.permute.xlu1 %7150  ;;  %v7143_v51 = vunpack.i.h.bf16 %v11325_v8  ;;  %v7142_v45 = vunpack.i.l.bf16 %v11325_v8 }
 0x51f   : > { %v11338_v10 = vpop.permute.xlu0 %7145  ;;  %5348 = vst.msk [vmem:[#allocation2 + $0x125] sm:$0x1] %vm1577_vm2, %v5344_v0  ;;  %v7152_v46 = vunpack.i.l.bf16 %v11336_v12 }
 0x520   : > { %5352 = vst.msk [vmem:[#allocation2 + $0x124] sm:$0x4] %vm1582_vm3, %v5344_v0  ;;  %5320 = vst.msk [vmem:[#allocation2 + $0x120] sm:$0x4] %vm1582_vm3, %v5311_v5  ;;  %v7147_v22 = vunpack.i.l.bf16 %v11338_v10 }
 0x521   : > { %7325 = vrot.lane.b32.xlu0 %v7324_v44, %s7474_s8  ;;  %7310 = vrot.lane.b32.xlu1 %v12735_v54, %s7473_s7  ;;  %5356 = vst.msk [vmem:[#allocation2 + $0x123] sm:$0x10] %vm1587_vm4, %v5344_v0  ;;  %5324 = vst.msk [vmem:[#allocation2 + $0x11f] sm:$0x10] %vm1587_vm4, %v5311_v5  ;;  %v11394_v30 = vld [vmem:[#allocation2 + $0x82] sm:$0xff] }
 0x522   : > { %v11340_v21 = vld [vmem:[#allocation2 + $0x80] sm:$0xff]  ;;  %5360 = vst.msk [vmem:[#allocation2 + $0x122] sm:$0x40] %vm1592_vm5, %v5344_v0  ;;  %5328 = vst.msk [vmem:[#allocation2 + $0x11e] sm:$0x40] %vm1592_vm5, %v5311_v5  ;;  %v11362_v25 = vpop.permute.xlu1 %7160  ;;  %v7374_v62 = vpack.i.bf16 %v11394_v30, %v11292_v23  ;;  %v7132_v23 = vunpack.i.l.bf16 %v11296_v34  ;;  %v7153_v34 = vunpack.i.h.bf16 %v11336_v12  ;;  %v7148_v12 = vunpack.i.h.bf16 %v11338_v10 }
 0x523   : > { %5316 = vst.msk [vmem:[#allocation2 + $0x121] sm:$0x1] %vm1577_vm2, %v5311_v5  ;;  %v7334_v38 = vpack.i.bf16 %v11340_v21, %v11342_v14  ;;  %v11364_v49 = vpop.permute.xlu0 %7155  ;;  %v11370_v13 = vld [vmem:[#allocation2 + $0x81] sm:$0xff]  ;;  %v7394_v44 = vpack.i.bf16 %v5465_v27, %v11340_v21  ;;  %v7137_v5 = vunpack.i.l.bf16 %v11327_v56  ;;  %v7163_v10 = vunpack.i.h.bf16 %v11362_v25  ;;  %v11458_v27 = vld [vmem:[#allocation2 + $0x92] sm:$0xff] }
 0x524   : > { %v7354_v16 = vpack.i.bf16 %v11370_v13, %v11265_v37  ;;  %v6026_v54 = vsel %vm297_vm0, %v5369_v3, %v7132_v23  ;;  %v7162_v63 = vunpack.i.l.bf16 %v11362_v25  ;;  %vm6391_vm2 = vcmask 129030  }
 0x525   : > { %7320 = vrot.lane.b32.xlu1 %v11353_v26, %s7473_s7  ;;  %7335 = vrot.lane.b32.xlu0 %v7334_v38, %s7474_s8  ;;  %v7457_v38 = vld [vmem:[#allocation2 + $0x10] sm:$0xff]  ;;  %v6043_v23 = vsel %vm6034_vm7, %v6026_v54, %v7152_v46 }
 0x526   : > { %v11374_v59 = vpop.permute.xlu1 %7170  ;;  %v6019_v31 = vsel %vm297_vm0, %v7457_v38, %v7128_v1  ;;  %v7157_v1 = vunpack.i.l.bf16 %v11364_v49 }
 0x527   : > { %v11376_v15 = vpop.permute.xlu0 %7165  ;;  %v6036_v25 = vsel %vm6034_vm7, %v6019_v31, %v7148_v12 }
 0x529   : > { %7330 = vrot.lane.b32.xlu1 %v7329_v18, %s7474_s8  ;;  %7345 = vrot.lane.b32.xlu0 %v7344_v53, %s7475_s9  ;;  %v11416_v55 = vld [vmem:[#allocation2 + $0x122] sm:$0xff]  ;;  %v6018_v18 = vsel %vm297_vm0, %v5361_v61, %v7127_v58  ;;  %v6028_v53 = vsel %vm297_vm0, %v7458_v4, %v7142_v45  ;;  %v7173_v61 = vunpack.i.h.bf16 %v11374_v59  ;;  %v7172_v45 = vunpack.i.l.bf16 %v11374_v59 }
 0x52a   : > { %v11380_v9 = vld [vmem:[#allocation2 + $0x120] sm:$0xff]  ;;  %v11388_v11 = vpop.permute.xlu1 %7180  ;;  %v7379_v0 = vpack.i.bf16 %v11416_v55, %v11331_v48  ;;  %v7456_v48 = vld [vmem:[#allocation2 + $0xb0] sm:$0xff]  ;;  %v6035_v3 = vsel %vm6034_vm7, %v6018_v18, %v7147_v22 }
 0x52b   : > { %v7339_v19 = vpack.i.bf16 %v11380_v9, %v11378_v36  ;;  %v11390_v52 = vpop.permute.xlu0 %7175  ;;  %v11396_v33 = vld [vmem:[#allocation2 + $0x121] sm:$0xff]  ;;  %v6027_v56 = vsel %vm297_vm0, %v7456_v48, %v7133_v20  ;;  %v7158_v20 = vunpack.i.h.bf16 %v11364_v49  ;;  %v7168_v49 = vunpack.i.h.bf16 %v11376_v15  ;;  %v5489_v48 = vld [vmem:[#allocation2 + $0x131] sm:$0xff] }
 0x52c   : > { %v7359_v47 = vpack.i.bf16 %v11396_v33, %v11314_v41  ;;  %v7183_v54 = vunpack.i.h.bf16 %v11388_v11  ;;  %v7182_v59 = vunpack.i.l.bf16 %v11388_v11  ;;  %v7178_v22 = vunpack.i.h.bf16 %v11390_v52 }
 0x52d   : > { %7355 = vrot.lane.b32.xlu0 %v7354_v16, %s7475_s9  ;;  %7340 = vrot.lane.b32.xlu1 %v7339_v19, %s7474_s8  ;;  %v7459_v16 = vld [vmem:[#allocation2 + $0xd0] sm:$0xff]  ;;  %v6060_v11 = vsel %vm6051_vm8, %v6043_v23, %v7172_v45  ;;  %v6053_v12 = vsel %vm6051_vm8, %v6036_v25, %v7168_v49 }
 0x52e   : > { %v11400_v37 = vpop.permute.xlu1 %7190  ;;  %v6029_v19 = vsel %vm297_vm0, %v7459_v16, %v7143_v51 }
 0x52f   : > { %v11402_v42 = vpop.permute.xlu0 %7185  ;;  %v7193_v31 = vunpack.i.h.bf16 %v11400_v37 }
 0x530   : > { %v7188_v4 = vunpack.i.h.bf16 %v11402_v42 }
 0x531   : > { %7365 = vrot.lane.b32.xlu0 %v7364_v29, %s7476_s10  ;;  %7350 = vrot.lane.b32.xlu1 %v7349_v60, %s7475_s9  ;;  %v6021_v29 = vsel %vm297_vm0, %v7460_v24, %v7138_v39  ;;  %v5481_v60 = vld [vmem:[#allocation2 + $0x91] sm:$0xff]  ;;  %v7419_v24 = vpack.i.bf16 %v5489_v48, %v11396_v33 }
 0x532   : > { %v11410_v6 = vpop.permute.xlu1 %7200  ;;  %v7414_v39 = vpack.i.bf16 %v5481_v60, %v11370_v13  ;;  %v6038_v13 = vsel %vm6034_vm7, %v6021_v29, %v7158_v20 }
 0x533   : > { %v11412_v28 = vpop.permute.xlu0 %7195 }
 0x534   : > { %v7197_v23 = vunpack.i.l.bf16 %v11412_v28 }
 0x535   : > { %7375 = vrot.lane.b32.xlu0 %v7374_v62, %s7476_s10  ;;  %7360 = vrot.lane.b32.xlu1 %v7359_v47, %s7475_s9  ;;  %v7461_v62 = vld [vmem:[#allocation2 + $0x20] sm:$0xff] }
 0x536   : > { %v11421_v50 = vpop.permute.xlu1 %7210  ;;  %v6020_v47 = vsel %vm297_vm0, %v7461_v62, %v7137_v5  ;;  %v6045_v5 = vsel %vm6034_vm7, %v6028_v53, %v7162_v63  ;;  %v7187_v53 = vunpack.i.l.bf16 %v11402_v42 }
 0x537   : > { %v11423_v41 = vpop.permute.xlu0 %7205  ;;  %v6037_v46 = vsel %vm6034_vm7, %v6020_v47, %v7157_v1  ;;  %v7213_v42 = vunpack.i.h.bf16 %v11421_v50  ;;  %v7212_v60 = vunpack.i.l.bf16 %v11421_v50  ;;  %v6070_v50 = vsel %vm6068_vm9, %v6053_v12, %v7188_v4 }
 0x538   : > { %v7207_v63 = vunpack.i.l.bf16 %v11423_v41 }
 0x539   : > { %7385 = vrot.lane.b32.xlu0 %v7384_v40, %s7477_s11  ;;  %7370 = vrot.lane.b32.xlu1 %v7369_v57, %s7476_s10  ;;  %v6044_v40 = vsel %vm6034_vm7, %v6027_v56, %v7153_v34  ;;  %v5473_v57 = vld [vmem:[#allocation2 + $0x130] sm:$0xff]  ;;  %v6046_v34 = vsel %vm6034_vm7, %v6029_v19, %v7163_v10  ;;  %v11508_v19 = vsel %vm6051_vm8, %v6045_v5, %v7182_v59  ;;  %v7208_v10 = vunpack.i.h.bf16 %v11423_v41 }
 0x53a   : > { %v11441_v8 = vpop.permute.xlu1 %7220  ;;  %v11494_v56 = vld [vmem:[#allocation2 + $0x132] sm:$0xff]  ;;  %v6061_v38 = vsel %vm6051_vm8, %v6044_v40, %v7173_v61  ;;  %v11505_v16 = vsel %vm6051_vm8, %v6046_v34, %v7183_v54 }
 0x53b   : > { %v11443_v21 = vpop.permute.xlu0 %7215  ;;  %v6078_v47 = vsel %vm6068_vm9, %v6061_v38, %v7193_v31  ;;  %v7222_v49 = vunpack.i.l.bf16 %v11441_v8 }
 0x53c   : > { %v6095_v41 = vsel %vm6085_vm10, %v6078_v47, %v7213_v42  ;;  %v7217_v34 = vunpack.i.l.bf16 %v11443_v21 }
 0x53d   : > { %7395 = vrot.lane.b32.xlu0 %v7394_v44, %s7477_s11  ;;  %7380 = vrot.lane.b32.xlu1 %v7379_v0, %s7476_s10  ;;  %v7167_v44 = vunpack.i.l.bf16 %v11376_v15  ;;  %v7434_v0 = vpack.i.bf16 %v11458_v27, %v11394_v30  ;;  %v7177_v15 = vunpack.i.l.bf16 %v11390_v52  ;;  %v7192_v52 = vunpack.i.l.bf16 %v11400_v37 }
 0x53e   : > { %v11467_v58 = vpop.permute.xlu1 %7230  ;;  %v7439_v37 = vpack.i.bf16 %v11494_v56, %v11416_v55  ;;  %v7202_v27 = vunpack.i.l.bf16 %v11410_v6 }
 0x53f   : > { %v11469_v51 = vpop.permute.xlu0 %7225  ;;  %v6052_v18 = vsel %vm6051_vm8, %v6035_v3, %v7167_v44  ;;  %v11514_v29 = vsel %vm6051_vm8, %v6037_v46, %v7177_v15  ;;  %v6077_v40 = vsel %vm6068_vm9, %v6060_v11, %v7192_v52  ;;  %v7233_v3 = vunpack.i.h.bf16 %v11467_v58 }
 0x540   : > { %v7232_v20 = vunpack.i.l.bf16 %v11467_v58  ;;  %v6094_v1 = vsel %vm6085_vm10, %v6077_v40, %v7212_v60  ;;  %v7228_v25 = vunpack.i.h.bf16 %v11469_v51  ;;  %v7227_v61 = vunpack.i.l.bf16 %v11469_v51 }
 0x541   : > { %7405 = vrot.lane.b32.xlu0 %v11284_v43, %s7478_s13  ;;  %7390 = vrot.lane.b32.xlu1 %v7389_v35, %s7477_s11  ;;  %v7399_v43 = vpack.i.bf16 %v5473_v57, %v11380_v9  ;;  %v11517_v35 = vsel %vm6051_vm8, %v6038_v13, %v7178_v22  ;;  %v6069_v57 = vsel %vm6068_vm9, %v6052_v18, %v7187_v53 }
 0x542   : > { %v11490_v9 = vpop.permute.xlu1 %7240  ;;  %v6086_v45 = vsel %vm6085_vm10, %v6069_v57, %v7207_v63  ;;  %v6087_v58 = vsel %vm6085_vm10, %v6070_v50, %v7208_v10  ;;  %v6111_v54 = vsel %vm6102_vm11, %v6094_v1, %v7232_v20  ;;  %v6112_v59 = vsel %vm6102_vm11, %v6095_v41, %v7233_v3 }
 0x543   : > { %v11492_v30 = vpop.permute.xlu0 %7235  ;;  %v6103_v46 = vsel %vm6102_vm11, %v6086_v45, %v7227_v61  ;;  %v6104_v13 = vsel %vm6102_vm11, %v6087_v58, %v7228_v25  ;;  %v7243_v22 = vunpack.i.h.bf16 %v11490_v9  ;;  %v6079_v10 = vsel %vm6068_vm9, %v11508_v19, %v7202_v27 }
 0x544   : > { %v7238_v42 = vunpack.i.h.bf16 %v11492_v30  ;;  %v7237_v60 = vunpack.i.l.bf16 %v11492_v30  ;;  %v6071_v30 = vsel %vm6068_vm9, %v11514_v29, %v7197_v23 }
 0x545   : > { %7415 = vrot.lane.b32.xlu0 %v7414_v39, %s7478_s13  ;;  %7400 = vrot.lane.b32.xlu1 %v7399_v43, %s7477_s11  ;;  %v7223_v39 = vunpack.i.h.bf16 %v11441_v8  ;;  %v7242_v8 = vunpack.i.l.bf16 %v11490_v9  ;;  %v6088_v29 = vsel %vm6085_vm10, %v6071_v30, %v7217_v34 }
 0x546   : > { %v7251_v33 = vpop.permute.xlu1 %7250 }
 0x547   : > { %v7246_v62 = vpop.permute.xlu0 %7245  ;;  %v7253_v44 = vunpack.i.h.bf16 %v7251_v33  ;;  %v7252_v43 = vunpack.i.l.bf16 %v7251_v33 }
 0x548   : > { %v7248_v5 = vunpack.i.h.bf16 %v7246_v62  ;;  %v7247_v51 = vunpack.i.l.bf16 %v7246_v62 }
 0x549   : > { %7425 = vrot.lane.b32.xlu0 %v11312_v17, %s7479_s17  ;;  %7410 = vrot.lane.b32.xlu1 %v11317_v7, %s7478_s13  ;;  %v7203_v17 = vunpack.i.h.bf16 %v11410_v6  ;;  %v7198_v7 = vunpack.i.h.bf16 %v11412_v28  ;;  %v6128_v12 = vsel %vm6119_vm12, %v6111_v54, %v7252_v43  ;;  %v6129_v4 = vsel %vm6119_vm12, %v6112_v59, %v7253_v44 }
 0x54a   : > { %v11543_v6 = vpop.permute.xlu1 %7260  ;;  %v6120_v52 = vsel %vm6119_vm12, %v6103_v46, %v7247_v51  ;;  %v6121_v18 = vsel %vm6119_vm12, %v6104_v13, %v7248_v5 }
 0x54b   : > { %v11545_v28 = vpop.permute.xlu0 %7255  ;;  %v6080_v63 = vsel %vm6068_vm9, %v11505_v16, %v7203_v17  ;;  %v6072_v57 = vsel %vm6068_vm9, %v11517_v35, %v7198_v7  ;;  %v7263_v55 = vunpack.i.h.bf16 %v11543_v6  ;;  %v7262_v56 = vunpack.i.l.bf16 %v11543_v6 }
 0x54c   : > { %v7257_v50 = vunpack.i.l.bf16 %v11545_v28  ;;  %v6096_v16 = vsel %vm6085_vm10, %v6079_v10, %v7222_v49  ;;  %v6097_v19 = vsel %vm6085_vm10, %v6080_v63, %v7223_v39  ;;  %v6105_v7 = vsel %vm6102_vm11, %v6088_v29, %v7237_v60  ;;  %v5366_v60 = vld [vmem:[#allocation2 + $0x50] sm:$0xff] }
 0x54d   : > { %7435 = vrot.lane.b32.xlu0 %v7434_v0, %s7479_s17  ;;  %7420 = vrot.lane.b32.xlu1 %v7419_v24, %s7478_s13  ;;  %v7218_v0 = vunpack.i.h.bf16 %v11443_v21  ;;  %v6114_v17 = vsel %vm6102_vm11, %v6097_v19, %v7243_v22  ;;  %v6113_v27 = vsel %vm6102_vm11, %v6096_v16, %v7242_v8 }
 0x54e   : > { %v7271_v15 = vpop.permute.xlu1 %7270  ;;  %v6130_v6 = vsel %vm6119_vm12, %v6113_v27, %v7262_v56  ;;  %v6122_v45 = vsel %vm6119_vm12, %v6105_v7, %v7257_v50 }
 0x54f   : > { %v7266_v48 = vpop.permute.xlu0 %7265  ;;  %v7273_v11 = vunpack.i.h.bf16 %v7271_v15  ;;  %v7272_v38 = vunpack.i.l.bf16 %v7271_v15  ;;  %v6089_v35 = vsel %vm6085_vm10, %v6072_v57, %v7218_v0 }
 0x550   : > { %v7268_v21 = vunpack.i.h.bf16 %v7266_v48  ;;  %v7267_v31 = vunpack.i.l.bf16 %v7266_v48  ;;  %v6106_v23 = vsel %vm6102_vm11, %v6089_v35, %v7238_v42  ;;  %v5374_v42 = vld [vmem:[#allocation2 + $0xf0] sm:$0xff] }
 0x551   : > { %7430 = vrot.lane.b32.xlu1 %v11353_v26, %s7479_s17  ;;  %v6145_v26 = vsel %vm6136_vm13, %v6128_v12, %v7272_v38  ;;  %v6146_v24 = vsel %vm6136_vm13, %v6129_v4, %v7273_v11 }
 0x552   : > { %v6137_v53 = vsel %vm6136_vm13, %v6120_v52, %v7267_v31  ;;  %v6138_v9 = vsel %vm6136_vm13, %v6121_v18, %v7268_v21  ;;  %v11575_v33 = vpop.permute.xlu1 %7280  ;;  %v6157_v40 = vpack.c.bf16 %v6146_v24, %v6145_v26  ;;  %v5373_v24 = vld [vmem:[#allocation2 + $0xe0] sm:$0xff] }
 0x553   : > { %v11577_v62 = vpop.permute.xlu0 %7275  ;;  %v6153_v47 = vpack.c.bf16 %v6138_v9, %v6137_v53  ;;  %v7283_v52 = vunpack.i.h.bf16 %v11575_v33  ;;  %v7282_v18 = vunpack.i.l.bf16 %v11575_v33 }
 0x554   : > { %7082 = vmatprep.mubr.msk.bf16.mxu1 %vm6182_vm14, %v6157_v40  ;;  %v7278_v12 = vunpack.i.h.bf16 %v11577_v62  ;;  %v7277_v9 = vunpack.i.l.bf16 %v11577_v62 }
 0x555   : > { %7440 = vrot.lane.b32.xlu1 %v7439_v37, %s7479_s17  ;;  %v7258_v37 = vunpack.i.h.bf16 %v11545_v28  ;;  %7074 = vmatprep.mubr.msk.bf16.mxu0 %vm6182_vm14, %v6153_v47  ;;  %v6131_v28 = vsel %vm6119_vm12, %v6114_v17, %v7263_v55  ;;  %v6030_v63 = vsel %vm297_vm0, %v5373_v24, %v7282_v18  ;;  %v6031_v30 = vsel %vm297_vm0, %v5374_v42, %v7283_v52 }
 0x556   : > { %v7291_v3 = vpop.permute.xlu1 %7290  ;;  %v6023_v33 = vsel %vm297_vm0, %v5366_v60, %v7278_v12 }
 0x557   : > { %v7286_v20 = vpop.permute.xlu0 %7285  ;;  %v7293_v1 = vunpack.i.h.bf16 %v7291_v3  ;;  %v7292_v41 = vunpack.i.l.bf16 %v7291_v3  ;;  %v6123_v58 = vsel %vm6119_vm12, %v6106_v23, %v7258_v37  ;;  %v5365_v37 = vld [vmem:[#allocation2 + $0x40] sm:$0xff] }
 0x558   : > { %v7288_v25 = vunpack.i.h.bf16 %v7286_v20  ;;  %v7287_v61 = vunpack.i.l.bf16 %v7286_v20  ;;  %v6022_v29 = vsel %vm297_vm0, %v5365_v37, %v7277_v9 }
 0x559   : > { %v6148_v39 = vsel %vm6136_vm13, %v6131_v28, %v7293_v1  ;;  %v6147_v49 = vsel %vm6136_vm13, %v6130_v6, %v7292_v41 }
 0x55a   : > { %v6139_v44 = vsel %vm6136_vm13, %v6122_v45, %v7287_v61  ;;  %v6140_v43 = vsel %vm6136_vm13, %v6123_v58, %v7288_v25  ;;  %v6158_v5 = vpack.c.bf16 %v6148_v39, %v6147_v49 }
 0x55b   : > { %v6154_v51 = vpack.c.bf16 %v6140_v43, %v6139_v44 }
 0x55c   : > { %7083 = vmatmul.mubr.msk.bf16.vlgmr.msra.gmra.mrb[0].mxu1 %vm6182_vm14, %v6158_v5 }
 0x55d   : > { %7075 = vmatmul.mubr.msk.bf16.vlgmr.msra.gmra.mrb[0].mxu0 %vm6182_vm14, %v6154_v51 }
 0x587   : > { %v7296_v0 = vpop.permute.xlu0 %7295 }
 0x588   : > { %v7298_v26 = vunpack.i.h.bf16 %v7296_v0  ;;  %v7297_v47 = vunpack.i.l.bf16 %v7296_v0 }
 0x58a   : > { %v6025_v35 = vsel %vm297_vm0, %v11342_v14, %v7298_v26  ;;  %v6024_v7 = vsel %vm297_vm0, %v11319_v32, %v7297_v47 }
 0x58b   : > { %v7306_v34 = vpop.permute.xlu0 %7305 }
 0x58c   : > { %v7308_v40 = vunpack.i.h.bf16 %v7306_v34  ;;  %v7307_v10 = vunpack.i.l.bf16 %v7306_v34 }
 0x58e   : > { %v6039_v23 = vsel %vm6034_vm7, %v6022_v29, %v7307_v10  ;;  %v6040_v3 = vsel %vm6034_vm7, %v6023_v33, %v7308_v40 }
 0x58f   : > { %v7301_v54 = vpop.permute.xlu1 %7300  ;;  %v7316_v59 = vpop.permute.xlu0 %7315 }
 0x590   : > { %v7302_v57 = vunpack.i.l.bf16 %v7301_v54  ;;  %v7303_v62 = vunpack.i.h.bf16 %v7301_v54  ;;  %v7318_v50 = vunpack.i.h.bf16 %v7316_v59  ;;  %v7317_v16 = vunpack.i.l.bf16 %v7316_v59 }
 0x592   : > { %v6032_v1 = vsel %vm297_vm0, %v11357_v2, %v7302_v57  ;;  %v6033_v28 = vsel %vm297_vm0, %v11378_v36, %v7303_v62  ;;  %v6041_v32 = vsel %vm6034_vm7, %v6024_v7, %v7317_v16  ;;  %v6042_v45 = vsel %vm6034_vm7, %v6025_v35, %v7318_v50 }
 0x593   : > { %v7311_v46 = vpop.permute.xlu1 %7310  ;;  %v7326_v13 = vpop.permute.xlu0 %7325  ;;  %vm6373_vm0 = vcmask 124930  }
 0x594   : > { %v7313_v19 = vunpack.i.h.bf16 %v7311_v46  ;;  %v7312_v17 = vunpack.i.l.bf16 %v7311_v46  ;;  %v7327_v27 = vunpack.i.l.bf16 %v7326_v13  ;;  %v7328_v20 = vunpack.i.h.bf16 %v7326_v13 }
 0x596   : > { %v6048_v58 = vsel %vm6034_vm7, %v6031_v30, %v7313_v19  ;;  %v6047_v39 = vsel %vm6034_vm7, %v6030_v63, %v7312_v17  ;;  %v6056_v2 = vsel %vm6051_vm8, %v6039_v23, %v7327_v27  ;;  %v6057_v43 = vsel %vm6051_vm8, %v6040_v3, %v7328_v20 }
 0x597   : > { %v7321_v22 = vpop.permute.xlu1 %7320  ;;  %v11611_v8 = vpop.permute.xlu0 %7335 }
 0x598   : > { %v7323_v41 = vunpack.i.h.bf16 %v7321_v22  ;;  %v7322_v25 = vunpack.i.l.bf16 %v7321_v22  ;;  %v7337_v61 = vunpack.i.l.bf16 %v11611_v8  ;;  %v7338_v49 = vunpack.i.h.bf16 %v11611_v8 }
 0x59a   : > { %v6049_v0 = vsel %vm6034_vm7, %v6032_v1, %v7322_v25  ;;  %v6050_v34 = vsel %vm6034_vm7, %v6033_v28, %v7323_v41  ;;  %v6058_v54 = vsel %vm6051_vm8, %v6041_v32, %v7337_v61 }
 0x59b   : > { %v11613_v15 = vpop.permute.xlu1 %7330  ;;  %v11615_v48 = vpop.permute.xlu0 %7345 }
 0x59c   : > { %v7332_v44 = vunpack.i.l.bf16 %v11613_v15  ;;  %v7333_v5 = vunpack.i.h.bf16 %v11613_v15  ;;  %v7348_v36 = vunpack.i.h.bf16 %v11615_v48  ;;  %v7347_v51 = vunpack.i.l.bf16 %v11615_v48 }
 0x59d   : > { %v6059_v48 = vsel %vm6051_vm8, %v6042_v45, %v7338_v49 }
 0x59e   : > { %v6064_v18 = vsel %vm6051_vm8, %v6047_v39, %v7332_v44  ;;  %v6065_v26 = vsel %vm6051_vm8, %v6048_v58, %v7333_v5  ;;  %v6073_v24 = vsel %vm6068_vm9, %v6056_v2, %v7347_v51 }
 0x59f   : > { %v11617_v11 = vpop.permute.xlu1 %7340  ;;  %v11619_v38 = vpop.permute.xlu0 %7355 }
 0x5a0   : > { %v7343_v59 = vunpack.i.h.bf16 %v11617_v11  ;;  %v7342_v22 = vunpack.i.l.bf16 %v11617_v11  ;;  %v7358_v8 = vunpack.i.h.bf16 %v11619_v38  ;;  %v7357_v15 = vunpack.i.l.bf16 %v11619_v38 }
 0x5a1   : > { %v6074_v11 = vsel %vm6068_vm9, %v6057_v43, %v7348_v36 }
 0x5a2   : > { %v11686_v38 = vsel %vm6051_vm8, %v6050_v34, %v7343_v59  ;;  %v11694_v63 = vsel %vm6051_vm8, %v6049_v0, %v7342_v22  ;;  %v6075_v30 = vsel %vm6068_vm9, %v6058_v54, %v7357_v15  ;;  %v6076_v33 = vsel %vm6068_vm9, %v6059_v48, %v7358_v8 }
 0x5a3   : > { %v11621_v21 = vpop.permute.xlu1 %7350  ;;  %v11623_v31 = vpop.permute.xlu0 %7365 }
 0x5a4   : > { %v7353_v52 = vunpack.i.h.bf16 %v11621_v21  ;;  %v7352_v12 = vunpack.i.l.bf16 %v11621_v21  ;;  %v7367_v9 = vunpack.i.l.bf16 %v11623_v31  ;;  %v7368_v42 = vunpack.i.h.bf16 %v11623_v31 }
 0x5a6   : > { %v6082_v31 = vsel %vm6068_vm9, %v6065_v26, %v7353_v52  ;;  %v6081_v57 = vsel %vm6068_vm9, %v6064_v18, %v7352_v12  ;;  %v6090_v37 = vsel %vm6085_vm10, %v6073_v24, %v7367_v9 }
 0x5a7   : > { %v11628_v4 = vpop.permute.xlu1 %7360  ;;  %v11630_v53 = vpop.permute.xlu0 %7375 }
 0x5a8   : > { %v7377_v60 = vunpack.i.l.bf16 %v11630_v53  ;;  %v7363_v16 = vunpack.i.h.bf16 %v11628_v4  ;;  %v7362_v19 = vunpack.i.l.bf16 %v11628_v4  ;;  %v7378_v29 = vunpack.i.h.bf16 %v11630_v53 }
 0x5aa   : > { %v6092_v35 = vsel %vm6085_vm10, %v6075_v30, %v7377_v60  ;;  %v6093_v32 = vsel %vm6085_vm10, %v6076_v33, %v7378_v29  ;;  %v6084_v30 = vsel %vm6068_vm9, %v11686_v38, %v7363_v16 }
 0x5ab   : > { %v11636_v55 = vpop.permute.xlu1 %7370  ;;  %v11638_v56 = vpop.permute.xlu0 %7385 }
 0x5ac   : > { %v7388_v47 = vunpack.i.h.bf16 %v11638_v56  ;;  %v7387_v40 = vunpack.i.l.bf16 %v11638_v56  ;;  %v6091_v56 = vsel %vm6085_vm10, %v6074_v11, %v7368_v42  ;;  %v7372_v17 = vunpack.i.l.bf16 %v11636_v55 }
 0x5ad   : > { %v7373_v45 = vunpack.i.h.bf16 %v11636_v55 }
 0x5ae   : > { %v6107_v27 = vsel %vm6102_vm11, %v6090_v37, %v7387_v40  ;;  %v6108_v7 = vsel %vm6102_vm11, %v6091_v56, %v7388_v47  ;;  %v6098_v2 = vsel %vm6085_vm10, %v6081_v57, %v7372_v17 }
 0x5af   : > { %v11650_v6 = vpop.permute.xlu1 %7380  ;;  %v11652_v14 = vpop.permute.xlu0 %7395  ;;  %v6099_v22 = vsel %vm6085_vm10, %v6082_v31, %v7373_v45 }
 0x5b0   : > { %v7398_v20 = vunpack.i.h.bf16 %v11652_v14  ;;  %v7397_v1 = vunpack.i.l.bf16 %v11652_v14  ;;  %v7382_v52 = vunpack.i.l.bf16 %v11650_v6 }
 0x5b2   : > { %v6109_v36 = vsel %vm6102_vm11, %v6092_v35, %v7397_v1  ;;  %v6110_v51 = vsel %vm6102_vm11, %v6093_v32, %v7398_v20 }
 0x5b3   : > { %v11671_v46 = vpop.permute.xlu1 %7390  ;;  %v7406_v13 = vpop.permute.xlu0 %7405 }
 0x5b4   : > { %v7408_v62 = vunpack.i.h.bf16 %v7406_v13  ;;  %v7407_v50 = vunpack.i.l.bf16 %v7406_v13  ;;  %v7393_v14 = vunpack.i.h.bf16 %v11671_v46  ;;  %v7392_v49 = vunpack.i.l.bf16 %v11671_v46 }
 0x5b5   : > { %v7383_v46 = vunpack.i.h.bf16 %v11650_v6  ;;  %v6083_v6 = vsel %vm6068_vm9, %v11694_v63, %v7362_v19 }
 0x5b6   : > { %v6124_v4 = vsel %vm6119_vm12, %v6107_v27, %v7407_v50  ;;  %v6125_v53 = vsel %vm6119_vm12, %v6108_v7, %v7408_v62  ;;  %v6115_v48 = vsel %vm6102_vm11, %v6098_v2, %v7392_v49  ;;  %v6116_v18 = vsel %vm6102_vm11, %v6099_v22, %v7393_v14  ;;  %v11757_v27 = vld [vmem:[%s287_s22] ss:$0 sm:$0xff] }
 0x5b7   : > { %v11691_v21 = vpop.permute.xlu1 %7400  ;;  %v7416_v10 = vpop.permute.xlu0 %7415  ;;  %v6100_v31 = vsel %vm6085_vm10, %v6083_v6, %v7382_v52  ;;  %v6101_v57 = vsel %vm6085_vm10, %v6084_v30, %v7383_v46 }
 0x5b8   : > { %v7418_v61 = vunpack.i.h.bf16 %v7416_v10  ;;  %v7417_v28 = vunpack.i.l.bf16 %v7416_v10  ;;  %v7403_v26 = vunpack.i.h.bf16 %v11691_v21  ;;  %v7402_v24 = vunpack.i.l.bf16 %v11691_v21 }
 0x5ba   : > { %v6126_v55 = vsel %vm6119_vm12, %v6109_v36, %v7417_v28  ;;  %v6127_v54 = vsel %vm6119_vm12, %v6110_v51, %v7418_v61  ;;  %v6117_v50 = vsel %vm6102_vm11, %v6100_v31, %v7402_v24  ;;  %v6118_v56 = vsel %vm6102_vm11, %v6101_v57, %v7403_v26 }
 0x5bb   : > { %v7411_v23 = vpop.permute.xlu1 %7410  ;;  %v7426_v3 = vpop.permute.xlu0 %7425 }
 0x5bc   : > { %v7428_v41 = vunpack.i.h.bf16 %v7426_v3  ;;  %v7427_v25 = vunpack.i.l.bf16 %v7426_v3  ;;  %v7413_v59 = vunpack.i.h.bf16 %v7411_v23  ;;  %v7412_v13 = vunpack.i.l.bf16 %v7411_v23 }
 0x5be   : > { %v6141_v58 = vsel %vm6136_vm13, %v6124_v4, %v7427_v25  ;;  %v6142_v39 = vsel %vm6136_vm13, %v6125_v53, %v7428_v41  ;;  %v6132_v60 = vsel %vm6119_vm12, %v6115_v48, %v7412_v13  ;;  %v6133_v47 = vsel %vm6119_vm12, %v6116_v18, %v7413_v59 }
 0x5bf   : > { %v6155_v44 = vpack.c.bf16 %v6142_v39, %v6141_v58  ;;  %v7421_v43 = vpop.permute.xlu1 %7420  ;;  %v7436_v5 = vpop.permute.xlu0 %7435 }
 0x5c0   : > { %v7438_v0 = vunpack.i.h.bf16 %v7436_v5  ;;  %v7437_v34 = vunpack.i.l.bf16 %v7436_v5  ;;  %v7423_v40 = vunpack.i.h.bf16 %v7421_v43  ;;  %v7422_v10 = vunpack.i.l.bf16 %v7421_v43 }
 0x5c1   : > { %7078 = vmatprep.mubr.msk.bf16.mxu0 %vm6182_vm14, %v6155_v44 }
 0x5c2   : > { %v6143_v8 = vsel %vm6136_vm13, %v6126_v55, %v7437_v34  ;;  %v6144_v15 = vsel %vm6136_vm13, %v6127_v54, %v7438_v0  ;;  %v6134_v19 = vsel %vm6119_vm12, %v6117_v50, %v7422_v10  ;;  %v6135_v38 = vsel %vm6119_vm12, %v6118_v56, %v7423_v40 }
 0x5c3   : > { %v6156_v12 = vpack.c.bf16 %v6144_v15, %v6143_v8  ;;  %v7431_v9 = vpop.permute.xlu1 %7430 }
 0x5c4   : > { %v7433_v11 = vunpack.i.h.bf16 %v7431_v9  ;;  %v7432_v42 = vunpack.i.l.bf16 %v7431_v9 }
 0x5c5   : > { %7079 = vmatmul.mubr.msk.bf16.gmra.mrb[4].mxu0 %vm6182_vm14, %v6156_v12 }
 0x5c6   : > { %v6149_v33 = vsel %vm6136_vm13, %v6132_v60, %v7432_v42  ;;  %v6150_v21 = vsel %vm6136_vm13, %v6133_v47, %v7433_v11 }
 0x5c7   : > { %v6159_v37 = vpack.c.bf16 %v6150_v21, %v6149_v33  ;;  %v7441_v62 = vpop.permute.xlu1 %7440 }
 0x5c8   : > { %v7443_v29 = vunpack.i.h.bf16 %v7441_v62  ;;  %v7442_v63 = vunpack.i.l.bf16 %v7441_v62 }
 0x5c9   : > { %7086 = vmatprep.mubr.msk.bf16.mxu1 %vm6182_vm14, %v6159_v37 }
 0x5ca   : > { %v6151_v16 = vsel %vm6136_vm13, %v6134_v19, %v7442_v63  ;;  %v6152_v35 = vsel %vm6136_vm13, %v6135_v38, %v7443_v29 }
 0x5cb   : > { %v6160_v17 = vpack.c.bf16 %v6152_v35, %v6151_v16 }
 0x5cd   : > { %7087 = vmatmul.mubr.msk.bf16.gmra.mrb[4].mxu1 %vm6182_vm14, %v6160_v17 }
 0x62f   : > { %v7084_v23 = vpop.f32.mrb[0].mxu1 }
 0x630   : > { %v7076_v7 = vpop.f32.mrb[0].mxu0  ;;  %v6286_v20 = vadd.f32 %v7084_v23, %v11757_v27  ;;  %v6277_v41 = vpop.f32.mrb[1].mxu1 }
 0x631   : > { %v6254_v3 = vadd.f32 %v7076_v7, %v11757_v27  ;;  %v6245_v1 = vpop.f32.mrb[1].mxu0  ;;  %v6278_v4 = vadd.f32 %v11757_v27, %v6277_v41  ;;  %v7085_v61 = vpop.f32.mrb[2].mxu1 }
 0x632   : > { %v6246_v25 = vadd.f32 %v11757_v27, %v6245_v1  ;;  %v7077_v53 = vpop.f32.mrb[2].mxu0  ;;  %v6289_v32 = vadd.f32 %v7085_v61, %v11757_v27  ;;  %v6280_v58 = vpop.f32.mrb[3].mxu1  ;;  %v6318_v49 = vmax.f32 %v6286_v20, 0.0 }
 0x633   : > { %v6257_v28 = vadd.f32 %v7077_v53, %v11757_v27  ;;  %v6248_v45 = vpop.f32.mrb[3].mxu0  ;;  %v6281_v2 = vadd.f32 %v11757_v27, %v6280_v58  ;;  %v6310_v14 = vmax.f32 %v6254_v3, 0.0  ;;  %v6316_v36 = vmax.f32 %v6278_v4, 0.0 }
 0x634   : > { %v6249_v39 = vadd.f32 %v11757_v27, %v6248_v45  ;;  %v6319_v43 = vmax.f32 %v6289_v32, 0.0  ;;  %v6308_v5 = vmax.f32 %v6246_v25, 0.0 }
 0x635   : > { %v6311_v44 = vmax.f32 %v6257_v28, 0.0  ;;  %v6317_v0 = vmax.f32 %v6281_v2, 0.0 }
 0x636   : > { %v6309_v51 = vmax.f32 %v6249_v39, 0.0  ;;  %v6329_v55 = vmax.f32 %v6318_v49, %v6319_v43 }
 0x637   : > { %v6325_v34 = vmax.f32 %v6310_v14, %v6311_v44  ;;  %v6328_v59 = vmax.f32 %v6316_v36, %v6317_v0 }
 0x638   : > { %v6324_v54 = vmax.f32 %v6308_v5, %v6309_v51  ;;  %v6345_v22 = vrot.slane %v6329_v55, 1 }
 0x639   : > { %v6341_v13 = vrot.slane %v6325_v34, 1  ;;  %v6344_v8 = vrot.slane %v6328_v59, 1 }
 0x63a   : > { %v6340_v46 = vrot.slane %v6324_v54, 1  ;;  %v6361_v52 = vmax.f32 %v6329_v55, %v6345_v22 }
 0x63b   : > { %v6357_v15 = vmax.f32 %v6325_v34, %v6341_v13  ;;  %v6360_v18 = vmax.f32 %v6328_v59, %v6344_v8 }
 0x63c   : > { %v6356_v48 = vmax.f32 %v6324_v54, %v6340_v46  ;;  %6370 = vst.msk [vmem:[%s11771_s26 + $0x14] sm:$0x1] %vm6364_vm15, %v6361_v52 }
 0x63d   : > { %6366 = vst.msk [vmem:[%s11771_s26 + $0x4] sm:$0x1] %vm6364_vm15, %v6357_v15  ;;  %6369 = vst.msk [vmem:[%s11771_s26 + $0x10] sm:$0x1] %vm6364_vm15, %v6360_v18 }
 0x63e   : > { %6375 = vst.msk [vmem:[%s11771_s26 + $0x3] sm:$0x4] %vm6373_vm0, %v6357_v15  ;;  %6379 = vst.msk [vmem:[%s11771_s26 + $0x13] sm:$0x4] %vm6373_vm0, %v6361_v52 }
 0x63f   : > { %6384 = vst.msk [vmem:[%s11771_s26 + $0x2] sm:$0x10] %vm6382_vm1, %v6357_v15  ;;  %6388 = vst.msk [vmem:[%s11771_s26 + $0x12] sm:$0x10] %vm6382_vm1, %v6361_v52 }
 0x640   : > { %6393 = vst.msk [vmem:[%s11771_s26 + $0x1] sm:$0x40] %vm6391_vm2, %v6357_v15  ;;  %6397 = vst.msk [vmem:[%s11771_s26 + $0x11] sm:$0x40] %vm6391_vm2, %v6361_v52 }
 0x641   : > { %6365 = vst.msk [vmem:[%s11771_s26] sm:$0x1] %vm6364_vm15, %v6356_v48 }
 0x642   : > { %6374 = vst.msk [vmem:[%s11771_s26 - $0x1] sm:$0x4] %vm6373_vm0, %v6356_v48  ;;  %6378 = vst.msk [vmem:[%s11771_s26 + $0xf] sm:$0x4] %vm6373_vm0, %v6360_v18 }
 0x643   : > { %6383 = vst.msk [vmem:[%s11771_s26 - $0x2] sm:$0x10] %vm6382_vm1, %v6356_v48  ;;  %6387 = vst.msk [vmem:[%s11771_s26 + $0xe] sm:$0x10] %vm6382_vm1, %v6360_v18 }
 0x644   : > { %6392 = vst.msk [vmem:[%s11771_s26 - $0x3] sm:$0x40] %vm6391_vm2, %v6356_v48  ;;  %6396 = vst.msk [vmem:[%s11771_s26 + $0xd] sm:$0x40] %vm6391_vm2, %v6360_v18 }
 0x698   : > { %v7080_v12 = vpop.f32.mrb[4].mxu0 }
 0x699   : > { %v6270_v9 = vadd.f32 %v7080_v12, %v11757_v27  ;;  %v6261_v26 = vpop.f32.mrb[5].mxu0 }
 0x69a   : > { %v6262_v24 = vadd.f32 %v11757_v27, %v6261_v26  ;;  %v7081_v11 = vpop.f32.mrb[6].mxu0 }
 0x69b   : > { %v6273_v42 = vadd.f32 %v7081_v11, %v11757_v27  ;;  %v6264_v60 = vpop.f32.mrb[7].mxu0  ;;  %v6314_v40 = vmax.f32 %v6270_v9, 0.0 }
 0x69c   : > { %v6265_v47 = vadd.f32 %v11757_v27, %v6264_v60  ;;  %v6312_v6 = vmax.f32 %v6262_v24, 0.0 }
 0x69d   : > { %v6315_v10 = vmax.f32 %v6273_v42, 0.0 }
 0x69e   : > { %v6313_v30 = vmax.f32 %v6265_v47, 0.0 }
 0x69f   : > { %v6327_v33 = vmax.f32 %v6314_v40, %v6315_v10 }
 0x6a0   : > { %v6326_v21 = vmax.f32 %v6312_v6, %v6313_v30  ;;  %v7088_v31 = vpop.f32.mrb[4].mxu1 }
 0x6a1   : > { %v6343_v57 = vrot.slane %v6327_v33, 1  ;;  %v6302_v37 = vadd.f32 %v7088_v31, %v11757_v27  ;;  %v6293_v62 = vpop.f32.mrb[5].mxu1 }
 0x6a2   : > { %v6342_v50 = vrot.slane %v6326_v21, 1  ;;  %v6294_v56 = vadd.f32 %v11757_v27, %v6293_v62  ;;  %v7089_v29 = vpop.f32.mrb[6].mxu1 }
 0x6a3   : > { %v6359_v63 = vmax.f32 %v6327_v33, %v6343_v57  ;;  %v6305_v19 = vadd.f32 %v7089_v29, %v11757_v27  ;;  %v6296_v38 = vpop.f32.mrb[7].mxu1  ;;  %v6322_v17 = vmax.f32 %v6302_v37, 0.0 }
 0x6a4   : > { %v6358_v16 = vmax.f32 %v6326_v21, %v6342_v50  ;;  %v6297_v35 = vadd.f32 %v11757_v27, %v6296_v38  ;;  %v6320_v27 = vmax.f32 %v6294_v56, 0.0 }
 0x6a5   : > { %6368 = vst.msk [vmem:[%s11771_s26 + $0xc] sm:$0x1] %vm6364_vm15, %v6359_v63  ;;  %v6323_v7 = vmax.f32 %v6305_v19, 0.0 }
 0x6a6   : > { %6377 = vst.msk [vmem:[%s11771_s26 + $0xb] sm:$0x4] %vm6373_vm0, %v6359_v63  ;;  %6376 = vst.msk [vmem:[%s11771_s26 + $0x7] sm:$0x4] %vm6373_vm0, %v6358_v16  ;;  %v6321_v23 = vmax.f32 %v6297_v35, 0.0 }
 0x6a7   : > { %6386 = vst.msk [vmem:[%s11771_s26 + $0xa] sm:$0x10] %vm6382_vm1, %v6359_v63  ;;  %6385 = vst.msk [vmem:[%s11771_s26 + $0x6] sm:$0x10] %vm6382_vm1, %v6358_v16  ;;  %v6331_v3 = vmax.f32 %v6322_v17, %v6323_v7 }
 0x6a8   : > { %6395 = vst.msk [vmem:[%s11771_s26 + $0x9] sm:$0x40] %vm6391_vm2, %v6359_v63  ;;  %6394 = vst.msk [vmem:[%s11771_s26 + $0x5] sm:$0x40] %vm6391_vm2, %v6358_v16  ;;  %v6330_v20 = vmax.f32 %v6320_v27, %v6321_v23 }
 0x6a9   : > { %6367 = vst.msk [vmem:[%s11771_s26 + $0x8] sm:$0x1] %vm6364_vm15, %v6358_v16  ;;  %v6347_v1 = vrot.slane %v6331_v3, 1 }
 0x6aa   : > { %v6346_v41 = vrot.slane %v6330_v20, 1 }
 0x6ab   : > { %v6363_v25 = vmax.f32 %v6331_v3, %v6347_v1 }
 0x6ac   : > { %v6362_v4 = vmax.f32 %v6330_v20, %v6346_v41 }
 0x6ad   : > { %6372 = vst.msk [vmem:[%s11771_s26 + $0x1c] sm:$0x1] %vm6364_vm15, %v6363_v25 }
 0x6ae   : > { %6381 = vst.msk [vmem:[%s11771_s26 + $0x1b] sm:$0x4] %vm6373_vm0, %v6363_v25  ;;  %6380 = vst.msk [vmem:[%s11771_s26 + $0x17] sm:$0x4] %vm6373_vm0, %v6362_v4 }
 0x6af   : > { %6390 = vst.msk [vmem:[%s11771_s26 + $0x1a] sm:$0x10] %vm6382_vm1, %v6363_v25  ;;  %6389 = vst.msk [vmem:[%s11771_s26 + $0x16] sm:$0x10] %vm6382_vm1, %v6362_v4 }
 0x6b0   : > { %6399 = vst.msk [vmem:[%s11771_s26 + $0x19] sm:$0x40] %vm6391_vm2, %v6363_v25  ;;  %6398 = vst.msk [vmem:[%s11771_s26 + $0x15] sm:$0x40] %vm6391_vm2, %v6362_v4 }
 0x6b1   : > { %6371 = vst.msk [vmem:[%s11771_s26 + $0x18] sm:$0x1] %vm6364_vm15, %v6362_v4 }
 0x6b2 PF: > { %s15_s18 = sadd.s32 1, %s7468_s18  }
 0x6b3   : > { %p12_p4 = scmp.ge.s32.totalorder %s15_s18, 6  }
 0x6b5   :  { %14 = sbr.rel (!%p12_p4) target bundleno = 1 (0x1), region = 98 }

</bundles_post_ra>
